<compile_context>
chip_gen: v6e
topology: v6e:2x2x1
jax: 0.10.0
libtpu: 0.0.40
codegen_flags: <defaults>
</compile_context>

<pallas_src>
import math

import jax
import jax.numpy as jnp
from jax.experimental import pallas as pl
from jax.experimental.pallas import tpu as pltpu


# ----------------------------------------------------------------------------
# Fused forward kernel
# ----------------------------------------------------------------------------
def _netgcn_sc_kernel(a_ref, x_ref, z_ref, w1x_ref, w1z_ref, w2_ref,
                      wl_ref, bl_ref, feat_ref, logp_ref):
    a = a_ref[...]                                                  # (N, N) bf16

    # graph1: relu( (A @ [X, Z]) @ W1 )  -- concat removed via weight split
    ax = jnp.dot(a, x_ref[...], preferred_element_type=jnp.float32)
    az = jnp.dot(a, z_ref[...], preferred_element_type=jnp.float32)
    h1 = jnp.dot(ax.astype(w1x_ref.dtype), w1x_ref[...],
                 preferred_element_type=jnp.float32)
    h1 = h1 + jnp.dot(az.astype(w1z_ref.dtype), w1z_ref[...],
                      preferred_element_type=jnp.float32)
    h1 = jnp.maximum(h1, 0.0)

    # graph2: feature = relu( (A @ h1) @ W2 )
    ah1 = jnp.dot(a, h1.astype(a.dtype), preferred_element_type=jnp.float32)
    feat = jnp.dot(ah1.astype(w2_ref.dtype), w2_ref[...],
                   preferred_element_type=jnp.float32)
    feat = jnp.maximum(feat, 0.0)
    feat_ref[...] = feat.astype(feat_ref.dtype)

    # classifier head: log_softmax(feature @ Wl + b, axis=-1)
    logits = jnp.dot(feat.astype(wl_ref.dtype), wl_ref[...],
                     preferred_element_type=jnp.float32)
    logits = logits + bl_ref[...]                                   # (1, C) broadcast
    m = jnp.max(logits, axis=-1, keepdims=True)
    lse = m + jnp.log(jnp.sum(jnp.exp(logits - m), axis=-1, keepdims=True))
    logp_ref[...] = (logits - lse).astype(logp_ref.dtype)


def netgcn_sc_forward(params, A, X, Z):
    """feature, log_probs = _netGCN_SC.forward(A, X, Z) as one Pallas call."""
    w1x, w1z = params["graph1_wx"], params["graph1_wz"]
    w2 = params["graph2_w"]
    wl, bl = params["linear_w"], params["linear_b"]
    N = A.shape[0]
    H2 = w2.shape[1]
    C = wl.shape[1]

    def full(shape):
        nd = len(shape)
        return pl.BlockSpec(shape, lambda i, _nd=nd: (0,) * _nd)

    operands = (A, X, Z, w1x, w1z, w2, wl, bl)
    return pl.pallas_call(
        _netgcn_sc_kernel,
        out_shape=(jax.ShapeDtypeStruct((N, H2), jnp.float32),   # feature
                   jax.ShapeDtypeStruct((N, C), jnp.float32)),   # log_softmax
        grid=(1,),
        in_specs=[full(op.shape) for op in operands],
        out_specs=(full((N, H2)), full((N, C))),
        compiler_params=pltpu.CompilerParams(
            dimension_semantics=("arbitrary",),
            vmem_limit_bytes=48 * 1024 * 1024),
    )(*operands)


# ----------------------------------------------------------------------------
# Parameter init (deterministic; mirrors kaiming_uniform_(a=sqrt(5)) bounds)
# ----------------------------------------------------------------------------
def init_netgcn_sc_params(key, dx, dz, out_dim=50, hidden1=1024, hidden2=2048,
                          wdtype=jnp.bfloat16):
    in_dim = dx + dz
    k1, k2, k3, k4 = jax.random.split(key, 4)
    b1 = 1.0 / math.sqrt(in_dim)
    w1 = jax.random.uniform(k1, (in_dim, hidden1), jnp.float32, -b1, b1)
    b2 = 1.0 / math.sqrt(hidden1)
    w2 = jax.random.uniform(k2, (hidden1, hidden2), jnp.float32, -b2, b2)
    b3 = 1.0 / math.sqrt(hidden2)
    wl = jax.random.uniform(k3, (hidden2, out_dim), jnp.float32, -b3, b3)
    lb = jax.random.uniform(k4, (1, out_dim), jnp.float32, -b3, b3)
    return {
        "graph1_wx": w1[:dx].astype(wdtype),   # W1 split: X half
        "graph1_wz": w1[dx:].astype(wdtype),   # W1 split: Z half
        "graph2_w": w2.astype(wdtype),
        "linear_w": wl.astype(wdtype),         # stored (in, out) = Linear W^T
        "linear_b": lb,                        # f32, lane-dense (1, C)
    }


# ----------------------------------------------------------------------------
# Pure-JAX reference (identical dtypes / casts) for a correctness check
# ----------------------------------------------------------------------------
def _reference_forward(params, A, X, Z):
    w1x, w1z = params["graph1_wx"], params["graph1_wz"]
    w2 = params["graph2_w"]
    wl, bl = params["linear_w"], params["linear_b"]
    ax = jnp.dot(A, X, preferred_element_type=jnp.float32)
    az = jnp.dot(A, Z, preferred_element_type=jnp.float32)
    h1 = (jnp.dot(ax.astype(w1x.dtype), w1x, preferred_element_type=jnp.float32)
          + jnp.dot(az.astype(w1z.dtype), w1z, preferred_element_type=jnp.float32))
    h1 = jnp.maximum(h1, 0.0)
    ah1 = jnp.dot(A, h1.astype(A.dtype), preferred_element_type=jnp.float32)
    feat = jnp.maximum(
        jnp.dot(ah1.astype(w2.dtype), w2, preferred_element_type=jnp.float32), 0.0)
    logits = jnp.dot(feat.astype(wl.dtype), wl,
                     preferred_element_type=jnp.float32) + bl
    return feat, jax.nn.log_softmax(logits, axis=-1)


if __name__ == "__main__":
    # Module defaults: in_dim=600 (split as X:300 + Z:300), out_dim=50.
    # Hidden widths 1024 / 2048 are hard-coded in the module. N = 16 graph nodes.
    N, DX, DZ, OUT_DIM = 16, 300, 300, 50

    root = jax.random.PRNGKey(0)
    kp, ka, kx, kz = jax.random.split(root, 4)

    params = init_netgcn_sc_params(kp, DX, DZ, OUT_DIM)

    a_raw = jax.random.uniform(ka, (N, N), jnp.float32)
    A = (a_raw / jnp.sum(a_raw, axis=1, keepdims=True)).astype(jnp.bfloat16)
    X = jax.random.normal(kx, (N, DX), jnp.float32).astype(jnp.bfloat16)
    Z = jax.random.normal(kz, (N, DZ), jnp.float32).astype(jnp.bfloat16)

    fwd = jax.jit(netgcn_sc_forward)
    feature, logp = fwd(params, A, X, Z)
    jax.block_until_ready((feature, logp))

    assert feature.shape == (N, 2048)
    assert logp.shape == (N, OUT_DIM)
    assert bool(jnp.all(jnp.isfinite(feature))) and bool(jnp.all(jnp.isfinite(logp)))

    ref_feat, ref_logp = jax.jit(_reference_forward)(params, A, X, Z)
    assert bool(jnp.allclose(feature, ref_feat, rtol=2e-2, atol=2e-2))
    assert bool(jnp.allclose(logp, ref_logp, rtol=2e-2, atol=2e-2))
    # rows of exp(log_softmax) sum to 1
    assert bool(jnp.allclose(jnp.sum(jnp.exp(logp), axis=-1), 1.0, atol=1e-3))

    print("KERNEL_OK")
</pallas_src>

<mosaic_0001>
module attributes {stable_mosaic.version = 11 : i64} {
  func.func @_netgcn_sc_kernel(%arg0: i32, %arg1: memref<16x16xbf16, #tpu.memory_space<vmem>>, %arg2: memref<16x300xbf16, #tpu.memory_space<vmem>>, %arg3: memref<16x300xbf16, #tpu.memory_space<vmem>>, %arg4: memref<300x1024xbf16, #tpu.memory_space<vmem>>, %arg5: memref<300x1024xbf16, #tpu.memory_space<vmem>>, %arg6: memref<1024x2048xbf16, #tpu.memory_space<vmem>>, %arg7: memref<2048x50xbf16, #tpu.memory_space<vmem>>, %arg8: memref<1x50xf32, #tpu.memory_space<vmem>>, %arg9: memref<16x2048xf32, #tpu.memory_space<vmem>>, %arg10: memref<16x50xf32, #tpu.memory_space<vmem>>) attributes {dimension_semantics = [#tpu.dimension_semantics<arbitrary>], iteration_bounds = array<i64: 1>, scalar_prefetch = 0 : i64, scratch_operands = 0 : i64, tpu.core_type = #tpu.core_type<tc>, window_params = [{pipeline_mode = #tpu.pipeline_mode<synchronous>, transform_indices = @transform_0, window_bounds = array<i64: 16, 16>}, {pipeline_mode = #tpu.pipeline_mode<synchronous>, transform_indices = @transform_1, window_bounds = array<i64: 16, 300>}, {pipeline_mode = #tpu.pipeline_mode<synchronous>, transform_indices = @transform_2, window_bounds = array<i64: 16, 300>}, {pipeline_mode = #tpu.pipeline_mode<synchronous>, transform_indices = @transform_3, window_bounds = array<i64: 300, 1024>}, {pipeline_mode = #tpu.pipeline_mode<synchronous>, transform_indices = @transform_4, window_bounds = array<i64: 300, 1024>}, {pipeline_mode = #tpu.pipeline_mode<synchronous>, transform_indices = @transform_5, window_bounds = array<i64: 1024, 2048>}, {pipeline_mode = #tpu.pipeline_mode<synchronous>, transform_indices = @transform_6, window_bounds = array<i64: 2048, 50>}, {pipeline_mode = #tpu.pipeline_mode<synchronous>, transform_indices = @transform_7, window_bounds = array<i64: 1, 50>}, {pipeline_mode = #tpu.pipeline_mode<synchronous>, transform_indices = @transform_8, window_bounds = array<i64: 16, 2048>}, {pipeline_mode = #tpu.pipeline_mode<synchronous>, transform_indices = @transform_9, window_bounds = array<i64: 16, 50>}]} {
    %c0 = arith.constant 0 : index
    %c0_0 = arith.constant 0 : index
    %0 = vector.load %arg1[%c0, %c0_0] : memref<16x16xbf16, #tpu.memory_space<vmem>>, vector<16x16xbf16>
    %c0_1 = arith.constant 0 : index
    %c0_2 = arith.constant 0 : index
    %1 = vector.load %arg2[%c0_1, %c0_2] : memref<16x300xbf16, #tpu.memory_space<vmem>>, vector<16x300xbf16>
    %cst = arith.constant dense<0.000000e+00> : vector<16x300xf32>
    %2 = tpu.matmul %0, %1, %cst {dimension_numbers = #tpu.dot_dimension_numbers<[1], [0], [0], [1], [0, 0, 1, 1], [], []>} : vector<16x16xbf16>, vector<16x300xbf16>, vector<16x300xf32> -> vector<16x300xf32>
    %c0_3 = arith.constant 0 : index
    %c0_4 = arith.constant 0 : index
    %3 = vector.load %arg3[%c0_3, %c0_4] : memref<16x300xbf16, #tpu.memory_space<vmem>>, vector<16x300xbf16>
    %cst_5 = arith.constant dense<0.000000e+00> : vector<16x300xf32>
    %4 = tpu.matmul %0, %3, %cst_5 {dimension_numbers = #tpu.dot_dimension_numbers<[1], [0], [0], [1], [0, 0, 1, 1], [], []>} : vector<16x16xbf16>, vector<16x300xbf16>, vector<16x300xf32> -> vector<16x300xf32>
    %5 = arith.truncf %2 : vector<16x300xf32> to vector<16x300xbf16>
    %c0_6 = arith.constant 0 : index
    %c0_7 = arith.constant 0 : index
    %6 = vector.load %arg4[%c0_6, %c0_7] : memref<300x1024xbf16, #tpu.memory_space<vmem>>, vector<300x1024xbf16>
    %cst_8 = arith.constant dense<0.000000e+00> : vector<16x1024xf32>
    %7 = tpu.matmul %5, %6, %cst_8 {dimension_numbers = #tpu.dot_dimension_numbers<[1], [0], [0], [1], [0, 0, 1, 1], [], []>} : vector<16x300xbf16>, vector<300x1024xbf16>, vector<16x1024xf32> -> vector<16x1024xf32>
    %8 = arith.truncf %4 : vector<16x300xf32> to vector<16x300xbf16>
    %c0_9 = arith.constant 0 : index
    %c0_10 = arith.constant 0 : index
    %9 = vector.load %arg5[%c0_9, %c0_10] : memref<300x1024xbf16, #tpu.memory_space<vmem>>, vector<300x1024xbf16>
    %cst_11 = arith.constant dense<0.000000e+00> : vector<16x1024xf32>
    %10 = tpu.matmul %8, %9, %cst_11 {dimension_numbers = #tpu.dot_dimension_numbers<[1], [0], [0], [1], [0, 0, 1, 1], [], []>} : vector<16x300xbf16>, vector<300x1024xbf16>, vector<16x1024xf32> -> vector<16x1024xf32>
    %11 = arith.addf %7, %10 : vector<16x1024xf32>
    %cst_12 = arith.constant 0.000000e+00 : f32
    %12 = vector.broadcast %cst_12 : f32 to vector<16x1024xf32>
    %13 = arith.maximumf %11, %12 : vector<16x1024xf32>
    %14 = arith.truncf %13 : vector<16x1024xf32> to vector<16x1024xbf16>
    %cst_13 = arith.constant dense<0.000000e+00> : vector<16x1024xf32>
    %15 = tpu.matmul %0, %14, %cst_13 {dimension_numbers = #tpu.dot_dimension_numbers<[1], [0], [0], [1], [0, 0, 1, 1], [], []>} : vector<16x16xbf16>, vector<16x1024xbf16>, vector<16x1024xf32> -> vector<16x1024xf32>
    %16 = arith.truncf %15 : vector<16x1024xf32> to vector<16x1024xbf16>
    %c0_14 = arith.constant 0 : index
    %c0_15 = arith.constant 0 : index
    %17 = vector.load %arg6[%c0_14, %c0_15] : memref<1024x2048xbf16, #tpu.memory_space<vmem>>, vector<1024x2048xbf16>
    %cst_16 = arith.constant dense<0.000000e+00> : vector<16x2048xf32>
    %18 = tpu.matmul %16, %17, %cst_16 {dimension_numbers = #tpu.dot_dimension_numbers<[1], [0], [0], [1], [0, 0, 1, 1], [], []>} : vector<16x1024xbf16>, vector<1024x2048xbf16>, vector<16x2048xf32> -> vector<16x2048xf32>
    %cst_17 = arith.constant 0.000000e+00 : f32
    %19 = vector.broadcast %cst_17 : f32 to vector<16x2048xf32>
    %20 = arith.maximumf %18, %19 : vector<16x2048xf32>
    %c0_18 = arith.constant 0 : index
    %c0_19 = arith.constant 0 : index
    %21 = vector.load %arg9[%c0_18, %c0_19] : memref<16x2048xf32, #tpu.memory_space<vmem>>, vector<16x2048xf32>
    tpu.vector_store %arg9[%c0_18, %c0_19], %20 {strides = array<i32>} : memref<16x2048xf32, #tpu.memory_space<vmem>>, vector<16x2048xf32>,
    %22 = arith.truncf %20 : vector<16x2048xf32> to vector<16x2048xbf16>
    %c0_20 = arith.constant 0 : index
    %c0_21 = arith.constant 0 : index
    %23 = vector.load %arg7[%c0_20, %c0_21] : memref<2048x50xbf16, #tpu.memory_space<vmem>>, vector<2048x50xbf16>
    %cst_22 = arith.constant dense<0.000000e+00> : vector<16x50xf32>
    %24 = tpu.matmul %22, %23, %cst_22 {dimension_numbers = #tpu.dot_dimension_numbers<[1], [0], [0], [1], [0, 0, 1, 1], [], []>} : vector<16x2048xbf16>, vector<2048x50xbf16>, vector<16x50xf32> -> vector<16x50xf32>
    %c0_23 = arith.constant 0 : index
    %c0_24 = arith.constant 0 : index
    %25 = vector.load %arg8[%c0_23, %c0_24] : memref<1x50xf32, #tpu.memory_space<vmem>>, vector<1x50xf32>
    %26 = vector.broadcast %25 : vector<1x50xf32> to vector<16x50xf32>
    %27 = arith.addf %24, %26 : vector<16x50xf32>
    %cst_25 = arith.constant dense<0xFF800000> : vector<16xf32>
    %28 = vector.multi_reduction <maximumf>, %27, %cst_25 [1] : vector<16x50xf32> to vector<16xf32>
    %29 = vector.shape_cast %28 : vector<16xf32> to vector<16x1xf32>
    %30 = vector.broadcast %29 : vector<16x1xf32> to vector<16x50xf32>
    %31 = arith.subf %27, %30 : vector<16x50xf32>
    %32 = math.exp %31 : vector<16x50xf32>
    %cst_26 = arith.constant dense<0.000000e+00> : vector<16xf32>
    %33 = vector.multi_reduction <add>, %32, %cst_26 [1] : vector<16x50xf32> to vector<16xf32>
    %34 = vector.shape_cast %33 : vector<16xf32> to vector<16x1xf32>
    %35 = math.log %34 : vector<16x1xf32>
    %36 = arith.addf %29, %35 : vector<16x1xf32>
    %37 = vector.broadcast %36 : vector<16x1xf32> to vector<16x50xf32>
    %38 = arith.subf %27, %37 : vector<16x50xf32>
    %c0_27 = arith.constant 0 : index
    %c0_28 = arith.constant 0 : index
    %39 = vector.load %arg10[%c0_27, %c0_28] : memref<16x50xf32, #tpu.memory_space<vmem>>, vector<16x50xf32>
    tpu.vector_store %arg10[%c0_27, %c0_28], %38 {strides = array<i32>} : memref<16x50xf32, #tpu.memory_space<vmem>>, vector<16x50xf32>,
    return
  }
  func.func @transform_0(%arg0: i32) -> (i32, i32) {
    %c0_i32 = arith.constant 0 : i32
    %c0_i32_0 = arith.constant 0 : i32
    %c0_i32_1 = arith.constant 0 : i32
    return %c0_i32, %c0_i32_0 : i32, i32
  }
  func.func @transform_1(%arg0: i32) -> (i32, i32) {
    %c0_i32 = arith.constant 0 : i32
    %c0_i32_0 = arith.constant 0 : i32
    %c0_i32_1 = arith.constant 0 : i32
    return %c0_i32, %c0_i32_0 : i32, i32
  }
  func.func @transform_2(%arg0: i32) -> (i32, i32) {
    %c0_i32 = arith.constant 0 : i32
    %c0_i32_0 = arith.constant 0 : i32
    %c0_i32_1 = arith.constant 0 : i32
    return %c0_i32, %c0_i32_0 : i32, i32
  }
  func.func @transform_3(%arg0: i32) -> (i32, i32) {
    %c0_i32 = arith.constant 0 : i32
    %c0_i32_0 = arith.constant 0 : i32
    %c0_i32_1 = arith.constant 0 : i32
    return %c0_i32, %c0_i32_0 : i32, i32
  }
  func.func @transform_4(%arg0: i32) -> (i32, i32) {
    %c0_i32 = arith.constant 0 : i32
    %c0_i32_0 = arith.constant 0 : i32
    %c0_i32_1 = arith.constant 0 : i32
    return %c0_i32, %c0_i32_0 : i32, i32
  }
  func.func @transform_5(%arg0: i32) -> (i32, i32) {
    %c0_i32 = arith.constant 0 : i32
    %c0_i32_0 = arith.constant 0 : i32
    %c0_i32_1 = arith.constant 0 : i32
    return %c0_i32, %c0_i32_0 : i32, i32
  }
  func.func @transform_6(%arg0: i32) -> (i32, i32) {
    %c0_i32 = arith.constant 0 : i32
    %c0_i32_0 = arith.constant 0 : i32
    %c0_i32_1 = arith.constant 0 : i32
    return %c0_i32, %c0_i32_0 : i32, i32
  }
  func.func @transform_7(%arg0: i32) -> (i32, i32) {
    %c0_i32 = arith.constant 0 : i32
    %c0_i32_0 = arith.constant 0 : i32
    %c0_i32_1 = arith.constant 0 : i32
    return %c0_i32, %c0_i32_0 : i32, i32
  }
  func.func @transform_8(%arg0: i32) -> (i32, i32) {
    %c0_i32 = arith.constant 0 : i32
    %c0_i32_0 = arith.constant 0 : i32
    %c0_i32_1 = arith.constant 0 : i32
    return %c0_i32, %c0_i32_0 : i32, i32
  }
  func.func @transform_9(%arg0: i32) -> (i32, i32) {
    %c0_i32 = arith.constant 0 : i32
    %c0_i32_0 = arith.constant 0 : i32
    %c0_i32_1 = arith.constant 0 : i32
    return %c0_i32, %c0_i32_0 : i32, i32
  }
}

</mosaic_0001>

<bundles_post_ra>
// kernel: netgcn_sc_forward.1
= control target key start
LH: loop header
LB: loop body
LE: loop exit
PB: predicated region body
PF: predicated region fallthrough
CT: control target
= control target key end

     0   :  { %15 = vsyncpa [#allocation3], 0  ;;  %s15024_s0 = inlined_call_operand.hbm [shape: bf16[16,16], index: 0, kind: input, shape index: {}]   ;;  %s15025_s1 = inlined_call_operand.hbm [shape: bf16[16,300], index: 1, kind: input, shape index: {}]   ;;  %s15026_s2 = inlined_call_operand.hbm [shape: bf16[16,300], index: 2, kind: input, shape index: {}]   ;;  %s15027_s3 = inlined_call_operand.hbm [shape: bf16[300,1024], index: 3, kind: input, shape index: {}]   ;;  %s15028_s4 = inlined_call_operand.hbm [shape: bf16[300,1024], index: 4, kind: input, shape index: {}]   ;;  %s15029_s5 = inlined_call_operand.hbm [shape: bf16[1024,2048], index: 5, kind: input, shape index: {}]   ;;  %s15030_s6 = inlined_call_operand.vmem [shape: bf16[2048,50], index: 6, kind: input, shape index: {}]   ;;  %s15031_s7 = inlined_call_operand.hbm [shape: f32[1,50], index: 7, kind: input, shape index: {}]   ;;  %s15032_s8 = inlined_call_operand.hbm [shape: f32[16,2048], index: 8, kind: output, shape index: {0}]   ;;  %s15033_s9 = inlined_call_operand.hbm [shape: f32[16,50], index: 9, kind: output, shape index: {1}]  }
   0x1   :  { %16 = vsyncpa [#allocation6], 0 }
   0x2   :  { %17 = vsyncpa [#allocation9], 0 }
   0x3   :  { %18 = vsyncpa [#allocation12], 0 }
   0x4   :  { %19 = vsyncpa [#allocation4], 0 }
   0x5   :  { %20 = vsyncpa [#allocation16], 0  ;;  %s14172_s30 = smov [#allocation5]  }
   0x6   :  { %s38_s10 = sshll.u32 %s14172_s30, 4  ;;  %s39_s10 = int_to_ptr.vmem [resolvable:$true] %s38_s10 }
   0x7   :  { %s13988_s11 = scalar_lea.vmem %s39_s10, 384  ;;  %p13993_p1 = scmp.lt.s32.totalorder %s39_s10, %s39_s10 }
   0x8   :  { %p13989_p0 = scmp.ne.s32.totalorder %s39_s10, %s13988_s11  ;;  %p13994_p2 = scmp.lt.s32.totalorder %s13988_s11, %s13988_s11 }
   0xa   :  { %p13995_p3 = por %p13994_p2, %p13993_p1 }
   0xc   :  { %p13996_p4 = pnand %p13995_p3, %p13989_p0 }
   0xe   :  { %13999 = shalt.err (!%p13996_p4)
}
   0xf   :  { %s14173_s12 = smov 192   ;;  %s14174_s13 = smov 12  }
  0x10   :  { %44 = dma.hbm_to_vmem [thread:$0]  %s15025_s1, 384, %s39_s10, [#allocation6], %s14173_s12, %s14173_s12, %s14174_s13  }
  0x11   :  { %s14175_s16 = smov [#allocation8]  }
  0x12   :  { %s62_s17 = sshll.u32 %s14175_s16, 4  ;;  %s63_s17 = int_to_ptr.vmem [resolvable:$true] %s62_s17 }
  0x13   :  { %s14008_s18 = scalar_lea.vmem %s63_s17, 19456  ;;  %p14013_p6 = scmp.lt.s32.totalorder %s63_s17, %s63_s17 }
  0x14   :  { %p14009_p5 = scmp.ne.s32.totalorder %s63_s17, %s14008_s18  ;;  %p14014_p7 = scmp.lt.s32.totalorder %s14008_s18, %s14008_s18 }
  0x16   :  { %p14015_p8 = por %p14014_p7, %p14013_p6 }
  0x18   :  { %p14016_p9 = pnand %p14015_p8, %p14009_p5 }
  0x1a   :  { %14019 = shalt.err (!%p14016_p9)
}
  0x1b   :  { %s14176_s19 = smov 512   ;;  %s14177_s20 = smov 32  }
  0x1c   :  { %68 = dma.hbm_to_vmem [thread:$0]  %s15027_s3, 19456, %s63_s17, [#allocation9], %s14176_s19, %s14176_s19, %s14177_s20  }
  0x1d   :  { %s14178_s1 = smov [#allocation11]  }
  0x1e   :  { %s86_s23 = sshll.u32 %s14178_s1, 4  ;;  %s87_s23 = int_to_ptr.vmem [resolvable:$true] %s86_s23 }
  0x1f   :  { %s14028_s24 = scalar_lea.vmem %s87_s23, 131072  ;;  %p14033_p11 = scmp.lt.s32.totalorder %s87_s23, %s87_s23 }
  0x20   :  { %p14029_p10 = scmp.ne.s32.totalorder %s87_s23, %s14028_s24  ;;  %p14034_p12 = scmp.lt.s32.totalorder %s14028_s24, %s14028_s24 }
  0x22   :  { %p14035_p13 = por %p14034_p12, %p14033_p11 }
  0x24   :  { %p14036_p0 = pnand %p14035_p13, %p14029_p10 }
  0x26   :  { %14039 = shalt.err (!%p14036_p0)
}
  0x27   :  { %s14179_s25 = smov 1024   ;;  %s14180_s26 = smov 64  }
  0x28   :  { %92 = dma.hbm_to_vmem [thread:$0]  %s15029_s5, 131072, %s87_s23, [#allocation12], %s14179_s25, %s14179_s25, %s14180_s26  }
  0x29   :  { %s14181_s29 = smov [#allocation2]  }
  0x2a   :  { %s26_s30 = sshll.u32 %s14181_s29, 4  ;;  %s27_s30 = int_to_ptr.vmem [resolvable:$true] %s26_s30 }
  0x2b   :  { %s14048_s3 = scalar_lea.vmem %s27_s30, 128  ;;  %p14053_p2 = scmp.lt.s32.totalorder %s27_s30, %s27_s30 }
  0x2c   :  { %p14049_p1 = scmp.ne.s32.totalorder %s27_s30, %s14048_s3  ;;  %p14054_p3 = scmp.lt.s32.totalorder %s14048_s3, %s14048_s3 }
  0x2e   :  { %p14055_p4 = por %p14054_p3, %p14053_p2 }
  0x30   :  { %p14056_p5 = pnand %p14055_p4, %p14049_p1 }
  0x32   :  { %14059 = shalt.err (!%p14056_p5)
}
  0x33   :  { %s14182_s10 = smov 4   ;;  %s14183_s15 = smov [#allocation7]  }
  0x34   :  { %32 = dma.hbm_to_vmem [thread:$0]  %s15024_s0, 128, %s27_s30, [#allocation3], %s14180_s26, %s14180_s26, %s14182_s10  }
  0x35   :  { %s50_s16 = sshll.u32 %s14183_s15, 4  ;;  %s14184_s17 = smov [#allocation10]   ;;  %s51_s16 = int_to_ptr.vmem [resolvable:$true] %s50_s16 }
  0x36   :  { %s74_s5 = sshll.u32 %s14184_s17, 4  ;;  %s14068_s18 = scalar_lea.vmem %s51_s16, 384  ;;  %s75_s5 = int_to_ptr.vmem [resolvable:$true] %s74_s5 }
  0x37   :  { %p14069_p6 = scmp.ne.s32.totalorder %s51_s16, %s14068_s18  ;;  %p14073_p7 = scmp.lt.s32.totalorder %s51_s16, %s51_s16 }
  0x38   :  { %p14074_p8 = scmp.lt.s32.totalorder %s14068_s18, %s14068_s18 }
  0x3a   :  { %p14075_p9 = por %p14074_p8, %p14073_p7 }
  0x3c   :  { %p14076_p10 = pnand %p14075_p9, %p14069_p6 }
  0x3e   :  { %14079 = shalt.err (!%p14076_p10)
}
  0x3f   :  { %56 = dma.hbm_to_vmem [thread:$0]  %s15026_s2, 384, %s51_s16, [#allocation6], %s14173_s12, %s14173_s12, %s14174_s13  }
  0x40   :  { %s14088_s0 = scalar_lea.vmem %s75_s5, 19456  ;;  %p14093_p12 = scmp.lt.s32.totalorder %s75_s5, %s75_s5 }
  0x41   :  { %p14089_p11 = scmp.ne.s32.totalorder %s75_s5, %s14088_s0  ;;  %p14094_p13 = scmp.lt.s32.totalorder %s14088_s0, %s14088_s0 }
  0x43   :  { %p14095_p0 = por %p14094_p13, %p14093_p12 }
  0x45   :  { %p14096_p1 = pnand %p14095_p0, %p14089_p11 }
  0x47   :  { %14099 = shalt.err (!%p14096_p1)
}
  0x48   :  { %80 = dma.hbm_to_vmem [thread:$0]  %s15028_s4, 19456, %s75_s5, [#allocation9], %s14176_s19, %s14176_s19, %s14177_s20  }
  0x49   :  { %s14185_s24 = smov [#allocation13]  }
  0x4a   :  { %s101_s25 = sshll.u32 %s14185_s24, 4  ;;  %s102_s25 = int_to_ptr.vmem [resolvable:$true] %s101_s25 }
  0x4b   :  { %s14108_s26 = scalar_lea.vmem %s102_s25, 16  ;;  %s14112_s2 = scalar_lea.vmem %s102_s25, 32 }
  0x4c   :  { %p14109_p2 = scmp.ne.s32.totalorder %s102_s25, %s14108_s26  ;;  %p14113_p3 = scmp.lt.s32.totalorder %s102_s25, %s102_s25 }
  0x4d   :  { %p14114_p4 = scmp.lt.s32.totalorder %s14112_s2, %s14108_s26 }
  0x4f   :  { %p14115_p5 = por %p14114_p4, %p14113_p3 }
  0x51   :  { %p14116_p6 = pnand %p14115_p5, %p14109_p2 }
  0x53   :  { %14119 = shalt.err (!%p14116_p6)
}
  0x54   :  { %104 = dma.hbm_to_vmem [thread:$0]  %s15031_s7, 16, %s102_s25, [#allocation12]  }
  0x55   :  { %14160 = dma.done.wait [#allocation3], 128  }
  0x56   :  { %14161 = vsyncadd [#allocation3], 4294967168 }
  0x57   :  { %14162 = dma.done.wait [#allocation6], 768  }
  0x58   :  { %14163 = vsyncadd [#allocation6], 4294966528 }
  0x59   :  { %14164 = dma.done.wait [#allocation9], 38912  }
  0x5a   :  { %14165 = vsyncadd [#allocation9], 4294928384 }
  0x5b   :  { %14166 = dma.done.wait [#allocation12], 131088  }
  0x5c   :  { %14167 = vsyncadd [#allocation12], 4294836208  ;;  %v14186_v0 = vmov 0.0   ;;  %vm14187_vm0 = vmmov 0   ;;  %v14188_v1 = vmov 0   ;;  %v13838_v5 = vld [vmem:[#allocation2] sm:$0xff]  }
  0x5d   :  { %13800 = vmatprep.subr.bf16.mxu1 %v14186_v0  ;;  %13802 = vmatprep.mubr.msk.bf16.mxu1 %vm14187_vm0, %v14186_v0  ;;  %v13834_v2 = vld [vmem:[#allocation5 + $0x4] ss:$12 sps:$4 sm:$0xff]   ;;  %v13836_v3 = vld [vmem:[#allocation5 + $0x8] ss:$12 sps:$4 sm:$0xff]   ;;  %v13837_v4 = vld [vmem:[#allocation5] ss:$12 sps:$4 sm:$0xff]  }
  0x5e   :  { %190 = vmatprep.mubr.bf16.mxu0 %v14188_v1  ;;  %172 = vmatprep.subr.bf16.mxu0 %v13834_v2  ;;  %vm154_vm1 = vcmask 130048   ;;  %v13839_v6 = vld [vmem:[#allocation7] ss:$12 sps:$4 sm:$0xff]   ;;  %v13841_v7 = vld [vmem:[#allocation7 + $0x4] ss:$12 sps:$4 sm:$0xff]   ;;  %v560_v9 = vld [vmem:[#allocation10 + $0x1c0] sm:$0xff] }
  0x5f   :  { %13801 = vmatpush3.bf16.msra.mxu1 %v13836_v3  ;;  %173 = vmatpush1.bf16.msra.mxu0 %v13837_v4  ;;  %v13842_v8 = vld [vmem:[#allocation7 + $0x8] ss:$12 sps:$4 sm:$0xff]   ;;  %v564_v10 = vld [vmem:[#allocation10 + $0x1e0] sm:$0xff]  ;;  %vm1412_vm2 = vcmask 1045504   ;;  %vm1408_vm3 = vcmask 359424   ;;  %vm12067_vm4 = vcmask 408576  }
  0x60   :  { %13806 = vmatprep.subr.bf16.mxu1 %v14186_v0  ;;  %276 = vmatprep.subr.bf16.mxu0 %v13841_v7  ;;  %v12200_v11 = vcombine.high %v560_v9, %v564_v10  ;;  %v552_v12 = vld [vmem:[#allocation10 + $0x180] sm:$0xff]  ;;  %v12199_v14 = vcombine.low %v560_v9, %v564_v10 }
  0x61   :  { %v556_v13 = vld [vmem:[#allocation10 + $0x1a0] sm:$0xff] }
  0x62   :  { %13803 = vmatmul.mubr.msk.bf16.vlgmr.msra.gmra.mxu1 %vm154_vm1, %v13838_v5  ;;  %12136 = vmatmul.mubr.msk.bf16.vlgmr.msra.gmra.mxu0 %vm154_vm1, %v13838_v5  ;;  %v12192_v15 = vcombine.high %v552_v12, %v556_v13  ;;  %v544_v16 = vld [vmem:[#allocation10 + $0x140] sm:$0xff]  ;;  %v12191_v18 = vcombine.low %v552_v12, %v556_v13 }
  0x63   :  { %13807 = vmatpush3.bf16.msra.mxu1 %v13842_v8  ;;  %277 = vmatpush1.bf16.msra.mxu0 %v13839_v6  ;;  %v548_v17 = vld [vmem:[#allocation10 + $0x160] sm:$0xff] }
  0x64   :  { %13808 = vmatprep.mubr.msk.bf16.mxu1 %vm14187_vm0, %v14186_v0  ;;  %294 = vmatprep.mubr.bf16.mxu0 %v14188_v1  ;;  %v536_v19 = vld [vmem:[#allocation10 + $0x100] sm:$0xff]  ;;  %v12184_v21 = vcombine.high %v544_v16, %v548_v17  ;;  %v12183_v22 = vcombine.low %v544_v16, %v548_v17 }
  0x65   :  { %1437 = vmatprep.subr.bf16.mxu0 %v12200_v11  ;;  %v540_v20 = vld [vmem:[#allocation10 + $0x120] sm:$0xff] }
  0x66   :  { %v528_v23 = vld [vmem:[#allocation10 + $0xc0] sm:$0xff]  ;;  %v12176_v25 = vcombine.high %v536_v19, %v540_v20  ;;  %v12175_v26 = vcombine.low %v536_v19, %v540_v20 }
  0x67   :  { %v532_v24 = vld [vmem:[#allocation10 + $0xe0] sm:$0xff] }
  0x68   :  { %v520_v27 = vld [vmem:[#allocation10 + $0x80] sm:$0xff]  ;;  %v12168_v29 = vcombine.high %v528_v23, %v532_v24  ;;  %v12167_v30 = vcombine.low %v528_v23, %v532_v24  ;;  %v565_v23 = vld [vmem:[#allocation10 + $0x1e8] sm:$0xff] }
  0x69   :  { %v524_v28 = vld [vmem:[#allocation10 + $0xa0] sm:$0xff] }
  0x6a   :  { %13809 = vmatmul.mubr.msk.bf16.vlgmr.msra.gmra.mxu1 %vm154_vm1, %v13838_v5  ;;  %12141 = vmatmul.mubr.msk.bf16.vlgmr.msra.gmra.mxu0 %vm154_vm1, %v13838_v5  ;;  %v512_v31 = vld [vmem:[#allocation10 + $0x40] sm:$0xff]  ;;  %v12160_v33 = vcombine.high %v520_v27, %v524_v28  ;;  %v12159_v34 = vcombine.low %v520_v27, %v524_v28  ;;  %v649_v27 = vld [vmem:[#allocation10 + $0x488] sm:$0xff] }
  0x6b   :  { %1512 = vmatprep.mubr.bf16.mxu1 %v14188_v1  ;;  %1438 = vmatpush1.bf16.msra.mxu0 %v12199_v14  ;;  %v516_v32 = vld [vmem:[#allocation10 + $0x60] sm:$0xff]  ;;  %v653_v28 = vld [vmem:[#allocation10 + $0x4a8] sm:$0x33] }
  0x6c   :  { %1439 = vmatprep.subr.bf16.mxu0 %v12192_v15  ;;  %v504_v35 = vld [vmem:[#allocation10] sm:$0xff]  ;;  %v12152_v37 = vcombine.high %v512_v31, %v516_v32  ;;  %v12151_v38 = vcombine.low %v512_v31, %v516_v32 }
  0x6d   :  { %v508_v36 = vld [vmem:[#allocation10 + $0x20] sm:$0xff] }
  0x6e   :  { %v624_v39 = vld [vmem:[#allocation10 + $0x3c0] sm:$0xff]  ;;  %v12144_v41 = vcombine.high %v504_v35, %v508_v36  ;;  %v12143_v42 = vcombine.low %v504_v35, %v508_v36 }
  0x6f   :  { %1440 = vmatpush1.bf16.msra.mxu0 %v12191_v18  ;;  %v628_v40 = vld [vmem:[#allocation10 + $0x3e0] sm:$0xff] }
  0x70   :  { %1441 = vmatprep.subr.bf16.mxu0 %v12184_v21  ;;  %v616_v43 = vld [vmem:[#allocation10 + $0x380] sm:$0xff]  ;;  %v12264_v45 = vcombine.high %v624_v39, %v628_v40  ;;  %v12263_v46 = vcombine.low %v624_v39, %v628_v40  ;;  %v561_v21 = vld [vmem:[#allocation10 + $0x1c8] sm:$0xff] }
  0x71   :  { %v620_v44 = vld [vmem:[#allocation10 + $0x3a0] sm:$0xff] }
  0x72   :  { %v608_v47 = vld [vmem:[#allocation10 + $0x340] sm:$0xff]  ;;  %v12256_v49 = vcombine.high %v616_v43, %v620_v44  ;;  %v12255_v50 = vcombine.low %v616_v43, %v620_v44  ;;  %v553_v44 = vld [vmem:[#allocation10 + $0x188] sm:$0xff] }
  0x73   :  { %1442 = vmatpush1.bf16.msra.mxu0 %v12183_v22  ;;  %v612_v48 = vld [vmem:[#allocation10 + $0x360] sm:$0xff] }
  0x74   :  { %1443 = vmatprep.subr.bf16.mxu0 %v12176_v25  ;;  %v600_v51 = vld [vmem:[#allocation10 + $0x300] sm:$0xff]  ;;  %v12248_v53 = vcombine.high %v608_v47, %v612_v48  ;;  %v12247_v54 = vcombine.low %v608_v47, %v612_v48  ;;  %v12201_v25 = vcombine.low %v561_v21, %v565_v23 }
  0x75   :  { %v604_v52 = vld [vmem:[#allocation10 + $0x320] sm:$0xff] }
  0x76   :  { %v12240_v55 = vcombine.high %v600_v51, %v604_v52  ;;  %v12239_v56 = vcombine.low %v600_v51, %v604_v52  ;;  %v592_v57 = vld [vmem:[#allocation10 + $0x2c0] sm:$0xff]  ;;  %v545_v51 = vld [vmem:[#allocation10 + $0x148] sm:$0xff] }
  0x77   :  { %1444 = vmatpush1.bf16.msra.mxu0 %v12175_v26  ;;  %v596_v58 = vld [vmem:[#allocation10 + $0x2e0] sm:$0xff]  ;;  %v12202_v26 = vcombine.high %v561_v21, %v565_v23 }
  0x78   :  { %1445 = vmatprep.subr.bf16.mxu0 %v12168_v29  ;;  %v648_v59 = vld [vmem:[#allocation10 + $0x480] sm:$0xff]  ;;  %v12232_v60 = vcombine.high %v592_v57, %v596_v58  ;;  %v12231_v62 = vcombine.low %v592_v57, %v596_v58  ;;  %v12290_v29 = vcombine.high %v649_v27, %v653_v28 }
  0x79   :  { %v652_v61 = vld [vmem:[#allocation10 + $0x4a0] sm:$0x33] }
  0x7a   :  { %v12288_v63 = vcombine.high %v648_v59, %v652_v61  ;;  %v12287_v0 = vcombine.low %v648_v59, %v652_v61  ;;  %v584_v3 = vld [vmem:[#allocation10 + $0x280] sm:$0xff] }
  0x7b   :  { %1446 = vmatpush1.bf16.msra.mxu0 %v12167_v30  ;;  %v588_v4 = vld [vmem:[#allocation10 + $0x2a0] sm:$0xff]  ;;  %v12289_v30 = vcombine.low %v649_v27, %v653_v28  ;;  %v550_v27 = vld [vmem:[#allocation10 + $0x170] sm:$0xff] }
  0x7c   :  { %1447 = vmatprep.subr.bf16.mxu0 %v12160_v33  ;;  %12295 = vmatprep.subr.msk.bf16.mxu1 %vm1412_vm2, %v12288_v63  ;;  %v1414_v2 = vsel %vm1412_vm2, %v12287_v0, 0  ;;  %v640_v5 = vld [vmem:[#allocation10 + $0x440] sm:$0xff]  ;;  %v12224_v6 = vcombine.high %v584_v3, %v588_v4  ;;  %v12223_v8 = vcombine.low %v584_v3, %v588_v4  ;;  %v537_v63 = vld [vmem:[#allocation10 + $0x108] sm:$0xff] }
  0x7d   :  { %1491 = vmatpush1.bf16.msra.mxu1 %v1414_v2  ;;  %v644_v7 = vld [vmem:[#allocation10 + $0x460] sm:$0xff]  ;;  %v541_v0 = vld [vmem:[#allocation10 + $0x128] sm:$0xff] }
  0x7e   :  { %v12279_v9 = vcombine.low %v640_v5, %v644_v7  ;;  %v12280_v10 = vcombine.high %v640_v5, %v644_v7  ;;  %v576_v11 = vld [vmem:[#allocation10 + $0x240] sm:$0xff]  ;;  %v633_v2 = vld [vmem:[#allocation10 + $0x408] sm:$0xff] }
  0x7f   :  { %1448 = vmatpush1.bf16.msra.mxu0 %v12159_v34  ;;  %v580_v12 = vld [vmem:[#allocation10 + $0x260] sm:$0xff]  ;;  %v637_v3 = vld [vmem:[#allocation10 + $0x428] sm:$0xff] }
  0x80   :  { %1449 = vmatprep.subr.bf16.mxu0 %v12152_v37  ;;  %1492 = vmatprep.subr.bf16.mxu1 %v12280_v10  ;;  %v632_v13 = vld [vmem:[#allocation10 + $0x400] sm:$0xff]  ;;  %v12216_v14 = vcombine.high %v576_v11, %v580_v12  ;;  %v12215_v16 = vcombine.low %v576_v11, %v580_v12  ;;  %v12274_v7 = vcombine.high %v633_v2, %v637_v3  ;;  %v562_v10 = vld [vmem:[#allocation10 + $0x1d0] sm:$0xff] }
  0x81   :  { %1493 = vmatpush1.bf16.msra.mxu1 %v12279_v9  ;;  %v636_v15 = vld [vmem:[#allocation10 + $0x420] sm:$0xff]  ;;  %v533_v9 = vld [vmem:[#allocation10 + $0xe8] sm:$0xff]  ;;  %v566_v11 = vld [vmem:[#allocation10 + $0x1f0] sm:$0xff]  ;;  %v12177_v12 = vcombine.low %v537_v63, %v541_v0 }
  0x82   :  { %v12271_v17 = vcombine.low %v632_v13, %v636_v15  ;;  %v12272_v18 = vcombine.high %v632_v13, %v636_v15  ;;  %v568_v19 = vld [vmem:[#allocation10 + $0x200] sm:$0xff]  ;;  %v12273_v13 = vcombine.low %v633_v2, %v637_v3  ;;  %v12204_v15 = vcombine.high %v562_v10, %v566_v11  ;;  %v514_v2 = vld [vmem:[#allocation10 + $0x50] sm:$0xff] }
  0x83   :  { %1450 = vmatpush1.bf16.msra.mxu0 %v12151_v38  ;;  %v572_v20 = vld [vmem:[#allocation10 + $0x220] sm:$0xff]  ;;  %v12203_v21 = vcombine.low %v562_v10, %v566_v11  ;;  %v518_v3 = vld [vmem:[#allocation10 + $0x70] sm:$0xff] }
  0x84   :  { %1451 = vmatprep.subr.bf16.mxu0 %v12144_v41  ;;  %1494 = vmatprep.subr.bf16.mxu1 %v12272_v18  ;;  %v12208_v22 = vcombine.high %v568_v19, %v572_v20  ;;  %v12207_v24 = vcombine.low %v568_v19, %v572_v20  ;;  %v554_v18 = vld [vmem:[#allocation10 + $0x190] sm:$0xff] }
  0x85   :  { %1495 = vmatpush1.bf16.msra.mxu1 %v12271_v17  ;;  %v525_v17 = vld [vmem:[#allocation10 + $0xa8] sm:$0xff]  ;;  %v558_v19 = vld [vmem:[#allocation10 + $0x1b0] sm:$0xff] }
  0x86   :  { %1523 = vmatprep.subr.bf16.mxu1 %v12202_v26  ;;  %v12196_v23 = vcombine.high %v554_v18, %v558_v19  ;;  %v546_v26 = vld [vmem:[#allocation10 + $0x150] sm:$0xff] }
  0x87   :  { %1452 = vmatpush1.bf16.msra.mxu0 %v12143_v42  ;;  %v506_v10 = vld [vmem:[#allocation10 + $0x10] sm:$0xff] }
  0x88   :  { %1453 = vmatprep.subr.bf16.mxu0 %v12264_v45  ;;  %v557_v45 = vld [vmem:[#allocation10 + $0x1a8] sm:$0xff]  ;;  %v510_v11 = vld [vmem:[#allocation10 + $0x30] sm:$0xff] }
  0x89   :  { %v12193_v59 = vcombine.low %v553_v44, %v557_v45 }
  0x8b   :  { %1454 = vmatpush2.bf16.msra.mxu0 %v12263_v46 }
  0x8c   :  { %1455 = vmatprep.subr.bf16.mxu0 %v12256_v49 }
  0x8f   :  { %1456 = vmatpush2.bf16.msra.mxu0 %v12255_v50  ;;  %v12194_v50 = vcombine.high %v553_v44, %v557_v45  ;;  %v625_v44 = vld [vmem:[#allocation10 + $0x3c8] sm:$0xff] }
  0x90   :  { %1457 = vmatprep.subr.bf16.mxu0 %v12248_v53  ;;  %v549_v53 = vld [vmem:[#allocation10 + $0x168] sm:$0xff] }
  0x91   :  { %v12186_v61 = vcombine.high %v545_v51, %v549_v53  ;;  %v12185_v4 = vcombine.low %v545_v51, %v549_v53  ;;  %v629_v45 = vld [vmem:[#allocation10 + $0x3e8] sm:$0xff] }
  0x92   :  { %v12266_v51 = vcombine.high %v625_v44, %v629_v45  ;;  %v617_v53 = vld [vmem:[#allocation10 + $0x388] sm:$0xff] }
  0x93   :  { %1458 = vmatpush2.bf16.msra.mxu0 %v12247_v54  ;;  %v641_v54 = vld [vmem:[#allocation10 + $0x448] sm:$0xff] }
  0x94   :  { %1459 = vmatprep.subr.bf16.mxu0 %v12240_v55  ;;  %v645_v55 = vld [vmem:[#allocation10 + $0x468] sm:$0xff] }
  0x95   :  { %v12281_v5 = vcombine.low %v641_v54, %v645_v55 }
  0x97   :  { %1460 = vmatpush2.bf16.msra.mxu0 %v12239_v56 }
  0x98   :  { %1461 = vmatprep.subr.bf16.mxu0 %v12232_v60  ;;  %v1420_v60 = vsel %vm1412_vm2, %v12289_v30, 0 }
  0x9b   :  { %1462 = vmatpush2.bf16.msra.mxu0 %v12231_v62  ;;  %v12282_v62 = vcombine.high %v641_v54, %v645_v55  ;;  %v621_v54 = vld [vmem:[#allocation10 + $0x3a8] sm:$0xff]  ;;  %v522_v55 = vld [vmem:[#allocation10 + $0x90] sm:$0xff] }
  0x9c   :  { %1463 = vmatprep.subr.bf16.mxu0 %v12224_v6  ;;  %v12178_v6 = vcombine.high %v537_v63, %v541_v0  ;;  %v609_v63 = vld [vmem:[#allocation10 + $0x348] sm:$0xff] }
  0x9d   :  { %v613_v0 = vld [vmem:[#allocation10 + $0x368] sm:$0xff] }
  0x9f   :  { %1464 = vmatpush2.bf16.msra.mxu0 %v12223_v8  ;;  %v529_v8 = vld [vmem:[#allocation10 + $0xc8] sm:$0xff] }
  0xa0   :  { %1465 = vmatprep.subr.bf16.mxu0 %v12216_v14  ;;  %v12170_v14 = vcombine.high %v529_v8, %v533_v9  ;;  %v12169_v20 = vcombine.low %v529_v8, %v533_v9  ;;  %v601_v8 = vld [vmem:[#allocation10 + $0x308] sm:$0xff] }
  0xa1   :  { %v605_v9 = vld [vmem:[#allocation10 + $0x328] sm:$0xff] }
  0xa3   :  { %1466 = vmatpush2.bf16.msra.mxu0 %v12215_v16  ;;  %v521_v16 = vld [vmem:[#allocation10 + $0x88] sm:$0xff] }
  0xa4   :  { %1467 = vmatprep.subr.bf16.mxu0 %v12208_v22  ;;  %v12162_v22 = vcombine.high %v521_v16, %v525_v17  ;;  %v12161_v28 = vcombine.low %v521_v16, %v525_v17  ;;  %v593_v16 = vld [vmem:[#allocation10 + $0x2c8] sm:$0xff] }
  0xa5   :  { %v597_v17 = vld [vmem:[#allocation10 + $0x2e8] sm:$0xff] }
  0xa7   :  { %1468 = vmatpush2.bf16.msra.mxu0 %v12207_v24  ;;  %v513_v24 = vld [vmem:[#allocation10 + $0x48] sm:$0xff] }
  0xa8   :  { %12297 = vmatprep.subr.msk.bf16.mxu0 %vm1412_vm2, %v12290_v29  ;;  %v12195_v29 = vcombine.low %v554_v18, %v558_v19  ;;  %v626_v18 = vld [vmem:[#allocation10 + $0x3d0] sm:$0xff] }
  0xa9   :  { %v630_v19 = vld [vmem:[#allocation10 + $0x3f0] sm:$0xff] }
 0x122   :  { %v235_v31 = vpop.f32.mrf.mxu1  ;;  %v192_v32 = vpop.f32.mrf.mxu0 }
 0x124   :  { %v13804_v33 = vpop.f32.mrf.mxu1  ;;  %v14289_v34 = vpop.f32.mrf.mxu0 }
 0x125   :  { %v509_v33 = vld [vmem:[#allocation10 + $0x28] sm:$0xff] }
 0x126   :  { %v238_v35 = vpop.f32.mrf.mxu1  ;;  %v196_v37 = vpop.f32.mrf.mxu0 }
 0x127   :  { %v14291_v36 = vpack.c.bf16 %v238_v35, %v235_v31  ;;  %v14293_v38 = vpack.c.bf16 %v196_v37, %v192_v32  ;;  %v12188_v31 = vcombine.high %v546_v26, %v550_v27  ;;  %v505_v32 = vld [vmem:[#allocation10 + $0x8] sm:$0xff]  ;;  %v538_v35 = vld [vmem:[#allocation10 + $0x110] sm:$0xff] }
 0x128   :  { %v13805_v39 = vpop.f32.mrf.mxu1  ;;  %v14295_v40 = vpop.f32.mrf.mxu0  ;;  %v542_v37 = vld [vmem:[#allocation10 + $0x130] sm:$0xff] }
 0x12a   :  { %v339_v41 = vpop.f32.mrf.mxu1  ;;  %v296_v42 = vpop.f32.mrf.mxu0 }
 0x12c   :  { %v13810_v43 = vpop.f32.mrf.mxu1  ;;  %v298_v46 = vpop.f32.mrf.mxu0 }
 0x12d   :  { %v12180_v43 = vcombine.high %v538_v35, %v542_v37 }
 0x12e   :  { %v342_v47 = vpop.f32.mrf.mxu1  ;;  %v300_v49 = vpop.f32.mrf.mxu0 }
 0x12f   :  { %v14297_v48 = vpack.c.bf16 %v342_v47, %v339_v41  ;;  %v14299_v56 = vpack.c.bf16 %v300_v49, %v296_v42  ;;  %v12187_v41 = vcombine.low %v546_v26, %v550_v27  ;;  %v12146_v42 = vcombine.high %v505_v32, %v509_v33  ;;  %v534_v47 = vld [vmem:[#allocation10 + $0xf0] sm:$0xff] }
 0x130   :  { %v13811_v52 = vpop.f32.mrf.mxu1  ;;  %v302_v57 = vpop.f32.mrf.mxu0  ;;  %v12145_v49 = vcombine.low %v505_v32, %v509_v33  ;;  %v618_v26 = vld [vmem:[#allocation10 + $0x390] sm:$0xff]  ;;  %v577_v32 = vld [vmem:[#allocation10 + $0x248] sm:$0xff] }
 0x131   :  { %12296 = vmatmul.mubr.msk.bf16.vlgmr.msra.gmra.mxu1 %vm1408_vm3, %v14297_v48  ;;  %v14303_v58 = vpack.c.bf16 %v302_v57, %v298_v46  ;;  %v530_v46 = vld [vmem:[#allocation10 + $0xd0] sm:$0xff]  ;;  %v581_v33 = vld [vmem:[#allocation10 + $0x268] sm:$0xff] }
 0x132   :  { %1524 = vmatpush1.bf16.msra.mxu1 %v12201_v25  ;;  %v517_v25 = vld [vmem:[#allocation10 + $0x68] sm:$0xff]  ;;  %v12172_v52 = vcombine.high %v530_v46, %v534_v47  ;;  %v526_v57 = vld [vmem:[#allocation10 + $0xb0] sm:$0xff] }
 0x133   :  { %1525 = vmatprep.subr.bf16.mxu1 %v12194_v50  ;;  %1469 = vmatprep.mubr.bf16.mxu0 %v14303_v58  ;;  %v12154_v30 = vcombine.high %v513_v24, %v517_v25  ;;  %v12153_v39 = vcombine.low %v513_v24, %v517_v25  ;;  %v12179_v50 = vcombine.low %v538_v35, %v542_v37  ;;  %v585_v24 = vld [vmem:[#allocation10 + $0x288] sm:$0xff]  ;;  %v622_v27 = vld [vmem:[#allocation10 + $0x3b0] sm:$0xff] }
 0x134   :  { %1555 = vmatprep.mubr.bf16.mxu1 %v14303_v58  ;;  %1470 = vmatmul.mubr.bf16.vlgmr.msra.gmra.mxu0 %v14299_v56  ;;  %v589_v25 = vld [vmem:[#allocation10 + $0x2a8] sm:$0xff]  ;;  %v610_v35 = vld [vmem:[#allocation10 + $0x350] sm:$0xff] }
 0x135   :  { %1577 = vmatpush1.bf16.msra.mxu0 %v1420_v60  ;;  %1598 = vmatprep.mubr.bf16.mxu0 %v14188_v1  ;;  %v12171_v60 = vcombine.low %v530_v46, %v534_v47  ;;  %v614_v37 = vld [vmem:[#allocation10 + $0x370] sm:$0xff] }
 0x136   :  { %1526 = vmatpush1.bf16.msra.mxu1 %v12193_v59  ;;  %1578 = vmatprep.subr.bf16.mxu0 %v12282_v62  ;;  %v12265_v59 = vcombine.low %v625_v44, %v629_v45  ;;  %v12164_v62 = vcombine.high %v522_v55, %v526_v57  ;;  %v569_v44 = vld [vmem:[#allocation10 + $0x208] sm:$0xff]  ;;  %v602_v46 = vld [vmem:[#allocation10 + $0x310] sm:$0xff] }
 0x137   :  { %1527 = vmatprep.subr.bf16.mxu1 %v12186_v61  ;;  %v12258_v61 = vcombine.high %v617_v53, %v621_v54  ;;  %v573_v45 = vld [vmem:[#allocation10 + $0x228] sm:$0xff]  ;;  %v606_v47 = vld [vmem:[#allocation10 + $0x330] sm:$0xff] }
 0x139   :  { %1579 = vmatpush1.bf16.msra.mxu0 %v12281_v5  ;;  %v12163_v5 = vcombine.low %v522_v55, %v526_v57  ;;  %v650_v55 = vld [vmem:[#allocation10 + $0x490] sm:$0xff] }
 0x13a   :  { %1528 = vmatpush1.bf16.msra.mxu1 %v12185_v4  ;;  %1580 = vmatprep.subr.bf16.mxu0 %v12274_v7  ;;  %v12257_v4 = vcombine.low %v617_v53, %v621_v54  ;;  %v12156_v7 = vcombine.high %v514_v2, %v518_v3  ;;  %v594_v53 = vld [vmem:[#allocation10 + $0x2d0] sm:$0xff] }
 0x13b   :  { %1529 = vmatprep.subr.bf16.mxu1 %v12178_v6  ;;  %v12250_v6 = vcombine.high %v609_v63, %v613_v0  ;;  %v598_v54 = vld [vmem:[#allocation10 + $0x2f0] sm:$0xff] }
 0x13c   :  { %v654_v57 = vld [vmem:[#allocation10 + $0x4b0] sm:$0x33] }
 0x13d   :  { %1581 = vmatpush1.bf16.msra.mxu0 %v12273_v13  ;;  %v12155_v13 = vcombine.low %v514_v2, %v518_v3  ;;  %v590_v2 = vld [vmem:[#allocation10 + $0x2b0] sm:$0xff] }
 0x13e   :  { %1530 = vmatpush1.bf16.msra.mxu1 %v12177_v12  ;;  %1609 = vmatprep.subr.bf16.mxu0 %v12204_v15  ;;  %v12249_v12 = vcombine.low %v609_v63, %v613_v0  ;;  %v12148_v15 = vcombine.high %v506_v10, %v510_v11  ;;  %v12291_v63 = vcombine.low %v650_v55, %v654_v57  ;;  %v586_v0 = vld [vmem:[#allocation10 + $0x290] sm:$0xff] }
 0x13f   :  { %1531 = vmatprep.subr.bf16.mxu1 %v12170_v14  ;;  %v12242_v14 = vcombine.high %v601_v8, %v605_v9  ;;  %v642_v3 = vld [vmem:[#allocation10 + $0x450] sm:$0xff] }
 0x140   :  { %12298 = vmatmul.mubr.msk.bf16.vlgmr.msra.gmra.mxu0 %vm1408_vm3, %v14297_v48 }
 0x141   :  { %1610 = vmatpush1.bf16.msra.mxu0 %v12203_v21  ;;  %1641 = vmatprep.mubr.bf16.mxu0 %v14303_v58  ;;  %v12147_v21 = vcombine.low %v506_v10, %v510_v11  ;;  %v582_v10 = vld [vmem:[#allocation10 + $0x270] sm:$0xff] }
 0x142   :  { %1532 = vmatpush1.bf16.msra.mxu1 %v12169_v20  ;;  %1611 = vmatprep.subr.bf16.mxu0 %v12196_v23  ;;  %v12241_v20 = vcombine.low %v601_v8, %v605_v9  ;;  %v12268_v23 = vcombine.high %v626_v18, %v630_v19  ;;  %v578_v9 = vld [vmem:[#allocation10 + $0x250] sm:$0xff] }
 0x143   :  { %1533 = vmatprep.subr.bf16.mxu1 %v12162_v22  ;;  %v12234_v22 = vcombine.high %v593_v16, %v597_v17  ;;  %v634_v11 = vld [vmem:[#allocation10 + $0x410] sm:$0xff] }
 0x145   :  { %1612 = vmatpush1.bf16.msra.mxu0 %v12195_v29  ;;  %v12267_v29 = vcombine.low %v626_v18, %v630_v19  ;;  %v574_v18 = vld [vmem:[#allocation10 + $0x230] sm:$0xff]  ;;  %v563_v19 = vld [vmem:[#allocation10 + $0x1d8] sm:$0xff] }
 0x146   :  { %1534 = vmatpush1.bf16.msra.mxu1 %v12161_v28  ;;  %1613 = vmatprep.subr.bf16.mxu0 %v12188_v31  ;;  %v12233_v28 = vcombine.low %v593_v16, %v597_v17  ;;  %v12260_v31 = vcombine.high %v618_v26, %v622_v27  ;;  %v570_v17 = vld [vmem:[#allocation10 + $0x210] sm:$0xff] }
 0x147   :  { %1535 = vmatprep.subr.bf16.mxu1 %v12154_v30  ;;  %v12226_v30 = vcombine.high %v585_v24, %v589_v25 }
 0x149   :  { %1614 = vmatpush1.bf16.msra.mxu0 %v12187_v41  ;;  %v12259_v41 = vcombine.low %v618_v26, %v622_v27  ;;  %v559_v26 = vld [vmem:[#allocation10 + $0x1b8] sm:$0xff] }
 0x14a   :  { %1536 = vmatpush1.bf16.msra.mxu1 %v12153_v39  ;;  %1615 = vmatprep.subr.bf16.mxu0 %v12180_v43  ;;  %v12225_v39 = vcombine.low %v585_v24, %v589_v25  ;;  %v12252_v43 = vcombine.high %v610_v35, %v614_v37  ;;  %v555_v25 = vld [vmem:[#allocation10 + $0x198] sm:$0xff] }
 0x14b   :  { %1537 = vmatprep.subr.bf16.mxu1 %v12146_v42  ;;  %v12218_v42 = vcombine.high %v577_v32, %v581_v33  ;;  %v651_v27 = vld [vmem:[#allocation10 + $0x498] sm:$0xff] }
 0x14d   :  { %1616 = vmatpush1.bf16.msra.mxu0 %v12179_v50  ;;  %v12251_v50 = vcombine.low %v610_v35, %v614_v37  ;;  %v551_v37 = vld [vmem:[#allocation10 + $0x178] sm:$0xff] }
 0x14e   :  { %1538 = vmatpush1.bf16.msra.mxu1 %v12145_v49  ;;  %1617 = vmatprep.subr.bf16.mxu0 %v12172_v52  ;;  %v12217_v49 = vcombine.low %v577_v32, %v581_v33  ;;  %v12244_v52 = vcombine.high %v602_v46, %v606_v47  ;;  %v547_v33 = vld [vmem:[#allocation10 + $0x158] sm:$0xff] }
 0x14f   :  { %1539 = vmatprep.subr.bf16.mxu1 %v12266_v51  ;;  %v12210_v51 = vcombine.high %v569_v44, %v573_v45 }
 0x151   :  { %1618 = vmatpush1.bf16.msra.mxu0 %v12171_v60  ;;  %v12243_v60 = vcombine.low %v602_v46, %v606_v47  ;;  %v539_v46 = vld [vmem:[#allocation10 + $0x118] sm:$0xff] }
 0x152   :  { %1540 = vmatpush2.bf16.msra.mxu1 %v12265_v59  ;;  %1619 = vmatprep.subr.bf16.mxu0 %v12164_v62  ;;  %v12209_v59 = vcombine.low %v569_v44, %v573_v45  ;;  %v12292_v62 = vcombine.high %v650_v55, %v654_v57  ;;  %v12190_v44 = vcombine.high %v547_v33, %v551_v37  ;;  %v543_v47 = vld [vmem:[#allocation10 + $0x138] sm:$0xff]  ;;  %v405_v57 = vld [vmem:[#allocation8 + $0x1c0] sm:$0xff] }
 0x153   :  { %1541 = vmatprep.subr.bf16.mxu1 %v12258_v61  ;;  %v12236_v61 = vcombine.high %v594_v53, %v598_v54  ;;  %v535_v55 = vld [vmem:[#allocation10 + $0xf8] sm:$0xff] }
 0x155   :  { %1620 = vmatpush1.bf16.msra.mxu0 %v12163_v5  ;;  %v12235_v5 = vcombine.low %v594_v53, %v598_v54  ;;  %v531_v54 = vld [vmem:[#allocation10 + $0xd8] sm:$0xff] }
 0x156   :  { %1542 = vmatpush2.bf16.msra.mxu1 %v12257_v4  ;;  %1621 = vmatprep.subr.bf16.mxu0 %v12156_v7  ;;  %v646_v4 = vld [vmem:[#allocation10 + $0x470] sm:$0xff]  ;;  %v12228_v7 = vcombine.high %v586_v0, %v590_v2 }
 0x157   :  { %1543 = vmatprep.subr.bf16.mxu1 %v12250_v6  ;;  %v1426_v6 = vsel %vm1412_vm2, %v12291_v63, 0  ;;  %v12284_v8 = vcombine.high %v642_v3, %v646_v4 }
 0x159   :  { %1622 = vmatpush1.bf16.msra.mxu0 %v12155_v13  ;;  %v12227_v13 = vcombine.low %v586_v0, %v590_v2  ;;  %v523_v0 = vld [vmem:[#allocation10 + $0x98] sm:$0xff] }
 0x15a   :  { %1544 = vmatpush2.bf16.msra.mxu1 %v12249_v12  ;;  %1623 = vmatprep.subr.bf16.mxu0 %v12148_v15  ;;  %v638_v12 = vld [vmem:[#allocation10 + $0x430] sm:$0xff]  ;;  %v12220_v15 = vcombine.high %v578_v9, %v582_v10  ;;  %v527_v2 = vld [vmem:[#allocation10 + $0xb8] sm:$0xff] }
 0x15b   :  { %1545 = vmatprep.subr.bf16.mxu1 %v12242_v14  ;;  %v12283_v14 = vcombine.low %v642_v3, %v646_v4  ;;  %v12276_v16 = vcombine.high %v634_v11, %v638_v12  ;;  %v397_v3 = vld [vmem:[#allocation8 + $0x180] sm:$0xff] }
 0x15c   :  { %v401_v4 = vld [vmem:[#allocation8 + $0x1a0] sm:$0xff] }
 0x15d   :  { %1624 = vmatpush1.bf16.msra.mxu0 %v12147_v21  ;;  %v12219_v21 = vcombine.low %v578_v9, %v582_v10  ;;  %v12352_v9 = vcombine.high %v397_v3, %v401_v4  ;;  %v519_v10 = vld [vmem:[#allocation10 + $0x78] sm:$0xff] }
 0x15e   :  { %1546 = vmatpush2.bf16.msra.mxu1 %v12241_v20  ;;  %1625 = vmatprep.subr.bf16.mxu0 %v12268_v23  ;;  %v567_v20 = vld [vmem:[#allocation10 + $0x1f8] sm:$0xff]  ;;  %v12212_v23 = vcombine.high %v570_v17, %v574_v18 }
 0x15f   :  { %1547 = vmatprep.subr.bf16.mxu1 %v12234_v22  ;;  %v12275_v22 = vcombine.low %v634_v11, %v638_v12  ;;  %v12206_v24 = vcombine.high %v563_v19, %v567_v20  ;;  %v389_v11 = vld [vmem:[#allocation8 + $0x140] sm:$0xff] }
 0x160   :  { %v393_v12 = vld [vmem:[#allocation8 + $0x160] sm:$0xff] }
 0x161   :  { %1626 = vmatpush2.bf16.msra.mxu0 %v12267_v29  ;;  %v12211_v29 = vcombine.low %v570_v17, %v574_v18  ;;  %v12344_v17 = vcombine.high %v389_v11, %v393_v12  ;;  %v507_v18 = vld [vmem:[#allocation10 + $0x18] sm:$0xff] }
 0x162   :  { %1548 = vmatpush2.bf16.msra.mxu1 %v12233_v28  ;;  %1627 = vmatprep.subr.bf16.mxu0 %v12260_v31  ;;  %v655_v28 = vld [vmem:[#allocation10 + $0x4b8] sm:$0x33]  ;;  %v12198_v31 = vcombine.high %v555_v25, %v559_v26 }
 0x163   :  { %1549 = vmatprep.subr.bf16.mxu1 %v12226_v30  ;;  %v12205_v30 = vcombine.low %v563_v19, %v567_v20  ;;  %v12293_v32 = vcombine.low %v651_v27, %v655_v28  ;;  %v12294_v35 = vcombine.high %v651_v27, %v655_v28  ;;  %v511_v19 = vld [vmem:[#allocation10 + $0x38] sm:$0xff]  ;;  %v381_v20 = vld [vmem:[#allocation8 + $0x100] sm:$0xff] }
 0x164   :  { %v12149_v27 = vcombine.low %v507_v18, %v511_v19 }
 0x165   :  { %1628 = vmatpush2.bf16.msra.mxu0 %v12259_v41  ;;  %v647_v41 = vld [vmem:[#allocation10 + $0x478] sm:$0xff] }
 0x166   :  { %1550 = vmatpush2.bf16.msra.mxu1 %v12225_v39  ;;  %1629 = vmatprep.subr.bf16.mxu0 %v12252_v43  ;;  %v643_v39 = vld [vmem:[#allocation10 + $0x458] sm:$0xff]  ;;  %v1432_v43 = vsel %vm1412_vm2, %v12293_v32, 0 }
 0x167   :  { %1551 = vmatprep.subr.bf16.mxu1 %v12218_v42  ;;  %v12197_v42 = vcombine.low %v555_v25, %v559_v26  ;;  %v12286_v45 = vcombine.high %v643_v39, %v647_v41  ;;  %v373_v25 = vld [vmem:[#allocation8 + $0xc0] sm:$0xff]  ;;  %v623_v32 = vld [vmem:[#allocation10 + $0x3b8] sm:$0xff] }
 0x168   :  { %v377_v26 = vld [vmem:[#allocation8 + $0xe0] sm:$0xff] }
 0x169   :  { %1630 = vmatpush2.bf16.msra.mxu0 %v12251_v50  ;;  %v639_v50 = vld [vmem:[#allocation10 + $0x438] sm:$0xff] }
 0x16a   :  { %1552 = vmatpush2.bf16.msra.mxu1 %v12217_v49  ;;  %1631 = vmatprep.subr.bf16.mxu0 %v12244_v52  ;;  %v635_v49 = vld [vmem:[#allocation10 + $0x418] sm:$0xff]  ;;  %v12285_v52 = vcombine.low %v643_v39, %v647_v41  ;;  %v12327_v39 = vcombine.low %v373_v25, %v377_v26 }
 0x16b   :  { %1553 = vmatprep.subr.bf16.mxu1 %v12210_v51  ;;  %v12189_v51 = vcombine.low %v547_v33, %v551_v37  ;;  %v12278_v53 = vcombine.high %v635_v49, %v639_v50  ;;  %v365_v33 = vld [vmem:[#allocation8 + $0x80] sm:$0xff] }
 0x16d   :  { %1632 = vmatpush2.bf16.msra.mxu0 %v12243_v60  ;;  %v12181_v60 = vcombine.low %v539_v46, %v543_v47 }
 0x16e   :  { %1554 = vmatpush2.bf16.msra.mxu1 %v12209_v59  ;;  %1633 = vmatprep.subr.bf16.mxu0 %v12236_v61  ;;  %v409_v59 = vld [vmem:[#allocation8 + $0x1e0] sm:$0xff]  ;;  %v12277_v61 = vcombine.low %v635_v49, %v639_v50 }
 0x16f   :  { %12299 = vmatprep.subr.msk.bf16.mxu1 %vm1412_vm2, %v12292_v62  ;;  %v12174_v62 = vcombine.high %v531_v54, %v535_v55  ;;  %v12360_v63 = vcombine.high %v405_v57, %v409_v59 }
 0x171   :  { %1556 = vmatmul.mubr.bf16.vlgmr.msra.gmra.mxu1 %v14299_v56  ;;  %1634 = vmatpush2.bf16.msra.mxu0 %v12235_v5  ;;  %v12173_v5 = vcombine.low %v531_v54, %v535_v55  ;;  %v353_v54 = vld [vmem:[#allocation8 + $0x20] sm:$0xff] }
 0x172   :  { %1663 = vmatpush1.bf16.msra.mxu1 %v1426_v6  ;;  %1635 = vmatprep.subr.bf16.mxu0 %v12228_v7  ;;  %v12359_v6 = vcombine.low %v405_v57, %v409_v59  ;;  %v12166_v7 = vcombine.high %v523_v0, %v527_v2 }
 0x173   :  { %1664 = vmatprep.subr.bf16.mxu1 %v12284_v8  ;;  %1684 = vmatprep.mubr.bf16.mxu1 %v14188_v1  ;;  %v515_v8 = vld [vmem:[#allocation10 + $0x58] sm:$0xff] }
 0x175   :  { %1636 = vmatpush2.bf16.msra.mxu0 %v12227_v13  ;;  %v14326_v13 = vpack.c.bf16 %v14295_v40, %v14289_v34  ;;  %v12157_v34 = vcombine.low %v515_v8, %v519_v10  ;;  %v12343_v40 = vcombine.low %v389_v11, %v393_v12 }
 0x176   :  { %1665 = vmatpush1.bf16.msra.mxu1 %v12283_v14  ;;  %1637 = vmatprep.subr.bf16.mxu0 %v12220_v15  ;;  %v12165_v14 = vcombine.low %v523_v0, %v527_v2  ;;  %v12351_v15 = vcombine.low %v397_v3, %v401_v4  ;;  %v473_v0 = vld [vmem:[#allocation8 + $0x3e0] sm:$0xff] }
 0x177   :  { %1666 = vmatprep.subr.bf16.mxu1 %v12276_v16  ;;  %v12158_v16 = vcombine.high %v515_v8, %v519_v10  ;;  %v461_v8 = vld [vmem:[#allocation8 + $0x380] sm:$0xff] }
 0x179   :  { %1638 = vmatpush2.bf16.msra.mxu0 %v12219_v21  ;;  %v385_v21 = vld [vmem:[#allocation8 + $0x120] sm:$0xff] }
 0x17a   :  { %1667 = vmatpush1.bf16.msra.mxu1 %v12275_v22  ;;  %1639 = vmatprep.subr.bf16.mxu0 %v12212_v23  ;;  %v12336_v22 = vcombine.high %v381_v20, %v385_v21  ;;  %v627_v23 = vld [vmem:[#allocation10 + $0x3d8] sm:$0xff]  ;;  %v12335_v28 = vcombine.low %v381_v20, %v385_v21 }
 0x17b   :  { %1695 = vmatprep.subr.bf16.mxu1 %v12206_v24  ;;  %v631_v24 = vld [vmem:[#allocation10 + $0x3f8] sm:$0xff] }
 0x17c   :  { %v12269_v37 = vcombine.low %v627_v23, %v631_v24 }
 0x17d   :  { %12300 = vmatmul.mubr.msk.bf16.vlgmr.msra.gmra.mxu1 %vm1408_vm3, %v14297_v48  ;;  %1640 = vmatpush2.bf16.msra.mxu0 %v12211_v29  ;;  %v12270_v29 = vcombine.high %v627_v23, %v631_v24  ;;  %v449_v23 = vld [vmem:[#allocation8 + $0x320] sm:$0xff] }
 0x17e   :  { %1696 = vmatpush1.bf16.msra.mxu1 %v12205_v30  ;;  %1727 = vmatprep.mubr.bf16.mxu1 %v14303_v58  ;;  %v12182_v58 = vcombine.high %v539_v46, %v543_v47  ;;  %v12328_v30 = vcombine.high %v373_v25, %v377_v26  ;;  %v361_v46 = vld [vmem:[#allocation8 + $0x60] sm:$0xff] }
 0x17f   :  { %1697 = vmatprep.subr.bf16.mxu1 %v12198_v31  ;;  %12301 = vmatprep.subr.msk.bf16.mxu0 %vm1412_vm2, %v12294_v35  ;;  %v619_v31 = vld [vmem:[#allocation10 + $0x398] sm:$0xff]  ;;  %v369_v35 = vld [vmem:[#allocation8 + $0xa0] sm:$0xff] }
 0x180   :  { %1642 = vmatmul.mubr.bf16.vlgmr.msra.gmra.mxu0 %v14299_v56  ;;  %v12262_v41 = vcombine.high %v619_v31, %v623_v32  ;;  %v12261_v47 = vcombine.low %v619_v31, %v623_v32  ;;  %v12319_v49 = vcombine.low %v365_v33, %v369_v35  ;;  %v497_v31 = vld [vmem:[#allocation8 + $0x4a0] sm:$0x33] }
 0x181   :  { %1749 = vmatpush1.bf16.msra.mxu0 %v1432_v43  ;;  %1770 = vmatprep.mubr.bf16.mxu0 %v14188_v1  ;;  %v611_v43 = vld [vmem:[#allocation10 + $0x358] sm:$0xff] }
 0x182   :  { %1698 = vmatpush1.bf16.msra.mxu1 %v12197_v42  ;;  %1750 = vmatprep.subr.bf16.mxu0 %v12286_v45  ;;  %v12320_v42 = vcombine.high %v365_v33, %v369_v35  ;;  %v357_v45 = vld [vmem:[#allocation8 + $0x40] sm:$0xff] }
 0x183   :  { %1699 = vmatprep.subr.bf16.mxu1 %v12190_v44  ;;  %v615_v44 = vld [vmem:[#allocation10 + $0x378] sm:$0xff]  ;;  %v12311_v57 = vcombine.low %v357_v45, %v361_v46 }
 0x184   :  { %v12254_v50 = vcombine.high %v611_v43, %v615_v44  ;;  %v12253_v55 = vcombine.low %v611_v43, %v615_v44  ;;  %v485_v43 = vld [vmem:[#allocation8 + $0x440] sm:$0xff] }
 0x185   :  { %1751 = vmatpush1.bf16.msra.mxu0 %v12285_v52  ;;  %v603_v52 = vld [vmem:[#allocation10 + $0x318] sm:$0xff]  ;;  %v489_v44 = vld [vmem:[#allocation8 + $0x460] sm:$0xff] }
 0x186   :  { %1700 = vmatpush1.bf16.msra.mxu1 %v12189_v51  ;;  %1752 = vmatprep.subr.bf16.mxu0 %v12278_v53  ;;  %v12312_v51 = vcombine.high %v357_v45, %v361_v46  ;;  %v349_v53 = vld [vmem:[#allocation8] sm:$0xff] }
 0x187   :  { %1701 = vmatprep.subr.bf16.mxu1 %v12182_v58  ;;  %v607_v58 = vld [vmem:[#allocation10 + $0x338] sm:$0xff]  ;;  %v12303_v3 = vcombine.low %v349_v53, %v353_v54 }
 0x188   :  { %v12246_v59 = vcombine.high %v603_v52, %v607_v58  ;;  %v12245_v2 = vcombine.low %v603_v52, %v607_v58  ;;  %v477_v52 = vld [vmem:[#allocation8 + $0x400] sm:$0xff] }
 0x189   :  { %1753 = vmatpush1.bf16.msra.mxu0 %v12277_v61  ;;  %v595_v61 = vld [vmem:[#allocation10 + $0x2d8] sm:$0xff]  ;;  %v481_v58 = vld [vmem:[#allocation8 + $0x420] sm:$0xff] }
 0x18a   :  { %1702 = vmatpush1.bf16.msra.mxu1 %v12181_v60  ;;  %2560 = vmatprep.subr.bf16.mxu0 %v12360_v63  ;;  %v12304_v60 = vcombine.high %v349_v53, %v353_v54  ;;  %v469_v63 = vld [vmem:[#allocation8 + $0x3c0] sm:$0xff]  ;;  %v12439_v54 = vcombine.low %v485_v43, %v489_v44 }
 0x18b   :  { %1703 = vmatprep.subr.bf16.mxu1 %v12174_v62  ;;  %v599_v62 = vld [vmem:[#allocation10 + $0x2f8] sm:$0xff]  ;;  %v12423_v11 = vcombine.low %v469_v63, %v473_v0 }
 0x18c   :  { %12302 = vmatmul.mubr.msk.bf16.vlgmr.msra.gmra.mxu0 %vm1408_vm3, %v14297_v48  ;;  %v12150_v48 = vcombine.high %v507_v18, %v511_v19  ;;  %v12238_v4 = vcombine.high %v595_v61, %v599_v62  ;;  %v12237_v10 = vcombine.low %v595_v61, %v599_v62  ;;  %v457_v18 = vld [vmem:[#allocation8 + $0x360] sm:$0xff]  ;;  %v406_v61 = vld [vmem:[#allocation8 + $0x1c8] sm:$0xff] }
 0x18d   :  { %2561 = vmatpush1.bf16.msra.mxu0 %v12359_v6  ;;  %2592 = vmatprep.mubr.bf16.mxu0 %v14326_v13  ;;  %v587_v6 = vld [vmem:[#allocation10 + $0x298] sm:$0xff]  ;;  %v410_v62 = vld [vmem:[#allocation8 + $0x1e8] sm:$0xff] }
 0x18e   :  { %1704 = vmatpush1.bf16.msra.mxu1 %v12173_v5  ;;  %2562 = vmatprep.subr.bf16.mxu0 %v12352_v9  ;;  %v12424_v5 = vcombine.high %v469_v63, %v473_v0  ;;  %v465_v9 = vld [vmem:[#allocation8 + $0x3a0] sm:$0xff]  ;;  %v12431_v0 = vcombine.low %v477_v52, %v481_v58 }
 0x18f   :  { %1705 = vmatprep.subr.bf16.mxu1 %v12166_v7  ;;  %v591_v7 = vld [vmem:[#allocation10 + $0x2b8] sm:$0xff]  ;;  %v12415_v20 = vcombine.low %v461_v8, %v465_v9 }
 0x190   :  { %v12230_v12 = vcombine.high %v587_v6, %v591_v7  ;;  %v12229_v19 = vcombine.low %v587_v6, %v591_v7  ;;  %v498_v6 = vld [vmem:[#allocation8 + $0x4a8] sm:$0x33] }
 0x191   :  { %2563 = vmatpush1.bf16.msra.mxu0 %v12351_v15  ;;  %v579_v15 = vld [vmem:[#allocation10 + $0x258] sm:$0xff] }
 0x192   :  { %1706 = vmatpush1.bf16.msra.mxu1 %v12165_v14  ;;  %2564 = vmatprep.subr.bf16.mxu0 %v12344_v17  ;;  %v12416_v14 = vcombine.high %v461_v8, %v465_v9  ;;  %v453_v17 = vld [vmem:[#allocation8 + $0x340] sm:$0xff]  ;;  %v12361_v8 = vcombine.low %v406_v61, %v410_v62 }
 0x193   :  { %1707 = vmatprep.subr.bf16.mxu1 %v12158_v16  ;;  %v583_v16 = vld [vmem:[#allocation10 + $0x278] sm:$0xff]  ;;  %v12407_v25 = vcombine.low %v453_v17, %v457_v18 }
 0x194   :  { %v12222_v21 = vcombine.high %v579_v15, %v583_v16  ;;  %v12221_v24 = vcombine.low %v579_v15, %v583_v16  ;;  %v486_v15 = vld [vmem:[#allocation8 + $0x448] sm:$0xff] }
 0x195   :  { %2565 = vmatpush1.bf16.msra.mxu0 %v12343_v40  ;;  %v571_v40 = vld [vmem:[#allocation10 + $0x218] sm:$0xff]  ;;  %v490_v16 = vld [vmem:[#allocation8 + $0x468] sm:$0xff] }
 0x196   :  { %1708 = vmatpush1.bf16.msra.mxu1 %v12157_v34  ;;  %2566 = vmatprep.subr.bf16.mxu0 %v12336_v22  ;;  %v12408_v34 = vcombine.high %v453_v17, %v457_v18  ;;  %v445_v22 = vld [vmem:[#allocation8 + $0x300] sm:$0xff] }
 0x197   :  { %1709 = vmatprep.subr.bf16.mxu1 %v12150_v48  ;;  %v575_v48 = vld [vmem:[#allocation10 + $0x238] sm:$0xff]  ;;  %v12399_v33 = vcombine.low %v445_v22, %v449_v23 }
 0x198   :  { %v12214_v26 = vcombine.high %v571_v40, %v575_v48  ;;  %v12213_v32 = vcombine.low %v571_v40, %v575_v48  ;;  %v478_v40 = vld [vmem:[#allocation8 + $0x408] sm:$0xff] }
 0x199   :  { %2567 = vmatpush1.bf16.msra.mxu0 %v12335_v28  ;;  %v437_v28 = vld [vmem:[#allocation8 + $0x2c0] sm:$0xff]  ;;  %v482_v48 = vld [vmem:[#allocation8 + $0x428] sm:$0xff] }
 0x19a   :  { %1710 = vmatpush1.bf16.msra.mxu1 %v12149_v27  ;;  %2568 = vmatprep.subr.bf16.mxu0 %v12328_v30  ;;  %v12400_v27 = vcombine.high %v445_v22, %v449_v23  ;;  %v493_v30 = vld [vmem:[#allocation8 + $0x480] sm:$0xff]  ;;  %v12441_v23 = vcombine.low %v486_v15, %v490_v16 }
 0x19b   :  { %1711 = vmatprep.subr.bf16.mxu1 %v12270_v29  ;;  %v441_v29 = vld [vmem:[#allocation8 + $0x2e0] sm:$0xff] }
 0x19c   :  { %v12392_v35 = vcombine.high %v437_v28, %v441_v29  ;;  %v12391_v45 = vcombine.low %v437_v28, %v441_v29  ;;  %v407_v28 = vld [vmem:[#allocation8 + $0x1d0] sm:$0xff] }
 0x19d   :  { %2569 = vmatpush1.bf16.msra.mxu0 %v12327_v39  ;;  %v12447_v39 = vcombine.low %v493_v30, %v497_v31  ;;  %v411_v29 = vld [vmem:[#allocation8 + $0x1f0] sm:$0xff] }
 0x19e   :  { %1712 = vmatpush2.bf16.msra.mxu1 %v12269_v37  ;;  %2570 = vmatprep.subr.bf16.mxu0 %v12320_v42  ;;  %v12448_v37 = vcombine.high %v493_v30, %v497_v31  ;;  %v433_v42 = vld [vmem:[#allocation8 + $0x2a0] sm:$0xff]  ;;  %v12433_v31 = vcombine.low %v478_v40, %v482_v48 }
 0x19f   :  { %1713 = vmatprep.subr.bf16.mxu1 %v12262_v41  ;;  %v429_v41 = vld [vmem:[#allocation8 + $0x280] sm:$0xff]  ;;  %v2537_v46 = vsel %vm1412_vm2, %v12447_v39, 0  ;;  %v399_v39 = vld [vmem:[#allocation8 + $0x190] sm:$0xff] }
 0x1a0   :  { %v12383_v53 = vcombine.low %v429_v41, %v433_v42 }
 0x1a1   :  { %2571 = vmatpush1.bf16.msra.mxu0 %v12319_v49  ;;  %v12440_v49 = vcombine.high %v485_v43, %v489_v44  ;;  %v12363_v43 = vcombine.low %v407_v28, %v411_v29 }
 0x1a2   :  { %1714 = vmatpush2.bf16.msra.mxu1 %v12261_v47  ;;  %2572 = vmatprep.subr.bf16.mxu0 %v12312_v51  ;;  %v12384_v47 = vcombine.high %v429_v41, %v433_v42  ;;  %v425_v51 = vld [vmem:[#allocation8 + $0x260] sm:$0xff]  ;;  %v403_v41 = vld [vmem:[#allocation8 + $0x1b0] sm:$0xff] }
 0x1a3   :  { %1715 = vmatprep.subr.bf16.mxu1 %v12254_v50  ;;  %v421_v50 = vld [vmem:[#allocation8 + $0x240] sm:$0xff] }
 0x1a4   :  { %v12375_v63 = vcombine.low %v421_v50, %v425_v51 }
 0x1a5   :  { %2573 = vmatpush1.bf16.msra.mxu0 %v12311_v57  ;;  %v12432_v57 = vcombine.high %v477_v52, %v481_v58  ;;  %v12355_v52 = vcombine.low %v399_v39, %v403_v41 }
 0x1a6   :  { %1716 = vmatpush2.bf16.msra.mxu1 %v12253_v55  ;;  %2574 = vmatprep.subr.bf16.mxu0 %v12304_v60  ;;  %v12376_v55 = vcombine.high %v421_v50, %v425_v51  ;;  %v417_v60 = vld [vmem:[#allocation8 + $0x220] sm:$0xff]  ;;  %v395_v50 = vld [vmem:[#allocation8 + $0x170] sm:$0xff] }
 0x1a7   :  { %1717 = vmatprep.subr.bf16.mxu1 %v12246_v59  ;;  %v413_v59 = vld [vmem:[#allocation8 + $0x200] sm:$0xff] }
 0x1a8   :  { %v12367_v7 = vcombine.low %v413_v59, %v417_v60 }
 0x1a9   :  { %2575 = vmatpush1.bf16.msra.mxu0 %v12303_v3  ;;  %v398_v3 = vld [vmem:[#allocation8 + $0x188] sm:$0xff] }
 0x1aa   :  { %1718 = vmatpush2.bf16.msra.mxu1 %v12245_v2  ;;  %2576 = vmatprep.subr.bf16.mxu0 %v12424_v5  ;;  %v12362_v2 = vcombine.high %v406_v61, %v410_v62  ;;  %v494_v5 = vld [vmem:[#allocation8 + $0x488] sm:$0xff] }
 0x1ab   :  { %1719 = vmatprep.subr.bf16.mxu1 %v12238_v4  ;;  %v402_v4 = vld [vmem:[#allocation8 + $0x1a8] sm:$0xff] }
 0x1ac   :  { %v12354_v9 = vcombine.high %v398_v3, %v402_v4  ;;  %v12353_v17 = vcombine.low %v398_v3, %v402_v4  ;;  %v379_v3 = vld [vmem:[#allocation8 + $0xf0] sm:$0xff] }
 0x1ad   :  { %2577 = vmatpush2.bf16.msra.mxu0 %v12423_v11  ;;  %v390_v11 = vld [vmem:[#allocation8 + $0x148] sm:$0xff] }
 0x1ae   :  { %1720 = vmatpush2.bf16.msra.mxu1 %v12237_v10  ;;  %2578 = vmatprep.subr.bf16.mxu0 %v12416_v14  ;;  %v12449_v10 = vcombine.low %v494_v5, %v498_v6  ;;  %v394_v14 = vld [vmem:[#allocation8 + $0x168] sm:$0xff] }
 0x1af   :  { %1721 = vmatprep.subr.bf16.mxu1 %v12230_v12  ;;  %v12450_v12 = vcombine.high %v494_v5, %v498_v6  ;;  %v12345_v22 = vcombine.low %v390_v11, %v394_v14 }
 0x1b0   :  { %v2543_v18 = vsel %vm1412_vm2, %v12449_v10, 0  ;;  %v367_v10 = vld [vmem:[#allocation8 + $0x90] sm:$0xff] }
 0x1b1   :  { %2579 = vmatpush2.bf16.msra.mxu0 %v12415_v20  ;;  %v12442_v20 = vcombine.high %v486_v15, %v490_v16 }
 0x1b2   :  { %1722 = vmatpush2.bf16.msra.mxu1 %v12229_v19  ;;  %2580 = vmatprep.subr.bf16.mxu0 %v12408_v34  ;;  %v12346_v19 = vcombine.high %v390_v11, %v394_v14  ;;  %v386_v34 = vld [vmem:[#allocation8 + $0x128] sm:$0xff]  ;;  %v371_v11 = vld [vmem:[#allocation8 + $0xb0] sm:$0xff] }
 0x1b3   :  { %1723 = vmatprep.subr.bf16.mxu1 %v12222_v21  ;;  %v382_v21 = vld [vmem:[#allocation8 + $0x108] sm:$0xff]  ;;  %v12324_v16 = vcombine.high %v367_v10, %v371_v11 }
 0x1b4   :  { %v12337_v30 = vcombine.low %v382_v21, %v386_v34 }
 0x1b5   :  { %2581 = vmatpush2.bf16.msra.mxu0 %v12407_v25  ;;  %v12434_v25 = vcombine.high %v478_v40, %v482_v48 }
 0x1b6   :  { %1724 = vmatpush2.bf16.msra.mxu1 %v12221_v24  ;;  %2582 = vmatprep.subr.bf16.mxu0 %v12400_v27  ;;  %v12338_v24 = vcombine.high %v382_v21, %v386_v34  ;;  %v378_v27 = vld [vmem:[#allocation8 + $0xe8] sm:$0xff]  ;;  %v12323_v34 = vcombine.low %v367_v10, %v371_v11 }
 0x1b7   :  { %1725 = vmatprep.subr.bf16.mxu1 %v12214_v26  ;;  %v374_v26 = vld [vmem:[#allocation8 + $0xc8] sm:$0xff] }
 0x1b8   :  { %v12329_v42 = vcombine.low %v374_v26, %v378_v27 }
 0x1b9   :  { %2583 = vmatpush2.bf16.msra.mxu0 %v12399_v33  ;;  %v12364_v33 = vcombine.high %v407_v28, %v411_v29 }
 0x1ba   :  { %1726 = vmatpush2.bf16.msra.mxu1 %v12213_v32  ;;  %2584 = vmatprep.subr.bf16.mxu0 %v12392_v35  ;;  %v12330_v32 = vcombine.high %v374_v26, %v378_v27  ;;  %v366_v35 = vld [vmem:[#allocation8 + $0x88] sm:$0xff] }
 0x1bb   :  { %12455 = vmatprep.subr.msk.bf16.mxu1 %vm1412_vm2, %v12448_v37  ;;  %v370_v37 = vld [vmem:[#allocation8 + $0xa8] sm:$0xff] }
 0x1bc   :  { %v12322_v44 = vcombine.high %v366_v35, %v370_v37  ;;  %v12321_v51 = vcombine.low %v366_v35, %v370_v37 }
 0x1bd   :  { %1728 = vmatmul.mubr.bf16.vlgmr.msra.gmra.mxu1 %v14299_v56  ;;  %2585 = vmatpush2.bf16.msra.mxu0 %v12391_v45  ;;  %v12368_v56 = vcombine.high %v413_v59, %v417_v60  ;;  %v358_v45 = vld [vmem:[#allocation8 + $0x48] sm:$0xff]  ;;  %v387_v59 = vld [vmem:[#allocation8 + $0x130] sm:$0xff] }
 0x1be   :  { %2614 = vmatpush1.bf16.msra.mxu1 %v2537_v46  ;;  %2586 = vmatprep.subr.bf16.mxu0 %v12384_v47  ;;  %v12356_v46 = vcombine.high %v399_v39, %v403_v41  ;;  %v362_v47 = vld [vmem:[#allocation8 + $0x68] sm:$0xff] }
 0x1bf   :  { %2615 = vmatprep.subr.bf16.mxu1 %v12440_v49  ;;  %2635 = vmatprep.mubr.bf16.mxu1 %v14188_v1  ;;  %v391_v49 = vld [vmem:[#allocation8 + $0x150] sm:$0xff]  ;;  %v12314_v58 = vcombine.high %v358_v45, %v362_v47  ;;  %v12313_v60 = vcombine.low %v358_v45, %v362_v47 }
 0x1c0   :  { %v12347_v61 = vcombine.low %v391_v49, %v395_v50  ;;  %v467_v45 = vld [vmem:[#allocation8 + $0x3b0] sm:$0xff] }
 0x1c1   :  { %2587 = vmatpush2.bf16.msra.mxu0 %v12383_v53  ;;  %v12348_v53 = vcombine.high %v391_v49, %v395_v50 }
 0x1c2   :  { %2616 = vmatpush1.bf16.msra.mxu1 %v12439_v54  ;;  %2588 = vmatprep.subr.bf16.mxu0 %v12376_v55  ;;  %v350_v54 = vld [vmem:[#allocation8 + $0x8] sm:$0xff] }
 0x1c3   :  { %2617 = vmatprep.subr.bf16.mxu1 %v12432_v57  ;;  %v354_v55 = vld [vmem:[#allocation8 + $0x28] sm:$0xff]  ;;  %v383_v57 = vld [vmem:[#allocation8 + $0x110] sm:$0xff] }
 0x1c4   :  { %v12306_v62 = vcombine.high %v350_v54, %v354_v55  ;;  %v12305_v4 = vcombine.low %v350_v54, %v354_v55  ;;  %v12339_v5 = vcombine.low %v383_v57, %v387_v59 }
 0x1c5   :  { %2589 = vmatpush2.bf16.msra.mxu0 %v12375_v63  ;;  %v12340_v63 = vcombine.high %v383_v57, %v387_v59 }
 0x1c6   :  { %2618 = vmatpush1.bf16.msra.mxu1 %v12431_v0  ;;  %2590 = vmatprep.subr.bf16.mxu0 %v12368_v56  ;;  %v470_v0 = vld [vmem:[#allocation8 + $0x3c8] sm:$0xff] }
 0x1c7   :  { %2646 = vmatprep.subr.bf16.mxu1 %v12362_v2  ;;  %v474_v56 = vld [vmem:[#allocation8 + $0x3e8] sm:$0xff]  ;;  %v375_v2 = vld [vmem:[#allocation8 + $0xd0] sm:$0xff] }
 0x1c8   :  { %v12426_v6 = vcombine.high %v470_v0, %v474_v56  ;;  %v12331_v14 = vcombine.low %v375_v2, %v379_v3 }
 0x1c9   :  { %12456 = vmatmul.mubr.msk.bf16.vlgmr.msra.gmra.mxu1 %vm1408_vm3, %v14291_v36  ;;  %2591 = vmatpush2.bf16.msra.mxu0 %v12367_v7  ;;  %v12332_v7 = vcombine.high %v375_v2, %v379_v3 }
 0x1ca   :  { %2647 = vmatpush1.bf16.msra.mxu1 %v12361_v8  ;;  %2678 = vmatprep.mubr.bf16.mxu1 %v14326_v13  ;;  %v462_v8 = vld [vmem:[#allocation8 + $0x388] sm:$0xff] }
 0x1cb   :  { %2648 = vmatprep.subr.bf16.mxu1 %v12354_v9  ;;  %12457 = vmatprep.subr.msk.bf16.mxu0 %vm1412_vm2, %v12450_v12  ;;  %v466_v9 = vld [vmem:[#allocation8 + $0x3a8] sm:$0xff]  ;;  %v12425_v12 = vcombine.low %v470_v0, %v474_v56 }
 0x1cc   :  { %2593 = vmatmul.mubr.bf16.vlgmr.msra.gmra.mxu0 %v14293_v38  ;;  %v12418_v15 = vcombine.high %v462_v8, %v466_v9  ;;  %v12417_v21 = vcombine.low %v462_v8, %v466_v9 }
 0x1cd   :  { %2700 = vmatpush1.bf16.msra.mxu0 %v2543_v18  ;;  %2721 = vmatprep.mubr.bf16.mxu0 %v14188_v1  ;;  %v458_v18 = vld [vmem:[#allocation8 + $0x368] sm:$0xff] }
 0x1ce   :  { %2649 = vmatpush1.bf16.msra.mxu1 %v12353_v17  ;;  %2701 = vmatprep.subr.bf16.mxu0 %v12442_v20  ;;  %v454_v17 = vld [vmem:[#allocation8 + $0x348] sm:$0xff]  ;;  %v363_v20 = vld [vmem:[#allocation8 + $0x70] sm:$0xff] }
 0x1cf   :  { %2650 = vmatprep.subr.bf16.mxu1 %v12346_v19  ;;  %v359_v19 = vld [vmem:[#allocation8 + $0x50] sm:$0xff]  ;;  %v12410_v40 = vcombine.high %v454_v17, %v458_v18  ;;  %v12409_v26 = vcombine.low %v454_v17, %v458_v18 }
 0x1d0   :  { %v12316_v48 = vcombine.high %v359_v19, %v363_v20  ;;  %v12315_v27 = vcombine.low %v359_v19, %v363_v20  ;;  %v491_v17 = vld [vmem:[#allocation8 + $0x470] sm:$0xff] }
 0x1d1   :  { %2702 = vmatpush1.bf16.msra.mxu0 %v12441_v23  ;;  %v450_v23 = vld [vmem:[#allocation8 + $0x328] sm:$0xff] }
 0x1d2   :  { %2651 = vmatpush1.bf16.msra.mxu1 %v12345_v22  ;;  %2703 = vmatprep.subr.bf16.mxu0 %v12434_v25  ;;  %v446_v22 = vld [vmem:[#allocation8 + $0x308] sm:$0xff]  ;;  %v355_v25 = vld [vmem:[#allocation8 + $0x30] sm:$0xff] }
 0x1d3   :  { %2652 = vmatprep.subr.bf16.mxu1 %v12338_v24  ;;  %v351_v24 = vld [vmem:[#allocation8 + $0x10] sm:$0xff]  ;;  %v12402_v28 = vcombine.high %v446_v22, %v450_v23  ;;  %v12401_v35 = vcombine.low %v446_v22, %v450_v23 }
 0x1d4   :  { %v12308_v29 = vcombine.high %v351_v24, %v355_v25  ;;  %v12307_v37 = vcombine.low %v351_v24, %v355_v25  ;;  %v483_v22 = vld [vmem:[#allocation8 + $0x430] sm:$0xff] }
 0x1d5   :  { %2704 = vmatpush1.bf16.msra.mxu0 %v12433_v31  ;;  %v442_v31 = vld [vmem:[#allocation8 + $0x2e8] sm:$0xff] }
 0x1d6   :  { %2653 = vmatpush1.bf16.msra.mxu1 %v12337_v30  ;;  %2732 = vmatprep.subr.bf16.mxu0 %v12364_v33  ;;  %v438_v30 = vld [vmem:[#allocation8 + $0x2c8] sm:$0xff]  ;;  %v475_v33 = vld [vmem:[#allocation8 + $0x3f0] sm:$0xff] }
 0x1d7   :  { %2654 = vmatprep.subr.bf16.mxu1 %v12330_v32  ;;  %v471_v32 = vld [vmem:[#allocation8 + $0x3d0] sm:$0xff]  ;;  %v12394_v39 = vcombine.high %v438_v30, %v442_v31 }
 0x1d8   :  { %12458 = vmatmul.mubr.msk.bf16.vlgmr.msra.gmra.mxu0 %vm1408_vm3, %v14291_v36  ;;  %v12428_v41 = vcombine.high %v471_v32, %v475_v33  ;;  %v12427_v47 = vcombine.low %v471_v32, %v475_v33 }
 0x1d9   :  { %2733 = vmatpush1.bf16.msra.mxu0 %v12363_v43  ;;  %2764 = vmatprep.mubr.bf16.mxu0 %v14326_v13  ;;  %v434_v43 = vld [vmem:[#allocation8 + $0x2a8] sm:$0xff] }
 0x1da   :  { %2655 = vmatpush1.bf16.msra.mxu1 %v12329_v42  ;;  %2734 = vmatprep.subr.bf16.mxu0 %v12356_v46  ;;  %v430_v42 = vld [vmem:[#allocation8 + $0x288] sm:$0xff]  ;;  %v12393_v46 = vcombine.low %v438_v30, %v442_v31  ;;  %v412_v30 = vld [vmem:[#allocation8 + $0x1f8] sm:$0xff] }
 0x1db   :  { %2656 = vmatprep.subr.bf16.mxu1 %v12322_v44  ;;  %v463_v44 = vld [vmem:[#allocation8 + $0x390] sm:$0xff]  ;;  %v12386_v49 = vcombine.high %v430_v42, %v434_v43  ;;  %v12385_v54 = vcombine.low %v430_v42, %v434_v43  ;;  %v500_v42 = vld [vmem:[#allocation8 + $0x4b8] sm:$0x33] }
 0x1dc   :  { %v12420_v50 = vcombine.high %v463_v44, %v467_v45  ;;  %v12419_v55 = vcombine.low %v463_v44, %v467_v45 }
 0x1dd   :  { %2735 = vmatpush1.bf16.msra.mxu0 %v12355_v52  ;;  %v426_v52 = vld [vmem:[#allocation8 + $0x268] sm:$0xff] }
 0x1de   :  { %2657 = vmatpush1.bf16.msra.mxu1 %v12321_v51  ;;  %2736 = vmatprep.subr.bf16.mxu0 %v12348_v53  ;;  %v422_v51 = vld [vmem:[#allocation8 + $0x248] sm:$0xff]  ;;  %v459_v53 = vld [vmem:[#allocation8 + $0x370] sm:$0xff] }
 0x1df   :  { %2658 = vmatprep.subr.bf16.mxu1 %v12314_v58  ;;  %v455_v58 = vld [vmem:[#allocation8 + $0x350] sm:$0xff]  ;;  %v12378_v57 = vcombine.high %v422_v51, %v426_v52  ;;  %v12377_v0 = vcombine.low %v422_v51, %v426_v52  ;;  %v488_v51 = vld [vmem:[#allocation8 + $0x458] sm:$0xff] }
 0x1e0   :  { %v12412_v59 = vcombine.high %v455_v58, %v459_v53  ;;  %v12411_v56 = vcombine.low %v455_v58, %v459_v53  ;;  %v492_v52 = vld [vmem:[#allocation8 + $0x478] sm:$0xff] }
 0x1e1   :  { %2737 = vmatpush1.bf16.msra.mxu0 %v12347_v61  ;;  %v418_v61 = vld [vmem:[#allocation8 + $0x228] sm:$0xff] }
 0x1e2   :  { %2659 = vmatpush1.bf16.msra.mxu1 %v12313_v60  ;;  %2738 = vmatprep.subr.bf16.mxu0 %v12340_v63  ;;  %v414_v60 = vld [vmem:[#allocation8 + $0x208] sm:$0xff]  ;;  %v451_v63 = vld [vmem:[#allocation8 + $0x330] sm:$0xff] }
 0x1e3   :  { %2660 = vmatprep.subr.bf16.mxu1 %v12306_v62  ;;  %v447_v62 = vld [vmem:[#allocation8 + $0x310] sm:$0xff]  ;;  %v12370_v2 = vcombine.high %v414_v60, %v418_v61  ;;  %v12369_v8 = vcombine.low %v414_v60, %v418_v61  ;;  %v480_v60 = vld [vmem:[#allocation8 + $0x418] sm:$0xff] }
 0x1e4   :  { %v12404_v3 = vcombine.high %v447_v62, %v451_v63  ;;  %v12403_v9 = vcombine.low %v447_v62, %v451_v63  ;;  %v484_v61 = vld [vmem:[#allocation8 + $0x438] sm:$0xff]  ;;  %v12445_v63 = vcombine.low %v488_v51, %v492_v52 }
 0x1e5   :  { %2739 = vmatpush1.bf16.msra.mxu0 %v12339_v5  ;;  %v443_v5 = vld [vmem:[#allocation8 + $0x2f0] sm:$0xff] }
 0x1e6   :  { %2661 = vmatpush1.bf16.msra.mxu1 %v12305_v4  ;;  %2740 = vmatprep.subr.bf16.mxu0 %v12332_v7  ;;  %v439_v4 = vld [vmem:[#allocation8 + $0x2d0] sm:$0xff] }
 0x1e7   :  { %2662 = vmatprep.subr.bf16.mxu1 %v12426_v6  ;;  %v495_v6 = vld [vmem:[#allocation8 + $0x490] sm:$0xff]  ;;  %v12396_v10 = vcombine.high %v439_v4, %v443_v5  ;;  %v12395_v18 = vcombine.low %v439_v4, %v443_v5  ;;  %v12437_v4 = vcombine.low %v480_v60, %v484_v61 }
 0x1e8   :  { %v499_v7 = vld [vmem:[#allocation8 + $0x4b0] sm:$0x33] }
 0x1e9   :  { %2741 = vmatpush1.bf16.msra.mxu0 %v12331_v14  ;;  %v12452_v11 = vcombine.high %v495_v6, %v499_v7  ;;  %v431_v14 = vld [vmem:[#allocation8 + $0x290] sm:$0xff] }
 0x1ea   :  { %2663 = vmatpush2.bf16.msra.mxu1 %v12425_v12  ;;  %2742 = vmatprep.subr.bf16.mxu0 %v12324_v16  ;;  %v12451_v12 = vcombine.low %v495_v6, %v499_v7  ;;  %v487_v16 = vld [vmem:[#allocation8 + $0x450] sm:$0xff]  ;;  %v368_v7 = vld [vmem:[#allocation8 + $0x98] sm:$0xff] }
 0x1eb   :  { %2664 = vmatprep.subr.bf16.mxu1 %v12418_v15  ;;  %v435_v15 = vld [vmem:[#allocation8 + $0x2b0] sm:$0xff]  ;;  %v12443_v24 = vcombine.low %v487_v16, %v491_v17 }
 0x1ec   :  { %v2549_v19 = vsel %vm1412_vm2, %v12451_v12, 0  ;;  %v12388_v20 = vcombine.high %v431_v14, %v435_v15  ;;  %v12387_v23 = vcombine.low %v431_v14, %v435_v15  ;;  %v360_v14 = vld [vmem:[#allocation8 + $0x58] sm:$0xff] }
 0x1ed   :  { %2743 = vmatpush1.bf16.msra.mxu0 %v12323_v34  ;;  %v423_v34 = vld [vmem:[#allocation8 + $0x250] sm:$0xff]  ;;  %v364_v15 = vld [vmem:[#allocation8 + $0x78] sm:$0xff] }
 0x1ee   :  { %2665 = vmatpush2.bf16.msra.mxu1 %v12417_v21  ;;  %2744 = vmatprep.subr.bf16.mxu0 %v12316_v48  ;;  %v12444_v21 = vcombine.high %v487_v16, %v491_v17  ;;  %v479_v48 = vld [vmem:[#allocation8 + $0x410] sm:$0xff] }
 0x1ef   :  { %2666 = vmatprep.subr.bf16.mxu1 %v12410_v40  ;;  %v427_v40 = vld [vmem:[#allocation8 + $0x270] sm:$0xff]  ;;  %v12435_v32 = vcombine.low %v479_v48, %v483_v22 }
 0x1f0   :  { %v12380_v25 = vcombine.high %v423_v34, %v427_v40  ;;  %v12379_v31 = vcombine.low %v423_v34, %v427_v40  ;;  %v12317_v34 = vcombine.low %v360_v14, %v364_v15 }
 0x1f1   :  { %2745 = vmatpush1.bf16.msra.mxu0 %v12315_v27  ;;  %v415_v27 = vld [vmem:[#allocation8 + $0x210] sm:$0xff] }
 0x1f2   :  { %2667 = vmatpush2.bf16.msra.mxu1 %v12409_v26  ;;  %2746 = vmatprep.subr.bf16.mxu0 %v12308_v29  ;;  %v12436_v26 = vcombine.high %v479_v48, %v483_v22  ;;  %v408_v29 = vld [vmem:[#allocation8 + $0x1d8] sm:$0xff] }
 0x1f3   :  { %2668 = vmatprep.subr.bf16.mxu1 %v12402_v28  ;;  %v419_v28 = vld [vmem:[#allocation8 + $0x230] sm:$0xff]  ;;  %v12365_v44 = vcombine.low %v408_v29, %v412_v30  ;;  %v472_v22 = vld [vmem:[#allocation8 + $0x3d8] sm:$0xff] }
 0x1f4   :  { %v12372_v33 = vcombine.high %v415_v27, %v419_v28  ;;  %v12371_v43 = vcombine.low %v415_v27, %v419_v28  ;;  %v14356_v5 = vpop.f32.mrf.mxu0  ;;  %v464_v28 = vld [vmem:[#allocation8 + $0x398] sm:$0xff] }
 0x1f5   :  { %2747 = vmatpush1.bf16.msra.mxu0 %v12307_v37  ;;  %v400_v37 = vld [vmem:[#allocation8 + $0x198] sm:$0xff] }
 0x1f6   :  { %2669 = vmatpush2.bf16.msra.mxu1 %v12401_v35  ;;  %2748 = vmatprep.subr.bf16.mxu0 %v12428_v41  ;;  %v12366_v35 = vcombine.high %v408_v29, %v412_v30  ;;  %v496_v41 = vld [vmem:[#allocation8 + $0x498] sm:$0xff] }
 0x1f7   :  { %2670 = vmatprep.subr.bf16.mxu1 %v12394_v39  ;;  %v404_v39 = vld [vmem:[#allocation8 + $0x1b8] sm:$0xff] }
 0x1f8   :  { %v12358_v45 = vcombine.high %v400_v37, %v404_v39  ;;  %v12357_v58 = vcombine.low %v400_v37, %v404_v39  ;;  %v468_v29 = vld [vmem:[#allocation8 + $0x3b8] sm:$0xff] }
 0x1f9   :  { %2749 = vmatpush2.bf16.msra.mxu0 %v12427_v47  ;;  %v392_v47 = vld [vmem:[#allocation8 + $0x158] sm:$0xff]  ;;  %v12422_v37 = vcombine.high %v464_v28, %v468_v29 }
 0x1fa   :  { %2671 = vmatpush2.bf16.msra.mxu1 %v12393_v46  ;;  %2750 = vmatprep.subr.bf16.mxu0 %v12420_v50  ;;  %v12453_v46 = vcombine.low %v496_v41, %v500_v42  ;;  %v396_v50 = vld [vmem:[#allocation8 + $0x178] sm:$0xff] }
 0x1fb   :  { %2672 = vmatprep.subr.bf16.mxu1 %v12386_v49  ;;  %v12454_v49 = vcombine.high %v496_v41, %v500_v42  ;;  %v12349_v62 = vcombine.low %v392_v47, %v396_v50  ;;  %v456_v41 = vld [vmem:[#allocation8 + $0x358] sm:$0xff] }
 0x1fc   :  { %v2555_v53 = vsel %vm1412_vm2, %v12453_v46, 0  ;;  %v460_v42 = vld [vmem:[#allocation8 + $0x378] sm:$0xff]  ;;  %v12421_v46 = vcombine.low %v464_v28, %v468_v29 }
 0x1fd   :  { %2751 = vmatpush2.bf16.msra.mxu0 %v12419_v55  ;;  %v12446_v55 = vcombine.high %v488_v51, %v492_v52  ;;  %v12413_v51 = vcombine.low %v456_v41, %v460_v42 }
 0x1fe   :  { %2673 = vmatpush2.bf16.msra.mxu1 %v12385_v54  ;;  %2752 = vmatprep.subr.bf16.mxu0 %v12412_v59  ;;  %v12350_v54 = vcombine.high %v392_v47, %v396_v50  ;;  %v388_v59 = vld [vmem:[#allocation8 + $0x138] sm:$0xff]  ;;  %v12414_v47 = vcombine.high %v456_v41, %v460_v42 }
 0x1ff   :  { %2674 = vmatprep.subr.bf16.mxu1 %v12378_v57  ;;  %v384_v57 = vld [vmem:[#allocation8 + $0x118] sm:$0xff] }
 0x200   :  { %v452_v50 = vld [vmem:[#allocation8 + $0x338] sm:$0xff] }
 0x201   :  { %2753 = vmatpush2.bf16.msra.mxu0 %v12411_v56  ;;  %v376_v56 = vld [vmem:[#allocation8 + $0xd8] sm:$0xff] }
 0x202   :  { %2675 = vmatpush2.bf16.msra.mxu1 %v12377_v0  ;;  %2754 = vmatprep.subr.bf16.mxu0 %v12404_v3  ;;  %v12438_v0 = vcombine.high %v480_v60, %v484_v61  ;;  %v12341_v3 = vcombine.low %v384_v57, %v388_v59 }
 0x203   :  { %2676 = vmatprep.subr.bf16.mxu1 %v12370_v2  ;;  %v380_v2 = vld [vmem:[#allocation8 + $0xf8] sm:$0xff] }
 0x204   :  { %v12334_v6 = vcombine.high %v376_v56, %v380_v2 }
 0x205   :  { %2755 = vmatpush2.bf16.msra.mxu0 %v12403_v9  ;;  %v12333_v9 = vcombine.low %v376_v56, %v380_v2 }
 0x206   :  { %2677 = vmatpush2.bf16.msra.mxu1 %v12369_v8  ;;  %2756 = vmatprep.subr.bf16.mxu0 %v12396_v10  ;;  %v372_v8 = vld [vmem:[#allocation8 + $0xb8] sm:$0xff]  ;;  %v14358_v10 = vpop.f32.mrf.mxu1 }
 0x207   :  { %12459 = vmatprep.subr.msk.bf16.mxu1 %vm1412_vm2, %v12452_v11  ;;  %v14360_v11 = vpop.f32.mrf.mxu0  ;;  %v12326_v12 = vcombine.high %v368_v7, %v372_v8  ;;  %v12325_v16 = vcombine.low %v368_v7, %v372_v8  ;;  %v424_v7 = vld [vmem:[#allocation8 + $0x258] sm:$0xff] }
 0x208   :  { %v14365_v17 = vpop.f32.mrf.mxu1  ;;  %v428_v8 = vld [vmem:[#allocation8 + $0x278] sm:$0xff] }
 0x209   :  { %2679 = vmatmul.mubr.bf16.vlgmr.msra.gmra.mxu1 %v14293_v38  ;;  %2757 = vmatpush2.bf16.msra.mxu0 %v12395_v18  ;;  %v14367_v18 = vpop.f32.mrf.mxu0 }
 0x20a   :  { %2786 = vmatpush1.bf16.msra.mxu1 %v2549_v19  ;;  %2758 = vmatprep.subr.bf16.mxu0 %v12388_v20  ;;  %v12318_v19 = vcombine.high %v360_v14, %v364_v15  ;;  %v352_v20 = vld [vmem:[#allocation8 + $0x18] sm:$0xff]  ;;  %v14369_v40 = vpop.f32.mrf.mxu1 }
 0x20b   :  { %2787 = vmatprep.subr.bf16.mxu1 %v12444_v21  ;;  %2807 = vmatprep.mubr.bf16.mxu1 %v14188_v1  ;;  %v356_v21 = vld [vmem:[#allocation8 + $0x38] sm:$0xff]  ;;  %v14371_v48 = vpop.f32.mrf.mxu0 }
 0x20d   :  { %2759 = vmatpush2.bf16.msra.mxu0 %v12387_v23  ;;  %v476_v23 = vld [vmem:[#allocation8 + $0x3f8] sm:$0xff] }
 0x20e   :  { %2788 = vmatpush1.bf16.msra.mxu1 %v12443_v24  ;;  %2760 = vmatprep.subr.bf16.mxu0 %v12380_v25  ;;  %v1600_v24 = vpop.f32.mrf.mxu0  ;;  %v12309_v25 = vcombine.low %v352_v20, %v356_v21  ;;  %v12430_v27 = vcombine.high %v472_v22, %v476_v23 }
 0x20f   :  { %2789 = vmatprep.subr.bf16.mxu1 %v12436_v26  ;;  %v14373_v26 = vpop.f32.mrf.mxu1 }
 0x210   :  { %v1602_v30 = vpop.f32.mrf.mxu0 }
 0x211   :  { %2761 = vmatpush2.bf16.msra.mxu0 %v12379_v31 }
 0x212   :  { %2790 = vmatpush1.bf16.msra.mxu1 %v12435_v32  ;;  %2762 = vmatprep.subr.bf16.mxu0 %v12372_v33  ;;  %v12429_v33 = vcombine.low %v472_v22, %v476_v23 }
 0x213   :  { %2818 = vmatprep.subr.bf16.mxu1 %v12366_v35 }
 0x215   :  { %12460 = vmatmul.mubr.msk.bf16.vlgmr.msra.gmra.mxu1 %vm1408_vm3, %v14291_v36  ;;  %2763 = vmatpush2.bf16.msra.mxu0 %v12371_v43  ;;  %v1604_v43 = vpop.f32.mrf.mxu0 }
 0x216   :  { %2819 = vmatpush1.bf16.msra.mxu1 %v12365_v44  ;;  %2850 = vmatprep.mubr.bf16.mxu1 %v14326_v13  ;;  %v12342_v13 = vcombine.high %v384_v57, %v388_v59 }
 0x217   :  { %2820 = vmatprep.subr.bf16.mxu1 %v12358_v45  ;;  %12461 = vmatprep.subr.msk.bf16.mxu0 %vm1412_vm2, %v12454_v49  ;;  %v448_v49 = vld [vmem:[#allocation8 + $0x318] sm:$0xff]  ;;  %v14383_v59 = vpop.f32.mrf.mxu0 }
 0x218   :  { %2765 = vmatmul.mubr.bf16.vlgmr.msra.gmra.mxu0 %v14293_v38  ;;  %v12405_v57 = vcombine.low %v448_v49, %v452_v50 }
 0x219   :  { %2872 = vmatpush1.bf16.msra.mxu0 %v2555_v53  ;;  %2893 = vmatprep.mubr.bf16.mxu0 %v14188_v1  ;;  %v440_v53 = vld [vmem:[#allocation8 + $0x2d8] sm:$0xff] }
 0x21a   :  { %2821 = vmatpush1.bf16.msra.mxu1 %v12357_v58  ;;  %2873 = vmatprep.subr.bf16.mxu0 %v12446_v55  ;;  %v12406_v58 = vcombine.high %v448_v49, %v452_v50  ;;  %v1519_v50 = vadd.f32 %v14369_v40, %v14367_v18 }
 0x21b   :  { %2822 = vmatprep.subr.bf16.mxu1 %v12350_v54  ;;  %v444_v54 = vld [vmem:[#allocation8 + $0x2f8] sm:$0xff] }
 0x21c   :  { %v12398_v61 = vcombine.high %v440_v53, %v444_v54  ;;  %v12397_v56 = vcombine.low %v440_v53, %v444_v54 }
 0x21d   :  { %2874 = vmatpush1.bf16.msra.mxu0 %v12445_v63  ;;  %v436_v63 = vld [vmem:[#allocation8 + $0x2b8] sm:$0xff] }
 0x21e   :  { %2823 = vmatpush1.bf16.msra.mxu1 %v12349_v62  ;;  %2875 = vmatprep.subr.bf16.mxu0 %v12438_v0  ;;  %v432_v62 = vld [vmem:[#allocation8 + $0x298] sm:$0xff] }
 0x21f   :  { %2824 = vmatprep.subr.bf16.mxu1 %v12342_v13  ;;  %v12389_v14 = vcombine.low %v432_v62, %v436_v63 }
 0x221   :  { %2876 = vmatpush1.bf16.msra.mxu0 %v12437_v4  ;;  %v12390_v4 = vcombine.high %v432_v62, %v436_v63 }
 0x222   :  { %2825 = vmatpush1.bf16.msra.mxu1 %v12341_v3 }
 0x223   :  { %2826 = vmatprep.subr.bf16.mxu1 %v12334_v6 }
 0x224   :  { %12462 = vmatmul.mubr.msk.bf16.vlgmr.msra.gmra.mxu0 %vm1408_vm3, %v14291_v36  ;;  %v12310_v36 = vcombine.high %v352_v20, %v356_v21  ;;  %v416_v21 = vld [vmem:[#allocation8 + $0x218] sm:$0xff] }
 0x225   :  { %2960 = vmatprep.mubr.bf16.mxu0 %v14188_v1 }
 0x226   :  { %2827 = vmatpush1.bf16.msra.mxu1 %v12333_v9 }
 0x227   :  { %2828 = vmatprep.subr.bf16.mxu1 %v12326_v12 }
 0x22a   :  { %2829 = vmatpush1.bf16.msra.mxu1 %v12325_v16 }
 0x22b   :  { %2830 = vmatprep.subr.bf16.mxu1 %v12318_v19  ;;  %v12382_v19 = vcombine.high %v424_v7, %v428_v8 }
 0x22e   :  { %2831 = vmatpush1.bf16.msra.mxu1 %v12317_v34  ;;  %v420_v34 = vld [vmem:[#allocation8 + $0x238] sm:$0xff] }
 0x22f   :  { %2832 = vmatprep.subr.bf16.mxu1 %v12310_v36  ;;  %v12381_v36 = vcombine.low %v424_v7, %v428_v8  ;;  %v12374_v22 = vcombine.high %v416_v21, %v420_v34  ;;  %v12373_v23 = vcombine.low %v416_v21, %v420_v34 }
 0x231   :  { %v1557_v31 = vpop.f32.mrf.mxu1 }
 0x232   :  { %v14375_v32 = vadd.f32 %v1600_v24, %v1557_v31  ;;  %2833 = vmatpush1.bf16.msra.mxu1 %v12309_v25 }
 0x233   :  { %v1559_v35 = vpop.f32.mrf.mxu1  ;;  %2834 = vmatprep.subr.bf16.mxu1 %v12430_v27 }
 0x234   :  { %v14377_v39 = vadd.f32 %v1602_v30, %v1559_v35 }
 0x235   :  { %v1561_v44 = vpop.f32.mrf.mxu1 }
 0x236   :  { %v14379_v45 = vadd.f32 %v1604_v43, %v1561_v44  ;;  %2835 = vmatpush2.bf16.msra.mxu1 %v12429_v33 }
 0x237   :  { %2836 = vmatprep.subr.bf16.mxu1 %v12422_v37  ;;  %v14381_v52 = vpop.f32.mrf.mxu1 }
 0x23a   :  { %2837 = vmatpush2.bf16.msra.mxu1 %v12421_v46  ;;  %v1517_v46 = vadd.f32 %v14365_v17, %v14360_v11 }
 0x23b   :  { %2838 = vmatprep.subr.bf16.mxu1 %v12414_v47  ;;  %v1515_v47 = vadd.f32 %v14358_v10, %v14356_v5 }
 0x23d   :  { %v1686_v55 = vpop.f32.mrf.mxu1 }
 0x23e   :  { %2839 = vmatpush2.bf16.msra.mxu1 %v12413_v51 }
 0x23f   :  { %v1688_v60 = vpop.f32.mrf.mxu1  ;;  %2840 = vmatprep.subr.bf16.mxu1 %v12406_v58 }
 0x240   :  { %v1643_v13 = vpop.f32.mrf.mxu0 }
 0x241   :  { %v14385_v0 = vadd.f32 %v1686_v55, %v1643_v13  ;;  %v1690_v2 = vpop.f32.mrf.mxu1  ;;  %v1521_v55 = vadd.f32 %v14373_v26, %v14371_v48 }
 0x242   :  { %2841 = vmatpush2.bf16.msra.mxu1 %v12405_v57  ;;  %v1645_v3 = vpop.f32.mrf.mxu0 }
 0x243   :  { %2842 = vmatprep.subr.bf16.mxu1 %v12398_v61  ;;  %v14387_v6 = vadd.f32 %v1688_v60, %v1645_v3  ;;  %v1692_v15 = vpop.f32.mrf.mxu1  ;;  %v14411_v3 = vld [vmem:[#allocation2] sm:$0xff]  }
 0x244   :  { %v1647_v9 = vpop.f32.mrf.mxu0 }
 0x245   :  { %v14389_v12 = vadd.f32 %v1690_v2, %v1647_v9 }
 0x246   :  { %2843 = vmatpush2.bf16.msra.mxu1 %v12397_v56  ;;  %v1649_v16 = vpop.f32.mrf.mxu0 }
 0x247   :  { %2844 = vmatprep.subr.bf16.mxu1 %v12390_v4  ;;  %v14391_v20 = vadd.f32 %v1692_v15, %v1649_v16  ;;  %v1607_v16 = vadd.f32 %v14383_v59, %v14381_v52 }
 0x24a   :  { %2845 = vmatpush2.bf16.msra.mxu1 %v12389_v14 }
 0x24b   :  { %2846 = vmatprep.subr.bf16.mxu1 %v12382_v19 }
 0x24c   :  { %v1772_v24 = vpop.f32.mrf.mxu0 }
 0x24e   :  { %2847 = vmatpush2.bf16.msra.mxu1 %v12381_v36  ;;  %v1774_v25 = vpop.f32.mrf.mxu0 }
 0x24f   :  { %2848 = vmatprep.subr.bf16.mxu1 %v12374_v22 }
 0x250   :  { %v1776_v29 = vpop.f32.mrf.mxu0 }
 0x252   :  { %2849 = vmatpush2.bf16.msra.mxu1 %v12373_v23  ;;  %v1778_v37 = vpop.f32.mrf.mxu0 }
 0x255   :  { %2851 = vmatmul.mubr.bf16.vlgmr.msra.gmra.mxu1 %v14293_v38 }
 0x256   :  { %3003 = vmatprep.mubr.bf16.mxu1 %v14188_v1 }
 0x27d   :  { %v1729_v27 = vpop.f32.mrf.mxu1 }
 0x27e   :  { %v14395_v28 = vadd.f32 %v1772_v24, %v1729_v27 }
 0x27f   :  { %v1731_v30 = vpop.f32.mrf.mxu1 }
 0x280   :  { %v14397_v31 = vadd.f32 %v1774_v25, %v1731_v30 }
 0x281   :  { %v1733_v33 = vpop.f32.mrf.mxu1 }
 0x282   :  { %v14399_v35 = vadd.f32 %v1776_v29, %v1733_v33 }
 0x283   :  { %v1735_v41 = vpop.f32.mrf.mxu1 }
 0x284   :  { %v14401_v42 = vadd.f32 %v1778_v37, %v1735_v41 }
 0x289   :  { %v2637_v43 = vpop.f32.mrf.mxu1 }
 0x28b   :  { %v2639_v38 = vpop.f32.mrf.mxu1 }
 0x28c   :  { %v2594_v44 = vpop.f32.mrf.mxu0 }
 0x28d   :  { %v2595_v58 = vadd.f32 %v2594_v44, %v1515_v47  ;;  %v2641_v53 = vpop.f32.mrf.mxu1 }
 0x28e   :  { %v2596_v49 = vpop.f32.mrf.mxu0 }
 0x28f   :  { %v2597_v51 = vadd.f32 %v2596_v49, %v1517_v46  ;;  %v2638_v11 = vadd.f32 %v2637_v43, %v2595_v58  ;;  %v2643_v17 = vpop.f32.mrf.mxu1 }
 0x290   :  { %v2598_v54 = vpop.f32.mrf.mxu0 }
 0x291   :  { %v2599_v57 = vadd.f32 %v2598_v54, %v1519_v50  ;;  %v2640_v61 = vadd.f32 %v2639_v38, %v2597_v51  ;;  %v2904_v2 = vmax.f32 %v2638_v11, 0.0 }
 0x292   :  { %v2600_v60 = vpop.f32.mrf.mxu0 }
 0x293   :  { %v2642_v62 = vadd.f32 %v2641_v53, %v2599_v57  ;;  %v2601_v63 = vadd.f32 %v2600_v60, %v1521_v55  ;;  %v2905_v10 = vmax.f32 %v2640_v61, 0.0  ;;  %v3228_v57 = vld [vmem:[#allocation11 + $0x3c0] sm:$0xff] }
 0x295   :  { %v2644_v13 = vadd.f32 %v2643_v17, %v2601_v63  ;;  %v2912_v5 = vmax.f32 %v2642_v62, 0.0  ;;  %v3212_v17 = vld [vmem:[#allocation11 + $0x340] sm:$0xff] }
 0x297   :  { %v2913_v56 = vmax.f32 %v2644_v13, 0.0  ;;  %v2920_v40 = vpack.c.bf16 %v2912_v5, %v2904_v2  ;;  %v14428_v13 = vld [vmem:[#allocation11 + $0x1380] sm:$0xff] }
 0x298   :  { %v2723_v48 = vpop.f32.mrf.mxu0  ;;  %v14430_v5 = vld [vmem:[#allocation11 + $0x13c0] sm:$0xff] }
 0x299   :  { %v2921_v18 = vpack.c.bf16 %v2913_v56, %v2905_v10  ;;  %v13091_v10 = vcombine.low %v14428_v13, %v14430_v5  ;;  %v3188_v56 = vld [vmem:[#allocation11 + $0x280] sm:$0xff] }
 0x29a   :  { %v2725_v26 = vpop.f32.mrf.mxu0  ;;  %v3196_v2 = vld [vmem:[#allocation11 + $0x2c0] sm:$0xff] }
 0x29b   :  { %2942 = vmatprep.subr.bf16.mxu0 %v2921_v18 }
 0x29c   :  { %2943 = vmatpush1.bf16.msra.mxu0 %v2920_v40  ;;  %v2727_v14 = vpop.f32.mrf.mxu0  ;;  %v12548_v40 = vcombine.high %v3188_v56, %v3196_v2 }
 0x29e   :  { %v2729_v24 = vpop.f32.mrf.mxu0 }
 0x29f   :  { %12463 = vmatmul.mubr.msk.bf16.vlgmr.msra.gmra.mxu0 %vm154_vm1, %v14411_v3 }
 0x2a0   :  { %3046 = vmatprep.mubr.bf16.mxu0 %v14188_v1 }
 0x2c9   :  { %v2680_v4 = vpop.f32.mrf.mxu1 }
 0x2ca   :  { %v2681_v7 = vadd.f32 %v2680_v4, %v14375_v32  ;;  %v12547_v4 = vcombine.low %v3188_v56, %v3196_v2 }
 0x2cb   :  { %v2682_v8 = vpop.f32.mrf.mxu1 }
 0x2cc   :  { %v2683_v9 = vadd.f32 %v2682_v8, %v14377_v39  ;;  %v2724_v19 = vadd.f32 %v2723_v48, %v2681_v7  ;;  %v3172_v48 = vld [vmem:[#allocation11 + $0x200] sm:$0xff] }
 0x2cd   :  { %v2684_v15 = vpop.f32.mrf.mxu1  ;;  %v3156_v8 = vld [vmem:[#allocation11 + $0x180] sm:$0xff] }
 0x2ce   :  { %v2685_v21 = vadd.f32 %v2684_v15, %v14379_v45  ;;  %v2726_v36 = vadd.f32 %v2725_v26, %v2683_v9  ;;  %v2906_v25 = vmax.f32 %v2724_v19, 0.0  ;;  %v3180_v26 = vld [vmem:[#allocation11 + $0x240] sm:$0xff] }
 0x2cf   :  { %v2686_v34 = vpop.f32.mrf.mxu1  ;;  %v12532_v7 = vcombine.high %v3172_v48, %v3180_v26  ;;  %v3164_v9 = vld [vmem:[#allocation11 + $0x1c0] sm:$0xff] }
 0x2d0   :  { %v2728_v22 = vadd.f32 %v2727_v14, %v2685_v21  ;;  %v2687_v23 = vadd.f32 %v2686_v34, %v1607_v16  ;;  %v2907_v32 = vmax.f32 %v2726_v36, 0.0  ;;  %v12531_v14 = vcombine.low %v3172_v48, %v3180_v26  ;;  %v3140_v16 = vld [vmem:[#allocation11 + $0x100] sm:$0xff] }
 0x2d1   :  { %v12516_v15 = vcombine.high %v3156_v8, %v3164_v9  ;;  %v3148_v19 = vld [vmem:[#allocation11 + $0x140] sm:$0xff]  ;;  %v12515_v21 = vcombine.low %v3156_v8, %v3164_v9 }
 0x2d2   :  { %v2914_v27 = vmax.f32 %v2728_v22, 0.0  ;;  %v2730_v29 = vadd.f32 %v2729_v24, %v2687_v23  ;;  %v12500_v34 = vcombine.high %v3140_v16, %v3148_v19  ;;  %v3124_v36 = vld [vmem:[#allocation11 + $0x80] sm:$0xff]  ;;  %v12499_v23 = vcombine.low %v3140_v16, %v3148_v19 }
 0x2d3   :  { %v3132_v22 = vld [vmem:[#allocation11 + $0xc0] sm:$0xff] }
 0x2d4   :  { %v2922_v30 = vpack.c.bf16 %v2914_v27, %v2906_v25  ;;  %v2915_v33 = vmax.f32 %v2730_v29, 0.0  ;;  %v12484_v24 = vcombine.high %v3124_v36, %v3132_v22  ;;  %v3108_v25 = vld [vmem:[#allocation11] sm:$0xff]  ;;  %v12483_v29 = vcombine.low %v3124_v36, %v3132_v22 }
 0x2d5   :  { %v2809_v39 = vpop.f32.mrf.mxu1  ;;  %v3116_v27 = vld [vmem:[#allocation11 + $0x40] sm:$0xff] }
 0x2d6   :  { %v2923_v37 = vpack.c.bf16 %v2915_v33, %v2907_v32  ;;  %v12468_v32 = vcombine.high %v3108_v25, %v3116_v27  ;;  %v3356_v33 = vld [vmem:[#allocation11 + $0x7c0] sm:$0xff] }
 0x2d7   :  { %v2811_v41 = vpop.f32.mrf.mxu1  ;;  %v3260_v48 = vld [vmem:[#allocation11 + $0x4c0] sm:$0xff] }
 0x2d8   :  { %2985 = vmatprep.subr.bf16.mxu1 %v2923_v37  ;;  %v2766_v43 = vpop.f32.mrf.mxu0  ;;  %v3484_v19 = vld [vmem:[#allocation11 + $0xbc0] sm:$0xff] }
 0x2d9   :  { %2986 = vmatpush1.bf16.msra.mxu1 %v2922_v30  ;;  %v2767_v52 = vadd.f32 %v2766_v43, %v14385_v0  ;;  %v2813_v38 = vpop.f32.mrf.mxu1  ;;  %v3348_v30 = vld [vmem:[#allocation11 + $0x780] sm:$0xff] }
 0x2da   :  { %v2768_v45 = vpop.f32.mrf.mxu0  ;;  %v12708_v37 = vcombine.high %v3348_v30, %v3356_v33  ;;  %v3340_v43 = vld [vmem:[#allocation11 + $0x740] sm:$0xff] }
 0x2db   :  { %v2769_v59 = vadd.f32 %v2768_v45, %v14387_v6  ;;  %v2810_v46 = vadd.f32 %v2809_v39, %v2767_v52  ;;  %v2815_v53 = vpop.f32.mrf.mxu1  ;;  %v3220_v6 = vld [vmem:[#allocation11 + $0x380] sm:$0xff]  ;;  %v12467_v39 = vcombine.low %v3108_v25, %v3116_v27  ;;  %v12707_v52 = vcombine.low %v3348_v30, %v3356_v33 }
 0x2dc   :  { %12464 = vmatmul.mubr.msk.bf16.vlgmr.msra.gmra.mxu1 %vm154_vm1, %v14411_v3  ;;  %v2770_v44 = vpop.f32.mrf.mxu0  ;;  %v12580_v11 = vcombine.high %v3220_v6, %v3228_v57  ;;  %v3460_v27 = vld [vmem:[#allocation11 + $0xb00] sm:$0xff] }
 0x2dd   :  { %3089 = vmatprep.mubr.bf16.mxu1 %v14188_v1  ;;  %v2771_v47 = vadd.f32 %v2770_v44, %v14389_v12  ;;  %v2812_v50 = vadd.f32 %v2811_v41, %v2769_v59  ;;  %v2908_v0 = vmax.f32 %v2810_v46, 0.0  ;;  %v3204_v1 = vld [vmem:[#allocation11 + $0x300] sm:$0xff]  ;;  %v12579_v12 = vcombine.low %v3220_v6, %v3228_v57 }
 0x2de   :  { %v2772_v49 = vpop.f32.mrf.mxu0  ;;  %v12563_v18 = vcombine.low %v3204_v1, %v3212_v17  ;;  %v3332_v41 = vld [vmem:[#allocation11 + $0x700] sm:$0xff] }
 0x2df   :  { %v2814_v51 = vadd.f32 %v2813_v38, %v2771_v47  ;;  %v2773_v58 = vadd.f32 %v2772_v49, %v14391_v20  ;;  %v2909_v60 = vmax.f32 %v2812_v50, 0.0  ;;  %v12564_v20 = vcombine.high %v3204_v1, %v3212_v17  ;;  %v3316_v59 = vld [vmem:[#allocation11 + $0x680] sm:$0xff] }
 0x2e0   :  { %v12692_v45 = vcombine.high %v3332_v41, %v3340_v43  ;;  %v3324_v38 = vld [vmem:[#allocation11 + $0x6c0] sm:$0xff]  ;;  %v12691_v44 = vcombine.low %v3332_v41, %v3340_v43 }
 0x2e1   :  { %v2916_v54 = vmax.f32 %v2814_v51, 0.0  ;;  %v2816_v55 = vadd.f32 %v2815_v53, %v2773_v58  ;;  %v12676_v46 = vcombine.high %v3316_v59, %v3324_v38  ;;  %v3300_v47 = vld [vmem:[#allocation11 + $0x600] sm:$0xff]  ;;  %v12675_v51 = vcombine.low %v3316_v59, %v3324_v38 }
 0x2e2   :  { %v3308_v49 = vld [vmem:[#allocation11 + $0x640] sm:$0xff] }
 0x2e3   :  { %v2924_v61 = vpack.c.bf16 %v2916_v54, %v2908_v0  ;;  %v2917_v62 = vmax.f32 %v2816_v55, 0.0  ;;  %v12660_v58 = vcombine.high %v3300_v47, %v3308_v49  ;;  %v3284_v53 = vld [vmem:[#allocation11 + $0x580] sm:$0xff]  ;;  %v12659_v6 = vcombine.low %v3300_v47, %v3308_v49 }
 0x2e4   :  { %v2895_v50 = vpop.f32.mrf.mxu0  ;;  %v3292_v0 = vld [vmem:[#allocation11 + $0x5c0] sm:$0xff] }
 0x2e5   :  { %v2925_v63 = vpack.c.bf16 %v2917_v62, %v2909_v60  ;;  %v12644_v60 = vcombine.high %v3284_v53, %v3292_v0  ;;  %v3268_v62 = vld [vmem:[#allocation11 + $0x500] sm:$0xff] }
 0x2e6   :  { %v2897_v54 = vpop.f32.mrf.mxu0  ;;  %v3452_v41 = vld [vmem:[#allocation11 + $0xac0] sm:$0xff] }
 0x2e7   :  { %3028 = vmatprep.subr.bf16.mxu0 %v2925_v63  ;;  %v3276_v63 = vld [vmem:[#allocation11 + $0x540] sm:$0xff] }
 0x2e8   :  { %3029 = vmatpush1.bf16.msra.mxu0 %v2924_v61  ;;  %v2899_v1 = vpop.f32.mrf.mxu0  ;;  %v12628_v2 = vcombine.high %v3268_v62, %v3276_v63  ;;  %v12627_v8 = vcombine.low %v3268_v62, %v3276_v63  ;;  %v3436_v59 = vld [vmem:[#allocation11 + $0xa40] sm:$0xff] }
 0x2e9   :  { %9252 = vmatprep.subr.bf16.mxu0 %v12580_v11  ;;  %v3420_v47 = vld [vmem:[#allocation11 + $0x9c0] sm:$0xff] }
 0x2ea   :  { %v14444_v49 = vld [vmem:[#allocation11 + $0x1b80] sm:$0xff] }
 0x2eb   :  { %12465 = vmatmul.mubr.msk.bf16.vlgmr.msra.gmra.mxu0 %vm154_vm1, %v14411_v3  ;;  %v3364_v62 = vld [vmem:[#allocation11 + $0x800] sm:$0xff] }
 0x2ec   :  { %9253 = vmatpush1.bf16.msra.mxu0 %v12579_v12  ;;  %v12643_v12 = vcombine.low %v3284_v53, %v3292_v0  ;;  %v3396_v53 = vld [vmem:[#allocation11 + $0x900] sm:$0xff] }
 0x2ed   :  { %9254 = vmatprep.subr.bf16.mxu0 %v12564_v20  ;;  %v3404_v0 = vld [vmem:[#allocation11 + $0x940] sm:$0xff] }
 0x2ee   :  { %v3372_v63 = vld [vmem:[#allocation11 + $0x840] sm:$0xff] }
 0x2f0   :  { %9255 = vmatpush1.bf16.msra.mxu0 %v12563_v18 }
 0x2f1   :  { %9256 = vmatprep.subr.bf16.mxu0 %v12548_v40  ;;  %v3252_v40 = vld [vmem:[#allocation11 + $0x480] sm:$0xff] }
 0x2f2   :  { %v12612_v16 = vcombine.high %v3252_v40, %v3260_v48 }
 0x2f4   :  { %9257 = vmatpush1.bf16.msra.mxu0 %v12547_v4 }
 0x2f5   :  { %9258 = vmatprep.subr.bf16.mxu0 %v12532_v7  ;;  %v2901_v7 = vpop.f32.mrf.mxu0 }
 0x2f8   :  { %9259 = vmatpush1.bf16.msra.mxu0 %v12531_v14 }
 0x2f9   :  { %9260 = vmatprep.subr.bf16.mxu0 %v12516_v15  ;;  %v3476_v15 = vld [vmem:[#allocation11 + $0xb80] sm:$0xff] }
 0x2fa   :  { %v12836_v25 = vcombine.high %v3476_v15, %v3484_v19 }
 0x2fc   :  { %9261 = vmatpush1.bf16.msra.mxu0 %v12515_v21  ;;  %v3244_v21 = vld [vmem:[#allocation11 + $0x440] sm:$0xff] }
 0x2fd   :  { %9262 = vmatprep.subr.bf16.mxu0 %v12500_v34 }
 0x300   :  { %9263 = vmatpush1.bf16.msra.mxu0 %v12499_v23  ;;  %v12611_v23 = vcombine.low %v3252_v40, %v3260_v48 }
 0x301   :  { %9264 = vmatprep.subr.bf16.mxu0 %v12484_v24 }
 0x304   :  { %9265 = vmatpush1.bf16.msra.mxu0 %v12483_v29  ;;  %v3468_v29 = vld [vmem:[#allocation11 + $0xb40] sm:$0xff] }
 0x305   :  { %9266 = vmatprep.subr.bf16.mxu0 %v12468_v32  ;;  %v12835_v32 = vcombine.low %v3476_v15, %v3484_v19  ;;  %v12820_v33 = vcombine.high %v3460_v27, %v3468_v29  ;;  %v12819_v43 = vcombine.low %v3460_v27, %v3468_v29  ;;  %v3540_v15 = vld [vmem:[#allocation11 + $0xd80] sm:$0xff] }
 0x306   :  { %v3492_v27 = vld [vmem:[#allocation11 + $0xc00] sm:$0xff] }
 0x307   :  { %v3500_v29 = vld [vmem:[#allocation11 + $0xc40] sm:$0xff] }
 0x308   :  { %9267 = vmatpush1.bf16.msra.mxu0 %v12467_v39  ;;  %v13092_v39 = vcombine.high %v14428_v13, %v14430_v5 }
 0x309   :  { %9268 = vmatprep.subr.bf16.mxu0 %v12708_v37  ;;  %v3444_v37 = vld [vmem:[#allocation11 + $0xa80] sm:$0xff] }
 0x30a   :  { %v12803_v38 = vcombine.low %v3444_v37, %v3452_v41 }
 0x30c   :  { %9269 = vmatpush2.bf16.msra.mxu0 %v12707_v52  ;;  %v12804_v52 = vcombine.high %v3444_v37, %v3452_v41 }
 0x30d   :  { %9270 = vmatprep.subr.bf16.mxu0 %v12692_v45  ;;  %v3428_v45 = vld [vmem:[#allocation11 + $0xa00] sm:$0xff] }
 0x310   :  { %9271 = vmatpush2.bf16.msra.mxu0 %v12691_v44  ;;  %v12788_v44 = vcombine.high %v3428_v45, %v3436_v59 }
 0x311   :  { %9272 = vmatprep.subr.bf16.mxu0 %v12676_v46  ;;  %v3412_v46 = vld [vmem:[#allocation11 + $0x980] sm:$0xff] }
 0x314   :  { %9273 = vmatpush2.bf16.msra.mxu0 %v12675_v51 }
 0x315   :  { %v2852_v55 = vpop.f32.mrf.mxu1  ;;  %9274 = vmatprep.subr.bf16.mxu0 %v12660_v58  ;;  %v12772_v58 = vcombine.high %v3412_v46, %v3420_v47 }
 0x316   :  { %v2853_v57 = vadd.f32 %v2852_v55, %v14395_v28  ;;  %v12756_v55 = vcombine.high %v3396_v53, %v3404_v0 }
 0x317   :  { %v2854_v61 = vpop.f32.mrf.mxu1 }
 0x318   :  { %v2855_v11 = vadd.f32 %v2854_v61, %v14397_v31  ;;  %9275 = vmatpush2.bf16.msra.mxu0 %v12659_v6  ;;  %v2896_v20 = vadd.f32 %v2895_v50, %v2853_v57  ;;  %v14446_v50 = vld [vmem:[#allocation11 + $0x1bc0] sm:$0xff] }
 0x319   :  { %v2856_v17 = vpop.f32.mrf.mxu1  ;;  %9276 = vmatprep.subr.bf16.mxu0 %v12644_v60  ;;  %v13347_v51 = vcombine.low %v14444_v49, %v14446_v50  ;;  %v3380_v6 = vld [vmem:[#allocation11 + $0x880] sm:$0xff]  ;;  %v12755_v60 = vcombine.low %v3396_v53, %v3404_v0  ;;  %v13348_v41 = vcombine.high %v14444_v49, %v14446_v50  ;;  %v3205_v50 = vld [vmem:[#allocation11 + $0x308] sm:$0xff] }
 0x31a   :  { %v2857_v56 = vadd.f32 %v2856_v17, %v14399_v35  ;;  %v2898_v28 = vadd.f32 %v2897_v54, %v2855_v11  ;;  %v2910_v31 = vmax.f32 %v2896_v20, 0.0  ;;  %v3236_v35 = vld [vmem:[#allocation11 + $0x400] sm:$0xff]  ;;  %v12771_v54 = vcombine.low %v3412_v46, %v3420_v47 }
 0x31b   :  { %v2858_v18 = vpop.f32.mrf.mxu1  ;;  %v12595_v30 = vcombine.low %v3236_v35, %v3244_v21  ;;  %v3388_v57 = vld [vmem:[#allocation11 + $0x8c0] sm:$0xff]  ;;  %v12723_v20 = vcombine.low %v3364_v62, %v3372_v63 }
 0x31c   :  { %v2900_v26 = vadd.f32 %v2899_v1, %v2857_v56  ;;  %v2859_v4 = vadd.f32 %v2858_v18, %v14401_v42  ;;  %9277 = vmatpush2.bf16.msra.mxu0 %v12643_v12  ;;  %v2911_v34 = vmax.f32 %v2898_v28, 0.0  ;;  %v12596_v42 = vcombine.high %v3236_v35, %v3244_v21  ;;  %v3604_v17 = vld [vmem:[#allocation11 + $0xf80] sm:$0xff] }
 0x31d   :  { %9278 = vmatprep.subr.bf16.mxu0 %v12628_v2  ;;  %v12740_v61 = vcombine.high %v3380_v6, %v3388_v57  ;;  %v12739_v11 = vcombine.low %v3380_v6, %v3388_v57  ;;  %v12724_v1 = vcombine.high %v3364_v62, %v3372_v63  ;;  %v3612_v12 = vld [vmem:[#allocation11 + $0xfc0] sm:$0xff] }
 0x31e   :  { %v2918_v9 = vmax.f32 %v2900_v26, 0.0  ;;  %v2902_v14 = vadd.f32 %v2901_v7, %v2859_v4  ;;  %v12964_v56 = vcombine.high %v3604_v17, %v3612_v12  ;;  %v3588_v2 = vld [vmem:[#allocation11 + $0xf00] sm:$0xff]  ;;  %v12963_v40 = vcombine.low %v3604_v17, %v3612_v12 }
 0x31f   :  { %v3596_v18 = vld [vmem:[#allocation11 + $0xf40] sm:$0xff] }
 0x320   :  { %v2926_v36 = vpack.c.bf16 %v2918_v9, %v2910_v31  ;;  %v2919_v22 = vmax.f32 %v2902_v14, 0.0  ;;  %9279 = vmatpush2.bf16.msra.mxu0 %v12627_v8  ;;  %v12948_v48 = vcombine.high %v3588_v2, %v3596_v18  ;;  %v3572_v28 = vld [vmem:[#allocation11 + $0xe80] sm:$0xff]  ;;  %v12947_v4 = vcombine.low %v3588_v2, %v3596_v18 }
 0x321   :  { %9280 = vmatprep.subr.bf16.mxu0 %v12612_v16  ;;  %v3580_v26 = vld [vmem:[#allocation11 + $0xec0] sm:$0xff] }
 0x322   :  { %v2927_v24 = vpack.c.bf16 %v2919_v22, %v2911_v34  ;;  %v12932_v7 = vcombine.high %v3572_v28, %v3580_v26  ;;  %v3556_v8 = vld [vmem:[#allocation11 + $0xe00] sm:$0xff]  ;;  %v12931_v9 = vcombine.low %v3572_v28, %v3580_v26 }
 0x323   :  { %v3564_v31 = vld [vmem:[#allocation11 + $0xe40] sm:$0xff] }
 0x324   :  { %3071 = vmatprep.subr.bf16.mxu1 %v2927_v24  ;;  %9281 = vmatpush2.bf16.msra.mxu0 %v12611_v23  ;;  %v12916_v14 = vcombine.high %v3556_v8, %v3564_v31  ;;  %v3548_v16 = vld [vmem:[#allocation11 + $0xdc0] sm:$0xff]  ;;  %v12915_v19 = vcombine.low %v3556_v8, %v3564_v31 }
 0x325   :  { %3072 = vmatpush1.bf16.msra.mxu1 %v2926_v36  ;;  %9282 = vmatprep.subr.bf16.mxu0 %v12596_v42  ;;  %v12900_v35 = vcombine.high %v3540_v15, %v3548_v16  ;;  %v3524_v21 = vld [vmem:[#allocation11 + $0xd00] sm:$0xff]  ;;  %v12899_v36 = vcombine.low %v3540_v15, %v3548_v16 }
 0x326   :  { %9295 = vmatprep.subr.bf16.mxu1 %v12836_v25  ;;  %v3532_v34 = vld [vmem:[#allocation11 + $0xd40] sm:$0xff] }
 0x327   :  { %v12884_v22 = vcombine.high %v3524_v21, %v3532_v34  ;;  %v3508_v23 = vld [vmem:[#allocation11 + $0xc80] sm:$0xff]  ;;  %v12883_v25 = vcombine.low %v3524_v21, %v3532_v34 }
 0x328   :  { %12466 = vmatmul.mubr.msk.bf16.vlgmr.msra.gmra.mxu1 %vm154_vm1, %v14411_v3  ;;  %9283 = vmatpush2.bf16.msra.mxu0 %v12595_v30  ;;  %v12787_v3 = vcombine.low %v3428_v45, %v3436_v59  ;;  %v3516_v24 = vld [vmem:[#allocation11 + $0xcc0] sm:$0xff]  ;;  %v12852_v30 = vcombine.high %v3492_v27, %v3500_v29 }
 0x329   :  { %9296 = vmatpush1.bf16.msra.mxu1 %v12835_v32  ;;  %9338 = vmatprep.subr.bf16.mxu0 %v13092_v39  ;;  %v12868_v42 = vcombine.high %v3508_v23, %v3516_v24  ;;  %v12867_v32 = vcombine.low %v3508_v23, %v3516_v24  ;;  %v12851_v39 = vcombine.low %v3492_v27, %v3500_v29  ;;  %v3724_v45 = vld [vmem:[#allocation11 + $0x1340] sm:$0xff] }
 0x32a   :  { %9297 = vmatprep.subr.bf16.mxu1 %v12820_v33  ;;  %v3700_v47 = vld [vmem:[#allocation11 + $0x1280] sm:$0xff] }
 0x32b   :  { %v3684_v0 = vld [vmem:[#allocation11 + $0x1200] sm:$0xff] }
 0x32c   :  { %v3668_v57 = vld [vmem:[#allocation11 + $0x1180] sm:$0xff] }
 0x32d   :  { %9298 = vmatpush1.bf16.msra.mxu1 %v12819_v43  ;;  %v3652_v63 = vld [vmem:[#allocation11 + $0x1100] sm:$0xff] }
 0x32e   :  { %9299 = vmatprep.subr.bf16.mxu1 %v12804_v52  ;;  %v3716_v52 = vld [vmem:[#allocation11 + $0x1300] sm:$0xff] }
 0x32f   :  { %v13076_v46 = vcombine.high %v3716_v52, %v3724_v45 }
 0x331   :  { %9300 = vmatpush1.bf16.msra.mxu1 %v12803_v38 }
 0x332   :  { %9301 = vmatprep.subr.bf16.mxu1 %v12788_v44 }
 0x335   :  { %9302 = vmatpush1.bf16.msra.mxu1 %v12787_v3  ;;  %v3708_v3 = vld [vmem:[#allocation11 + $0x12c0] sm:$0xff] }
 0x336   :  { %9303 = vmatprep.subr.bf16.mxu1 %v12772_v58  ;;  %v13075_v58 = vcombine.low %v3716_v52, %v3724_v45  ;;  %v13060_v53 = vcombine.high %v3700_v47, %v3708_v3 }
 0x339   :  { %9304 = vmatpush1.bf16.msra.mxu1 %v12771_v54  ;;  %v3692_v54 = vld [vmem:[#allocation11 + $0x1240] sm:$0xff] }
 0x33a   :  { %9305 = vmatprep.subr.bf16.mxu1 %v12756_v55  ;;  %v13059_v55 = vcombine.low %v3700_v47, %v3708_v3  ;;  %v13044_v6 = vcombine.high %v3684_v0, %v3692_v54  ;;  %v3972_v47 = vld [vmem:[#allocation11 + $0x1b00] sm:$0xff] }
 0x33b   :  { %v3980_v3 = vld [vmem:[#allocation11 + $0x1b40] sm:$0xff] }
 0x33d   :  { %9306 = vmatpush1.bf16.msra.mxu1 %v12755_v60  ;;  %v3676_v60 = vld [vmem:[#allocation11 + $0x11c0] sm:$0xff] }
 0x33e   :  { %9307 = vmatprep.subr.bf16.mxu1 %v12740_v61  ;;  %v13043_v61 = vcombine.low %v3684_v0, %v3692_v54  ;;  %v13028_v62 = vcombine.high %v3668_v57, %v3676_v60  ;;  %v13027_v13 = vcombine.low %v3668_v57, %v3676_v60  ;;  %v13332_v57 = vcombine.high %v3972_v47, %v3980_v3 }
 0x341   :  { %9308 = vmatpush1.bf16.msra.mxu1 %v12739_v11  ;;  %v3660_v11 = vld [vmem:[#allocation11 + $0x1140] sm:$0xff] }
 0x342   :  { %9309 = vmatprep.subr.bf16.mxu1 %v12724_v1  ;;  %v13012_v5 = vcombine.high %v3652_v63, %v3660_v11  ;;  %v3644_v1 = vld [vmem:[#allocation11 + $0x10c0] sm:$0xff]  ;;  %v13011_v17 = vcombine.low %v3652_v63, %v3660_v11  ;;  %v13331_v63 = vcombine.low %v3972_v47, %v3980_v3 }
 0x343   :  { %v4100_v47 = vld [vmem:[#allocation11 + $0x1f00] sm:$0xff] }
 0x344   :  { %v4108_v3 = vld [vmem:[#allocation11 + $0x1f40] sm:$0xff] }
 0x345   :  { %9310 = vmatpush1.bf16.msra.mxu1 %v12723_v20  ;;  %v3620_v20 = vld [vmem:[#allocation11 + $0x1000] sm:$0xff] }
 0x346   :  { %9311 = vmatprep.subr.bf16.mxu1 %v12964_v56  ;;  %v3628_v56 = vld [vmem:[#allocation11 + $0x1040] sm:$0xff] }
 0x347   :  { %v12980_v18 = vcombine.high %v3620_v20, %v3628_v56  ;;  %v12979_v28 = vcombine.low %v3620_v20, %v3628_v56  ;;  %v3932_v20 = vld [vmem:[#allocation11 + $0x19c0] sm:$0xff] }
 0x349   :  { %9312 = vmatpush2.bf16.msra.mxu1 %v12963_v40  ;;  %v3860_v40 = vld [vmem:[#allocation11 + $0x1780] sm:$0xff] }
 0x34a   :  { %9313 = vmatprep.subr.bf16.mxu1 %v12948_v48  ;;  %v3868_v48 = vld [vmem:[#allocation11 + $0x17c0] sm:$0xff] }
 0x34b   :  { %v13220_v26 = vcombine.high %v3860_v40, %v3868_v48  ;;  %v13219_v8 = vcombine.low %v3860_v40, %v3868_v48 }
 0x34d   :  { %9314 = vmatpush2.bf16.msra.mxu1 %v12947_v4  ;;  %v3844_v4 = vld [vmem:[#allocation11 + $0x1700] sm:$0xff] }
 0x34e   :  { %9315 = vmatprep.subr.bf16.mxu1 %v12932_v7  ;;  %v3852_v7 = vld [vmem:[#allocation11 + $0x1740] sm:$0xff] }
 0x34f   :  { %v13204_v31 = vcombine.high %v3844_v4, %v3852_v7  ;;  %v13203_v15 = vcombine.low %v3844_v4, %v3852_v7 }
 0x351   :  { %9316 = vmatpush2.bf16.msra.mxu1 %v12931_v9  ;;  %v3828_v9 = vld [vmem:[#allocation11 + $0x1680] sm:$0xff] }
 0x352   :  { %9317 = vmatprep.subr.bf16.mxu1 %v12916_v14  ;;  %v3836_v14 = vld [vmem:[#allocation11 + $0x16c0] sm:$0xff] }
 0x353   :  { %v13188_v16 = vcombine.high %v3828_v9, %v3836_v14  ;;  %v13187_v21 = vcombine.low %v3828_v9, %v3836_v14  ;;  %v3189_v9 = vld [vmem:[#allocation11 + $0x288] sm:$0xff] }
 0x354   :  { %v3197_v14 = vld [vmem:[#allocation11 + $0x2c8] sm:$0xff] }
 0x355   :  { %9318 = vmatpush2.bf16.msra.mxu1 %v12915_v19  ;;  %v3812_v19 = vld [vmem:[#allocation11 + $0x1600] sm:$0xff] }
 0x356   :  { %9319 = vmatprep.subr.bf16.mxu1 %v12900_v35  ;;  %v3820_v35 = vld [vmem:[#allocation11 + $0x1640] sm:$0xff] }
 0x357   :  { %v13172_v34 = vcombine.high %v3812_v19, %v3820_v35  ;;  %v13171_v23 = vcombine.low %v3812_v19, %v3820_v35  ;;  %v3900_v19 = vld [vmem:[#allocation11 + $0x18c0] sm:$0xff] }
 0x359   :  { %9320 = vmatpush2.bf16.msra.mxu1 %v12899_v36  ;;  %v3796_v36 = vld [vmem:[#allocation11 + $0x1580] sm:$0xff] }
 0x35a   :  { %9321 = vmatprep.subr.bf16.mxu1 %v12884_v22  ;;  %v3804_v22 = vld [vmem:[#allocation11 + $0x15c0] sm:$0xff] }
 0x35b   :  { %v13156_v24 = vcombine.high %v3796_v36, %v3804_v22  ;;  %v13155_v27 = vcombine.low %v3796_v36, %v3804_v22  ;;  %v3173_v36 = vld [vmem:[#allocation11 + $0x208] sm:$0xff] }
 0x35c   :  { %v3181_v22 = vld [vmem:[#allocation11 + $0x248] sm:$0xff] }
 0x35d   :  { %9322 = vmatpush2.bf16.msra.mxu1 %v12883_v25  ;;  %v3780_v25 = vld [vmem:[#allocation11 + $0x1500] sm:$0xff] }
 0x35e   :  { %9323 = vmatprep.subr.bf16.mxu1 %v12868_v42  ;;  %v3788_v42 = vld [vmem:[#allocation11 + $0x1540] sm:$0xff] }
 0x35f   :  { %v2962_v33 = vpop.f32.mrf.mxu0  ;;  %v13140_v29 = vcombine.high %v3780_v25, %v3788_v42 }
 0x361   :  { %9324 = vmatpush2.bf16.msra.mxu1 %v12867_v32  ;;  %v2964_v37 = vpop.f32.mrf.mxu0  ;;  %v3764_v32 = vld [vmem:[#allocation11 + $0x1480] sm:$0xff] }
 0x362   :  { %9325 = vmatprep.subr.bf16.mxu1 %v12852_v30  ;;  %v3772_v30 = vld [vmem:[#allocation11 + $0x14c0] sm:$0xff] }
 0x363   :  { %v2966_v43 = vpop.f32.mrf.mxu0  ;;  %v13123_v45 = vcombine.low %v3764_v32, %v3772_v30 }
 0x364   :  { %v14452_v59 = vpack.c.bf16 %v2966_v43, %v2962_v33  ;;  %v13139_v33 = vcombine.low %v3780_v25, %v3788_v42  ;;  %v3756_v43 = vld [vmem:[#allocation11 + $0x1440] sm:$0xff]  ;;  %v12549_v42 = vcombine.low %v3189_v9, %v3197_v14 }
 0x365   :  { %9326 = vmatpush2.bf16.msra.mxu1 %v12851_v39  ;;  %v2968_v38 = vpop.f32.mrf.mxu0  ;;  %v3884_v25 = vld [vmem:[#allocation11 + $0x1840] sm:$0xff] }
 0x366   :  { %9381 = vmatprep.subr.bf16.mxu1 %v13348_v41  ;;  %v14454_v44 = vpack.c.bf16 %v2968_v38, %v2964_v37  ;;  %v13124_v37 = vcombine.high %v3764_v32, %v3772_v30  ;;  %v3748_v41 = vld [vmem:[#allocation11 + $0x1400] sm:$0xff]  ;;  %v3157_v32 = vld [vmem:[#allocation11 + $0x188] sm:$0xff] }
 0x367   :  { %v3165_v30 = vld [vmem:[#allocation11 + $0x1c8] sm:$0xff] }
 0x368   :  { %9284 = vmatprep.mubr.bf16.mxu0 %v14454_v44 }
 0x369   :  { %9285 = vmatmul.mubr.bf16.vlgmr.msra.gmra.mxu0 %v14452_v59 }
 0x36a   :  { %9339 = vmatpush1.bf16.msra.mxu0 %v13091_v10  ;;  %v3636_v10 = vld [vmem:[#allocation11 + $0x1080] sm:$0xff] }
 0x36b   :  { %9340 = vmatprep.subr.bf16.mxu0 %v13076_v46  ;;  %v12996_v12 = vcombine.high %v3636_v10, %v3644_v1  ;;  %v12995_v2 = vcombine.low %v3636_v10, %v3644_v1  ;;  %v13108_v46 = vcombine.high %v3748_v41, %v3756_v43 }
 0x36e   :  { %9341 = vmatpush1.bf16.msra.mxu0 %v13075_v58  ;;  %v3221_v58 = vld [vmem:[#allocation11 + $0x388] sm:$0xff] }
 0x36f   :  { %9342 = vmatprep.subr.bf16.mxu0 %v13060_v53  ;;  %v3229_v53 = vld [vmem:[#allocation11 + $0x3c8] sm:$0xff] }
 0x370   :  { %v12582_v60 = vcombine.high %v3221_v58, %v3229_v53  ;;  %v12581_v7 = vcombine.low %v3221_v58, %v3229_v53  ;;  %v12517_v58 = vcombine.low %v3157_v32, %v3165_v30 }
 0x372   :  { %9343 = vmatpush1.bf16.msra.mxu0 %v13059_v55 }
 0x373   :  { %9344 = vmatprep.subr.bf16.mxu0 %v13044_v6  ;;  %v13107_v6 = vcombine.low %v3748_v41, %v3756_v43  ;;  %v12533_v41 = vcombine.low %v3173_v36, %v3181_v22  ;;  %v12518_v43 = vcombine.high %v3157_v32, %v3165_v30  ;;  %v4004_v30 = vld [vmem:[#allocation11 + $0x1c00] sm:$0xff] }
 0x376   :  { %9345 = vmatpush1.bf16.msra.mxu0 %v13043_v61  ;;  %v3956_v61 = vld [vmem:[#allocation11 + $0x1a80] sm:$0xff] }
 0x377   :  { %9346 = vmatprep.subr.bf16.mxu0 %v13028_v62  ;;  %v3964_v62 = vld [vmem:[#allocation11 + $0x1ac0] sm:$0xff] }
 0x378   :  { %v13316_v11 = vcombine.high %v3956_v61, %v3964_v62  ;;  %v13315_v10 = vcombine.low %v3956_v61, %v3964_v62  ;;  %v4084_v61 = vld [vmem:[#allocation11 + $0x1e80] sm:$0xff] }
 0x379   :  { %v4092_v62 = vld [vmem:[#allocation11 + $0x1ec0] sm:$0xff] }
 0x37a   :  { %9347 = vmatpush1.bf16.msra.mxu0 %v13027_v13  ;;  %v3940_v13 = vld [vmem:[#allocation11 + $0x1a00] sm:$0xff] }
 0x37b   :  { %9348 = vmatprep.subr.bf16.mxu0 %v13012_v5  ;;  %v3948_v5 = vld [vmem:[#allocation11 + $0x1a40] sm:$0xff] }
 0x37e   :  { %9349 = vmatpush1.bf16.msra.mxu0 %v13011_v17  ;;  %v13300_v17 = vcombine.high %v3940_v13, %v3948_v5 }
 0x37f   :  { %9350 = vmatprep.subr.bf16.mxu0 %v12996_v12  ;;  %v3924_v12 = vld [vmem:[#allocation11 + $0x1980] sm:$0xff] }
 0x380   :  { %v13284_v49 = vcombine.high %v3924_v12, %v3932_v20 }
 0x382   :  { %9351 = vmatpush1.bf16.msra.mxu0 %v12995_v2  ;;  %v13299_v2 = vcombine.low %v3940_v13, %v3948_v5  ;;  %v13459_v13 = vcombine.low %v4100_v47, %v4108_v3  ;;  %v3109_v5 = vld [vmem:[#allocation11 + $0x8] sm:$0xff] }
 0x383   :  { %9352 = vmatprep.subr.bf16.mxu0 %v12980_v18 }
 0x386   :  { %9353 = vmatpush1.bf16.msra.mxu0 %v12979_v28  ;;  %v3908_v28 = vld [vmem:[#allocation11 + $0x1900] sm:$0xff] }
 0x387   :  { %9354 = vmatprep.subr.bf16.mxu0 %v13220_v26  ;;  %v3916_v26 = vld [vmem:[#allocation11 + $0x1940] sm:$0xff] }
 0x38a   :  { %9355 = vmatpush2.bf16.msra.mxu0 %v13219_v8 }
 0x38b   :  { %9356 = vmatprep.subr.bf16.mxu0 %v13204_v31  ;;  %v13283_v31 = vcombine.low %v3924_v12, %v3932_v20  ;;  %v4076_v12 = vld [vmem:[#allocation11 + $0x1e40] sm:$0xff] }
 0x38e   :  { %9357 = vmatpush2.bf16.msra.mxu0 %v13203_v15  ;;  %v13268_v15 = vcombine.high %v3908_v28, %v3916_v26 }
 0x38f   :  { %9358 = vmatprep.subr.bf16.mxu0 %v13188_v16  ;;  %v3892_v16 = vld [vmem:[#allocation11 + $0x1880] sm:$0xff] }
 0x392   :  { %9359 = vmatpush2.bf16.msra.mxu0 %v13187_v21  ;;  %v12550_v21 = vcombine.high %v3189_v9, %v3197_v14  ;;  %v4036_v14 = vld [vmem:[#allocation11 + $0x1d00] sm:$0xff] }
 0x393   :  { %9360 = vmatprep.subr.bf16.mxu0 %v13172_v34  ;;  %v13267_v34 = vcombine.low %v3908_v28, %v3916_v26 }
 0x396   :  { %9361 = vmatpush2.bf16.msra.mxu0 %v13171_v23  ;;  %v13252_v23 = vcombine.high %v3892_v16, %v3900_v19 }
 0x397   :  { %9362 = vmatprep.subr.bf16.mxu0 %v13156_v24  ;;  %v3876_v24 = vld [vmem:[#allocation11 + $0x1800] sm:$0xff] }
 0x39a   :  { %9363 = vmatpush2.bf16.msra.mxu0 %v13155_v27  ;;  %v12534_v27 = vcombine.high %v3173_v36, %v3181_v22  ;;  %v4020_v22 = vld [vmem:[#allocation11 + $0x1c80] sm:$0xff] }
 0x39b   :  { %9364 = vmatprep.subr.bf16.mxu0 %v13140_v29  ;;  %v13251_v29 = vcombine.low %v3892_v16, %v3900_v19 }
 0x39c   :  { %v3005_v39 = vpop.f32.mrf.mxu1 }
 0x39e   :  { %v3007_v52 = vpop.f32.mrf.mxu1  ;;  %9365 = vmatpush2.bf16.msra.mxu0 %v13139_v33  ;;  %v13236_v33 = vcombine.high %v3876_v24, %v3884_v25 }
 0x39f   :  { %9366 = vmatprep.subr.bf16.mxu0 %v13124_v37  ;;  %v4124_v37 = vld [vmem:[#allocation11 + $0x1fc0] sm:$0xff] }
 0x3a0   :  { %v3009_v38 = vpop.f32.mrf.mxu1 }
 0x3a1   :  { %v14461_v0 = vpack.c.bf16 %v3009_v38, %v3005_v39  ;;  %v4116_v39 = vld [vmem:[#allocation11 + $0x1f80] sm:$0xff]  ;;  %v3149_v38 = vld [vmem:[#allocation11 + $0x148] sm:$0xff] }
 0x3a2   :  { %v3011_v54 = vpop.f32.mrf.mxu1  ;;  %9367 = vmatpush2.bf16.msra.mxu0 %v13123_v45  ;;  %v3141_v45 = vld [vmem:[#allocation11 + $0x108] sm:$0xff] }
 0x3a3   :  { %v14463_v55 = vpack.c.bf16 %v3011_v54, %v3007_v52  ;;  %9368 = vmatprep.subr.bf16.mxu0 %v13108_v46  ;;  %v13235_v52 = vcombine.low %v3876_v24, %v3884_v25  ;;  %v13476_v46 = vcombine.high %v4116_v39, %v4124_v37  ;;  %v12502_v53 = vcombine.high %v3141_v45, %v3149_v38 }
 0x3a4   :  { %v13475_v54 = vcombine.low %v4116_v39, %v4124_v37 }
 0x3a5   :  { %9327 = vmatprep.mubr.bf16.mxu1 %v14463_v55 }
 0x3a6   :  { %9328 = vmatmul.mubr.bf16.vlgmr.msra.gmra.mxu1 %v14461_v0  ;;  %9369 = vmatpush2.bf16.msra.mxu0 %v13107_v6  ;;  %v3125_v6 = vld [vmem:[#allocation11 + $0x88] sm:$0xff] }
 0x3a7   :  { %9382 = vmatpush1.bf16.msra.mxu1 %v13347_v51  ;;  %9424 = vmatprep.subr.bf16.mxu0 %v12582_v60  ;;  %v3213_v51 = vld [vmem:[#allocation11 + $0x348] sm:$0xff]  ;;  %v13460_v60 = vcombine.high %v4100_v47, %v4108_v3 }
 0x3a8   :  { %9383 = vmatprep.subr.bf16.mxu1 %v13332_v57  ;;  %v12566_v8 = vcombine.high %v3205_v50, %v3213_v51  ;;  %v12565_v35 = vcombine.low %v3205_v50, %v3213_v51  ;;  %v3133_v57 = vld [vmem:[#allocation11 + $0xc8] sm:$0xff]  ;;  %v4052_v51 = vld [vmem:[#allocation11 + $0x1d80] sm:$0xff] }
 0x3a9   :  { %v12485_v20 = vcombine.low %v3125_v6, %v3133_v57 }
 0x3ab   :  { %9384 = vmatpush1.bf16.msra.mxu1 %v13331_v63  ;;  %v3048_v1 = vpop.f32.mrf.mxu0  ;;  %v12501_v63 = vcombine.low %v3141_v45, %v3149_v38  ;;  %v3477_v38 = vld [vmem:[#allocation11 + $0xb88] sm:$0xff] }
 0x3ac   :  { %9385 = vmatprep.subr.bf16.mxu1 %v13316_v11  ;;  %v12486_v11 = vcombine.high %v3125_v6, %v3133_v57 }
 0x3ad   :  { %v3050_v56 = vpop.f32.mrf.mxu0 }
 0x3af   :  { %9386 = vmatpush1.bf16.msra.mxu1 %v13315_v10  ;;  %v3052_v18 = vpop.f32.mrf.mxu0  ;;  %v3117_v10 = vld [vmem:[#allocation11 + $0x48] sm:$0xff] }
 0x3b0   :  { %9387 = vmatprep.subr.bf16.mxu1 %v13300_v17  ;;  %v14470_v40 = vpack.c.bf16 %v3052_v18, %v3048_v1  ;;  %v13444_v1 = vcombine.high %v4084_v61, %v4092_v62  ;;  %v4068_v17 = vld [vmem:[#allocation11 + $0x1e00] sm:$0xff]  ;;  %v3349_v18 = vld [vmem:[#allocation11 + $0x788] sm:$0xff]  ;;  %v12469_v28 = vcombine.low %v3109_v5, %v3117_v10 }
 0x3b1   :  { %v3054_v48 = vpop.f32.mrf.mxu0  ;;  %v13428_v50 = vcombine.high %v4068_v17, %v4076_v12 }
 0x3b2   :  { %v14472_v4 = vpack.c.bf16 %v3054_v48, %v3050_v56  ;;  %v12470_v56 = vcombine.high %v3109_v5, %v3117_v10  ;;  %v4060_v48 = vld [vmem:[#allocation11 + $0x1dc0] sm:$0xff]  ;;  %v3237_v5 = vld [vmem:[#allocation11 + $0x408] sm:$0xff] }
 0x3b3   :  { %9388 = vmatpush1.bf16.msra.mxu1 %v13299_v2  ;;  %v13443_v2 = vcombine.low %v4084_v61, %v4092_v62  ;;  %v13412_v9 = vcombine.high %v4052_v51, %v4060_v48  ;;  %v3253_v61 = vld [vmem:[#allocation11 + $0x488] sm:$0xff] }
 0x3b4   :  { %9389 = vmatprep.subr.bf16.mxu1 %v13284_v49  ;;  %9370 = vmatprep.mubr.bf16.mxu0 %v14472_v4  ;;  %v3357_v49 = vld [vmem:[#allocation11 + $0x7c8] sm:$0xff] }
 0x3b5   :  { %9371 = vmatmul.mubr.bf16.vlgmr.msra.gmra.mxu0 %v14470_v40  ;;  %v12710_v26 = vcombine.high %v3349_v18, %v3357_v49  ;;  %v12709_v16 = vcombine.low %v3349_v18, %v3357_v49  ;;  %v3261_v62 = vld [vmem:[#allocation11 + $0x4c8] sm:$0xff] }
 0x3b6   :  { %9425 = vmatpush1.bf16.msra.mxu0 %v12581_v7  ;;  %9456 = vmatprep.mubr.bf16.mxu0 %v14454_v44  ;;  %v13427_v7 = vcombine.low %v4068_v17, %v4076_v12  ;;  %v3245_v10 = vld [vmem:[#allocation11 + $0x448] sm:$0xff]  ;;  %v12613_v17 = vcombine.low %v3253_v61, %v3261_v62 }
 0x3b7   :  { %9426 = vmatprep.subr.bf16.mxu0 %v12566_v8  ;;  %9390 = vmatpush1.bf16.msra.mxu1 %v13283_v31  ;;  %v3333_v8 = vld [vmem:[#allocation11 + $0x708] sm:$0xff] }
 0x3b8   :  { %9391 = vmatprep.subr.bf16.mxu1 %v13268_v15  ;;  %v3341_v31 = vld [vmem:[#allocation11 + $0x748] sm:$0xff]  ;;  %v4044_v15 = vld [vmem:[#allocation11 + $0x1d40] sm:$0xff] }
 0x3b9   :  { %v12694_v19 = vcombine.high %v3333_v8, %v3341_v31  ;;  %v13396_v36 = vcombine.high %v4036_v14, %v4044_v15  ;;  %v12693_v24 = vcombine.low %v3333_v8, %v3341_v31  ;;  %v3733_v49 = vld [vmem:[#allocation11 + $0x1388] sm:$0xff] }
 0x3ba   :  { %9427 = vmatpush1.bf16.msra.mxu0 %v12565_v35  ;;  %v13411_v35 = vcombine.low %v4052_v51, %v4060_v48  ;;  %v12597_v48 = vcombine.low %v3237_v5, %v3245_v10  ;;  %v3445_v31 = vld [vmem:[#allocation11 + $0xa88] sm:$0xff] }
 0x3bb   :  { %9428 = vmatprep.subr.bf16.mxu0 %v12550_v21  ;;  %9392 = vmatpush1.bf16.msra.mxu1 %v13267_v34  ;;  %v3317_v21 = vld [vmem:[#allocation11 + $0x688] sm:$0xff] }
 0x3bc   :  { %9393 = vmatprep.subr.bf16.mxu1 %v13252_v23  ;;  %v3325_v34 = vld [vmem:[#allocation11 + $0x6c8] sm:$0xff]  ;;  %v4028_v23 = vld [vmem:[#allocation11 + $0x1cc0] sm:$0xff] }
 0x3bd   :  { %v12678_v25 = vcombine.high %v3317_v21, %v3325_v34  ;;  %v13380_v32 = vcombine.high %v4020_v22, %v4028_v23  ;;  %v12677_v39 = vcombine.low %v3317_v21, %v3325_v34  ;;  %v3429_v21 = vld [vmem:[#allocation11 + $0xa08] sm:$0xff] }
 0x3be   :  { %9429 = vmatpush1.bf16.msra.mxu0 %v12549_v42  ;;  %v13395_v42 = vcombine.low %v4036_v14, %v4044_v15  ;;  %v3717_v14 = vld [vmem:[#allocation11 + $0x1308] sm:$0xff] }
 0x3bf   :  { %9430 = vmatprep.subr.bf16.mxu0 %v12534_v27  ;;  %9394 = vmatpush1.bf16.msra.mxu1 %v13251_v29  ;;  %v3301_v27 = vld [vmem:[#allocation11 + $0x608] sm:$0xff] }
 0x3c0   :  { %9395 = vmatprep.subr.bf16.mxu1 %v13236_v33  ;;  %v3309_v29 = vld [vmem:[#allocation11 + $0x648] sm:$0xff]  ;;  %v4012_v33 = vld [vmem:[#allocation11 + $0x1c40] sm:$0xff] }
 0x3c1   :  { %v12662_v37 = vcombine.high %v3301_v27, %v3309_v29  ;;  %v13364_v45 = vcombine.high %v4004_v30, %v4012_v33  ;;  %v12661_v47 = vcombine.low %v3301_v27, %v3309_v29  ;;  %v3725_v15 = vld [vmem:[#allocation11 + $0x1348] sm:$0xff] }
 0x3c2   :  { %9431 = vmatpush1.bf16.msra.mxu0 %v12533_v41  ;;  %v13379_v41 = vcombine.low %v4020_v22, %v4028_v23  ;;  %v13078_v34 = vcombine.high %v3717_v14, %v3725_v15  ;;  %v3701_v22 = vld [vmem:[#allocation11 + $0x1288] sm:$0xff] }
 0x3c3   :  { %9432 = vmatprep.subr.bf16.mxu0 %v12518_v43  ;;  %9396 = vmatpush1.bf16.msra.mxu1 %v13235_v52  ;;  %v3285_v43 = vld [vmem:[#allocation11 + $0x588] sm:$0xff] }
 0x3c4   :  { %9397 = vmatprep.subr.bf16.mxu1 %v13476_v46  ;;  %v3293_v52 = vld [vmem:[#allocation11 + $0x5c8] sm:$0xff] }
 0x3c5   :  { %v3485_v46 = vld [vmem:[#allocation11 + $0xbc8] sm:$0xff]  ;;  %v12646_v3 = vcombine.high %v3285_v43, %v3293_v52  ;;  %v12645_v57 = vcombine.low %v3285_v43, %v3293_v52 }
 0x3c6   :  { %9433 = vmatpush1.bf16.msra.mxu0 %v12517_v58  ;;  %v13363_v58 = vcombine.low %v4004_v30, %v4012_v33  ;;  %v12838_v6 = vcombine.high %v3477_v38, %v3485_v46  ;;  %v3709_v23 = vld [vmem:[#allocation11 + $0x12c8] sm:$0xff] }
 0x3c7   :  { %9434 = vmatprep.subr.bf16.mxu0 %v12502_v53  ;;  %9398 = vmatpush2.bf16.msra.mxu1 %v13475_v54  ;;  %v3269_v53 = vld [vmem:[#allocation11 + $0x508] sm:$0xff]  ;;  %v13062_v27 = vcombine.high %v3701_v22, %v3709_v23 }
 0x3c8   :  { %9399 = vmatprep.subr.bf16.mxu1 %v13460_v60  ;;  %v3277_v54 = vld [vmem:[#allocation11 + $0x548] sm:$0xff] }
 0x3c9   :  { %v12630_v60 = vcombine.high %v3269_v53, %v3277_v54  ;;  %v3413_v29 = vld [vmem:[#allocation11 + $0x988] sm:$0xff] }
 0x3ca   :  { %9435 = vmatpush1.bf16.msra.mxu0 %v12501_v63  ;;  %v12629_v63 = vcombine.low %v3269_v53, %v3277_v54  ;;  %v3685_v30 = vld [vmem:[#allocation11 + $0x1208] sm:$0xff] }
 0x3cb   :  { %9436 = vmatprep.subr.bf16.mxu0 %v12486_v11  ;;  %9400 = vmatpush2.bf16.msra.mxu1 %v13459_v13  ;;  %v12614_v13 = vcombine.high %v3253_v61, %v3261_v62  ;;  %v3693_v33 = vld [vmem:[#allocation11 + $0x1248] sm:$0xff] }
 0x3cc   :  { %9401 = vmatprep.subr.bf16.mxu1 %v13444_v1  ;;  %v13046_v43 = vcombine.high %v3685_v30, %v3693_v33  ;;  %v3397_v52 = vld [vmem:[#allocation11 + $0x908] sm:$0xff] }
 0x3cd   :  { %v3381_v54 = vld [vmem:[#allocation11 + $0x888] sm:$0xff] }
 0x3ce   :  { %9437 = vmatpush1.bf16.msra.mxu0 %v12485_v20  ;;  %v12598_v20 = vcombine.high %v3237_v5, %v3245_v10  ;;  %v3373_v5 = vld [vmem:[#allocation11 + $0x848] sm:$0xff] }
 0x3cf   :  { %9438 = vmatprep.subr.bf16.mxu0 %v12470_v56  ;;  %9402 = vmatpush2.bf16.msra.mxu1 %v13443_v2  ;;  %v3461_v56 = vld [vmem:[#allocation11 + $0xb08] sm:$0xff] }
 0x3d0   :  { %9403 = vmatprep.subr.bf16.mxu1 %v13428_v50  ;;  %v3469_v2 = vld [vmem:[#allocation11 + $0xb48] sm:$0xff] }
 0x3d1   :  { %v3741_v50 = vld [vmem:[#allocation11 + $0x13c8] sm:$0xff] }
 0x3d2   :  { %9439 = vmatpush1.bf16.msra.mxu0 %v12469_v28  ;;  %v12837_v28 = vcombine.low %v3477_v38, %v3485_v46  ;;  %v13094_v8 = vcombine.high %v3733_v49, %v3741_v50  ;;  %v3669_v38 = vld [vmem:[#allocation11 + $0x1188] sm:$0xff] }
 0x3d3   :  { %9440 = vmatprep.subr.bf16.mxu0 %v12710_v26  ;;  %9404 = vmatpush2.bf16.msra.mxu1 %v13427_v7  ;;  %v12822_v7 = vcombine.high %v3461_v56, %v3469_v2  ;;  %v3677_v46 = vld [vmem:[#allocation11 + $0x11c8] sm:$0xff] }
 0x3d4   :  { %9405 = vmatprep.subr.bf16.mxu1 %v13412_v9  ;;  %v3453_v9 = vld [vmem:[#allocation11 + $0xac8] sm:$0xff]  ;;  %v13030_v53 = vcombine.high %v3669_v38, %v3677_v46  ;;  %v13029_v62 = vcombine.low %v3669_v38, %v3677_v46 }
 0x3d5   :  { %v3637_v10 = vld [vmem:[#allocation11 + $0x1088] sm:$0xff] }
 0x3d6   :  { %9441 = vmatpush2.bf16.msra.mxu0 %v12709_v16  ;;  %v12821_v16 = vcombine.low %v3461_v56, %v3469_v2  ;;  %v3605_v2 = vld [vmem:[#allocation11 + $0xf88] sm:$0xff] }
 0x3d7   :  { %9442 = vmatprep.subr.bf16.mxu0 %v12694_v19  ;;  %9406 = vmatpush2.bf16.msra.mxu1 %v13411_v35  ;;  %v13093_v19 = vcombine.low %v3733_v49, %v3741_v50  ;;  %v12806_v35 = vcombine.high %v3445_v31, %v3453_v9  ;;  %v3621_v49 = vld [vmem:[#allocation11 + $0x1008] sm:$0xff] }
 0x3d8   :  { %9407 = vmatprep.subr.bf16.mxu1 %v13396_v36  ;;  %v3437_v36 = vld [vmem:[#allocation11 + $0xa48] sm:$0xff] }
 0x3d9   :  { %v3629_v50 = vld [vmem:[#allocation11 + $0x1048] sm:$0xff] }
 0x3da   :  { %9443 = vmatpush2.bf16.msra.mxu0 %v12693_v24  ;;  %v12805_v24 = vcombine.low %v3445_v31, %v3453_v9  ;;  %v3589_v31 = vld [vmem:[#allocation11 + $0xf08] sm:$0xff] }
 0x3db   :  { %9444 = vmatprep.subr.bf16.mxu0 %v12678_v25  ;;  %9408 = vmatpush2.bf16.msra.mxu1 %v13395_v42  ;;  %v13077_v25 = vcombine.low %v3717_v14, %v3725_v15  ;;  %v12790_v42 = vcombine.high %v3429_v21, %v3437_v36  ;;  %v3597_v9 = vld [vmem:[#allocation11 + $0xf48] sm:$0xff] }
 0x3dc   :  { %9409 = vmatprep.subr.bf16.mxu1 %v13380_v32  ;;  %v3421_v32 = vld [vmem:[#allocation11 + $0x9c8] sm:$0xff] }
 0x3dd   :  { %v3861_v14 = vld [vmem:[#allocation11 + $0x1788] sm:$0xff] }
 0x3de   :  { %9445 = vmatpush2.bf16.msra.mxu0 %v12677_v39  ;;  %v12789_v39 = vcombine.low %v3429_v21, %v3437_v36  ;;  %v3869_v15 = vld [vmem:[#allocation11 + $0x17c8] sm:$0xff] }
 0x3df   :  { %9446 = vmatprep.subr.bf16.mxu0 %v12662_v37  ;;  %9410 = vmatpush2.bf16.msra.mxu1 %v13379_v41  ;;  %v13061_v37 = vcombine.low %v3701_v22, %v3709_v23  ;;  %v12774_v41 = vcombine.high %v3413_v29, %v3421_v32  ;;  %v13222_v21 = vcombine.high %v3861_v14, %v3869_v15  ;;  %v3581_v36 = vld [vmem:[#allocation11 + $0xec8] sm:$0xff] }
 0x3e0   :  { %9411 = vmatprep.subr.bf16.mxu1 %v13364_v45  ;;  %v3405_v45 = vld [vmem:[#allocation11 + $0x948] sm:$0xff] }
 0x3e1   :  { %v12757_v61 = vcombine.low %v3397_v52, %v3405_v45  ;;  %v3845_v22 = vld [vmem:[#allocation11 + $0x1708] sm:$0xff] }
 0x3e2   :  { %9447 = vmatpush2.bf16.msra.mxu0 %v12661_v47  ;;  %v12773_v47 = vcombine.low %v3413_v29, %v3421_v32  ;;  %v3853_v23 = vld [vmem:[#allocation11 + $0x1748] sm:$0xff] }
 0x3e3   :  { %9448 = vmatprep.subr.bf16.mxu0 %v12646_v3  ;;  %9412 = vmatpush2.bf16.msra.mxu1 %v13363_v58  ;;  %v13045_v3 = vcombine.low %v3685_v30, %v3693_v33  ;;  %v12758_v58 = vcombine.high %v3397_v52, %v3405_v45  ;;  %v3557_v29 = vld [vmem:[#allocation11 + $0xe08] sm:$0xff] }
 0x3e4   :  { %9467 = vmatprep.subr.bf16.mxu1 %v12838_v6  ;;  %v3389_v6 = vld [vmem:[#allocation11 + $0x8c8] sm:$0xff] }
 0x3e5   :  { %v3565_v32 = vld [vmem:[#allocation11 + $0xe48] sm:$0xff] }
 0x3e6   :  { %9449 = vmatpush2.bf16.msra.mxu0 %v12645_v57  ;;  %v3653_v57 = vld [vmem:[#allocation11 + $0x1108] sm:$0xff] }
 0x3e7   :  { %9450 = vmatprep.subr.bf16.mxu0 %v12630_v60  ;;  %v3661_v60 = vld [vmem:[#allocation11 + $0x1148] sm:$0xff] }
 0x3e8   :  { %v3091_v11 = vpop.f32.mrf.mxu1  ;;  %v3829_v30 = vld [vmem:[#allocation11 + $0x1688] sm:$0xff] }
 0x3e9   :  { %v3837_v33 = vld [vmem:[#allocation11 + $0x16c8] sm:$0xff] }
 0x3ea   :  { %v3093_v1 = vpop.f32.mrf.mxu1  ;;  %9451 = vmatpush2.bf16.msra.mxu0 %v12629_v63  ;;  %v12742_v63 = vcombine.high %v3381_v54, %v3389_v6  ;;  %v3541_v52 = vld [vmem:[#allocation11 + $0xd88] sm:$0xff] }
 0x3eb   :  { %9452 = vmatprep.subr.bf16.mxu0 %v12614_v13  ;;  %v3365_v13 = vld [vmem:[#allocation11 + $0x808] sm:$0xff] }
 0x3ec   :  { %v3095_v12 = vpop.f32.mrf.mxu1  ;;  %v3549_v45 = vld [vmem:[#allocation11 + $0xdc8] sm:$0xff] }
 0x3ed   :  { %v14479_v26 = vpack.c.bf16 %v3095_v12, %v3091_v11  ;;  %v13014_v11 = vcombine.high %v3653_v57, %v3661_v60  ;;  %v13013_v12 = vcombine.low %v3653_v57, %v3661_v60  ;;  %v3813_v38 = vld [vmem:[#allocation11 + $0x1608] sm:$0xff] }
 0x3ee   :  { %v3097_v18 = vpop.f32.mrf.mxu1  ;;  %9453 = vmatpush2.bf16.msra.mxu0 %v12613_v17  ;;  %v12741_v17 = vcombine.low %v3381_v54, %v3389_v6  ;;  %v3821_v46 = vld [vmem:[#allocation11 + $0x1648] sm:$0xff] }
 0x3ef   :  { %v14477_v51 = vpack.c.bf16 %v3097_v18, %v3093_v1  ;;  %9454 = vmatprep.subr.bf16.mxu0 %v12598_v20  ;;  %v3645_v1 = vld [vmem:[#allocation11 + $0x10c8] sm:$0xff]  ;;  %v12726_v20 = vcombine.high %v3365_v13, %v3373_v5 }
 0x3f0   :  { %v12998_v56 = vcombine.high %v3637_v10, %v3645_v1  ;;  %v3613_v18 = vld [vmem:[#allocation11 + $0xfc8] sm:$0xff] }
 0x3f1   :  { %9413 = vmatprep.mubr.bf16.mxu1 %v14477_v51  ;;  %v3525_v54 = vld [vmem:[#allocation11 + $0xd08] sm:$0xff] }
 0x3f2   :  { %9414 = vmatmul.mubr.bf16.vlgmr.msra.gmra.mxu1 %v14479_v26  ;;  %9455 = vmatpush2.bf16.msra.mxu0 %v12597_v48  ;;  %v12725_v48 = vcombine.low %v3365_v13, %v3373_v5  ;;  %v3533_v6 = vld [vmem:[#allocation11 + $0xd48] sm:$0xff] }
 0x3f3   :  { %9468 = vmatpush1.bf16.msra.mxu1 %v12837_v28  ;;  %9499 = vmatprep.mubr.bf16.mxu1 %v14463_v55  ;;  %v12997_v28 = vcombine.low %v3637_v10, %v3645_v1  ;;  %v3797_v57 = vld [vmem:[#allocation11 + $0x1588] sm:$0xff] }
 0x3f4   :  { %9469 = vmatprep.subr.bf16.mxu1 %v12822_v7  ;;  %9510 = vmatprep.subr.bf16.mxu0 %v13094_v8  ;;  %v12966_v7 = vcombine.high %v3605_v2, %v3613_v18  ;;  %v12982_v8 = vcombine.high %v3621_v49, %v3629_v50  ;;  %v3805_v60 = vld [vmem:[#allocation11 + $0x15c8] sm:$0xff] }
 0x3f5   :  { %9457 = vmatmul.mubr.bf16.vlgmr.msra.gmra.mxu0 %v14452_v59  ;;  %v3509_v13 = vld [vmem:[#allocation11 + $0xc88] sm:$0xff] }
 0x3f6   :  { %9511 = vmatpush1.bf16.msra.mxu0 %v13093_v19  ;;  %9542 = vmatprep.mubr.bf16.mxu0 %v14472_v4  ;;  %v12981_v19 = vcombine.low %v3621_v49, %v3629_v50  ;;  %v3517_v5 = vld [vmem:[#allocation11 + $0xcc8] sm:$0xff] }
 0x3f7   :  { %9470 = vmatpush1.bf16.msra.mxu1 %v12821_v16  ;;  %9512 = vmatprep.subr.bf16.mxu0 %v13078_v34  ;;  %v12965_v16 = vcombine.low %v3605_v2, %v3613_v18  ;;  %v3573_v34 = vld [vmem:[#allocation11 + $0xe88] sm:$0xff] }
 0x3f8   :  { %9471 = vmatprep.subr.bf16.mxu1 %v12806_v35  ;;  %v12950_v35 = vcombine.high %v3589_v31, %v3597_v9  ;;  %v3781_v10 = vld [vmem:[#allocation11 + $0x1508] sm:$0xff] }
 0x3f9   :  { %v3789_v1 = vld [vmem:[#allocation11 + $0x1548] sm:$0xff] }
 0x3fa   :  { %9513 = vmatpush1.bf16.msra.mxu0 %v13077_v25  ;;  %v13221_v25 = vcombine.low %v3861_v14, %v3869_v15  ;;  %v3493_v2 = vld [vmem:[#allocation11 + $0xc08] sm:$0xff] }
 0x3fb   :  { %9472 = vmatpush1.bf16.msra.mxu1 %v12805_v24  ;;  %9514 = vmatprep.subr.bf16.mxu0 %v13062_v27  ;;  %v12949_v24 = vcombine.low %v3589_v31, %v3597_v9  ;;  %v13206_v27 = vcombine.high %v3845_v22, %v3853_v23  ;;  %v3501_v18 = vld [vmem:[#allocation11 + $0xc48] sm:$0xff] }
 0x3fc   :  { %9473 = vmatprep.subr.bf16.mxu1 %v12790_v42  ;;  %v12934_v42 = vcombine.high %v3573_v34, %v3581_v36  ;;  %v3765_v49 = vld [vmem:[#allocation11 + $0x1488] sm:$0xff] }
 0x3fd   :  { %v3773_v50 = vld [vmem:[#allocation11 + $0x14c8] sm:$0xff] }
 0x3fe   :  { %9515 = vmatpush1.bf16.msra.mxu0 %v13061_v37  ;;  %v13205_v37 = vcombine.low %v3845_v22, %v3853_v23  ;;  %v3749_v31 = vld [vmem:[#allocation11 + $0x1408] sm:$0xff]  ;;  %v3222_v22 = vld [vmem:[#allocation11 + $0x390] sm:$0xff] }
 0x3ff   :  { %9474 = vmatpush1.bf16.msra.mxu1 %v12789_v39  ;;  %9516 = vmatprep.subr.bf16.mxu0 %v13046_v43  ;;  %v12933_v39 = vcombine.low %v3573_v34, %v3581_v36  ;;  %v13190_v43 = vcombine.high %v3829_v30, %v3837_v33  ;;  %v3757_v9 = vld [vmem:[#allocation11 + $0x1448] sm:$0xff]  ;;  %v3230_v23 = vld [vmem:[#allocation11 + $0x3d0] sm:$0xff] }
 0x400   :  { %9475 = vmatprep.subr.bf16.mxu1 %v12774_v41  ;;  %v12918_v41 = vcombine.high %v3557_v29, %v3565_v32  ;;  %v3989_v14 = vld [vmem:[#allocation11 + $0x1b88] sm:$0xff] }
 0x401   :  { %v3997_v15 = vld [vmem:[#allocation11 + $0x1bc8] sm:$0xff] }
 0x402   :  { %9517 = vmatpush1.bf16.msra.mxu0 %v13045_v3  ;;  %v13189_v3 = vcombine.low %v3829_v30, %v3837_v33  ;;  %v3973_v34 = vld [vmem:[#allocation11 + $0x1b08] sm:$0xff]  ;;  %v3206_v30 = vld [vmem:[#allocation11 + $0x310] sm:$0xff] }
 0x403   :  { %9476 = vmatpush1.bf16.msra.mxu1 %v12773_v47  ;;  %9518 = vmatprep.subr.bf16.mxu0 %v13030_v53  ;;  %v12917_v47 = vcombine.low %v3557_v29, %v3565_v32  ;;  %v13174_v53 = vcombine.high %v3813_v38, %v3821_v46  ;;  %v3981_v36 = vld [vmem:[#allocation11 + $0x1b48] sm:$0xff]  ;;  %v3214_v33 = vld [vmem:[#allocation11 + $0x350] sm:$0xff] }
 0x404   :  { %9477 = vmatprep.subr.bf16.mxu1 %v12758_v58  ;;  %v12902_v58 = vcombine.high %v3541_v52, %v3549_v45  ;;  %v3957_v29 = vld [vmem:[#allocation11 + $0x1a88] sm:$0xff] }
 0x405   :  { %v3965_v32 = vld [vmem:[#allocation11 + $0x1ac8] sm:$0xff] }
 0x406   :  { %9519 = vmatpush1.bf16.msra.mxu0 %v13029_v62  ;;  %v13173_v62 = vcombine.low %v3813_v38, %v3821_v46  ;;  %v3190_v38 = vld [vmem:[#allocation11 + $0x290] sm:$0xff] }
 0x407   :  { %9478 = vmatpush1.bf16.msra.mxu1 %v12757_v61  ;;  %9520 = vmatprep.subr.bf16.mxu0 %v13014_v11  ;;  %v12901_v61 = vcombine.low %v3541_v52, %v3549_v45  ;;  %v13158_v11 = vcombine.high %v3797_v57, %v3805_v60  ;;  %v12568_v52 = vcombine.high %v3206_v30, %v3214_v33  ;;  %v3949_v45 = vld [vmem:[#allocation11 + $0x1a48] sm:$0xff]  ;;  %v3198_v46 = vld [vmem:[#allocation11 + $0x2d0] sm:$0xff] }
 0x408   :  { %9479 = vmatprep.subr.bf16.mxu1 %v12742_v63  ;;  %v12886_v63 = vcombine.high %v3525_v54, %v3533_v6 }
 0x40a   :  { %9521 = vmatpush1.bf16.msra.mxu0 %v13013_v12  ;;  %v13157_v12 = vcombine.low %v3797_v57, %v3805_v60  ;;  %v3174_v57 = vld [vmem:[#allocation11 + $0x210] sm:$0xff] }
 0x40b   :  { %9480 = vmatpush1.bf16.msra.mxu1 %v12741_v17  ;;  %9522 = vmatprep.subr.bf16.mxu0 %v12998_v56  ;;  %v12885_v17 = vcombine.low %v3525_v54, %v3533_v6  ;;  %v13142_v56 = vcombine.high %v3781_v10, %v3789_v1  ;;  %v3925_v54 = vld [vmem:[#allocation11 + $0x1988] sm:$0xff]  ;;  %v3182_v60 = vld [vmem:[#allocation11 + $0x250] sm:$0xff] }
 0x40c   :  { %9481 = vmatprep.subr.bf16.mxu1 %v12726_v20  ;;  %v12870_v20 = vcombine.high %v3509_v13, %v3517_v5  ;;  %v3933_v6 = vld [vmem:[#allocation11 + $0x19c8] sm:$0xff] }
 0x40e   :  { %9523 = vmatpush1.bf16.msra.mxu0 %v12997_v28  ;;  %v13141_v28 = vcombine.low %v3781_v10, %v3789_v1  ;;  %v3158_v10 = vld [vmem:[#allocation11 + $0x190] sm:$0xff] }
 0x40f   :  { %9482 = vmatpush1.bf16.msra.mxu1 %v12725_v48  ;;  %9524 = vmatprep.subr.bf16.mxu0 %v12982_v8  ;;  %v12869_v48 = vcombine.low %v3509_v13, %v3517_v5  ;;  %v13126_v8 = vcombine.high %v3765_v49, %v3773_v50  ;;  %v3909_v13 = vld [vmem:[#allocation11 + $0x1908] sm:$0xff]  ;;  %v3166_v1 = vld [vmem:[#allocation11 + $0x1d0] sm:$0xff] }
 0x410   :  { %9483 = vmatprep.subr.bf16.mxu1 %v12966_v7  ;;  %v12854_v7 = vcombine.high %v3493_v2, %v3501_v18  ;;  %v3917_v5 = vld [vmem:[#allocation11 + $0x1948] sm:$0xff] }
 0x412   :  { %9525 = vmatpush1.bf16.msra.mxu0 %v12981_v19  ;;  %v13125_v19 = vcombine.low %v3765_v49, %v3773_v50  ;;  %v3142_v49 = vld [vmem:[#allocation11 + $0x110] sm:$0xff] }
 0x413   :  { %9484 = vmatpush2.bf16.msra.mxu1 %v12965_v16  ;;  %9526 = vmatprep.subr.bf16.mxu0 %v13222_v21  ;;  %v12853_v16 = vcombine.low %v3493_v2, %v3501_v18  ;;  %v13350_v21 = vcombine.high %v3989_v14, %v3997_v15  ;;  %v3893_v2 = vld [vmem:[#allocation11 + $0x1888] sm:$0xff]  ;;  %v3150_v50 = vld [vmem:[#allocation11 + $0x150] sm:$0xff] }
 0x414   :  { %9485 = vmatprep.subr.bf16.mxu1 %v12950_v35  ;;  %v13110_v35 = vcombine.high %v3749_v31, %v3757_v9  ;;  %v3901_v18 = vld [vmem:[#allocation11 + $0x18c8] sm:$0xff] }
 0x416   :  { %9527 = vmatpush2.bf16.msra.mxu0 %v13221_v25  ;;  %v13349_v25 = vcombine.low %v3989_v14, %v3997_v15  ;;  %v3126_v14 = vld [vmem:[#allocation11 + $0x90] sm:$0xff] }
 0x417   :  { %9486 = vmatpush2.bf16.msra.mxu1 %v12949_v24  ;;  %9528 = vmatprep.subr.bf16.mxu0 %v13206_v27  ;;  %v13109_v24 = vcombine.low %v3749_v31, %v3757_v9  ;;  %v12584_v27 = vcombine.high %v3222_v22, %v3230_v23  ;;  %v3877_v31 = vld [vmem:[#allocation11 + $0x1808] sm:$0xff]  ;;  %v3134_v15 = vld [vmem:[#allocation11 + $0xd0] sm:$0xff] }
 0x418   :  { %9487 = vmatprep.subr.bf16.mxu1 %v12934_v42  ;;  %v13334_v42 = vcombine.high %v3973_v34, %v3981_v36  ;;  %v3885_v9 = vld [vmem:[#allocation11 + $0x1848] sm:$0xff] }
 0x41a   :  { %9529 = vmatpush2.bf16.msra.mxu0 %v13205_v37  ;;  %v12583_v37 = vcombine.low %v3222_v22, %v3230_v23  ;;  %v3110_v22 = vld [vmem:[#allocation11 + $0x10] sm:$0xff] }
 0x41b   :  { %9488 = vmatpush2.bf16.msra.mxu1 %v12933_v39  ;;  %9530 = vmatprep.subr.bf16.mxu0 %v13190_v43  ;;  %v13333_v39 = vcombine.low %v3973_v34, %v3981_v36  ;;  %v3941_v43 = vld [vmem:[#allocation11 + $0x1a08] sm:$0xff]  ;;  %v3118_v23 = vld [vmem:[#allocation11 + $0x50] sm:$0xff] }
 0x41c   :  { %9489 = vmatprep.subr.bf16.mxu1 %v12918_v41  ;;  %v13318_v41 = vcombine.high %v3957_v29, %v3965_v32  ;;  %v4117_v34 = vld [vmem:[#allocation11 + $0x1f88] sm:$0xff] }
 0x41d   :  { %v4125_v36 = vld [vmem:[#allocation11 + $0x1fc8] sm:$0xff] }
 0x41e   :  { %9531 = vmatpush2.bf16.msra.mxu0 %v13189_v3  ;;  %v12567_v3 = vcombine.low %v3206_v30, %v3214_v33  ;;  %v3350_v30 = vld [vmem:[#allocation11 + $0x790] sm:$0xff] }
 0x41f   :  { %9490 = vmatpush2.bf16.msra.mxu1 %v12917_v47  ;;  %9532 = vmatprep.subr.bf16.mxu0 %v13174_v53  ;;  %v13317_v47 = vcombine.low %v3957_v29, %v3965_v32  ;;  %v12552_v53 = vcombine.high %v3190_v38, %v3198_v46  ;;  %v4101_v29 = vld [vmem:[#allocation11 + $0x1f08] sm:$0xff]  ;;  %v3358_v33 = vld [vmem:[#allocation11 + $0x7d0] sm:$0xff] }
 0x420   :  { %9491 = vmatprep.subr.bf16.mxu1 %v12902_v58  ;;  %v13302_v58 = vcombine.high %v3941_v43, %v3949_v45  ;;  %v4109_v32 = vld [vmem:[#allocation11 + $0x1f48] sm:$0xff] }
 0x422   :  { %9533 = vmatpush2.bf16.msra.mxu0 %v13173_v62  ;;  %v12551_v62 = vcombine.low %v3190_v38, %v3198_v46  ;;  %v3334_v38 = vld [vmem:[#allocation11 + $0x710] sm:$0xff] }
 0x423   :  { %9492 = vmatpush2.bf16.msra.mxu1 %v12901_v61  ;;  %9534 = vmatprep.subr.bf16.mxu0 %v13158_v11  ;;  %v13301_v61 = vcombine.low %v3941_v43, %v3949_v45  ;;  %v12536_v11 = vcombine.high %v3174_v57, %v3182_v60  ;;  %v12712_v43 = vcombine.high %v3350_v30, %v3358_v33  ;;  %v4093_v45 = vld [vmem:[#allocation11 + $0x1ec8] sm:$0xff]  ;;  %v3342_v46 = vld [vmem:[#allocation11 + $0x750] sm:$0xff] }
 0x424   :  { %9493 = vmatprep.subr.bf16.mxu1 %v12886_v63  ;;  %v13286_v63 = vcombine.high %v3925_v54, %v3933_v6 }
 0x426   :  { %9535 = vmatpush2.bf16.msra.mxu0 %v13157_v12  ;;  %v12535_v12 = vcombine.low %v3174_v57, %v3182_v60  ;;  %v3318_v57 = vld [vmem:[#allocation11 + $0x690] sm:$0xff] }
 0x427   :  { %9494 = vmatpush2.bf16.msra.mxu1 %v12885_v17  ;;  %9536 = vmatprep.subr.bf16.mxu0 %v13142_v56  ;;  %v13285_v17 = vcombine.low %v3925_v54, %v3933_v6  ;;  %v12520_v56 = vcombine.high %v3158_v10, %v3166_v1  ;;  %v4069_v54 = vld [vmem:[#allocation11 + $0x1e08] sm:$0xff]  ;;  %v3326_v60 = vld [vmem:[#allocation11 + $0x6d0] sm:$0xff] }
 0x428   :  { %9495 = vmatprep.subr.bf16.mxu1 %v12870_v20  ;;  %v13270_v20 = vcombine.high %v3909_v13, %v3917_v5  ;;  %v4077_v6 = vld [vmem:[#allocation11 + $0x1e48] sm:$0xff] }
 0x42a   :  { %9537 = vmatpush2.bf16.msra.mxu0 %v13141_v28  ;;  %v12519_v28 = vcombine.low %v3158_v10, %v3166_v1  ;;  %v3302_v10 = vld [vmem:[#allocation11 + $0x610] sm:$0xff] }
 0x42b   :  { %9496 = vmatpush2.bf16.msra.mxu1 %v12869_v48  ;;  %9538 = vmatprep.subr.bf16.mxu0 %v13126_v8  ;;  %v13269_v48 = vcombine.low %v3909_v13, %v3917_v5  ;;  %v12504_v8 = vcombine.high %v3142_v49, %v3150_v50  ;;  %v4053_v13 = vld [vmem:[#allocation11 + $0x1d88] sm:$0xff]  ;;  %v3310_v1 = vld [vmem:[#allocation11 + $0x650] sm:$0xff] }
 0x42c   :  { %9497 = vmatprep.subr.bf16.mxu1 %v12854_v7  ;;  %v13254_v7 = vcombine.high %v3893_v2, %v3901_v18  ;;  %v4061_v5 = vld [vmem:[#allocation11 + $0x1dc8] sm:$0xff] }
 0x42e   :  { %9539 = vmatpush2.bf16.msra.mxu0 %v13125_v19  ;;  %v12503_v19 = vcombine.low %v3142_v49, %v3150_v50  ;;  %v3286_v49 = vld [vmem:[#allocation11 + $0x590] sm:$0xff] }
 0x42f   :  { %9498 = vmatpush2.bf16.msra.mxu1 %v12853_v16  ;;  %9540 = vmatprep.subr.bf16.mxu0 %v13110_v35  ;;  %v13253_v16 = vcombine.low %v3893_v2, %v3901_v18  ;;  %v13238_v35 = vcombine.high %v3877_v31, %v3885_v9  ;;  %v4037_v2 = vld [vmem:[#allocation11 + $0x1d08] sm:$0xff]  ;;  %v3294_v50 = vld [vmem:[#allocation11 + $0x5d0] sm:$0xff] }
 0x430   :  { %9553 = vmatprep.subr.bf16.mxu1 %v13350_v21  ;;  %v12488_v21 = vcombine.high %v3126_v14, %v3134_v15  ;;  %v4045_v18 = vld [vmem:[#allocation11 + $0x1d48] sm:$0xff] }
 0x432   :  { %9500 = vmatmul.mubr.bf16.vlgmr.msra.gmra.mxu1 %v14461_v0  ;;  %9541 = vmatpush2.bf16.msra.mxu0 %v13109_v24  ;;  %v13237_v24 = vcombine.low %v3877_v31, %v3885_v9  ;;  %v4021_v31 = vld [vmem:[#allocation11 + $0x1c88] sm:$0xff] }
 0x433   :  { %9554 = vmatpush1.bf16.msra.mxu1 %v13349_v25  ;;  %9585 = vmatprep.mubr.bf16.mxu1 %v14477_v51  ;;  %v12487_v25 = vcombine.low %v3126_v14, %v3134_v15  ;;  %v4029_v9 = vld [vmem:[#allocation11 + $0x1cc8] sm:$0xff]  ;;  %v3270_v14 = vld [vmem:[#allocation11 + $0x510] sm:$0xff] }
 0x434   :  { %9555 = vmatprep.subr.bf16.mxu1 %v13334_v42  ;;  %9596 = vmatprep.subr.bf16.mxu0 %v12584_v27  ;;  %v13478_v42 = vcombine.high %v4117_v34, %v4125_v36  ;;  %v12472_v27 = vcombine.high %v3110_v22, %v3118_v23  ;;  %v3278_v15 = vld [vmem:[#allocation11 + $0x550] sm:$0xff] }
 0x435   :  { %9543 = vmatmul.mubr.bf16.vlgmr.msra.gmra.mxu0 %v14470_v40 }
 0x436   :  { %9597 = vmatpush1.bf16.msra.mxu0 %v12583_v37  ;;  %9628 = vmatprep.mubr.bf16.mxu0 %v14454_v44  ;;  %v12471_v37 = vcombine.low %v3110_v22, %v3118_v23  ;;  %v3254_v22 = vld [vmem:[#allocation11 + $0x490] sm:$0xff] }
 0x437   :  { %9556 = vmatpush1.bf16.msra.mxu1 %v13333_v39  ;;  %9598 = vmatprep.subr.bf16.mxu0 %v12568_v52  ;;  %v13477_v39 = vcombine.low %v4117_v34, %v4125_v36  ;;  %v4085_v52 = vld [vmem:[#allocation11 + $0x1e88] sm:$0xff]  ;;  %v3262_v23 = vld [vmem:[#allocation11 + $0x4d0] sm:$0xff] }
 0x438   :  { %9557 = vmatprep.subr.bf16.mxu1 %v13318_v41  ;;  %v13462_v41 = vcombine.high %v4101_v29, %v4109_v32  ;;  %v4005_v34 = vld [vmem:[#allocation11 + $0x1c08] sm:$0xff] }
 0x439   :  { %v4013_v36 = vld [vmem:[#allocation11 + $0x1c48] sm:$0xff] }
 0x43a   :  { %9599 = vmatpush1.bf16.msra.mxu0 %v12567_v3  ;;  %v12711_v3 = vcombine.low %v3350_v30, %v3358_v33  ;;  %v3478_v30 = vld [vmem:[#allocation11 + $0xb90] sm:$0xff] }
 0x43b   :  { %9558 = vmatpush1.bf16.msra.mxu1 %v13317_v47  ;;  %9600 = vmatprep.subr.bf16.mxu0 %v12552_v53  ;;  %v13461_v47 = vcombine.low %v4101_v29, %v4109_v32  ;;  %v12696_v53 = vcombine.high %v3334_v38, %v3342_v46  ;;  %v3238_v29 = vld [vmem:[#allocation11 + $0x410] sm:$0xff] }
 0x43c   :  { %9559 = vmatprep.subr.bf16.mxu1 %v13302_v58  ;;  %v13446_v58 = vcombine.high %v4085_v52, %v4093_v45  ;;  %v3246_v32 = vld [vmem:[#allocation11 + $0x450] sm:$0xff] }
 0x43d   :  { %v3486_v33 = vld [vmem:[#allocation11 + $0xbd0] sm:$0xff] }
 0x43e   :  { %9601 = vmatpush1.bf16.msra.mxu0 %v12551_v62  ;;  %v12695_v62 = vcombine.low %v3334_v38, %v3342_v46  ;;  %v3734_v38 = vld [vmem:[#allocation11 + $0x1390] sm:$0xff] }
 0x43f   :  { %9560 = vmatpush1.bf16.msra.mxu1 %v13301_v61  ;;  %9602 = vmatprep.subr.bf16.mxu0 %v12536_v11  ;;  %v13445_v61 = vcombine.low %v4085_v52, %v4093_v45  ;;  %v12680_v11 = vcombine.high %v3318_v57, %v3326_v60  ;;  %v3462_v52 = vld [vmem:[#allocation11 + $0xb10] sm:$0xff] }
 0x440   :  { %9561 = vmatprep.subr.bf16.mxu1 %v13286_v63  ;;  %v13430_v63 = vcombine.high %v4069_v54, %v4077_v6  ;;  %v3470_v45 = vld [vmem:[#allocation11 + $0xb50] sm:$0xff] }
 0x441   :  { %v3742_v46 = vld [vmem:[#allocation11 + $0x13d0] sm:$0xff] }
 0x442   :  { %9603 = vmatpush1.bf16.msra.mxu0 %v12535_v12  ;;  %v12679_v12 = vcombine.low %v3318_v57, %v3326_v60  ;;  %v3718_v57 = vld [vmem:[#allocation11 + $0x1310] sm:$0xff] }
 0x443   :  { %9562 = vmatpush1.bf16.msra.mxu1 %v13285_v17  ;;  %9604 = vmatprep.subr.bf16.mxu0 %v12520_v56  ;;  %v13429_v17 = vcombine.low %v4069_v54, %v4077_v6  ;;  %v12664_v56 = vcombine.high %v3302_v10, %v3310_v1  ;;  %v3446_v54 = vld [vmem:[#allocation11 + $0xa90] sm:$0xff] }
 0x444   :  { %9563 = vmatprep.subr.bf16.mxu1 %v13270_v20  ;;  %v13414_v20 = vcombine.high %v4053_v13, %v4061_v5  ;;  %v3454_v6 = vld [vmem:[#allocation11 + $0xad0] sm:$0xff] }
 0x445   :  { %v3726_v60 = vld [vmem:[#allocation11 + $0x1350] sm:$0xff] }
 0x446   :  { %9605 = vmatpush1.bf16.msra.mxu0 %v12519_v28  ;;  %v12663_v28 = vcombine.low %v3302_v10, %v3310_v1  ;;  %v3702_v10 = vld [vmem:[#allocation11 + $0x1290] sm:$0xff] }
 0x447   :  { %9564 = vmatpush1.bf16.msra.mxu1 %v13269_v48  ;;  %9606 = vmatprep.subr.bf16.mxu0 %v12504_v8  ;;  %v13413_v48 = vcombine.low %v4053_v13, %v4061_v5  ;;  %v12648_v8 = vcombine.high %v3286_v49, %v3294_v50  ;;  %v13080_v13 = vcombine.high %v3718_v57, %v3726_v60  ;;  %v3438_v5 = vld [vmem:[#allocation11 + $0xa50] sm:$0xff] }
 0x448   :  { %9565 = vmatprep.subr.bf16.mxu1 %v13254_v7  ;;  %v13398_v7 = vcombine.high %v4037_v2, %v4045_v18  ;;  %v3710_v1 = vld [vmem:[#allocation11 + $0x12d0] sm:$0xff] }
 0x44a   :  { %9607 = vmatpush1.bf16.msra.mxu0 %v12503_v19  ;;  %v12647_v19 = vcombine.low %v3286_v49, %v3294_v50  ;;  %v3686_v49 = vld [vmem:[#allocation11 + $0x1210] sm:$0xff] }
 0x44b   :  { %9566 = vmatpush1.bf16.msra.mxu1 %v13253_v16  ;;  %9608 = vmatprep.subr.bf16.mxu0 %v12488_v21  ;;  %v13397_v16 = vcombine.low %v4037_v2, %v4045_v18  ;;  %v12632_v21 = vcombine.high %v3270_v14, %v3278_v15  ;;  %v3414_v2 = vld [vmem:[#allocation11 + $0x990] sm:$0xff] }
 0x44c   :  { %9567 = vmatprep.subr.bf16.mxu1 %v13238_v35  ;;  %v13382_v35 = vcombine.high %v4021_v31, %v4029_v9  ;;  %v3422_v18 = vld [vmem:[#allocation11 + $0x9d0] sm:$0xff] }
 0x44d   :  { %v3694_v50 = vld [vmem:[#allocation11 + $0x1250] sm:$0xff] }
 0x44e   :  { %9609 = vmatpush1.bf16.msra.mxu0 %v12487_v25  ;;  %v12631_v25 = vcombine.low %v3270_v14, %v3278_v15  ;;  %v3670_v14 = vld [vmem:[#allocation11 + $0x1190] sm:$0xff] }
 0x44f   :  { %9568 = vmatpush1.bf16.msra.mxu1 %v13237_v24  ;;  %9610 = vmatprep.subr.bf16.mxu0 %v12472_v27  ;;  %v13381_v24 = vcombine.low %v4021_v31, %v4029_v9  ;;  %v12616_v27 = vcombine.high %v3254_v22, %v3262_v23  ;;  %v3398_v31 = vld [vmem:[#allocation11 + $0x910] sm:$0xff] }
 0x450   :  { %9569 = vmatprep.subr.bf16.mxu1 %v13478_v42  ;;  %v13366_v42 = vcombine.high %v4005_v34, %v4013_v36  ;;  %v3406_v9 = vld [vmem:[#allocation11 + $0x950] sm:$0xff] }
 0x451   :  { %v3678_v15 = vld [vmem:[#allocation11 + $0x11d0] sm:$0xff] }
 0x452   :  { %9611 = vmatpush1.bf16.msra.mxu0 %v12471_v37  ;;  %v12615_v37 = vcombine.low %v3254_v22, %v3262_v23  ;;  %v3654_v22 = vld [vmem:[#allocation11 + $0x1110] sm:$0xff] }
 0x453   :  { %9570 = vmatpush2.bf16.msra.mxu1 %v13477_v39  ;;  %9612 = vmatprep.subr.bf16.mxu0 %v12712_v43  ;;  %v13365_v39 = vcombine.low %v4005_v34, %v4013_v36  ;;  %v12840_v43 = vcombine.high %v3478_v30, %v3486_v33  ;;  %v3382_v34 = vld [vmem:[#allocation11 + $0x890] sm:$0xff] }
 0x454   :  { %9571 = vmatprep.subr.bf16.mxu1 %v13462_v41  ;;  %v12600_v41 = vcombine.high %v3238_v29, %v3246_v32  ;;  %v3390_v36 = vld [vmem:[#allocation11 + $0x8d0] sm:$0xff] }
 0x455   :  { %v3662_v23 = vld [vmem:[#allocation11 + $0x1150] sm:$0xff] }
 0x456   :  { %9613 = vmatpush2.bf16.msra.mxu0 %v12711_v3  ;;  %v12839_v3 = vcombine.low %v3478_v30, %v3486_v33  ;;  %v3638_v30 = vld [vmem:[#allocation11 + $0x1090] sm:$0xff] }
 0x457   :  { %9572 = vmatpush2.bf16.msra.mxu1 %v13461_v47  ;;  %9614 = vmatprep.subr.bf16.mxu0 %v12696_v53  ;;  %v12599_v47 = vcombine.low %v3238_v29, %v3246_v32  ;;  %v13096_v53 = vcombine.high %v3734_v38, %v3742_v46  ;;  %v3366_v29 = vld [vmem:[#allocation11 + $0x810] sm:$0xff] }
 0x458   :  { %9573 = vmatprep.subr.bf16.mxu1 %v13446_v58  ;;  %v12824_v58 = vcombine.high %v3462_v52, %v3470_v45  ;;  %v3374_v32 = vld [vmem:[#allocation11 + $0x850] sm:$0xff] }
 0x459   :  { %v3646_v33 = vld [vmem:[#allocation11 + $0x10d0] sm:$0xff] }
 0x45a   :  { %9615 = vmatpush2.bf16.msra.mxu0 %v12695_v62  ;;  %v13095_v62 = vcombine.low %v3734_v38, %v3742_v46  ;;  %v3622_v38 = vld [vmem:[#allocation11 + $0x1010] sm:$0xff] }
 0x45b   :  { %9574 = vmatpush2.bf16.msra.mxu1 %v13445_v61  ;;  %9616 = vmatprep.subr.bf16.mxu0 %v12680_v11  ;;  %v12823_v61 = vcombine.low %v3462_v52, %v3470_v45  ;;  %v3430_v11 = vld [vmem:[#allocation11 + $0xa10] sm:$0xff] }
 0x45c   :  { %9575 = vmatprep.subr.bf16.mxu1 %v13430_v63  ;;  %v12808_v63 = vcombine.high %v3446_v54, %v3454_v6  ;;  %v3606_v52 = vld [vmem:[#allocation11 + $0xf90] sm:$0xff] }
 0x45d   :  { %v3614_v45 = vld [vmem:[#allocation11 + $0xfd0] sm:$0xff] }
 0x45e   :  { %9617 = vmatpush2.bf16.msra.mxu0 %v12679_v12  ;;  %v13079_v12 = vcombine.low %v3718_v57, %v3726_v60  ;;  %v3630_v46 = vld [vmem:[#allocation11 + $0x1050] sm:$0xff] }
 0x45f   :  { %9576 = vmatpush2.bf16.msra.mxu1 %v13429_v17  ;;  %9618 = vmatprep.subr.bf16.mxu0 %v12664_v56  ;;  %v12807_v17 = vcombine.low %v3446_v54, %v3454_v6  ;;  %v13064_v56 = vcombine.high %v3702_v10, %v3710_v1  ;;  %v3590_v54 = vld [vmem:[#allocation11 + $0xf10] sm:$0xff] }
 0x460   :  { %9577 = vmatprep.subr.bf16.mxu1 %v13414_v20  ;;  %v12792_v20 = vcombine.high %v3430_v11, %v3438_v5  ;;  %v3598_v6 = vld [vmem:[#allocation11 + $0xf50] sm:$0xff] }
 0x461   :  { %v3862_v57 = vld [vmem:[#allocation11 + $0x1790] sm:$0xff] }
 0x462   :  { %9619 = vmatpush2.bf16.msra.mxu0 %v12663_v28  ;;  %v13063_v28 = vcombine.low %v3702_v10, %v3710_v1  ;;  %v3870_v60 = vld [vmem:[#allocation11 + $0x17d0] sm:$0xff] }
 0x463   :  { %9578 = vmatpush2.bf16.msra.mxu1 %v13413_v48  ;;  %9620 = vmatprep.subr.bf16.mxu0 %v12648_v8  ;;  %v12791_v48 = vcombine.low %v3430_v11, %v3438_v5  ;;  %v13048_v8 = vcombine.high %v3686_v49, %v3694_v50  ;;  %v13224_v11 = vcombine.high %v3862_v57, %v3870_v60  ;;  %v3582_v5 = vld [vmem:[#allocation11 + $0xed0] sm:$0xff] }
 0x464   :  { %9579 = vmatprep.subr.bf16.mxu1 %v13398_v7  ;;  %v12776_v7 = vcombine.high %v3414_v2, %v3422_v18  ;;  %v3846_v10 = vld [vmem:[#allocation11 + $0x1710] sm:$0xff] }
 0x465   :  { %v3854_v1 = vld [vmem:[#allocation11 + $0x1750] sm:$0xff] }
 0x466   :  { %9621 = vmatpush2.bf16.msra.mxu0 %v12647_v19  ;;  %v13047_v19 = vcombine.low %v3686_v49, %v3694_v50  ;;  %v3830_v49 = vld [vmem:[#allocation11 + $0x1690] sm:$0xff] }
 0x467   :  { %9580 = vmatpush2.bf16.msra.mxu1 %v13397_v16  ;;  %9622 = vmatprep.subr.bf16.mxu0 %v12632_v21  ;;  %v12775_v16 = vcombine.low %v3414_v2, %v3422_v18  ;;  %v13032_v21 = vcombine.high %v3670_v14, %v3678_v15  ;;  %v3558_v2 = vld [vmem:[#allocation11 + $0xe10] sm:$0xff] }
 0x468   :  { %9581 = vmatprep.subr.bf16.mxu1 %v13382_v35  ;;  %v12760_v35 = vcombine.high %v3398_v31, %v3406_v9  ;;  %v3566_v18 = vld [vmem:[#allocation11 + $0xe50] sm:$0xff] }
 0x469   :  { %v3838_v50 = vld [vmem:[#allocation11 + $0x16d0] sm:$0xff] }
 0x46a   :  { %9623 = vmatpush2.bf16.msra.mxu0 %v12631_v25  ;;  %v13031_v25 = vcombine.low %v3670_v14, %v3678_v15  ;;  %v3814_v14 = vld [vmem:[#allocation11 + $0x1610] sm:$0xff] }
 0x46b   :  { %9582 = vmatpush2.bf16.msra.mxu1 %v13381_v24  ;;  %9624 = vmatprep.subr.bf16.mxu0 %v12616_v27  ;;  %v12759_v24 = vcombine.low %v3398_v31, %v3406_v9  ;;  %v13016_v27 = vcombine.high %v3654_v22, %v3662_v23  ;;  %v3542_v31 = vld [vmem:[#allocation11 + $0xd90] sm:$0xff] }
 0x46c   :  { %9583 = vmatprep.subr.bf16.mxu1 %v13366_v42  ;;  %v12744_v42 = vcombine.high %v3382_v34, %v3390_v36  ;;  %v3550_v9 = vld [vmem:[#allocation11 + $0xdd0] sm:$0xff] }
 0x46d   :  { %v3822_v15 = vld [vmem:[#allocation11 + $0x1650] sm:$0xff] }
 0x46e   :  { %9625 = vmatpush2.bf16.msra.mxu0 %v12615_v37  ;;  %v13015_v37 = vcombine.low %v3654_v22, %v3662_v23  ;;  %v3534_v22 = vld [vmem:[#allocation11 + $0xd50] sm:$0xff] }
 0x46f   :  { %9584 = vmatpush2.bf16.msra.mxu1 %v13365_v39  ;;  %9626 = vmatprep.subr.bf16.mxu0 %v12600_v41  ;;  %v12743_v39 = vcombine.low %v3382_v34, %v3390_v36  ;;  %v12728_v41 = vcombine.high %v3366_v29, %v3374_v32  ;;  %v13176_v34 = vcombine.high %v3814_v14, %v3822_v15  ;;  %v3526_v36 = vld [vmem:[#allocation11 + $0xd10] sm:$0xff] }
 0x470   :  { %9639 = vmatprep.subr.bf16.mxu1 %v12840_v43  ;;  %v13000_v43 = vcombine.high %v3638_v30, %v3646_v33  ;;  %v3798_v23 = vld [vmem:[#allocation11 + $0x1590] sm:$0xff] }
 0x472   :  { %9586 = vmatmul.mubr.bf16.vlgmr.msra.gmra.mxu1 %v14479_v26  ;;  %9627 = vmatpush2.bf16.msra.mxu0 %v12599_v47  ;;  %v12727_v47 = vcombine.low %v3366_v29, %v3374_v32  ;;  %v12888_v29 = vcombine.high %v3526_v36, %v3534_v22 }
 0x473   :  { %9640 = vmatpush1.bf16.msra.mxu1 %v12839_v3  ;;  %9671 = vmatprep.mubr.bf16.mxu1 %v14463_v55  ;;  %v12999_v3 = vcombine.low %v3638_v30, %v3646_v33  ;;  %v3510_v30 = vld [vmem:[#allocation11 + $0xc90] sm:$0xff] }
 0x474   :  { %9641 = vmatprep.subr.bf16.mxu1 %v12824_v58  ;;  %9682 = vmatprep.subr.bf16.mxu0 %v13096_v53  ;;  %v12968_v58 = vcombine.high %v3606_v52, %v3614_v45  ;;  %v12984_v53 = vcombine.high %v3622_v38, %v3630_v46  ;;  %v3518_v33 = vld [vmem:[#allocation11 + $0xcd0] sm:$0xff] }
 0x475   :  { %9629 = vmatmul.mubr.bf16.vlgmr.msra.gmra.mxu0 %v14452_v59 }
 0x476   :  { %9683 = vmatpush1.bf16.msra.mxu0 %v13095_v62  ;;  %9714 = vmatprep.mubr.bf16.mxu0 %v14472_v4  ;;  %v12983_v62 = vcombine.low %v3622_v38, %v3630_v46  ;;  %v12872_v38 = vcombine.high %v3510_v30, %v3518_v33 }
 0x477   :  { %9642 = vmatpush1.bf16.msra.mxu1 %v12823_v61  ;;  %9684 = vmatprep.subr.bf16.mxu0 %v13080_v13  ;;  %v12967_v61 = vcombine.low %v3606_v52, %v3614_v45  ;;  %v3574_v13 = vld [vmem:[#allocation11 + $0xe90] sm:$0xff]  ;;  %v9329_v45 = vpop.f32.mrf.mxu1 }
 0x478   :  { %9643 = vmatprep.subr.bf16.mxu1 %v12808_v63  ;;  %v12952_v63 = vcombine.high %v3590_v54, %v3598_v6 }
 0x47a   :  { %9685 = vmatpush1.bf16.msra.mxu0 %v13079_v12  ;;  %v13223_v12 = vcombine.low %v3862_v57, %v3870_v60  ;;  %v9331_v60 = vpop.f32.mrf.mxu1 }
 0x47b   :  { %9644 = vmatpush1.bf16.msra.mxu1 %v12807_v17  ;;  %9686 = vmatprep.subr.bf16.mxu0 %v13064_v56  ;;  %v12951_v17 = vcombine.low %v3590_v54, %v3598_v6  ;;  %v13208_v56 = vcombine.high %v3846_v10, %v3854_v1  ;;  %v12871_v6 = vcombine.low %v3510_v30, %v3518_v33 }
 0x47c   :  { %9645 = vmatprep.subr.bf16.mxu1 %v12792_v20  ;;  %v12936_v20 = vcombine.high %v3574_v13, %v3582_v5 }
 0x47e   :  { %9687 = vmatpush1.bf16.msra.mxu0 %v13063_v28  ;;  %v13207_v28 = vcombine.low %v3846_v10, %v3854_v1  ;;  %v3998_v10 = vld [vmem:[#allocation11 + $0x1bd0] sm:$0xff] }
 0x47f   :  { %9646 = vmatpush1.bf16.msra.mxu1 %v12791_v48  ;;  %9688 = vmatprep.subr.bf16.mxu0 %v13048_v8  ;;  %v12935_v48 = vcombine.low %v3574_v13, %v3582_v5  ;;  %v13192_v8 = vcombine.high %v3830_v49, %v3838_v50  ;;  %v3758_v13 = vld [vmem:[#allocation11 + $0x1450] sm:$0xff] }
 0x480   :  { %9647 = vmatprep.subr.bf16.mxu1 %v12776_v7  ;;  %v12920_v7 = vcombine.high %v3558_v2, %v3566_v18  ;;  %v3990_v5 = vld [vmem:[#allocation11 + $0x1b90] sm:$0xff] }
 0x482   :  { %9689 = vmatpush1.bf16.msra.mxu0 %v13047_v19  ;;  %v12919_v19 = vcombine.low %v3558_v2, %v3566_v18  ;;  %v13352_v2 = vcombine.high %v3990_v5, %v3998_v10  ;;  %v3974_v18 = vld [vmem:[#allocation11 + $0x1b10] sm:$0xff] }
 0x483   :  { %9648 = vmatpush1.bf16.msra.mxu1 %v12775_v16  ;;  %9690 = vmatprep.subr.bf16.mxu0 %v13032_v21  ;;  %v14494_v16 = vpop.f32.mrf.mxu0  ;;  %v12904_v21 = vcombine.high %v3542_v31, %v3550_v9 }
 0x484   :  { %9649 = vmatprep.subr.bf16.mxu1 %v12760_v35  ;;  %v13191_v35 = vcombine.low %v3830_v49, %v3838_v50  ;;  %v3982_v49 = vld [vmem:[#allocation11 + $0x1b50] sm:$0xff]  ;;  %v3223_v50 = vld [vmem:[#allocation11 + $0x398] sm:$0xff] }
 0x486   :  { %9691 = vmatpush1.bf16.msra.mxu0 %v13031_v25  ;;  %v14496_v25 = vpop.f32.mrf.mxu0 }
 0x487   :  { %9650 = vmatpush1.bf16.msra.mxu1 %v12759_v24  ;;  %9692 = vmatprep.subr.bf16.mxu0 %v13016_v27  ;;  %v3806_v24 = vld [vmem:[#allocation11 + $0x15d0] sm:$0xff]  ;;  %v13175_v27 = vcombine.low %v3814_v14, %v3822_v15  ;;  %v13336_v14 = vcombine.high %v3974_v18, %v3982_v49 }
 0x488   :  { %9651 = vmatprep.subr.bf16.mxu1 %v12744_v42  ;;  %v12903_v42 = vcombine.low %v3542_v31, %v3550_v9  ;;  %v13160_v32 = vcombine.high %v3798_v23, %v3806_v24  ;;  %v13159_v52 = vcombine.low %v3798_v23, %v3806_v24  ;;  %v3958_v15 = vld [vmem:[#allocation11 + $0x1a90] sm:$0xff]  ;;  %v13335_v23 = vcombine.low %v3974_v18, %v3982_v49 }
 0x489   :  { %v3910_v18 = vld [vmem:[#allocation11 + $0x1910] sm:$0xff] }
 0x48a   :  { %9693 = vmatpush1.bf16.msra.mxu0 %v13015_v37  ;;  %v3790_v37 = vld [vmem:[#allocation11 + $0x1550] sm:$0xff] }
 0x48b   :  { %9652 = vmatpush1.bf16.msra.mxu1 %v12743_v39  ;;  %9694 = vmatprep.subr.bf16.mxu0 %v13000_v43  ;;  %v3782_v39 = vld [vmem:[#allocation11 + $0x1510] sm:$0xff]  ;;  %v12887_v43 = vcombine.low %v3526_v36, %v3534_v22  ;;  %v3207_v36 = vld [vmem:[#allocation11 + $0x318] sm:$0xff] }
 0x48c   :  { %9653 = vmatprep.subr.bf16.mxu1 %v12728_v41  ;;  %v14498_v41 = vpop.f32.mrf.mxu0  ;;  %v13144_v46 = vcombine.high %v3782_v39, %v3790_v37  ;;  %v13143_v57 = vcombine.low %v3782_v39, %v3790_v37  ;;  %v3215_v22 = vld [vmem:[#allocation11 + $0x358] sm:$0xff]  ;;  %v3942_v39 = vld [vmem:[#allocation11 + $0x1a10] sm:$0xff] }
 0x48d   :  { %v12570_v33 = vcombine.high %v3207_v36, %v3215_v22 }
 0x48e   :  { %9695 = vmatpush1.bf16.msra.mxu0 %v12999_v3  ;;  %v3502_v3 = vld [vmem:[#allocation11 + $0xc50] sm:$0xff]  ;;  %v9292_v54 = vpop.f32.mrf.mxu0 }
 0x48f   :  { %9654 = vmatpush1.bf16.msra.mxu1 %v12727_v47  ;;  %9696 = vmatprep.subr.bf16.mxu0 %v12984_v53  ;;  %v3494_v47 = vld [vmem:[#allocation11 + $0xc10] sm:$0xff] }
 0x490   :  { %9655 = vmatprep.subr.bf16.mxu1 %v12968_v58  ;;  %v3766_v58 = vld [vmem:[#allocation11 + $0x1490] sm:$0xff]  ;;  %v12855_v1 = vcombine.low %v3494_v47, %v3502_v3 }
 0x491   :  { %v3774_v53 = vld [vmem:[#allocation11 + $0x14d0] sm:$0xff] }
 0x492   :  { %9697 = vmatpush1.bf16.msra.mxu0 %v12983_v62  ;;  %v12856_v62 = vcombine.high %v3494_v47, %v3502_v3 }
 0x493   :  { %9656 = vmatpush2.bf16.msra.mxu1 %v12967_v61  ;;  %9698 = vmatprep.subr.bf16.mxu0 %v13224_v11  ;;  %v9372_v61 = vpop.f32.mrf.mxu0  ;;  %v3750_v11 = vld [vmem:[#allocation11 + $0x1410] sm:$0xff] }
 0x494   :  { %9657 = vmatprep.subr.bf16.mxu1 %v12952_v63  ;;  %v13128_v63 = vcombine.high %v3766_v58, %v3774_v53 }
 0x496   :  { %9699 = vmatpush2.bf16.msra.mxu0 %v13223_v12  ;;  %v9333_v12 = vpop.f32.mrf.mxu1 }
 0x497   :  { %9658 = vmatpush2.bf16.msra.mxu1 %v12951_v17  ;;  %9700 = vmatprep.subr.bf16.mxu0 %v13208_v56  ;;  %v13127_v17 = vcombine.low %v3766_v58, %v3774_v53  ;;  %v13112_v56 = vcombine.high %v3750_v11, %v3758_v13 }
 0x498   :  { %9659 = vmatprep.subr.bf16.mxu1 %v12936_v20  ;;  %v9374_v20 = vpop.f32.mrf.mxu0  ;;  %v9335_v31 = vpop.f32.mrf.mxu1 }
 0x499   :  { %v9336_v37 = vadd.f32 %v9335_v31, %v9292_v54 }
 0x49a   :  { %9701 = vmatpush2.bf16.msra.mxu0 %v13207_v28  ;;  %v9330_v28 = vadd.f32 %v9329_v45, %v14494_v16  ;;  %v9376_v9 = vpop.f32.mrf.mxu0 }
 0x49b   :  { %9660 = vmatpush2.bf16.msra.mxu1 %v12935_v48  ;;  %9702 = vmatprep.subr.bf16.mxu0 %v13192_v8  ;;  %v3231_v48 = vld [vmem:[#allocation11 + $0x3d8] sm:$0xff]  ;;  %v13351_v8 = vcombine.low %v3990_v5, %v3998_v10 }
 0x49c   :  { %9661 = vmatprep.subr.bf16.mxu1 %v12920_v7  ;;  %v13111_v7 = vcombine.low %v3750_v11, %v3758_v13  ;;  %v12585_v24 = vcombine.low %v3223_v50, %v3231_v48  ;;  %v3934_v13 = vld [vmem:[#allocation11 + $0x19d0] sm:$0xff]  ;;  %v3175_v5 = vld [vmem:[#allocation11 + $0x218] sm:$0xff] }
 0x49d   :  { %v3183_v10 = vld [vmem:[#allocation11 + $0x258] sm:$0xff] }
 0x49e   :  { %9703 = vmatpush2.bf16.msra.mxu0 %v13191_v35  ;;  %v9373_v35 = vadd.f32 %v9372_v61, %v9330_v28  ;;  %v3167_v28 = vld [vmem:[#allocation11 + $0x1d8] sm:$0xff] }
 0x49f   :  { %9662 = vmatpush2.bf16.msra.mxu1 %v12919_v19  ;;  %9704 = vmatprep.subr.bf16.mxu0 %v13176_v34  ;;  %v9332_v19 = vadd.f32 %v9331_v60, %v14496_v25  ;;  %v3966_v34 = vld [vmem:[#allocation11 + $0x1ad0] sm:$0xff] }
 0x4a0   :  { %9663 = vmatprep.subr.bf16.mxu1 %v12904_v21  ;;  %v12586_v21 = vcombine.high %v3223_v50, %v3231_v48  ;;  %v13320_v30 = vcombine.high %v3958_v15, %v3966_v34  ;;  %v13319_v3 = vcombine.low %v3958_v15, %v3966_v34  ;;  %v3918_v50 = vld [vmem:[#allocation11 + $0x1950] sm:$0xff]  ;;  %v3159_v48 = vld [vmem:[#allocation11 + $0x198] sm:$0xff] }
 0x4a1   :  { %v13272_v31 = vcombine.high %v3910_v18, %v3918_v50  ;;  %v3902_v15 = vld [vmem:[#allocation11 + $0x18d0] sm:$0xff]  ;;  %v12521_v34 = vcombine.low %v3159_v48, %v3167_v28 }
 0x4a2   :  { %9705 = vmatpush2.bf16.msra.mxu0 %v13175_v27  ;;  %v9375_v27 = vadd.f32 %v9374_v20, %v9332_v19  ;;  %v3143_v19 = vld [vmem:[#allocation11 + $0x118] sm:$0xff] }
 0x4a3   :  { %9664 = vmatpush2.bf16.msra.mxu1 %v12903_v42  ;;  %9706 = vmatprep.subr.bf16.mxu0 %v13160_v32  ;;  %v9334_v42 = vadd.f32 %v9333_v12, %v14498_v41  ;;  %v9378_v32 = vpop.f32.mrf.mxu0  ;;  %v3199_v41 = vld [vmem:[#allocation11 + $0x2d8] sm:$0xff] }
 0x4a4   :  { %9665 = vmatprep.subr.bf16.mxu1 %v12888_v29  ;;  %v9379_v58 = vadd.f32 %v9378_v32, %v9336_v37  ;;  %v3119_v37 = vld [vmem:[#allocation11 + $0x58] sm:$0xff] }
 0x4a6   :  { %9707 = vmatpush2.bf16.msra.mxu0 %v13159_v52 }
 0x4a7   :  { %9666 = vmatpush2.bf16.msra.mxu1 %v12887_v43  ;;  %9708 = vmatprep.subr.bf16.mxu0 %v13144_v46  ;;  %v9377_v43 = vadd.f32 %v9376_v9, %v9334_v42  ;;  %v3191_v46 = vld [vmem:[#allocation11 + $0x298] sm:$0xff]  ;;  %v12522_v9 = vcombine.high %v3159_v48, %v3167_v28  ;;  %v4054_v48 = vld [vmem:[#allocation11 + $0x1d90] sm:$0xff] }
 0x4a8   :  { %9667 = vmatprep.subr.bf16.mxu1 %v12872_v38  ;;  %v3950_v38 = vld [vmem:[#allocation11 + $0x1a50] sm:$0xff]  ;;  %v12554_v61 = vcombine.high %v3191_v46, %v3199_v41  ;;  %v12553_v20 = vcombine.low %v3191_v46, %v3199_v41  ;;  %v3135_v42 = vld [vmem:[#allocation11 + $0xd8] sm:$0xff] }
 0x4a9   :  { %v13304_v60 = vcombine.high %v3942_v39, %v3950_v38  ;;  %v13303_v12 = vcombine.low %v3942_v39, %v3950_v38  ;;  %v3111_v39 = vld [vmem:[#allocation11 + $0x18] sm:$0xff]  ;;  %v4102_v46 = vld [vmem:[#allocation11 + $0x1f10] sm:$0xff] }
 0x4aa   :  { %9709 = vmatpush2.bf16.msra.mxu0 %v13143_v57  ;;  %v12569_v57 = vcombine.low %v3207_v36, %v3215_v22  ;;  %v12474_v38 = vcombine.high %v3111_v39, %v3119_v37  ;;  %v4110_v41 = vld [vmem:[#allocation11 + $0x1f50] sm:$0xff] }
 0x4ab   :  { %9668 = vmatpush2.bf16.msra.mxu1 %v12871_v6  ;;  %9710 = vmatprep.subr.bf16.mxu0 %v13128_v63  ;;  %v4062_v28 = vld [vmem:[#allocation11 + $0x1dd0] sm:$0xff] }
 0x4ac   :  { %9669 = vmatprep.subr.bf16.mxu1 %v12856_v62  ;;  %v3926_v62 = vld [vmem:[#allocation11 + $0x1990] sm:$0xff] }
 0x4ae   :  { %9711 = vmatpush2.bf16.msra.mxu0 %v13127_v17 }
 0x4af   :  { %9670 = vmatpush2.bf16.msra.mxu1 %v12855_v1  ;;  %9712 = vmatprep.subr.bf16.mxu0 %v13112_v56  ;;  %v13288_v56 = vcombine.high %v3926_v62, %v3934_v13 }
 0x4b0   :  { %9725 = vmatprep.subr.bf16.mxu1 %v13352_v2  ;;  %v12538_v2 = vcombine.high %v3175_v5, %v3183_v10 }
 0x4b2   :  { %9672 = vmatmul.mubr.bf16.vlgmr.msra.gmra.mxu1 %v14461_v0  ;;  %v9415_v16 = vpop.f32.mrf.mxu1  ;;  %9713 = vmatpush2.bf16.msra.mxu0 %v13111_v7  ;;  %v13287_v7 = vcombine.low %v3926_v62, %v3934_v13  ;;  %v3343_v62 = vld [vmem:[#allocation11 + $0x758] sm:$0xff] }
 0x4b3   :  { %v9416_v29 = vadd.f32 %v9415_v16, %v9373_v35  ;;  %9726 = vmatpush1.bf16.msra.mxu1 %v13351_v8  ;;  %9757 = vmatprep.mubr.bf16.mxu1 %v14477_v51  ;;  %v12537_v8 = vcombine.low %v3175_v5, %v3183_v10  ;;  %v3151_v35 = vld [vmem:[#allocation11 + $0x158] sm:$0xff]  ;;  %v3878_v16 = vld [vmem:[#allocation11 + $0x1810] sm:$0xff] }
 0x4b4   :  { %v9417_v25 = vpop.f32.mrf.mxu1  ;;  %9727 = vmatprep.subr.bf16.mxu1 %v13336_v14  ;;  %9768 = vmatprep.subr.bf16.mxu0 %v12586_v21  ;;  %v3894_v14 = vld [vmem:[#allocation11 + $0x1890] sm:$0xff]  ;;  %v13271_v21 = vcombine.low %v3910_v18, %v3918_v50  ;;  %v12506_v22 = vcombine.high %v3143_v19, %v3151_v35 }
 0x4b5   :  { %v10628_v52 = vmax.f32 %v9416_v29, 0.0  ;;  %v9418_v45 = vadd.f32 %v9417_v25, %v9375_v27  ;;  %9715 = vmatmul.mubr.bf16.vlgmr.msra.gmra.mxu0 %v14470_v40  ;;  %v13256_v36 = vcombine.high %v3894_v14, %v3902_v15  ;;  %v13255_v27 = vcombine.low %v3894_v14, %v3902_v15  ;;  %v4070_v10 = vld [vmem:[#allocation11 + $0x1e10] sm:$0xff] }
 0x4b6   :  { %v9419_v47 = vpop.f32.mrf.mxu1  ;;  %9769 = vmatpush1.bf16.msra.mxu0 %v12585_v24  ;;  %9800 = vmatprep.mubr.bf16.mxu0 %v14454_v44  ;;  %v3127_v24 = vld [vmem:[#allocation11 + $0x98] sm:$0xff]  ;;  %v12505_v29 = vcombine.low %v3143_v19, %v3151_v35  ;;  %v13416_v14 = vcombine.high %v4054_v48, %v4062_v28  ;;  %v4038_v19 = vld [vmem:[#allocation11 + $0x1d10] sm:$0xff] }
 0x4b7   :  { %10660 = vst [vmem:[#allocation14] sm:$0xff] %v10628_v52  ;;  %v10629_v53 = vmax.f32 %v9418_v45, 0.0  ;;  %v9420_v6 = vadd.f32 %v9419_v47, %v9377_v43  ;;  %9728 = vmatpush1.bf16.msra.mxu1 %v13335_v23  ;;  %9770 = vmatprep.subr.bf16.mxu0 %v12570_v33  ;;  %v3886_v23 = vld [vmem:[#allocation11 + $0x1850] sm:$0xff]  ;;  %v12490_v25 = vcombine.high %v3127_v24, %v3135_v42  ;;  %v3351_v47 = vld [vmem:[#allocation11 + $0x798] sm:$0xff] }
 0x4b8   :  { %v9421_v54 = vpop.f32.mrf.mxu1  ;;  %9729 = vmatprep.subr.bf16.mxu1 %v13320_v30  ;;  %v13240_v32 = vcombine.high %v3878_v16, %v3886_v23  ;;  %v4118_v30 = vld [vmem:[#allocation11 + $0x1f90] sm:$0xff]  ;;  %v13239_v43 = vcombine.low %v3878_v16, %v3886_v23 }
 0x4b9   :  { %10661 = vst [vmem:[#allocation14 + $0x8] sm:$0xff] %v10629_v53  ;;  %v10644_v63 = vmax.f32 %v9420_v6, 0.0  ;;  %v9422_v11 = vadd.f32 %v9421_v54, %v9379_v58  ;;  %v4126_v33 = vld [vmem:[#allocation11 + $0x1fd0] sm:$0xff]  ;;  %v13464_v6 = vcombine.high %v4102_v46, %v4110_v41 }
 0x4ba   :  { %9771 = vmatpush1.bf16.msra.mxu0 %v12569_v57  ;;  %v13480_v45 = vcombine.high %v4118_v30, %v4126_v33  ;;  %v13479_v58 = vcombine.low %v4118_v30, %v4126_v33  ;;  %v4086_v54 = vld [vmem:[#allocation11 + $0x1e90] sm:$0xff] }
 0x4bb   :  { %10676 = vst [vmem:[#allocation14 + $0x80] sm:$0xff] %v10644_v63  ;;  %v14507_v1 = vpack.c.bf16 %v10644_v63, %v10628_v52  ;;  %v10645_v17 = vmax.f32 %v9422_v11, 0.0  ;;  %9730 = vmatpush1.bf16.msra.mxu1 %v13319_v3  ;;  %9772 = vmatprep.subr.bf16.mxu0 %v12554_v61  ;;  %v12489_v52 = vcombine.low %v3127_v24, %v3135_v42  ;;  %v3359_v3 = vld [vmem:[#allocation11 + $0x7d8] sm:$0xff]  ;;  %v4046_v35 = vld [vmem:[#allocation11 + $0x1d50] sm:$0xff] }
 0x4bc   :  { %9731 = vmatprep.subr.bf16.mxu1 %v13304_v60  ;;  %v12714_v57 = vcombine.high %v3351_v47, %v3359_v3  ;;  %v4094_v60 = vld [vmem:[#allocation11 + $0x1ed0] sm:$0xff]  ;;  %v3335_v61 = vld [vmem:[#allocation11 + $0x718] sm:$0xff]  ;;  %v13463_v63 = vcombine.low %v4102_v46, %v4110_v41  ;;  %v12713_v11 = vcombine.low %v3351_v47, %v3359_v3  ;;  %v13400_v16 = vcombine.high %v4038_v19, %v4046_v35 }
 0x4bd   :  { %10677 = vst [vmem:[#allocation14 + $0x88] sm:$0xff] %v10645_v17  ;;  %v14509_v49 = vpack.c.bf16 %v10645_v17, %v10629_v53  ;;  %v12473_v53 = vcombine.low %v3111_v39, %v3119_v37  ;;  %v13448_v13 = vcombine.high %v4086_v54, %v4094_v60  ;;  %v12698_v5 = vcombine.high %v3335_v61, %v3343_v62  ;;  %v4078_v17 = vld [vmem:[#allocation11 + $0x1e50] sm:$0xff]  ;;  %v3239_v47 = vld [vmem:[#allocation11 + $0x418] sm:$0xff] }
 0x4be   :  { %9773 = vmatpush1.bf16.msra.mxu0 %v12553_v20  ;;  %v3327_v20 = vld [vmem:[#allocation11 + $0x6d8] sm:$0xff]  ;;  %v13432_v18 = vcombine.high %v4070_v10, %v4078_v17  ;;  %v4022_v24 = vld [vmem:[#allocation11 + $0x1c90] sm:$0xff] }
 0x4bf   :  { %9732 = vmatpush1.bf16.msra.mxu1 %v13303_v12  ;;  %9774 = vmatprep.subr.bf16.mxu0 %v12538_v2  ;;  %v3319_v12 = vld [vmem:[#allocation11 + $0x698] sm:$0xff]  ;;  %v12697_v2 = vcombine.low %v3335_v61, %v3343_v62  ;;  %v4030_v42 = vld [vmem:[#allocation11 + $0x1cd0] sm:$0xff] }
 0x4c0   :  { %9733 = vmatprep.subr.bf16.mxu1 %v13288_v56  ;;  %v13447_v56 = vcombine.low %v4086_v54, %v4094_v60  ;;  %v12682_v50 = vcombine.high %v3319_v12, %v3327_v20  ;;  %v13384_v30 = vcombine.high %v4022_v24, %v4030_v42  ;;  %v4006_v39 = vld [vmem:[#allocation11 + $0x1c10] sm:$0xff]  ;;  %v3247_v3 = vld [vmem:[#allocation11 + $0x458] sm:$0xff] }
 0x4c1   :  { %v4014_v37 = vld [vmem:[#allocation11 + $0x1c50] sm:$0xff]  ;;  %v12602_v54 = vcombine.high %v3239_v47, %v3247_v3  ;;  %v3463_v61 = vld [vmem:[#allocation11 + $0xb18] sm:$0xff] }
 0x4c2   :  { %9775 = vmatpush1.bf16.msra.mxu0 %v12537_v8  ;;  %v3311_v8 = vld [vmem:[#allocation11 + $0x658] sm:$0xff]  ;;  %v13368_v46 = vcombine.high %v4006_v39, %v4014_v37 }
 0x4c3   :  { %9734 = vmatpush1.bf16.msra.mxu1 %v13287_v7  ;;  %9776 = vmatprep.subr.bf16.mxu0 %v12522_v9  ;;  %v3303_v7 = vld [vmem:[#allocation11 + $0x618] sm:$0xff]  ;;  %v12681_v9 = vcombine.low %v3319_v12, %v3327_v20 }
 0x4c4   :  { %9735 = vmatprep.subr.bf16.mxu1 %v13272_v31  ;;  %v13431_v31 = vcombine.low %v4070_v10, %v4078_v17  ;;  %v12666_v15 = vcombine.high %v3303_v7, %v3311_v8  ;;  %v3471_v62 = vld [vmem:[#allocation11 + $0xb58] sm:$0xff] }
 0x4c5   :  { %v12826_v10 = vcombine.high %v3463_v61, %v3471_v62  ;;  %v3447_v12 = vld [vmem:[#allocation11 + $0xa98] sm:$0xff] }
 0x4c6   :  { %9777 = vmatpush1.bf16.msra.mxu0 %v12521_v34  ;;  %v3295_v34 = vld [vmem:[#allocation11 + $0x5d8] sm:$0xff] }
 0x4c7   :  { %9736 = vmatpush1.bf16.msra.mxu1 %v13271_v21  ;;  %9778 = vmatprep.subr.bf16.mxu0 %v12506_v22  ;;  %v3287_v21 = vld [vmem:[#allocation11 + $0x598] sm:$0xff]  ;;  %v12665_v22 = vcombine.low %v3303_v7, %v3311_v8 }
 0x4c8   :  { %9737 = vmatprep.subr.bf16.mxu1 %v13256_v36  ;;  %v13415_v36 = vcombine.low %v4054_v48, %v4062_v28  ;;  %v12650_v23 = vcombine.high %v3287_v21, %v3295_v34  ;;  %v3455_v20 = vld [vmem:[#allocation11 + $0xad8] sm:$0xff] }
 0x4c9   :  { %v12810_v48 = vcombine.high %v3447_v12, %v3455_v20  ;;  %v3431_v28 = vld [vmem:[#allocation11 + $0xa18] sm:$0xff] }
 0x4ca   :  { %9779 = vmatpush1.bf16.msra.mxu0 %v12505_v29  ;;  %v3279_v29 = vld [vmem:[#allocation11 + $0x558] sm:$0xff] }
 0x4cb   :  { %9738 = vmatpush1.bf16.msra.mxu1 %v13255_v27  ;;  %9780 = vmatprep.subr.bf16.mxu0 %v12490_v25  ;;  %v3271_v27 = vld [vmem:[#allocation11 + $0x518] sm:$0xff]  ;;  %v12649_v25 = vcombine.low %v3287_v21, %v3295_v34 }
 0x4cc   :  { %9739 = vmatprep.subr.bf16.mxu1 %v13240_v32  ;;  %v13399_v32 = vcombine.low %v4038_v19, %v4046_v35  ;;  %v12634_v33 = vcombine.high %v3271_v27, %v3279_v29  ;;  %v3439_v8 = vld [vmem:[#allocation11 + $0xa58] sm:$0xff] }
 0x4cd   :  { %v12794_v19 = vcombine.high %v3431_v28, %v3439_v8  ;;  %v3415_v21 = vld [vmem:[#allocation11 + $0x998] sm:$0xff] }
 0x4ce   :  { %9781 = vmatpush1.bf16.msra.mxu0 %v12489_v52  ;;  %v3263_v52 = vld [vmem:[#allocation11 + $0x4d8] sm:$0xff] }
 0x4cf   :  { %9740 = vmatpush1.bf16.msra.mxu1 %v13239_v43  ;;  %9782 = vmatprep.subr.bf16.mxu0 %v12474_v38  ;;  %v3255_v43 = vld [vmem:[#allocation11 + $0x498] sm:$0xff]  ;;  %v12633_v38 = vcombine.low %v3271_v27, %v3279_v29 }
 0x4d0   :  { %9741 = vmatprep.subr.bf16.mxu1 %v13480_v45  ;;  %v13383_v45 = vcombine.low %v4022_v24, %v4030_v42  ;;  %v12618_v41 = vcombine.high %v3255_v43, %v3263_v52  ;;  %v3423_v34 = vld [vmem:[#allocation11 + $0x9d8] sm:$0xff] }
 0x4d1   :  { %v12778_v24 = vcombine.high %v3415_v21, %v3423_v34  ;;  %v3399_v27 = vld [vmem:[#allocation11 + $0x918] sm:$0xff] }
 0x4d2   :  { %9783 = vmatpush1.bf16.msra.mxu0 %v12473_v53  ;;  %v3487_v53 = vld [vmem:[#allocation11 + $0xbd8] sm:$0xff] }
 0x4d3   :  { %9742 = vmatpush2.bf16.msra.mxu1 %v13479_v58  ;;  %9784 = vmatprep.subr.bf16.mxu0 %v12714_v57  ;;  %v3479_v58 = vld [vmem:[#allocation11 + $0xb98] sm:$0xff]  ;;  %v12617_v57 = vcombine.low %v3255_v43, %v3263_v52 }
 0x4d4   :  { %9743 = vmatprep.subr.bf16.mxu1 %v13464_v6  ;;  %v13367_v6 = vcombine.low %v4006_v39, %v4014_v37  ;;  %v12842_v60 = vcombine.high %v3479_v58, %v3487_v53  ;;  %v3407_v29 = vld [vmem:[#allocation11 + $0x958] sm:$0xff] }
 0x4d5   :  { %v12762_v39 = vcombine.high %v3399_v27, %v3407_v29  ;;  %v3383_v43 = vld [vmem:[#allocation11 + $0x898] sm:$0xff] }
 0x4d6   :  { %9785 = vmatpush2.bf16.msra.mxu0 %v12713_v11  ;;  %v3743_v11 = vld [vmem:[#allocation11 + $0x13d8] sm:$0xff] }
 0x4d7   :  { %9744 = vmatpush2.bf16.msra.mxu1 %v13463_v63  ;;  %9786 = vmatprep.subr.bf16.mxu0 %v12698_v5  ;;  %v3735_v63 = vld [vmem:[#allocation11 + $0x1398] sm:$0xff]  ;;  %v12841_v5 = vcombine.low %v3479_v58, %v3487_v53 }
 0x4d8   :  { %9745 = vmatprep.subr.bf16.mxu1 %v13448_v13  ;;  %v12601_v13 = vcombine.low %v3239_v47, %v3247_v3  ;;  %v13098_v17 = vcombine.high %v3735_v63, %v3743_v11  ;;  %v3391_v52 = vld [vmem:[#allocation11 + $0x8d8] sm:$0xff] }
 0x4d9   :  { %v12746_v47 = vcombine.high %v3383_v43, %v3391_v52  ;;  %v3367_v58 = vld [vmem:[#allocation11 + $0x818] sm:$0xff] }
 0x4da   :  { %9787 = vmatpush2.bf16.msra.mxu0 %v12697_v2  ;;  %v3727_v2 = vld [vmem:[#allocation11 + $0x1358] sm:$0xff] }
 0x4db   :  { %9746 = vmatpush2.bf16.msra.mxu1 %v13447_v56  ;;  %9788 = vmatprep.subr.bf16.mxu0 %v12682_v50  ;;  %v3719_v56 = vld [vmem:[#allocation11 + $0x1318] sm:$0xff]  ;;  %v13097_v50 = vcombine.low %v3735_v63, %v3743_v11 }
 0x4dc   :  { %9747 = vmatprep.subr.bf16.mxu1 %v13432_v18  ;;  %v12825_v18 = vcombine.low %v3463_v61, %v3471_v62  ;;  %v13082_v7 = vcombine.high %v3719_v56, %v3727_v2  ;;  %v3375_v53 = vld [vmem:[#allocation11 + $0x858] sm:$0xff] }
 0x4dd   :  { %v12730_v61 = vcombine.high %v3367_v58, %v3375_v53  ;;  %v3607_v63 = vld [vmem:[#allocation11 + $0xf98] sm:$0xff] }
 0x4de   :  { %9789 = vmatpush2.bf16.msra.mxu0 %v12681_v9  ;;  %v3711_v9 = vld [vmem:[#allocation11 + $0x12d8] sm:$0xff] }
 0x4df   :  { %9748 = vmatpush2.bf16.msra.mxu1 %v13431_v31  ;;  %9790 = vmatprep.subr.bf16.mxu0 %v12666_v15  ;;  %v3703_v31 = vld [vmem:[#allocation11 + $0x1298] sm:$0xff]  ;;  %v13081_v15 = vcombine.low %v3719_v56, %v3727_v2 }
 0x4e0   :  { %9749 = vmatprep.subr.bf16.mxu1 %v13416_v14  ;;  %v12809_v14 = vcombine.low %v3447_v12, %v3455_v20  ;;  %v13066_v35 = vcombine.high %v3703_v31, %v3711_v9  ;;  %v3615_v11 = vld [vmem:[#allocation11 + $0xfd8] sm:$0xff] }
 0x4e1   :  { %v12970_v12 = vcombine.high %v3607_v63, %v3615_v11  ;;  %v3591_v56 = vld [vmem:[#allocation11 + $0xf18] sm:$0xff] }
 0x4e2   :  { %9791 = vmatpush2.bf16.msra.mxu0 %v12665_v22  ;;  %v3695_v22 = vld [vmem:[#allocation11 + $0x1258] sm:$0xff] }
 0x4e3   :  { %9750 = vmatpush2.bf16.msra.mxu1 %v13415_v36  ;;  %9792 = vmatprep.subr.bf16.mxu0 %v12650_v23  ;;  %v3687_v36 = vld [vmem:[#allocation11 + $0x1218] sm:$0xff]  ;;  %v13065_v23 = vcombine.low %v3703_v31, %v3711_v9 }
 0x4e4   :  { %9751 = vmatprep.subr.bf16.mxu1 %v13400_v16  ;;  %v12793_v16 = vcombine.low %v3431_v28, %v3439_v8  ;;  %v13050_v42 = vcombine.high %v3687_v36, %v3695_v22  ;;  %v3599_v2 = vld [vmem:[#allocation11 + $0xf58] sm:$0xff] }
 0x4e5   :  { %v3575_v31 = vld [vmem:[#allocation11 + $0xe98] sm:$0xff] }
 0x4e6   :  { %9793 = vmatpush2.bf16.msra.mxu0 %v12649_v25  ;;  %v3679_v25 = vld [vmem:[#allocation11 + $0x11d8] sm:$0xff] }
 0x4e7   :  { %9752 = vmatpush2.bf16.msra.mxu1 %v13399_v32  ;;  %9794 = vmatprep.subr.bf16.mxu0 %v12634_v33  ;;  %v3671_v32 = vld [vmem:[#allocation11 + $0x1198] sm:$0xff]  ;;  %v13049_v33 = vcombine.low %v3687_v36, %v3695_v22 }
 0x4e8   :  { %9753 = vmatprep.subr.bf16.mxu1 %v13384_v30  ;;  %v12777_v30 = vcombine.low %v3415_v21, %v3423_v34  ;;  %v13034_v37 = vcombine.high %v3671_v32, %v3679_v25  ;;  %v3583_v9 = vld [vmem:[#allocation11 + $0xed8] sm:$0xff] }
 0x4e9   :  { %v12938_v21 = vcombine.high %v3575_v31, %v3583_v9  ;;  %v3559_v36 = vld [vmem:[#allocation11 + $0xe18] sm:$0xff] }
 0x4ea   :  { %9795 = vmatpush2.bf16.msra.mxu0 %v12633_v38  ;;  %v3663_v38 = vld [vmem:[#allocation11 + $0x1158] sm:$0xff] }
 0x4eb   :  { %9754 = vmatpush2.bf16.msra.mxu1 %v13383_v45  ;;  %9796 = vmatprep.subr.bf16.mxu0 %v12618_v41  ;;  %v3655_v45 = vld [vmem:[#allocation11 + $0x1118] sm:$0xff]  ;;  %v13033_v41 = vcombine.low %v3671_v32, %v3679_v25 }
 0x4ec   :  { %9755 = vmatprep.subr.bf16.mxu1 %v13368_v46  ;;  %v12761_v46 = vcombine.low %v3399_v27, %v3407_v29  ;;  %v13018_v3 = vcombine.high %v3655_v45, %v3663_v38  ;;  %v3567_v22 = vld [vmem:[#allocation11 + $0xe58] sm:$0xff] }
 0x4ed   :  { %v12922_v27 = vcombine.high %v3559_v36, %v3567_v22  ;;  %v3543_v32 = vld [vmem:[#allocation11 + $0xd98] sm:$0xff] }
 0x4ee   :  { %9797 = vmatpush2.bf16.msra.mxu0 %v12617_v57  ;;  %v3647_v57 = vld [vmem:[#allocation11 + $0x10d8] sm:$0xff] }
 0x4ef   :  { %9756 = vmatpush2.bf16.msra.mxu1 %v13367_v6  ;;  %9798 = vmatprep.subr.bf16.mxu0 %v12602_v54  ;;  %v3639_v6 = vld [vmem:[#allocation11 + $0x1098] sm:$0xff]  ;;  %v12745_v54 = vcombine.low %v3383_v43, %v3391_v52 }
 0x4f0   :  { %9811 = vmatprep.subr.bf16.mxu1 %v12842_v60  ;;  %v13017_v60 = vcombine.low %v3655_v45, %v3663_v38  ;;  %v13002_v62 = vcombine.high %v3639_v6, %v3647_v57  ;;  %v3551_v25 = vld [vmem:[#allocation11 + $0xdd8] sm:$0xff] }
 0x4f1   :  { %v12906_v52 = vcombine.high %v3543_v32, %v3551_v25  ;;  %v3527_v38 = vld [vmem:[#allocation11 + $0xd18] sm:$0xff] }
 0x4f2   :  { %9758 = vmatmul.mubr.bf16.vlgmr.msra.gmra.mxu1 %v14479_v26  ;;  %9799 = vmatpush2.bf16.msra.mxu0 %v12601_v13  ;;  %v3623_v13 = vld [vmem:[#allocation11 + $0x1018] sm:$0xff] }
 0x4f3   :  { %9812 = vmatpush1.bf16.msra.mxu1 %v12841_v5  ;;  %9843 = vmatprep.mubr.bf16.mxu1 %v14463_v55  ;;  %v3631_v5 = vld [vmem:[#allocation11 + $0x1058] sm:$0xff] }
 0x4f4   :  { %9813 = vmatprep.subr.bf16.mxu1 %v12826_v10  ;;  %9854 = vmatprep.subr.bf16.mxu0 %v13098_v17  ;;  %v12729_v10 = vcombine.low %v3367_v58, %v3375_v53  ;;  %v13001_v17 = vcombine.low %v3639_v6, %v3647_v57  ;;  %v12986_v20 = vcombine.high %v3623_v13, %v3631_v5 }
 0x4f5   :  { %9801 = vmatmul.mubr.bf16.vlgmr.msra.gmra.mxu0 %v14452_v59  ;;  %v12985_v28 = vcombine.low %v3623_v13, %v3631_v5  ;;  %v12905_v58 = vcombine.low %v3543_v32, %v3551_v25  ;;  %v9501_v5 = vpop.f32.mrf.mxu1 }
 0x4f6   :  { %9855 = vmatpush1.bf16.msra.mxu0 %v13097_v50  ;;  %9886 = vmatprep.mubr.bf16.mxu0 %v14472_v4  ;;  %v3871_v50 = vld [vmem:[#allocation11 + $0x17d8] sm:$0xff] }
 0x4f7   :  { %9814 = vmatpush1.bf16.msra.mxu1 %v12825_v18  ;;  %9856 = vmatprep.subr.bf16.mxu0 %v13082_v7  ;;  %v3863_v18 = vld [vmem:[#allocation11 + $0x1798] sm:$0xff]  ;;  %v12954_v7 = vcombine.high %v3591_v56, %v3599_v2 }
 0x4f8   :  { %9815 = vmatprep.subr.bf16.mxu1 %v12810_v48  ;;  %v12969_v48 = vcombine.low %v3607_v63, %v3615_v11  ;;  %v13226_v8 = vcombine.high %v3863_v18, %v3871_v50 }
 0x4fa   :  { %9857 = vmatpush1.bf16.msra.mxu0 %v13081_v15  ;;  %v3855_v15 = vld [vmem:[#allocation11 + $0x1758] sm:$0xff] }
 0x4fb   :  { %9816 = vmatpush1.bf16.msra.mxu1 %v12809_v14  ;;  %9858 = vmatprep.subr.bf16.mxu0 %v13066_v35  ;;  %v3847_v14 = vld [vmem:[#allocation11 + $0x1718] sm:$0xff]  ;;  %v13225_v35 = vcombine.low %v3863_v18, %v3871_v50 }
 0x4fc   :  { %9817 = vmatprep.subr.bf16.mxu1 %v12794_v19  ;;  %v12953_v19 = vcombine.low %v3591_v56, %v3599_v2  ;;  %v13210_v34 = vcombine.high %v3847_v14, %v3855_v15  ;;  %v3767_v56 = vld [vmem:[#allocation11 + $0x1498] sm:$0xff] }
 0x4fd   :  { %v3775_v2 = vld [vmem:[#allocation11 + $0x14d8] sm:$0xff] }
 0x4fe   :  { %9859 = vmatpush1.bf16.msra.mxu0 %v13065_v23  ;;  %v3839_v23 = vld [vmem:[#allocation11 + $0x16d8] sm:$0xff] }
 0x4ff   :  { %9818 = vmatpush1.bf16.msra.mxu1 %v12793_v16  ;;  %9860 = vmatprep.subr.bf16.mxu0 %v13050_v42  ;;  %v3831_v16 = vld [vmem:[#allocation11 + $0x1698] sm:$0xff]  ;;  %v13209_v42 = vcombine.low %v3847_v14, %v3855_v15 }
 0x500   :  { %9819 = vmatprep.subr.bf16.mxu1 %v12778_v24  ;;  %v12937_v24 = vcombine.low %v3575_v31, %v3583_v9  ;;  %v13194_v29 = vcombine.high %v3831_v16, %v3839_v23  ;;  %v13193_v43 = vcombine.low %v3831_v16, %v3839_v23  ;;  %v13130_v31 = vcombine.high %v3767_v56, %v3775_v2  ;;  %v3751_v9 = vld [vmem:[#allocation11 + $0x1418] sm:$0xff] }
 0x501   :  { %v3759_v14 = vld [vmem:[#allocation11 + $0x1458] sm:$0xff] }
 0x502   :  { %9861 = vmatpush1.bf16.msra.mxu0 %v13049_v33  ;;  %v3823_v33 = vld [vmem:[#allocation11 + $0x1658] sm:$0xff]  ;;  %v13113_v32 = vcombine.low %v3751_v9, %v3759_v14 }
 0x503   :  { %9820 = vmatpush1.bf16.msra.mxu1 %v12777_v30  ;;  %9862 = vmatprep.subr.bf16.mxu0 %v13034_v37  ;;  %v3815_v30 = vld [vmem:[#allocation11 + $0x1618] sm:$0xff]  ;;  %v12921_v37 = vcombine.low %v3559_v36, %v3567_v22  ;;  %v13114_v22 = vcombine.high %v3751_v9, %v3759_v14 }
 0x504   :  { %9821 = vmatprep.subr.bf16.mxu1 %v12762_v39  ;;  %v14515_v39 = vpop.f32.mrf.mxu0  ;;  %v13178_v45 = vcombine.high %v3815_v30, %v3823_v33  ;;  %v13177_v53 = vcombine.low %v3815_v30, %v3823_v33  ;;  %v3991_v15 = vld [vmem:[#allocation11 + $0x1b98] sm:$0xff] }
 0x505   :  { %v3975_v23 = vld [vmem:[#allocation11 + $0x1b18] sm:$0xff] }
 0x506   :  { %9863 = vmatpush1.bf16.msra.mxu0 %v13033_v41  ;;  %v3799_v41 = vld [vmem:[#allocation11 + $0x1598] sm:$0xff] }
 0x507   :  { %9822 = vmatpush1.bf16.msra.mxu1 %v12761_v46  ;;  %9864 = vmatprep.subr.bf16.mxu0 %v13018_v3  ;;  %v3535_v46 = vld [vmem:[#allocation11 + $0xd58] sm:$0xff]  ;;  %v14517_v3 = vpop.f32.mrf.mxu0 }
 0x508   :  { %9823 = vmatprep.subr.bf16.mxu1 %v12746_v47  ;;  %v3807_v47 = vld [vmem:[#allocation11 + $0x15d8] sm:$0xff]  ;;  %v12890_v6 = vcombine.high %v3527_v38, %v3535_v46  ;;  %v12889_v11 = vcombine.low %v3527_v38, %v3535_v46 }
 0x509   :  { %v13162_v57 = vcombine.high %v3799_v41, %v3807_v47  ;;  %v14519_v63 = vpop.f32.mrf.mxu0  ;;  %v13161_v13 = vcombine.low %v3799_v41, %v3807_v47  ;;  %v3967_v46 = vld [vmem:[#allocation11 + $0x1ad8] sm:$0xff]  ;;  %v3208_v41 = vld [vmem:[#allocation11 + $0x320] sm:$0xff] }
 0x50a   :  { %9865 = vmatpush1.bf16.msra.mxu0 %v13017_v60  ;;  %v3519_v60 = vld [vmem:[#allocation11 + $0xcd8] sm:$0xff]  ;;  %v3216_v47 = vld [vmem:[#allocation11 + $0x360] sm:$0xff] }
 0x50b   :  { %9824 = vmatpush1.bf16.msra.mxu1 %v12745_v54  ;;  %9866 = vmatprep.subr.bf16.mxu0 %v13002_v62  ;;  %v3511_v54 = vld [vmem:[#allocation11 + $0xc98] sm:$0xff]  ;;  %v9464_v18 = vpop.f32.mrf.mxu0 }
 0x50c   :  { %9825 = vmatprep.subr.bf16.mxu1 %v12730_v61  ;;  %v3783_v61 = vld [vmem:[#allocation11 + $0x1518] sm:$0xff]  ;;  %v12873_v50 = vcombine.low %v3511_v54, %v3519_v60 }
 0x50d   :  { %v3791_v62 = vld [vmem:[#allocation11 + $0x1558] sm:$0xff] }
 0x50e   :  { %9867 = vmatpush1.bf16.msra.mxu0 %v13001_v17  ;;  %v13146_v17 = vcombine.high %v3783_v61, %v3791_v62  ;;  %v3927_v9 = vld [vmem:[#allocation11 + $0x1998] sm:$0xff] }
 0x50f   :  { %9826 = vmatpush1.bf16.msra.mxu1 %v12729_v10  ;;  %9868 = vmatprep.subr.bf16.mxu0 %v12986_v20  ;;  %v12874_v10 = vcombine.high %v3511_v54, %v3519_v60  ;;  %v3503_v20 = vld [vmem:[#allocation11 + $0xc58] sm:$0xff] }
 0x510   :  { %9827 = vmatprep.subr.bf16.mxu1 %v12970_v12  ;;  %v3495_v12 = vld [vmem:[#allocation11 + $0xc18] sm:$0xff] }
 0x512   :  { %9869 = vmatpush1.bf16.msra.mxu0 %v12985_v28  ;;  %v9503_v28 = vpop.f32.mrf.mxu1 }
 0x513   :  { %9828 = vmatpush2.bf16.msra.mxu1 %v12969_v48  ;;  %9870 = vmatprep.subr.bf16.mxu0 %v13226_v8  ;;  %v13145_v48 = vcombine.low %v3783_v61, %v3791_v62  ;;  %v12858_v8 = vcombine.high %v3495_v12, %v3503_v20  ;;  %v12572_v62 = vcombine.high %v3208_v41, %v3216_v47 }
 0x514   :  { %9829 = vmatprep.subr.bf16.mxu1 %v12954_v7  ;;  %v9544_v7 = vpop.f32.mrf.mxu0 }
 0x516   :  { %9871 = vmatpush2.bf16.msra.mxu0 %v13225_v35  ;;  %v12857_v35 = vcombine.low %v3495_v12, %v3503_v20  ;;  %v9546_v36 = vpop.f32.mrf.mxu0  ;;  %v3951_v12 = vld [vmem:[#allocation11 + $0x1a58] sm:$0xff]  ;;  %v3192_v20 = vld [vmem:[#allocation11 + $0x2a0] sm:$0xff] }
 0x517   :  { %9830 = vmatpush2.bf16.msra.mxu1 %v12953_v19  ;;  %9872 = vmatprep.subr.bf16.mxu0 %v13210_v34  ;;  %v3999_v19 = vld [vmem:[#allocation11 + $0x1bd8] sm:$0xff]  ;;  %v9505_v34 = vpop.f32.mrf.mxu1 }
 0x518   :  { %9831 = vmatprep.subr.bf16.mxu1 %v12938_v21  ;;  %v13129_v21 = vcombine.low %v3767_v56, %v3775_v2  ;;  %v13354_v16 = vcombine.high %v3991_v15, %v3999_v19  ;;  %v13353_v25 = vcombine.low %v3991_v15, %v3999_v19  ;;  %v9548_v33 = vpop.f32.mrf.mxu0  ;;  %v3935_v19 = vld [vmem:[#allocation11 + $0x19d8] sm:$0xff] }
 0x519   :  { %v9507_v30 = vpop.f32.mrf.mxu1 }
 0x51a   :  { %9873 = vmatpush2.bf16.msra.mxu0 %v13209_v42  ;;  %v3224_v42 = vld [vmem:[#allocation11 + $0x3a0] sm:$0xff]  ;;  %v9550_v60 = vpop.f32.mrf.mxu0 }
 0x51b   :  { %9832 = vmatpush2.bf16.msra.mxu1 %v12937_v24  ;;  %9874 = vmatprep.subr.bf16.mxu0 %v13194_v29  ;;  %v3983_v24 = vld [vmem:[#allocation11 + $0x1b58] sm:$0xff]  ;;  %v9502_v29 = vadd.f32 %v9501_v5, %v14515_v39 }
 0x51c   :  { %9833 = vmatprep.subr.bf16.mxu1 %v12922_v27  ;;  %v3232_v27 = vld [vmem:[#allocation11 + $0x3e0] sm:$0xff]  ;;  %v13337_v39 = vcombine.low %v3975_v23, %v3983_v24 }
 0x51d   :  { %v12588_v38 = vcombine.high %v3224_v42, %v3232_v27 }
 0x51e   :  { %9875 = vmatpush2.bf16.msra.mxu0 %v13193_v43  ;;  %v3959_v43 = vld [vmem:[#allocation11 + $0x1a98] sm:$0xff] }
 0x51f   :  { %9834 = vmatpush2.bf16.msra.mxu1 %v12921_v37  ;;  %9876 = vmatprep.subr.bf16.mxu0 %v13178_v45  ;;  %v13338_v37 = vcombine.high %v3975_v23, %v3983_v24  ;;  %v9545_v45 = vadd.f32 %v9544_v7, %v9502_v29  ;;  %v13322_v61 = vcombine.high %v3959_v43, %v3967_v46  ;;  %v3919_v29 = vld [vmem:[#allocation11 + $0x1958] sm:$0xff] }
 0x520   :  { %9835 = vmatprep.subr.bf16.mxu1 %v12906_v52  ;;  %v9504_v52 = vadd.f32 %v9503_v28, %v14517_v3  ;;  %v13321_v2 = vcombine.low %v3959_v43, %v3967_v46  ;;  %v12571_v7 = vcombine.low %v3208_v41, %v3216_v47  ;;  %v13290_v23 = vcombine.high %v3927_v9, %v3935_v19  ;;  %v3152_v46 = vld [vmem:[#allocation11 + $0x160] sm:$0xff] }
 0x522   :  { %9877 = vmatpush2.bf16.msra.mxu0 %v13177_v53  ;;  %v12587_v53 = vcombine.low %v3224_v42, %v3232_v27  ;;  %v3911_v42 = vld [vmem:[#allocation11 + $0x1918] sm:$0xff] }
 0x523   :  { %9836 = vmatpush2.bf16.msra.mxu1 %v12905_v58  ;;  %9878 = vmatprep.subr.bf16.mxu0 %v13162_v57  ;;  %v9547_v57 = vadd.f32 %v9546_v36, %v9504_v52  ;;  %v3895_v52 = vld [vmem:[#allocation11 + $0x1898] sm:$0xff]  ;;  %v13273_v41 = vcombine.low %v3911_v42, %v3919_v29 }
 0x524   :  { %9837 = vmatprep.subr.bf16.mxu1 %v12890_v6  ;;  %v9506_v6 = vadd.f32 %v9505_v34, %v14519_v63  ;;  %v3200_v63 = vld [vmem:[#allocation11 + $0x2e0] sm:$0xff] }
 0x526   :  { %9879 = vmatpush2.bf16.msra.mxu0 %v13161_v13  ;;  %v9508_v13 = vadd.f32 %v9507_v30, %v9464_v18  ;;  %v9549_v5 = vadd.f32 %v9548_v33, %v9506_v6  ;;  %v13289_v30 = vcombine.low %v3927_v9, %v3935_v19  ;;  %v3887_v6 = vld [vmem:[#allocation11 + $0x1858] sm:$0xff] }
 0x527   :  { %9838 = vmatpush2.bf16.msra.mxu1 %v12889_v11  ;;  %9880 = vmatprep.subr.bf16.mxu0 %v13146_v17  ;;  %v3943_v11 = vld [vmem:[#allocation11 + $0x1a18] sm:$0xff] }
 0x528   :  { %9839 = vmatprep.subr.bf16.mxu1 %v12874_v10  ;;  %v4095_v9 = vld [vmem:[#allocation11 + $0x1ed8] sm:$0xff] }
 0x52a   :  { %9881 = vmatpush2.bf16.msra.mxu0 %v13145_v48 }
 0x52b   :  { %9840 = vmatpush2.bf16.msra.mxu1 %v12873_v50  ;;  %9882 = vmatprep.subr.bf16.mxu0 %v13130_v31  ;;  %v9551_v50 = vadd.f32 %v9550_v60, %v9508_v13  ;;  %v12556_v31 = vcombine.high %v3192_v20, %v3200_v63  ;;  %v4127_v13 = vld [vmem:[#allocation11 + $0x1fd8] sm:$0xff] }
 0x52c   :  { %9841 = vmatprep.subr.bf16.mxu1 %v12858_v8  ;;  %v13306_v8 = vcombine.high %v3943_v11, %v3951_v12 }
 0x52e   :  { %9883 = vmatpush2.bf16.msra.mxu0 %v13129_v21  ;;  %v3184_v21 = vld [vmem:[#allocation11 + $0x260] sm:$0xff] }
 0x52f   :  { %9842 = vmatpush2.bf16.msra.mxu1 %v12857_v35  ;;  %9884 = vmatprep.subr.bf16.mxu0 %v13114_v22  ;;  %v3176_v35 = vld [vmem:[#allocation11 + $0x220] sm:$0xff]  ;;  %v13305_v22 = vcombine.low %v3943_v11, %v3951_v12  ;;  %v4119_v11 = vld [vmem:[#allocation11 + $0x1f98] sm:$0xff] }
 0x530   :  { %9897 = vmatprep.subr.bf16.mxu1 %v13354_v16  ;;  %v12555_v16 = vcombine.low %v3192_v20, %v3200_v63  ;;  %v12540_v24 = vcombine.high %v3176_v35, %v3184_v21  ;;  %v12539_v33 = vcombine.low %v3176_v35, %v3184_v21  ;;  %v13482_v20 = vcombine.high %v4119_v11, %v4127_v13 }
 0x532   :  { %v9587_v58 = vpop.f32.mrf.mxu1  ;;  %9844 = vmatmul.mubr.bf16.vlgmr.msra.gmra.mxu1 %v14461_v0  ;;  %9885 = vmatpush2.bf16.msra.mxu0 %v13113_v32  ;;  %v3160_v32 = vld [vmem:[#allocation11 + $0x1a0] sm:$0xff] }
 0x533   :  { %v9588_v54 = vadd.f32 %v9587_v58, %v9545_v45  ;;  %9898 = vmatpush1.bf16.msra.mxu1 %v13353_v25  ;;  %9929 = vmatprep.mubr.bf16.mxu1 %v14477_v51  ;;  %v3168_v25 = vld [vmem:[#allocation11 + $0x1e0] sm:$0xff]  ;;  %v3903_v45 = vld [vmem:[#allocation11 + $0x18d8] sm:$0xff] }
 0x534   :  { %v9589_v3 = vpop.f32.mrf.mxu1  ;;  %9899 = vmatprep.subr.bf16.mxu1 %v13338_v37  ;;  %9940 = vmatprep.subr.bf16.mxu0 %v12588_v38  ;;  %v13274_v37 = vcombine.high %v3911_v42, %v3919_v29  ;;  %v12524_v43 = vcombine.high %v3160_v32, %v3168_v25  ;;  %v3144_v38 = vld [vmem:[#allocation11 + $0x120] sm:$0xff]  ;;  %v12523_v47 = vcombine.low %v3160_v32, %v3168_v25 }
 0x535   :  { %v10630_v10 = vmax.f32 %v9588_v54, 0.0  ;;  %v9590_v17 = vadd.f32 %v9589_v3, %v9547_v57  ;;  %9887 = vmatmul.mubr.bf16.vlgmr.msra.gmra.mxu0 %v14470_v40  ;;  %v13258_v58 = vcombine.high %v3895_v52, %v3903_v45  ;;  %v3128_v57 = vld [vmem:[#allocation11 + $0xa0] sm:$0xff]  ;;  %v13257_v60 = vcombine.low %v3895_v52, %v3903_v45 }
 0x536   :  { %v9591_v56 = vpop.f32.mrf.mxu1  ;;  %9941 = vmatpush1.bf16.msra.mxu0 %v12587_v53  ;;  %9972 = vmatprep.mubr.bf16.mxu0 %v14454_v44  ;;  %v3879_v53 = vld [vmem:[#allocation11 + $0x1818] sm:$0xff]  ;;  %v3136_v54 = vld [vmem:[#allocation11 + $0xe0] sm:$0xff]  ;;  %v12507_v3 = vcombine.low %v3144_v38, %v3152_v46 }
 0x537   :  { %10662 = vst [vmem:[#allocation14 + $0x10] sm:$0xff] %v10630_v10  ;;  %v10631_v48 = vmax.f32 %v9590_v17, 0.0  ;;  %v9592_v28 = vadd.f32 %v9591_v56, %v9549_v5  ;;  %9900 = vmatpush1.bf16.msra.mxu1 %v13337_v39  ;;  %9942 = vmatprep.subr.bf16.mxu0 %v12572_v62  ;;  %v12508_v39 = vcombine.high %v3144_v38, %v3152_v46  ;;  %v3112_v5 = vld [vmem:[#allocation11 + $0x20] sm:$0xff]  ;;  %v4103_v56 = vld [vmem:[#allocation11 + $0x1f18] sm:$0xff] }
 0x538   :  { %v9593_v18 = vpop.f32.mrf.mxu1  ;;  %9901 = vmatprep.subr.bf16.mxu1 %v13322_v61  ;;  %v13242_v61 = vcombine.high %v3879_v53, %v3887_v6  ;;  %v12492_v62 = vcombine.high %v3128_v57, %v3136_v54  ;;  %v13241_v17 = vcombine.low %v3879_v53, %v3887_v6  ;;  %v12491_v12 = vcombine.low %v3128_v57, %v3136_v54 }
 0x539   :  { %10663 = vst [vmem:[#allocation14 + $0x18] sm:$0xff] %v10631_v48  ;;  %v10646_v14 = vmax.f32 %v9592_v28, 0.0  ;;  %v9594_v15 = vadd.f32 %v9593_v18, %v9551_v50  ;;  %v3352_v50 = vld [vmem:[#allocation11 + $0x7a0] sm:$0xff]  ;;  %v13481_v28 = vcombine.low %v4119_v11, %v4127_v13 }
 0x53a   :  { %9943 = vmatpush1.bf16.msra.mxu0 %v12571_v7 }
 0x53b   :  { %10678 = vst [vmem:[#allocation14 + $0x90] sm:$0xff] %v10646_v14  ;;  %v14528_v34 = vpack.c.bf16 %v10646_v14, %v10630_v10  ;;  %v10647_v36 = vmax.f32 %v9594_v15, 0.0  ;;  %9902 = vmatpush1.bf16.msra.mxu1 %v13321_v2  ;;  %9944 = vmatprep.subr.bf16.mxu0 %v12556_v31  ;;  %v3120_v10 = vld [vmem:[#allocation11 + $0x60] sm:$0xff]  ;;  %v4111_v2 = vld [vmem:[#allocation11 + $0x1f58] sm:$0xff] }
 0x53c   :  { %9903 = vmatprep.subr.bf16.mxu1 %v13306_v8  ;;  %v12476_v63 = vcombine.high %v3112_v5, %v3120_v10  ;;  %v12475_v7 = vcombine.low %v3112_v5, %v3120_v10  ;;  %v13466_v18 = vcombine.high %v4103_v56, %v4111_v2  ;;  %v4087_v31 = vld [vmem:[#allocation11 + $0x1e98] sm:$0xff]  ;;  %v3336_v14 = vld [vmem:[#allocation11 + $0x720] sm:$0xff]  ;;  %v13465_v19 = vcombine.low %v4103_v56, %v4111_v2 }
 0x53d   :  { %10679 = vst [vmem:[#allocation14 + $0x98] sm:$0xff] %v10647_v36  ;;  %v14530_v27 = vpack.c.bf16 %v10647_v36, %v10631_v48  ;;  %v3360_v48 = vld [vmem:[#allocation11 + $0x7e0] sm:$0xff]  ;;  %v13450_v21 = vcombine.high %v4087_v31, %v4095_v9  ;;  %v13449_v42 = vcombine.low %v4087_v31, %v4095_v9 }
 0x53e   :  { %9945 = vmatpush1.bf16.msra.mxu0 %v12555_v16  ;;  %v12716_v8 = vcombine.high %v3352_v50, %v3360_v48  ;;  %v3344_v15 = vld [vmem:[#allocation11 + $0x760] sm:$0xff]  ;;  %v12715_v35 = vcombine.low %v3352_v50, %v3360_v48  ;;  %v4079_v16 = vld [vmem:[#allocation11 + $0x1e58] sm:$0xff] }
 0x53f   :  { %9904 = vmatpush1.bf16.msra.mxu1 %v13305_v22  ;;  %9946 = vmatprep.subr.bf16.mxu0 %v12540_v24  ;;  %v12700_v36 = vcombine.high %v3336_v14, %v3344_v15  ;;  %v4071_v22 = vld [vmem:[#allocation11 + $0x1e18] sm:$0xff]  ;;  %v3328_v24 = vld [vmem:[#allocation11 + $0x6e0] sm:$0xff]  ;;  %v12699_v29 = vcombine.low %v3336_v14, %v3344_v15 }
 0x540   :  { %9905 = vmatprep.subr.bf16.mxu1 %v13290_v23  ;;  %v3320_v23 = vld [vmem:[#allocation11 + $0x6a0] sm:$0xff]  ;;  %v13434_v32 = vcombine.high %v4071_v22, %v4079_v16  ;;  %v13433_v52 = vcombine.low %v4071_v22, %v4079_v16 }
 0x541   :  { %v12684_v25 = vcombine.high %v3320_v23, %v3328_v24  ;;  %v12683_v45 = vcombine.low %v3320_v23, %v3328_v24 }
 0x542   :  { %9947 = vmatpush1.bf16.msra.mxu0 %v12539_v33  ;;  %v4063_v33 = vld [vmem:[#allocation11 + $0x1dd8] sm:$0xff] }
 0x543   :  { %9906 = vmatpush1.bf16.msra.mxu1 %v13289_v30  ;;  %9948 = vmatprep.subr.bf16.mxu0 %v12524_v43  ;;  %v4055_v30 = vld [vmem:[#allocation11 + $0x1d98] sm:$0xff]  ;;  %v3312_v43 = vld [vmem:[#allocation11 + $0x660] sm:$0xff] }
 0x544   :  { %9907 = vmatprep.subr.bf16.mxu1 %v13274_v37  ;;  %v3304_v37 = vld [vmem:[#allocation11 + $0x620] sm:$0xff]  ;;  %v13418_v38 = vcombine.high %v4055_v30, %v4063_v33  ;;  %v13417_v53 = vcombine.low %v4055_v30, %v4063_v33 }
 0x545   :  { %v12668_v46 = vcombine.high %v3304_v37, %v3312_v43  ;;  %v12667_v6 = vcombine.low %v3304_v37, %v3312_v43  ;;  %v3432_v43 = vld [vmem:[#allocation11 + $0xa20] sm:$0xff] }
 0x546   :  { %9949 = vmatpush1.bf16.msra.mxu0 %v12523_v47  ;;  %v4047_v47 = vld [vmem:[#allocation11 + $0x1d58] sm:$0xff] }
 0x547   :  { %9908 = vmatpush1.bf16.msra.mxu1 %v13273_v41  ;;  %9950 = vmatprep.subr.bf16.mxu0 %v12508_v39  ;;  %v4039_v41 = vld [vmem:[#allocation11 + $0x1d18] sm:$0xff]  ;;  %v3296_v39 = vld [vmem:[#allocation11 + $0x5e0] sm:$0xff] }
 0x548   :  { %9909 = vmatprep.subr.bf16.mxu1 %v13258_v58  ;;  %v3288_v58 = vld [vmem:[#allocation11 + $0x5a0] sm:$0xff]  ;;  %v13402_v57 = vcombine.high %v4039_v41, %v4047_v47  ;;  %v13401_v11 = vcombine.low %v4039_v41, %v4047_v47 }
 0x549   :  { %v12652_v54 = vcombine.high %v3288_v58, %v3296_v39  ;;  %v12651_v13 = vcombine.low %v3288_v58, %v3296_v39 }
 0x54a   :  { %9951 = vmatpush1.bf16.msra.mxu0 %v12507_v3  ;;  %v4031_v3 = vld [vmem:[#allocation11 + $0x1cd8] sm:$0xff] }
 0x54b   :  { %9910 = vmatpush1.bf16.msra.mxu1 %v13257_v60  ;;  %9952 = vmatprep.subr.bf16.mxu0 %v12492_v62  ;;  %v4023_v60 = vld [vmem:[#allocation11 + $0x1c98] sm:$0xff]  ;;  %v3280_v62 = vld [vmem:[#allocation11 + $0x560] sm:$0xff] }
 0x54c   :  { %9911 = vmatprep.subr.bf16.mxu1 %v13242_v61  ;;  %v3272_v61 = vld [vmem:[#allocation11 + $0x520] sm:$0xff]  ;;  %v13386_v5 = vcombine.high %v4023_v60, %v4031_v3  ;;  %v13385_v56 = vcombine.low %v4023_v60, %v4031_v3 }
 0x54d   :  { %v12636_v10 = vcombine.high %v3272_v61, %v3280_v62  ;;  %v12635_v2 = vcombine.low %v3272_v61, %v3280_v62 }
 0x54e   :  { %9953 = vmatpush1.bf16.msra.mxu0 %v12491_v12  ;;  %v4015_v12 = vld [vmem:[#allocation11 + $0x1c58] sm:$0xff] }
 0x54f   :  { %9912 = vmatpush1.bf16.msra.mxu1 %v13241_v17  ;;  %9954 = vmatprep.subr.bf16.mxu0 %v12476_v63  ;;  %v4007_v17 = vld [vmem:[#allocation11 + $0x1c18] sm:$0xff]  ;;  %v3264_v63 = vld [vmem:[#allocation11 + $0x4e0] sm:$0xff] }
 0x550   :  { %9913 = vmatprep.subr.bf16.mxu1 %v13482_v20  ;;  %v3256_v20 = vld [vmem:[#allocation11 + $0x4a0] sm:$0xff]  ;;  %v13370_v50 = vcombine.high %v4007_v17, %v4015_v12  ;;  %v13369_v31 = vcombine.low %v4007_v17, %v4015_v12 }
 0x551   :  { %v12620_v48 = vcombine.high %v3256_v20, %v3264_v63  ;;  %v12619_v9 = vcombine.low %v3256_v20, %v3264_v63 }
 0x552   :  { %9955 = vmatpush1.bf16.msra.mxu0 %v12475_v7  ;;  %v3248_v7 = vld [vmem:[#allocation11 + $0x460] sm:$0xff] }
 0x553   :  { %9914 = vmatpush2.bf16.msra.mxu1 %v13481_v28  ;;  %9956 = vmatprep.subr.bf16.mxu0 %v12716_v8  ;;  %v3240_v28 = vld [vmem:[#allocation11 + $0x420] sm:$0xff] }
 0x554   :  { %9915 = vmatprep.subr.bf16.mxu1 %v13466_v18  ;;  %v3480_v18 = vld [vmem:[#allocation11 + $0xba0] sm:$0xff]  ;;  %v12604_v14 = vcombine.high %v3240_v28, %v3248_v7  ;;  %v12603_v22 = vcombine.low %v3240_v28, %v3248_v7 }
 0x555   :  { %v3488_v8 = vld [vmem:[#allocation11 + $0xbe0] sm:$0xff] }
 0x556   :  { %9957 = vmatpush2.bf16.msra.mxu0 %v12715_v35  ;;  %v12844_v15 = vcombine.high %v3480_v18, %v3488_v8  ;;  %v3472_v35 = vld [vmem:[#allocation11 + $0xb60] sm:$0xff]  ;;  %v12843_v16 = vcombine.low %v3480_v18, %v3488_v8 }
 0x557   :  { %9916 = vmatpush2.bf16.msra.mxu1 %v13465_v19  ;;  %9958 = vmatprep.subr.bf16.mxu0 %v12700_v36  ;;  %v3464_v19 = vld [vmem:[#allocation11 + $0xb20] sm:$0xff] }
 0x558   :  { %9917 = vmatprep.subr.bf16.mxu1 %v13450_v21  ;;  %v3736_v21 = vld [vmem:[#allocation11 + $0x13a0] sm:$0xff]  ;;  %v12828_v23 = vcombine.high %v3464_v19, %v3472_v35  ;;  %v12827_v30 = vcombine.low %v3464_v19, %v3472_v35 }
 0x559   :  { %v3744_v36 = vld [vmem:[#allocation11 + $0x13e0] sm:$0xff] }
 0x55a   :  { %9959 = vmatpush2.bf16.msra.mxu0 %v12699_v29  ;;  %v13100_v24 = vcombine.high %v3736_v21, %v3744_v36  ;;  %v3456_v29 = vld [vmem:[#allocation11 + $0xae0] sm:$0xff]  ;;  %v13099_v33 = vcombine.low %v3736_v21, %v3744_v36 }
 0x55b   :  { %9918 = vmatpush2.bf16.msra.mxu1 %v13449_v42  ;;  %9960 = vmatprep.subr.bf16.mxu0 %v12684_v25  ;;  %v3448_v42 = vld [vmem:[#allocation11 + $0xaa0] sm:$0xff] }
 0x55c   :  { %9919 = vmatprep.subr.bf16.mxu1 %v13434_v32  ;;  %v3720_v32 = vld [vmem:[#allocation11 + $0x1320] sm:$0xff]  ;;  %v12812_v37 = vcombine.high %v3448_v42, %v3456_v29  ;;  %v12811_v41 = vcombine.low %v3448_v42, %v3456_v29 }
 0x55d   :  { %v3728_v25 = vld [vmem:[#allocation11 + $0x1360] sm:$0xff] }
 0x55e   :  { %9961 = vmatpush2.bf16.msra.mxu0 %v12683_v45  ;;  %v3440_v45 = vld [vmem:[#allocation11 + $0xa60] sm:$0xff]  ;;  %v13083_v47 = vcombine.low %v3720_v32, %v3728_v25 }
 0x55f   :  { %9920 = vmatpush2.bf16.msra.mxu1 %v13433_v52  ;;  %9962 = vmatprep.subr.bf16.mxu0 %v12668_v46  ;;  %v13084_v52 = vcombine.high %v3720_v32, %v3728_v25  ;;  %v3712_v46 = vld [vmem:[#allocation11 + $0x12e0] sm:$0xff]  ;;  %v12796_v58 = vcombine.high %v3432_v43, %v3440_v45  ;;  %v12795_v60 = vcombine.low %v3432_v43, %v3440_v45 }
 0x560   :  { %9921 = vmatprep.subr.bf16.mxu1 %v13418_v38  ;;  %v3704_v38 = vld [vmem:[#allocation11 + $0x12a0] sm:$0xff] }
 0x561   :  { %v13068_v39 = vcombine.high %v3704_v38, %v3712_v46  ;;  %v13067_v3 = vcombine.low %v3704_v38, %v3712_v46  ;;  %v3872_v43 = vld [vmem:[#allocation11 + $0x17e0] sm:$0xff] }
 0x562   :  { %9963 = vmatpush2.bf16.msra.mxu0 %v12667_v6  ;;  %v3424_v6 = vld [vmem:[#allocation11 + $0x9e0] sm:$0xff] }
 0x563   :  { %9922 = vmatpush2.bf16.msra.mxu1 %v13417_v53  ;;  %9964 = vmatprep.subr.bf16.mxu0 %v12652_v54  ;;  %v3416_v53 = vld [vmem:[#allocation11 + $0x9a0] sm:$0xff] }
 0x564   :  { %9923 = vmatprep.subr.bf16.mxu1 %v13402_v57  ;;  %v3688_v57 = vld [vmem:[#allocation11 + $0x1220] sm:$0xff]  ;;  %v12780_v61 = vcombine.high %v3416_v53, %v3424_v6  ;;  %v12779_v17 = vcombine.low %v3416_v53, %v3424_v6 }
 0x565   :  { %v3696_v54 = vld [vmem:[#allocation11 + $0x1260] sm:$0xff] }
 0x566   :  { %9965 = vmatpush2.bf16.msra.mxu0 %v12651_v13  ;;  %v13052_v62 = vcombine.high %v3688_v57, %v3696_v54  ;;  %v3408_v13 = vld [vmem:[#allocation11 + $0x960] sm:$0xff]  ;;  %v13051_v12 = vcombine.low %v3688_v57, %v3696_v54 }
 0x567   :  { %9924 = vmatpush2.bf16.msra.mxu1 %v13401_v11  ;;  %9966 = vmatprep.subr.bf16.mxu0 %v12636_v10  ;;  %v3400_v11 = vld [vmem:[#allocation11 + $0x920] sm:$0xff] }
 0x568   :  { %9925 = vmatprep.subr.bf16.mxu1 %v13386_v5  ;;  %v3672_v5 = vld [vmem:[#allocation11 + $0x11a0] sm:$0xff]  ;;  %v12764_v20 = vcombine.high %v3400_v11, %v3408_v13  ;;  %v12763_v28 = vcombine.low %v3400_v11, %v3408_v13 }
 0x569   :  { %v3680_v10 = vld [vmem:[#allocation11 + $0x11e0] sm:$0xff] }
 0x56a   :  { %9967 = vmatpush2.bf16.msra.mxu0 %v12635_v2  ;;  %v13036_v63 = vcombine.high %v3672_v5, %v3680_v10  ;;  %v3392_v2 = vld [vmem:[#allocation11 + $0x8e0] sm:$0xff]  ;;  %v13035_v7 = vcombine.low %v3672_v5, %v3680_v10 }
 0x56b   :  { %9926 = vmatpush2.bf16.msra.mxu1 %v13385_v56  ;;  %9968 = vmatprep.subr.bf16.mxu0 %v12620_v48  ;;  %v3384_v56 = vld [vmem:[#allocation11 + $0x8a0] sm:$0xff] }
 0x56c   :  { %9927 = vmatprep.subr.bf16.mxu1 %v13370_v50  ;;  %v3656_v50 = vld [vmem:[#allocation11 + $0x1120] sm:$0xff]  ;;  %v12748_v18 = vcombine.high %v3384_v56, %v3392_v2  ;;  %v12747_v19 = vcombine.low %v3384_v56, %v3392_v2  ;;  %v14536_v56 = vpop.f32.mrf.mxu0 }
 0x56d   :  { %v3664_v48 = vld [vmem:[#allocation11 + $0x1160] sm:$0xff] }
 0x56e   :  { %9969 = vmatpush2.bf16.msra.mxu0 %v12619_v9  ;;  %v13020_v8 = vcombine.high %v3656_v50, %v3664_v48  ;;  %v3376_v9 = vld [vmem:[#allocation11 + $0x860] sm:$0xff]  ;;  %v13019_v35 = vcombine.low %v3656_v50, %v3664_v48 }
 0x56f   :  { %9928 = vmatpush2.bf16.msra.mxu1 %v13369_v31  ;;  %9970 = vmatprep.subr.bf16.mxu0 %v12604_v14  ;;  %v3368_v31 = vld [vmem:[#allocation11 + $0x820] sm:$0xff] }
 0x570   :  { %9983 = vmatprep.subr.bf16.mxu1 %v12844_v15  ;;  %v3640_v14 = vld [vmem:[#allocation11 + $0x10a0] sm:$0xff]  ;;  %v12732_v21 = vcombine.high %v3368_v31, %v3376_v9  ;;  %v12731_v42 = vcombine.low %v3368_v31, %v3376_v9  ;;  %v14538_v9 = vpop.f32.mrf.mxu0 }
 0x571   :  { %v3648_v15 = vld [vmem:[#allocation11 + $0x10e0] sm:$0xff] }
 0x572   :  { %9930 = vmatmul.mubr.bf16.vlgmr.msra.gmra.mxu1 %v14479_v26  ;;  %9971 = vmatpush2.bf16.msra.mxu0 %v12603_v22  ;;  %v13004_v36 = vcombine.high %v3640_v14, %v3648_v15  ;;  %v3608_v22 = vld [vmem:[#allocation11 + $0xfa0] sm:$0xff]  ;;  %v13003_v29 = vcombine.low %v3640_v14, %v3648_v15 }
 0x573   :  { %9984 = vmatpush1.bf16.msra.mxu1 %v12843_v16  ;;  %10015 = vmatprep.mubr.bf16.mxu1 %v14463_v55  ;;  %v3616_v16 = vld [vmem:[#allocation11 + $0xfe0] sm:$0xff] }
 0x574   :  { %9985 = vmatprep.subr.bf16.mxu1 %v12828_v23  ;;  %10026 = vmatprep.subr.bf16.mxu0 %v13100_v24  ;;  %v3624_v23 = vld [vmem:[#allocation11 + $0x1020] sm:$0xff]  ;;  %v12972_v32 = vcombine.high %v3608_v22, %v3616_v16 }
 0x575   :  { %9973 = vmatmul.mubr.bf16.vlgmr.msra.gmra.mxu0 %v14452_v59  ;;  %v3632_v24 = vld [vmem:[#allocation11 + $0x1060] sm:$0xff] }
 0x576   :  { %10027 = vmatpush1.bf16.msra.mxu0 %v13099_v33  ;;  %10058 = vmatprep.mubr.bf16.mxu0 %v14472_v4  ;;  %v12988_v25 = vcombine.high %v3624_v23, %v3632_v24  ;;  %v3600_v33 = vld [vmem:[#allocation11 + $0xf60] sm:$0xff]  ;;  %v12987_v45 = vcombine.low %v3624_v23, %v3632_v24  ;;  %v14540_v23 = vpop.f32.mrf.mxu0 }
 0x577   :  { %9986 = vmatpush1.bf16.msra.mxu1 %v12827_v30  ;;  %10028 = vmatprep.subr.bf16.mxu0 %v13084_v52  ;;  %v3592_v30 = vld [vmem:[#allocation11 + $0xf20] sm:$0xff]  ;;  %v12971_v52 = vcombine.low %v3608_v22, %v3616_v16 }
 0x578   :  { %9987 = vmatprep.subr.bf16.mxu1 %v12812_v37  ;;  %v3864_v37 = vld [vmem:[#allocation11 + $0x17a0] sm:$0xff]  ;;  %v12956_v38 = vcombine.high %v3592_v30, %v3600_v33  ;;  %v12955_v53 = vcombine.low %v3592_v30, %v3600_v33 }
 0x579   :  { %v13228_v46 = vcombine.high %v3864_v37, %v3872_v43  ;;  %v13227_v6 = vcombine.low %v3864_v37, %v3872_v43  ;;  %v3808_v31 = vld [vmem:[#allocation11 + $0x15e0] sm:$0xff] }
 0x57a   :  { %10029 = vmatpush1.bf16.msra.mxu0 %v13083_v47  ;;  %v3584_v47 = vld [vmem:[#allocation11 + $0xee0] sm:$0xff] }
 0x57b   :  { %9988 = vmatpush1.bf16.msra.mxu1 %v12811_v41  ;;  %10030 = vmatprep.subr.bf16.mxu0 %v13068_v39  ;;  %v3576_v41 = vld [vmem:[#allocation11 + $0xea0] sm:$0xff] }
 0x57c   :  { %9989 = vmatprep.subr.bf16.mxu1 %v12796_v58  ;;  %v3848_v58 = vld [vmem:[#allocation11 + $0x1720] sm:$0xff]  ;;  %v12940_v57 = vcombine.high %v3576_v41, %v3584_v47  ;;  %v12939_v11 = vcombine.low %v3576_v41, %v3584_v47 }
 0x57d   :  { %v3856_v39 = vld [vmem:[#allocation11 + $0x1760] sm:$0xff] }
 0x57e   :  { %10031 = vmatpush1.bf16.msra.mxu0 %v13067_v3  ;;  %v13212_v54 = vcombine.high %v3848_v58, %v3856_v39  ;;  %v3568_v3 = vld [vmem:[#allocation11 + $0xe60] sm:$0xff]  ;;  %v13211_v13 = vcombine.low %v3848_v58, %v3856_v39 }
 0x57f   :  { %9990 = vmatpush1.bf16.msra.mxu1 %v12795_v60  ;;  %10032 = vmatprep.subr.bf16.mxu0 %v13052_v62  ;;  %v3560_v60 = vld [vmem:[#allocation11 + $0xe20] sm:$0xff] }
 0x580   :  { %9991 = vmatprep.subr.bf16.mxu1 %v12780_v61  ;;  %v3832_v61 = vld [vmem:[#allocation11 + $0x16a0] sm:$0xff]  ;;  %v12924_v5 = vcombine.high %v3560_v60, %v3568_v3  ;;  %v12923_v2 = vcombine.low %v3560_v60, %v3568_v3 }
 0x581   :  { %v3840_v62 = vld [vmem:[#allocation11 + $0x16e0] sm:$0xff] }
 0x582   :  { %10033 = vmatpush1.bf16.msra.mxu0 %v13051_v12  ;;  %v13196_v10 = vcombine.high %v3832_v61, %v3840_v62  ;;  %v3552_v12 = vld [vmem:[#allocation11 + $0xde0] sm:$0xff]  ;;  %v13195_v50 = vcombine.low %v3832_v61, %v3840_v62 }
 0x583   :  { %9992 = vmatpush1.bf16.msra.mxu1 %v12779_v17  ;;  %10034 = vmatprep.subr.bf16.mxu0 %v13036_v63  ;;  %v3544_v17 = vld [vmem:[#allocation11 + $0xda0] sm:$0xff] }
 0x584   :  { %9993 = vmatprep.subr.bf16.mxu1 %v12764_v20  ;;  %v3816_v20 = vld [vmem:[#allocation11 + $0x1620] sm:$0xff]  ;;  %v12908_v48 = vcombine.high %v3544_v17, %v3552_v12  ;;  %v12907_v14 = vcombine.low %v3544_v17, %v3552_v12  ;;  %v3233_v17 = vld [vmem:[#allocation11 + $0x3e8] sm:$0xff] }
 0x585   :  { %v3824_v63 = vld [vmem:[#allocation11 + $0x1660] sm:$0xff] }
 0x586   :  { %10035 = vmatpush1.bf16.msra.mxu0 %v13035_v7  ;;  %v3528_v7 = vld [vmem:[#allocation11 + $0xd20] sm:$0xff]  ;;  %v13179_v15 = vcombine.low %v3816_v20, %v3824_v63 }
 0x587   :  { %9994 = vmatpush1.bf16.msra.mxu1 %v12763_v28  ;;  %10036 = vmatprep.subr.bf16.mxu0 %v13020_v8  ;;  %v13180_v28 = vcombine.high %v3816_v20, %v3824_v63  ;;  %v3800_v8 = vld [vmem:[#allocation11 + $0x15a0] sm:$0xff] }
 0x588   :  { %9995 = vmatprep.subr.bf16.mxu1 %v12748_v18  ;;  %v3536_v18 = vld [vmem:[#allocation11 + $0xd60] sm:$0xff] }
 0x589   :  { %v3784_v22 = vld [vmem:[#allocation11 + $0x1520] sm:$0xff]  ;;  %v12891_v24 = vcombine.low %v3528_v7, %v3536_v18 }
 0x58a   :  { %10037 = vmatpush1.bf16.msra.mxu0 %v13019_v35  ;;  %v13164_v35 = vcombine.high %v3800_v8, %v3808_v31  ;;  %v3792_v16 = vld [vmem:[#allocation11 + $0x1560] sm:$0xff] }
 0x58b   :  { %9996 = vmatpush1.bf16.msra.mxu1 %v12747_v19  ;;  %10038 = vmatprep.subr.bf16.mxu0 %v13004_v36  ;;  %v12892_v19 = vcombine.high %v3528_v7, %v3536_v18  ;;  %v3520_v36 = vld [vmem:[#allocation11 + $0xce0] sm:$0xff] }
 0x58c   :  { %9997 = vmatprep.subr.bf16.mxu1 %v12732_v21  ;;  %v3512_v21 = vld [vmem:[#allocation11 + $0xca0] sm:$0xff] }
 0x58d   :  { %v3496_v30 = vld [vmem:[#allocation11 + $0xc20] sm:$0xff] }
 0x58e   :  { %10039 = vmatpush1.bf16.msra.mxu0 %v13003_v29  ;;  %v9673_v29 = vpop.f32.mrf.mxu1  ;;  %v3504_v33 = vld [vmem:[#allocation11 + $0xc60] sm:$0xff] }
 0x58f   :  { %9998 = vmatpush1.bf16.msra.mxu1 %v12731_v42  ;;  %10040 = vmatprep.subr.bf16.mxu0 %v12988_v25  ;;  %v13163_v42 = vcombine.low %v3800_v8, %v3808_v31  ;;  %v13148_v25 = vcombine.high %v3784_v22, %v3792_v16  ;;  %v3768_v37 = vld [vmem:[#allocation11 + $0x14a0] sm:$0xff]  ;;  %v12860_v47 = vcombine.high %v3496_v30, %v3504_v33 }
 0x590   :  { %9999 = vmatprep.subr.bf16.mxu1 %v12972_v32  ;;  %v12876_v32 = vcombine.high %v3512_v21, %v3520_v36  ;;  %v3776_v43 = vld [vmem:[#allocation11 + $0x14e0] sm:$0xff]  ;;  %v9674_v12 = vadd.f32 %v9673_v29, %v14536_v56 }
 0x591   :  { %v13132_v58 = vcombine.high %v3768_v37, %v3776_v43  ;;  %v3752_v39 = vld [vmem:[#allocation11 + $0x1420] sm:$0xff]  ;;  %v13131_v60 = vcombine.low %v3768_v37, %v3776_v43  ;;  %v3193_v43 = vld [vmem:[#allocation11 + $0x2a8] sm:$0xff] }
 0x592   :  { %10041 = vmatpush1.bf16.msra.mxu0 %v12987_v45  ;;  %v12875_v45 = vcombine.low %v3512_v21, %v3520_v36  ;;  %v3968_v31 = vld [vmem:[#allocation11 + $0x1ae0] sm:$0xff] }
 0x593   :  { %10000 = vmatpush2.bf16.msra.mxu1 %v12971_v52  ;;  %10042 = vmatprep.subr.bf16.mxu0 %v13228_v46  ;;  %v9636_v52 = vpop.f32.mrf.mxu0  ;;  %v9675_v46 = vpop.f32.mrf.mxu1  ;;  %v3944_v29 = vld [vmem:[#allocation11 + $0x1a20] sm:$0xff] }
 0x594   :  { %10001 = vmatprep.subr.bf16.mxu1 %v12956_v38  ;;  %v13147_v38 = vcombine.low %v3784_v22, %v3792_v16  ;;  %v9676_v7 = vadd.f32 %v9675_v46, %v14538_v9  ;;  %v3952_v37 = vld [vmem:[#allocation11 + $0x1a60] sm:$0xff] }
 0x595   :  { %v9716_v41 = vpop.f32.mrf.mxu0  ;;  %v9677_v3 = vpop.f32.mrf.mxu1 }
 0x596   :  { %10043 = vmatpush2.bf16.msra.mxu0 %v13227_v6  ;;  %v3992_v6 = vld [vmem:[#allocation11 + $0x1ba0] sm:$0xff]  ;;  %v9717_v18 = vadd.f32 %v9716_v41, %v9674_v12  ;;  %v9678_v21 = vadd.f32 %v9677_v3, %v14540_v23  ;;  %v3201_v23 = vld [vmem:[#allocation11 + $0x2e8] sm:$0xff] }
 0x597   :  { %10002 = vmatpush2.bf16.msra.mxu1 %v12955_v53  ;;  %10044 = vmatprep.subr.bf16.mxu0 %v13212_v54  ;;  %v3760_v53 = vld [vmem:[#allocation11 + $0x1460] sm:$0xff]  ;;  %v12859_v54 = vcombine.low %v3496_v30, %v3504_v33  ;;  %v9718_v61 = vpop.f32.mrf.mxu0  ;;  %v3177_v3 = vld [vmem:[#allocation11 + $0x228] sm:$0xff] }
 0x598   :  { %10003 = vmatprep.subr.bf16.mxu1 %v12940_v57  ;;  %v4000_v57 = vld [vmem:[#allocation11 + $0x1be0] sm:$0xff]  ;;  %v13116_v62 = vcombine.high %v3752_v39, %v3760_v53  ;;  %v13115_v20 = vcombine.low %v3752_v39, %v3760_v53  ;;  %v9719_v36 = vadd.f32 %v9718_v61, %v9676_v7  ;;  %v13308_v39 = vcombine.high %v3944_v29, %v3952_v37  ;;  %v3185_v61 = vld [vmem:[#allocation11 + $0x268] sm:$0xff] }
 0x599   :  { %v13355_v63 = vcombine.low %v3992_v6, %v4000_v57  ;;  %v12558_v53 = vcombine.high %v3193_v43, %v3201_v23  ;;  %v3912_v12 = vld [vmem:[#allocation11 + $0x1920] sm:$0xff] }
 0x59a   :  { %10045 = vmatpush2.bf16.msra.mxu0 %v13211_v13  ;;  %v3976_v13 = vld [vmem:[#allocation11 + $0x1b20] sm:$0xff] }
 0x59b   :  { %10004 = vmatpush2.bf16.msra.mxu1 %v12939_v11  ;;  %10046 = vmatprep.subr.bf16.mxu0 %v13196_v10  ;;  %v13356_v11 = vcombine.high %v3992_v6, %v4000_v57  ;;  %v3225_v10 = vld [vmem:[#allocation11 + $0x3a8] sm:$0xff]  ;;  %v3928_v6 = vld [vmem:[#allocation11 + $0x19a0] sm:$0xff] }
 0x59c   :  { %10005 = vmatprep.subr.bf16.mxu1 %v12924_v5  ;;  %v3984_v5 = vld [vmem:[#allocation11 + $0x1b60] sm:$0xff]  ;;  %v12590_v8 = vcombine.high %v3225_v10, %v3233_v17 }
 0x59d   :  { %v13339_v56 = vcombine.low %v3976_v13, %v3984_v5 }
 0x59e   :  { %10047 = vmatpush2.bf16.msra.mxu0 %v13195_v50  ;;  %v9720_v50 = vpop.f32.mrf.mxu0 }
 0x59f   :  { %10006 = vmatpush2.bf16.msra.mxu1 %v12923_v2  ;;  %10048 = vmatprep.subr.bf16.mxu0 %v13180_v28  ;;  %v9679_v2 = vpop.f32.mrf.mxu1  ;;  %v3960_v28 = vld [vmem:[#allocation11 + $0x1aa0] sm:$0xff] }
 0x5a0   :  { %10007 = vmatprep.subr.bf16.mxu1 %v12908_v48  ;;  %v13340_v48 = vcombine.high %v3976_v13, %v3984_v5  ;;  %v9722_v16 = vpop.f32.mrf.mxu0  ;;  %v13307_v13 = vcombine.low %v3944_v29, %v3952_v37  ;;  %v12557_v5 = vcombine.low %v3193_v43, %v3201_v23  ;;  %v3121_v37 = vld [vmem:[#allocation11 + $0x68] sm:$0xff] }
 0x5a2   :  { %10049 = vmatpush2.bf16.msra.mxu0 %v13179_v15  ;;  %v3217_v15 = vld [vmem:[#allocation11 + $0x368] sm:$0xff] }
 0x5a3   :  { %10008 = vmatpush2.bf16.msra.mxu1 %v12907_v14  ;;  %10050 = vmatprep.subr.bf16.mxu0 %v13164_v35  ;;  %v3209_v14 = vld [vmem:[#allocation11 + $0x328] sm:$0xff]  ;;  %v12589_v35 = vcombine.low %v3225_v10, %v3233_v17  ;;  %v12542_v17 = vcombine.high %v3177_v3, %v3185_v61 }
 0x5a4   :  { %10009 = vmatprep.subr.bf16.mxu1 %v12892_v19 }
 0x5a6   :  { %10051 = vmatpush2.bf16.msra.mxu0 %v13163_v42  ;;  %v12574_v42 = vcombine.high %v3209_v14, %v3217_v15 }
 0x5a7   :  { %10010 = vmatpush2.bf16.msra.mxu1 %v12891_v24  ;;  %10052 = vmatprep.subr.bf16.mxu0 %v13148_v25  ;;  %v13324_v24 = vcombine.high %v3960_v28, %v3968_v31  ;;  %v9721_v25 = vadd.f32 %v9720_v50, %v9678_v21  ;;  %v3169_v50 = vld [vmem:[#allocation11 + $0x1e8] sm:$0xff] }
 0x5a8   :  { %10011 = vmatprep.subr.bf16.mxu1 %v12876_v32  ;;  %v9680_v32 = vadd.f32 %v9679_v2, %v9636_v52  ;;  %v3161_v2 = vld [vmem:[#allocation11 + $0x1a8] sm:$0xff] }
 0x5aa   :  { %10053 = vmatpush2.bf16.msra.mxu0 %v13147_v38  ;;  %v13323_v38 = vcombine.low %v3960_v28, %v3968_v31  ;;  %v9723_v46 = vadd.f32 %v9722_v16, %v9680_v32  ;;  %v12541_v28 = vcombine.low %v3177_v3, %v3185_v61  ;;  %v3904_v31 = vld [vmem:[#allocation11 + $0x18e0] sm:$0xff]  ;;  %v3129_v16 = vld [vmem:[#allocation11 + $0xa8] sm:$0xff] }
 0x5ab   :  { %10012 = vmatpush2.bf16.msra.mxu1 %v12875_v45  ;;  %10054 = vmatprep.subr.bf16.mxu0 %v13132_v58  ;;  %v12573_v58 = vcombine.low %v3209_v14, %v3217_v15  ;;  %v3145_v14 = vld [vmem:[#allocation11 + $0x128] sm:$0xff] }
 0x5ac   :  { %10013 = vmatprep.subr.bf16.mxu1 %v12860_v47  ;;  %v3153_v15 = vld [vmem:[#allocation11 + $0x168] sm:$0xff] }
 0x5ad   :  { %v12510_v21 = vcombine.high %v3145_v14, %v3153_v15  ;;  %v3345_v3 = vld [vmem:[#allocation11 + $0x768] sm:$0xff] }
 0x5ae   :  { %10055 = vmatpush2.bf16.msra.mxu0 %v13131_v60  ;;  %v3936_v60 = vld [vmem:[#allocation11 + $0x19e0] sm:$0xff] }
 0x5af   :  { %10014 = vmatpush2.bf16.msra.mxu1 %v12859_v54  ;;  %10056 = vmatprep.subr.bf16.mxu0 %v13116_v62  ;;  %v13292_v10 = vcombine.high %v3928_v6, %v3936_v60 }
 0x5b0   :  { %10069 = vmatprep.subr.bf16.mxu1 %v13356_v11 }
 0x5b2   :  { %v9759_v19 = vpop.f32.mrf.mxu1  ;;  %10016 = vmatmul.mubr.bf16.vlgmr.msra.gmra.mxu1 %v14461_v0  ;;  %10057 = vmatpush2.bf16.msra.mxu0 %v13115_v20 }
 0x5b3   :  { %v9760_v22 = vadd.f32 %v9759_v19, %v9717_v18  ;;  %10070 = vmatpush1.bf16.msra.mxu1 %v13355_v63  ;;  %10101 = vmatprep.mubr.bf16.mxu1 %v14477_v51  ;;  %v3920_v63 = vld [vmem:[#allocation11 + $0x1960] sm:$0xff]  ;;  %v12526_v18 = vcombine.high %v3161_v2, %v3169_v50 }
 0x5b4   :  { %v9761_v9 = vpop.f32.mrf.mxu1  ;;  %10071 = vmatprep.subr.bf16.mxu1 %v13340_v48  ;;  %10112 = vmatprep.subr.bf16.mxu0 %v12590_v8  ;;  %v13291_v48 = vcombine.low %v3928_v6, %v3936_v60  ;;  %v13276_v7 = vcombine.high %v3912_v12, %v3920_v63  ;;  %v3896_v8 = vld [vmem:[#allocation11 + $0x18a0] sm:$0xff]  ;;  %v13275_v19 = vcombine.low %v3912_v12, %v3920_v63  ;;  %v3337_v60 = vld [vmem:[#allocation11 + $0x728] sm:$0xff] }
 0x5b5   :  { %v10632_v30 = vmax.f32 %v9760_v22, 0.0  ;;  %v9762_v33 = vadd.f32 %v9761_v9, %v9719_v36  ;;  %10059 = vmatmul.mubr.bf16.vlgmr.msra.gmra.mxu0 %v14470_v40  ;;  %v3880_v36 = vld [vmem:[#allocation11 + $0x1820] sm:$0xff]  ;;  %v3137_v9 = vld [vmem:[#allocation11 + $0xe8] sm:$0xff] }
 0x5b6   :  { %v9763_v45 = vpop.f32.mrf.mxu1  ;;  %10113 = vmatpush1.bf16.msra.mxu0 %v12589_v35  ;;  %10144 = vmatprep.mubr.bf16.mxu0 %v14454_v44  ;;  %v13260_v35 = vcombine.high %v3896_v8, %v3904_v31  ;;  %v3888_v22 = vld [vmem:[#allocation11 + $0x1860] sm:$0xff]  ;;  %v12494_v32 = vcombine.high %v3129_v16, %v3137_v9  ;;  %v12493_v23 = vcombine.low %v3129_v16, %v3137_v9  ;;  %v3321_v12 = vld [vmem:[#allocation11 + $0x6a8] sm:$0xff] }
 0x5b7   :  { %10664 = vst [vmem:[#allocation14 + $0x20] sm:$0xff] %v10632_v30  ;;  %v10633_v41 = vmax.f32 %v9762_v33, 0.0  ;;  %v9764_v47 = vadd.f32 %v9763_v45, %v9721_v25  ;;  %10072 = vmatpush1.bf16.msra.mxu1 %v13339_v56  ;;  %10114 = vmatprep.subr.bf16.mxu0 %v12574_v42  ;;  %v12525_v56 = vcombine.low %v3161_v2, %v3169_v50  ;;  %v4120_v25 = vld [vmem:[#allocation11 + $0x1fa0] sm:$0xff]  ;;  %v3113_v33 = vld [vmem:[#allocation11 + $0x28] sm:$0xff] }
 0x5b8   :  { %v9765_v52 = vpop.f32.mrf.mxu1  ;;  %10073 = vmatprep.subr.bf16.mxu1 %v13324_v24  ;;  %v13259_v24 = vcombine.low %v3896_v8, %v3904_v31  ;;  %v12509_v42 = vcombine.low %v3145_v14, %v3153_v15  ;;  %v13244_v29 = vcombine.high %v3880_v36, %v3888_v22  ;;  %v13243_v43 = vcombine.low %v3880_v36, %v3888_v22  ;;  %v3329_v63 = vld [vmem:[#allocation11 + $0x6e8] sm:$0xff] }
 0x5b9   :  { %10665 = vst [vmem:[#allocation14 + $0x28] sm:$0xff] %v10633_v41  ;;  %v10648_v57 = vmax.f32 %v9764_v47, 0.0  ;;  %v9766_v54 = vadd.f32 %v9765_v52, %v9723_v46  ;;  %v4104_v46 = vld [vmem:[#allocation11 + $0x1f20] sm:$0xff]  ;;  %v3353_v47 = vld [vmem:[#allocation11 + $0x7a8] sm:$0xff]  ;;  %v12701_v50 = vcombine.low %v3337_v60, %v3345_v3  ;;  %v12685_v15 = vcombine.low %v3321_v12, %v3329_v63 }
 0x5ba   :  { %10115 = vmatpush1.bf16.msra.mxu0 %v12573_v58  ;;  %v3361_v58 = vld [vmem:[#allocation11 + $0x7e8] sm:$0xff] }
 0x5bb   :  { %10680 = vst [vmem:[#allocation14 + $0xa0] sm:$0xff] %v10648_v57  ;;  %v14549_v62 = vpack.c.bf16 %v10648_v57, %v10632_v30  ;;  %v10649_v11 = vmax.f32 %v9766_v54, 0.0  ;;  %10074 = vmatpush1.bf16.msra.mxu1 %v13323_v38  ;;  %10116 = vmatprep.subr.bf16.mxu0 %v12558_v53  ;;  %v4128_v30 = vld [vmem:[#allocation11 + $0x1fe0] sm:$0xff]  ;;  %v12478_v38 = vcombine.high %v3113_v33, %v3121_v37  ;;  %v3305_v8 = vld [vmem:[#allocation11 + $0x628] sm:$0xff] }
 0x5bc   :  { %10075 = vmatprep.subr.bf16.mxu1 %v13308_v39  ;;  %v13484_v45 = vcombine.high %v4120_v25, %v4128_v30  ;;  %v13483_v52 = vcombine.low %v4120_v25, %v4128_v30  ;;  %v12477_v39 = vcombine.low %v3113_v33, %v3121_v37  ;;  %v12718_v6 = vcombine.high %v3353_v47, %v3361_v58  ;;  %v4088_v57 = vld [vmem:[#allocation11 + $0x1ea0] sm:$0xff]  ;;  %v3313_v31 = vld [vmem:[#allocation11 + $0x668] sm:$0xff] }
 0x5bd   :  { %10681 = vst [vmem:[#allocation14 + $0xa8] sm:$0xff] %v10649_v11  ;;  %v14551_v20 = vpack.c.bf16 %v10649_v11, %v10633_v41  ;;  %v4112_v41 = vld [vmem:[#allocation11 + $0x1f60] sm:$0xff]  ;;  %v12717_v11 = vcombine.low %v3353_v47, %v3361_v58  ;;  %v3289_v36 = vld [vmem:[#allocation11 + $0x5a8] sm:$0xff]  ;;  %v12669_v9 = vcombine.low %v3305_v8, %v3313_v31 }
 0x5be   :  { %10117 = vmatpush1.bf16.msra.mxu0 %v12557_v5  ;;  %v13468_v53 = vcombine.high %v4104_v46, %v4112_v41  ;;  %v4096_v54 = vld [vmem:[#allocation11 + $0x1ee0] sm:$0xff]  ;;  %v13467_v61 = vcombine.low %v4104_v46, %v4112_v41  ;;  %v12702_v5 = vcombine.high %v3337_v60, %v3345_v3  ;;  %v3297_v22 = vld [vmem:[#allocation11 + $0x5e8] sm:$0xff] }
 0x5bf   :  { %10076 = vmatpush1.bf16.msra.mxu1 %v13307_v13  ;;  %10118 = vmatprep.subr.bf16.mxu0 %v12542_v17  ;;  %v13452_v13 = vcombine.high %v4088_v57, %v4096_v54  ;;  %v4080_v17 = vld [vmem:[#allocation11 + $0x1e60] sm:$0xff]  ;;  %v13451_v2 = vcombine.low %v4088_v57, %v4096_v54  ;;  %v3273_v25 = vld [vmem:[#allocation11 + $0x528] sm:$0xff]  ;;  %v12653_v37 = vcombine.low %v3289_v36, %v3297_v22 }
 0x5c0   :  { %10077 = vmatprep.subr.bf16.mxu1 %v13292_v10  ;;  %v4072_v10 = vld [vmem:[#allocation11 + $0x1e20] sm:$0xff]  ;;  %v3281_v30 = vld [vmem:[#allocation11 + $0x568] sm:$0xff] }
 0x5c1   :  { %v13435_v14 = vcombine.low %v4072_v10, %v4080_v17  ;;  %v3257_v46 = vld [vmem:[#allocation11 + $0x4a8] sm:$0xff]  ;;  %v12637_v58 = vcombine.low %v3273_v25, %v3281_v30 }
 0x5c2   :  { %10119 = vmatpush1.bf16.msra.mxu0 %v12541_v28  ;;  %v12686_v28 = vcombine.high %v3321_v12, %v3329_v63  ;;  %v3265_v41 = vld [vmem:[#allocation11 + $0x4e8] sm:$0xff] }
 0x5c3   :  { %10078 = vmatpush1.bf16.msra.mxu1 %v13291_v48  ;;  %10120 = vmatprep.subr.bf16.mxu0 %v12526_v18  ;;  %v13436_v48 = vcombine.high %v4072_v10, %v4080_v17  ;;  %v4064_v18 = vld [vmem:[#allocation11 + $0x1de0] sm:$0xff]  ;;  %v3481_v57 = vld [vmem:[#allocation11 + $0xba8] sm:$0xff]  ;;  %v12621_v3 = vcombine.low %v3257_v46, %v3265_v41 }
 0x5c4   :  { %10079 = vmatprep.subr.bf16.mxu1 %v13276_v7  ;;  %v4056_v7 = vld [vmem:[#allocation11 + $0x1da0] sm:$0xff]  ;;  %v3489_v54 = vld [vmem:[#allocation11 + $0xbe8] sm:$0xff] }
 0x5c5   :  { %v13419_v16 = vcombine.low %v4056_v7, %v4064_v18  ;;  %v3737_v10 = vld [vmem:[#allocation11 + $0x13a8] sm:$0xff]  ;;  %v12845_v63 = vcombine.low %v3481_v57, %v3489_v54 }
 0x5c6   :  { %10121 = vmatpush1.bf16.msra.mxu0 %v12525_v56  ;;  %v12670_v56 = vcombine.high %v3305_v8, %v3313_v31  ;;  %v3745_v17 = vld [vmem:[#allocation11 + $0x13e8] sm:$0xff] }
 0x5c7   :  { %10080 = vmatpush1.bf16.msra.mxu1 %v13275_v19  ;;  %10122 = vmatprep.subr.bf16.mxu0 %v12510_v21  ;;  %v13420_v19 = vcombine.high %v4056_v7, %v4064_v18  ;;  %v4048_v21 = vld [vmem:[#allocation11 + $0x1d60] sm:$0xff]  ;;  %v3721_v7 = vld [vmem:[#allocation11 + $0x1328] sm:$0xff]  ;;  %v13101_v31 = vcombine.low %v3737_v10, %v3745_v17 }
 0x5c8   :  { %10081 = vmatprep.subr.bf16.mxu1 %v13260_v35  ;;  %v4040_v35 = vld [vmem:[#allocation11 + $0x1d20] sm:$0xff]  ;;  %v3729_v18 = vld [vmem:[#allocation11 + $0x1368] sm:$0xff] }
 0x5c9   :  { %v13403_v33 = vcombine.low %v4040_v35, %v4048_v21 }
 0x5ca   :  { %10123 = vmatpush1.bf16.msra.mxu0 %v12509_v42  ;;  %v12654_v42 = vcombine.high %v3289_v36, %v3297_v22  ;;  %v13085_v22 = vcombine.low %v3721_v7, %v3729_v18 }
 0x5cb   :  { %10082 = vmatpush1.bf16.msra.mxu1 %v13259_v24  ;;  %10124 = vmatprep.subr.bf16.mxu0 %v12494_v32  ;;  %v13404_v24 = vcombine.high %v4040_v35, %v4048_v21  ;;  %v4032_v32 = vld [vmem:[#allocation11 + $0x1ce0] sm:$0xff]  ;;  %v3705_v35 = vld [vmem:[#allocation11 + $0x12a8] sm:$0xff] }
 0x5cc   :  { %10083 = vmatprep.subr.bf16.mxu1 %v13244_v29  ;;  %v4024_v29 = vld [vmem:[#allocation11 + $0x1ca0] sm:$0xff]  ;;  %v3713_v21 = vld [vmem:[#allocation11 + $0x12e8] sm:$0xff] }
 0x5cd   :  { %v13387_v47 = vcombine.low %v4024_v29, %v4032_v32 }
 0x5ce   :  { %10125 = vmatpush1.bf16.msra.mxu0 %v12493_v23  ;;  %v12638_v23 = vcombine.high %v3273_v25, %v3281_v30  ;;  %v13069_v30 = vcombine.low %v3705_v35, %v3713_v21 }
 0x5cf   :  { %10084 = vmatpush1.bf16.msra.mxu1 %v13243_v43  ;;  %10126 = vmatprep.subr.bf16.mxu0 %v12478_v38  ;;  %v13388_v43 = vcombine.high %v4024_v29, %v4032_v32  ;;  %v4016_v38 = vld [vmem:[#allocation11 + $0x1c60] sm:$0xff]  ;;  %v3689_v29 = vld [vmem:[#allocation11 + $0x1228] sm:$0xff] }
 0x5d0   :  { %10085 = vmatprep.subr.bf16.mxu1 %v13484_v45  ;;  %v4008_v45 = vld [vmem:[#allocation11 + $0x1c20] sm:$0xff]  ;;  %v3697_v32 = vld [vmem:[#allocation11 + $0x1268] sm:$0xff] }
 0x5d1   :  { %v13371_v60 = vcombine.low %v4008_v45, %v4016_v38 }
 0x5d2   :  { %10127 = vmatpush1.bf16.msra.mxu0 %v12477_v39  ;;  %v12622_v39 = vcombine.high %v3257_v46, %v3265_v41  ;;  %v13053_v41 = vcombine.low %v3689_v29, %v3697_v32 }
 0x5d3   :  { %10086 = vmatpush2.bf16.msra.mxu1 %v13483_v52  ;;  %10128 = vmatprep.subr.bf16.mxu0 %v12718_v6  ;;  %v13372_v52 = vcombine.high %v4008_v45, %v4016_v38  ;;  %v3249_v6 = vld [vmem:[#allocation11 + $0x468] sm:$0xff] }
 0x5d4   :  { %10087 = vmatprep.subr.bf16.mxu1 %v13468_v53  ;;  %v3241_v53 = vld [vmem:[#allocation11 + $0x428] sm:$0xff] }
 0x5d5   :  { %v12605_v12 = vcombine.low %v3241_v53, %v3249_v6  ;;  %v3673_v45 = vld [vmem:[#allocation11 + $0x11a8] sm:$0xff] }
 0x5d6   :  { %10129 = vmatpush2.bf16.msra.mxu0 %v12717_v11  ;;  %v12846_v11 = vcombine.high %v3481_v57, %v3489_v54  ;;  %v3681_v38 = vld [vmem:[#allocation11 + $0x11e8] sm:$0xff] }
 0x5d7   :  { %10088 = vmatpush2.bf16.msra.mxu1 %v13467_v61  ;;  %10130 = vmatprep.subr.bf16.mxu0 %v12702_v5  ;;  %v12606_v61 = vcombine.high %v3241_v53, %v3249_v6  ;;  %v3473_v5 = vld [vmem:[#allocation11 + $0xb68] sm:$0xff]  ;;  %v13037_v54 = vcombine.low %v3673_v45, %v3681_v38 }
 0x5d8   :  { %10089 = vmatprep.subr.bf16.mxu1 %v13452_v13  ;;  %v3465_v13 = vld [vmem:[#allocation11 + $0xb28] sm:$0xff] }
 0x5d9   :  { %v12829_v8 = vcombine.low %v3465_v13, %v3473_v5  ;;  %v3657_v53 = vld [vmem:[#allocation11 + $0x1128] sm:$0xff] }
 0x5da   :  { %10131 = vmatpush2.bf16.msra.mxu0 %v12701_v50  ;;  %v13102_v50 = vcombine.high %v3737_v10, %v3745_v17  ;;  %v3665_v6 = vld [vmem:[#allocation11 + $0x1168] sm:$0xff] }
 0x5db   :  { %10090 = vmatpush2.bf16.msra.mxu1 %v13451_v2  ;;  %10132 = vmatprep.subr.bf16.mxu0 %v12686_v28  ;;  %v12830_v2 = vcombine.high %v3465_v13, %v3473_v5  ;;  %v3457_v28 = vld [vmem:[#allocation11 + $0xae8] sm:$0xff]  ;;  %v13021_v17 = vcombine.low %v3657_v53, %v3665_v6 }
 0x5dc   :  { %10091 = vmatprep.subr.bf16.mxu1 %v13436_v48  ;;  %v3449_v48 = vld [vmem:[#allocation11 + $0xaa8] sm:$0xff] }
 0x5dd   :  { %v12813_v36 = vcombine.low %v3449_v48, %v3457_v28  ;;  %v3641_v13 = vld [vmem:[#allocation11 + $0x10a8] sm:$0xff] }
 0x5de   :  { %10133 = vmatpush2.bf16.msra.mxu0 %v12685_v15  ;;  %v3433_v15 = vld [vmem:[#allocation11 + $0xa28] sm:$0xff] }
 0x5df   :  { %10092 = vmatpush2.bf16.msra.mxu1 %v13435_v14  ;;  %10134 = vmatprep.subr.bf16.mxu0 %v12670_v56  ;;  %v12814_v14 = vcombine.high %v3449_v48, %v3457_v28  ;;  %v3441_v56 = vld [vmem:[#allocation11 + $0xa68] sm:$0xff] }
 0x5e0   :  { %10093 = vmatprep.subr.bf16.mxu1 %v13420_v19  ;;  %v13086_v19 = vcombine.high %v3721_v7, %v3729_v18  ;;  %v12797_v25 = vcombine.low %v3433_v15, %v3441_v56  ;;  %v3649_v5 = vld [vmem:[#allocation11 + $0x10e8] sm:$0xff] }
 0x5e1   :  { %v3625_v48 = vld [vmem:[#allocation11 + $0x1028] sm:$0xff]  ;;  %v13005_v18 = vcombine.low %v3641_v13, %v3649_v5 }
 0x5e2   :  { %10135 = vmatpush2.bf16.msra.mxu0 %v12669_v9  ;;  %v13070_v9 = vcombine.high %v3705_v35, %v3713_v21  ;;  %v3633_v28 = vld [vmem:[#allocation11 + $0x1068] sm:$0xff] }
 0x5e3   :  { %10094 = vmatpush2.bf16.msra.mxu1 %v13419_v16  ;;  %10136 = vmatprep.subr.bf16.mxu0 %v12654_v42  ;;  %v12798_v16 = vcombine.high %v3433_v15, %v3441_v56  ;;  %v3425_v42 = vld [vmem:[#allocation11 + $0x9e8] sm:$0xff]  ;;  %v12989_v21 = vcombine.low %v3625_v48, %v3633_v28 }
 0x5e4   :  { %10095 = vmatprep.subr.bf16.mxu1 %v13404_v24  ;;  %v3417_v24 = vld [vmem:[#allocation11 + $0x9a8] sm:$0xff] }
 0x5e5   :  { %v12781_v46 = vcombine.low %v3417_v24, %v3425_v42  ;;  %v3601_v15 = vld [vmem:[#allocation11 + $0xf68] sm:$0xff] }
 0x5e6   :  { %10137 = vmatpush2.bf16.msra.mxu0 %v12653_v37  ;;  %v13054_v37 = vcombine.high %v3689_v29, %v3697_v32  ;;  %v3873_v56 = vld [vmem:[#allocation11 + $0x17e8] sm:$0xff] }
 0x5e7   :  { %10096 = vmatpush2.bf16.msra.mxu1 %v13403_v33  ;;  %10138 = vmatprep.subr.bf16.mxu0 %v12638_v23  ;;  %v12782_v33 = vcombine.high %v3417_v24, %v3425_v42  ;;  %v3409_v23 = vld [vmem:[#allocation11 + $0x968] sm:$0xff] }
 0x5e8   :  { %10097 = vmatprep.subr.bf16.mxu1 %v13388_v43  ;;  %v3401_v43 = vld [vmem:[#allocation11 + $0x928] sm:$0xff] }
 0x5e9   :  { %v12765_v57 = vcombine.low %v3401_v43, %v3409_v23  ;;  %v3849_v24 = vld [vmem:[#allocation11 + $0x1728] sm:$0xff] }
 0x5ea   :  { %10139 = vmatpush2.bf16.msra.mxu0 %v12637_v58  ;;  %v13038_v58 = vcombine.high %v3673_v45, %v3681_v38  ;;  %v3857_v42 = vld [vmem:[#allocation11 + $0x1768] sm:$0xff] }
 0x5eb   :  { %10098 = vmatpush2.bf16.msra.mxu1 %v13387_v47  ;;  %10140 = vmatprep.subr.bf16.mxu0 %v12622_v39  ;;  %v12766_v47 = vcombine.high %v3401_v43, %v3409_v23  ;;  %v3393_v39 = vld [vmem:[#allocation11 + $0x8e8] sm:$0xff]  ;;  %v13213_v38 = vcombine.low %v3849_v24, %v3857_v42 }
 0x5ec   :  { %10099 = vmatprep.subr.bf16.mxu1 %v13372_v52  ;;  %v3385_v52 = vld [vmem:[#allocation11 + $0x8a8] sm:$0xff] }
 0x5ed   :  { %v12749_v10 = vcombine.low %v3385_v52, %v3393_v39  ;;  %v3833_v43 = vld [vmem:[#allocation11 + $0x16a8] sm:$0xff] }
 0x5ee   :  { %10141 = vmatpush2.bf16.msra.mxu0 %v12621_v3  ;;  %v13022_v3 = vcombine.high %v3657_v53, %v3665_v6  ;;  %v3841_v23 = vld [vmem:[#allocation11 + $0x16e8] sm:$0xff]  ;;  %v14557_v53 = vpop.f32.mrf.mxu0 }
 0x5ef   :  { %10100 = vmatpush2.bf16.msra.mxu1 %v13371_v60  ;;  %10142 = vmatprep.subr.bf16.mxu0 %v12606_v61  ;;  %v12750_v60 = vcombine.high %v3385_v52, %v3393_v39  ;;  %v3369_v61 = vld [vmem:[#allocation11 + $0x828] sm:$0xff] }
 0x5f0   :  { %10155 = vmatprep.subr.bf16.mxu1 %v12846_v11  ;;  %v3377_v11 = vld [vmem:[#allocation11 + $0x868] sm:$0xff] }
 0x5f1   :  { %v12733_v7 = vcombine.low %v3369_v61, %v3377_v11  ;;  %v3817_v52 = vld [vmem:[#allocation11 + $0x1628] sm:$0xff] }
 0x5f2   :  { %10102 = vmatmul.mubr.bf16.vlgmr.msra.gmra.mxu1 %v14479_v26  ;;  %10143 = vmatpush2.bf16.msra.mxu0 %v12605_v12  ;;  %v12734_v12 = vcombine.high %v3369_v61, %v3377_v11  ;;  %v3825_v39 = vld [vmem:[#allocation11 + $0x1668] sm:$0xff] }
 0x5f3   :  { %10156 = vmatpush1.bf16.msra.mxu1 %v12845_v63  ;;  %10187 = vmatprep.mubr.bf16.mxu1 %v14463_v55  ;;  %v13006_v63 = vcombine.high %v3641_v13, %v3649_v5  ;;  %v3537_v61 = vld [vmem:[#allocation11 + $0xd68] sm:$0xff]  ;;  %v14559_v5 = vpop.f32.mrf.mxu0 }
 0x5f4   :  { %10157 = vmatprep.subr.bf16.mxu1 %v12830_v2  ;;  %10198 = vmatprep.subr.bf16.mxu0 %v13102_v50  ;;  %v3609_v2 = vld [vmem:[#allocation11 + $0xfa8] sm:$0xff] }
 0x5f5   :  { %10145 = vmatmul.mubr.bf16.vlgmr.msra.gmra.mxu0 %v14452_v59  ;;  %v3617_v50 = vld [vmem:[#allocation11 + $0xfe8] sm:$0xff] }
 0x5f6   :  { %10199 = vmatpush1.bf16.msra.mxu0 %v13101_v31  ;;  %10230 = vmatprep.mubr.bf16.mxu0 %v14472_v4  ;;  %v12990_v31 = vcombine.high %v3625_v48, %v3633_v28  ;;  %v12973_v35 = vcombine.low %v3609_v2, %v3617_v50  ;;  %v3801_v11 = vld [vmem:[#allocation11 + $0x15a8] sm:$0xff] }
 0x5f7   :  { %10158 = vmatpush1.bf16.msra.mxu1 %v12829_v8  ;;  %10200 = vmatprep.subr.bf16.mxu0 %v13086_v19  ;;  %v12974_v8 = vcombine.high %v3609_v2, %v3617_v50  ;;  %v3865_v19 = vld [vmem:[#allocation11 + $0x17a8] sm:$0xff] }
 0x5f8   :  { %10159 = vmatprep.subr.bf16.mxu1 %v12814_v14  ;;  %v3593_v14 = vld [vmem:[#allocation11 + $0xf28] sm:$0xff]  ;;  %v13229_v32 = vcombine.low %v3865_v19, %v3873_v56 }
 0x5f9   :  { %v12957_v29 = vcombine.low %v3593_v14, %v3601_v15  ;;  %v3809_v13 = vld [vmem:[#allocation11 + $0x15e8] sm:$0xff] }
 0x5fa   :  { %10201 = vmatpush1.bf16.msra.mxu0 %v13085_v22  ;;  %v13230_v22 = vcombine.high %v3865_v19, %v3873_v56  ;;  %v3513_v2 = vld [vmem:[#allocation11 + $0xca8] sm:$0xff] }
 0x5fb   :  { %10160 = vmatpush1.bf16.msra.mxu1 %v12813_v36  ;;  %10202 = vmatprep.subr.bf16.mxu0 %v13070_v9  ;;  %v12958_v36 = vcombine.high %v3593_v14, %v3601_v15  ;;  %v3585_v9 = vld [vmem:[#allocation11 + $0xee8] sm:$0xff] }
 0x5fc   :  { %10161 = vmatprep.subr.bf16.mxu1 %v12798_v16  ;;  %v3577_v16 = vld [vmem:[#allocation11 + $0xea8] sm:$0xff] }
 0x5fd   :  { %v12941_v45 = vcombine.low %v3577_v16, %v3585_v9  ;;  %v3521_v50 = vld [vmem:[#allocation11 + $0xce8] sm:$0xff] }
 0x5fe   :  { %10203 = vmatpush1.bf16.msra.mxu0 %v13069_v30  ;;  %v13214_v30 = vcombine.high %v3849_v24, %v3857_v42  ;;  %v3785_v48 = vld [vmem:[#allocation11 + $0x1528] sm:$0xff]  ;;  %v12878_v14 = vcombine.high %v3513_v2, %v3521_v50 }
 0x5ff   :  { %10162 = vmatpush1.bf16.msra.mxu1 %v12797_v25  ;;  %10204 = vmatprep.subr.bf16.mxu0 %v13054_v37  ;;  %v12942_v25 = vcombine.high %v3577_v16, %v3585_v9  ;;  %v3569_v37 = vld [vmem:[#allocation11 + $0xe68] sm:$0xff] }
 0x600   :  { %10163 = vmatprep.subr.bf16.mxu1 %v12782_v33  ;;  %v3561_v33 = vld [vmem:[#allocation11 + $0xe28] sm:$0xff] }
 0x601   :  { %v12925_v6 = vcombine.low %v3561_v33, %v3569_v37  ;;  %v3793_v28 = vld [vmem:[#allocation11 + $0x1568] sm:$0xff] }
 0x602   :  { %10205 = vmatpush1.bf16.msra.mxu0 %v13053_v41  ;;  %v13198_v41 = vcombine.high %v3833_v43, %v3841_v23  ;;  %v13150_v15 = vcombine.high %v3785_v48, %v3793_v28  ;;  %v3497_v19 = vld [vmem:[#allocation11 + $0xc28] sm:$0xff]  ;;  %v13149_v16 = vcombine.low %v3785_v48, %v3793_v28 }
 0x603   :  { %10164 = vmatpush1.bf16.msra.mxu1 %v12781_v46  ;;  %10206 = vmatprep.subr.bf16.mxu0 %v13038_v58  ;;  %v12926_v46 = vcombine.high %v3561_v33, %v3569_v37  ;;  %v3553_v58 = vld [vmem:[#allocation11 + $0xde8] sm:$0xff] }
 0x604   :  { %10165 = vmatprep.subr.bf16.mxu1 %v12766_v47  ;;  %v3545_v47 = vld [vmem:[#allocation11 + $0xda8] sm:$0xff] }
 0x605   :  { %v3505_v56 = vld [vmem:[#allocation11 + $0xc68] sm:$0xff] }
 0x606   :  { %10207 = vmatpush1.bf16.msra.mxu0 %v13037_v54  ;;  %v12910_v54 = vcombine.high %v3545_v47, %v3553_v58  ;;  %v12862_v42 = vcombine.high %v3497_v19, %v3505_v56  ;;  %v4001_v33 = vld [vmem:[#allocation11 + $0x1be8] sm:$0xff]  ;;  %v12861_v37 = vcombine.low %v3497_v19, %v3505_v56 }
 0x607   :  { %10166 = vmatpush1.bf16.msra.mxu1 %v12765_v57  ;;  %10208 = vmatprep.subr.bf16.mxu0 %v13022_v3  ;;  %v13197_v57 = vcombine.low %v3833_v43, %v3841_v23  ;;  %v3529_v3 = vld [vmem:[#allocation11 + $0xd28] sm:$0xff] }
 0x608   :  { %10167 = vmatprep.subr.bf16.mxu1 %v12750_v60  ;;  %v13182_v60 = vcombine.high %v3817_v52, %v3825_v39 }
 0x60a   :  { %10209 = vmatpush1.bf16.msra.mxu0 %v13021_v17  ;;  %v13181_v17 = vcombine.low %v3817_v52, %v3825_v39  ;;  %v3234_v52 = vld [vmem:[#allocation11 + $0x3f0] sm:$0xff] }
 0x60b   :  { %10168 = vmatpush1.bf16.msra.mxu1 %v12749_v10  ;;  %10210 = vmatprep.subr.bf16.mxu0 %v13006_v63  ;;  %v12909_v10 = vcombine.low %v3545_v47, %v3553_v58  ;;  %v13166_v63 = vcombine.high %v3801_v11, %v3809_v13  ;;  %v3985_v47 = vld [vmem:[#allocation11 + $0x1b68] sm:$0xff]  ;;  %v3226_v58 = vld [vmem:[#allocation11 + $0x3b0] sm:$0xff] }
 0x60c   :  { %10169 = vmatprep.subr.bf16.mxu1 %v12734_v12  ;;  %v12894_v12 = vcombine.high %v3529_v3, %v3537_v61 }
 0x60e   :  { %10211 = vmatpush1.bf16.msra.mxu0 %v13005_v18  ;;  %v12893_v18 = vcombine.low %v3529_v3, %v3537_v61  ;;  %v3961_v61 = vld [vmem:[#allocation11 + $0x1aa8] sm:$0xff] }
 0x60f   :  { %10170 = vmatpush1.bf16.msra.mxu1 %v12733_v7  ;;  %10212 = vmatprep.subr.bf16.mxu0 %v12990_v31  ;;  %v14561_v7 = vpop.f32.mrf.mxu0  ;;  %v9845_v31 = vpop.f32.mrf.mxu1 }
 0x610   :  { %10171 = vmatprep.subr.bf16.mxu1 %v12974_v8  ;;  %v13165_v8 = vcombine.low %v3801_v11, %v3809_v13  ;;  %v9846_v39 = vadd.f32 %v9845_v31, %v14557_v53 }
 0x611   :  { %v9847_v9 = vpop.f32.mrf.mxu1 }
 0x612   :  { %10213 = vmatpush1.bf16.msra.mxu0 %v12989_v21  ;;  %v3777_v21 = vld [vmem:[#allocation11 + $0x14e8] sm:$0xff]  ;;  %v9848_v11 = vadd.f32 %v9847_v9, %v14559_v5 }
 0x613   :  { %10172 = vmatpush2.bf16.msra.mxu1 %v12973_v35  ;;  %10214 = vmatprep.subr.bf16.mxu0 %v13230_v22  ;;  %v3769_v35 = vld [vmem:[#allocation11 + $0x14a8] sm:$0xff]  ;;  %v12877_v22 = vcombine.low %v3513_v2, %v3521_v50  ;;  %v9849_v23 = vpop.f32.mrf.mxu1  ;;  %v12591_v50 = vcombine.low %v3226_v58, %v3234_v52 }
 0x614   :  { %10173 = vmatprep.subr.bf16.mxu1 %v12958_v36  ;;  %v9808_v36 = vpop.f32.mrf.mxu0  ;;  %v13133_v43 = vcombine.low %v3769_v35, %v3777_v21  ;;  %v9850_v48 = vadd.f32 %v9849_v23, %v14561_v7  ;;  %v3202_v7 = vld [vmem:[#allocation11 + $0x2f0] sm:$0xff] }
 0x616   :  { %10215 = vmatpush2.bf16.msra.mxu0 %v13229_v32  ;;  %v9888_v24 = vpop.f32.mrf.mxu0  ;;  %v3753_v32 = vld [vmem:[#allocation11 + $0x1428] sm:$0xff] }
 0x617   :  { %10174 = vmatpush2.bf16.msra.mxu1 %v12957_v29  ;;  %10216 = vmatprep.subr.bf16.mxu0 %v13214_v30  ;;  %v13134_v29 = vcombine.high %v3769_v35, %v3777_v21  ;;  %v3993_v30 = vld [vmem:[#allocation11 + $0x1ba8] sm:$0xff]  ;;  %v9889_v13 = vadd.f32 %v9888_v24, %v9846_v39 }
 0x618   :  { %10175 = vmatprep.subr.bf16.mxu1 %v12942_v25  ;;  %v3761_v25 = vld [vmem:[#allocation11 + $0x1468] sm:$0xff] }
 0x61a   :  { %10217 = vmatpush2.bf16.msra.mxu0 %v13213_v38  ;;  %v13118_v38 = vcombine.high %v3753_v32, %v3761_v25 }
 0x61b   :  { %10176 = vmatpush2.bf16.msra.mxu1 %v12941_v45  ;;  %10218 = vmatprep.subr.bf16.mxu0 %v13198_v41  ;;  %v9890_v45 = vpop.f32.mrf.mxu0  ;;  %v3977_v41 = vld [vmem:[#allocation11 + $0x1b28] sm:$0xff] }
 0x61c   :  { %10177 = vmatprep.subr.bf16.mxu1 %v12926_v46  ;;  %v13358_v46 = vcombine.high %v3993_v30, %v4001_v33  ;;  %v13342_v3 = vcombine.high %v3977_v41, %v3985_v47  ;;  %v13341_v53 = vcombine.low %v3977_v41, %v3985_v47  ;;  %v9891_v28 = vadd.f32 %v9890_v45, %v9848_v11  ;;  %v3937_v45 = vld [vmem:[#allocation11 + $0x19e8] sm:$0xff] }
 0x61e   :  { %10219 = vmatpush2.bf16.msra.mxu0 %v13197_v57  ;;  %v13357_v57 = vcombine.low %v3993_v30, %v4001_v33 }
 0x61f   :  { %10178 = vmatpush2.bf16.msra.mxu1 %v12925_v6  ;;  %10220 = vmatprep.subr.bf16.mxu0 %v13182_v60  ;;  %v13117_v6 = vcombine.low %v3753_v32, %v3761_v25  ;;  %v9892_v60 = vpop.f32.mrf.mxu0 }
 0x620   :  { %10179 = vmatprep.subr.bf16.mxu1 %v12910_v54  ;;  %v9851_v54 = vpop.f32.mrf.mxu1  ;;  %v9893_v56 = vadd.f32 %v9892_v60, %v9850_v48  ;;  %v3921_v60 = vld [vmem:[#allocation11 + $0x1968] sm:$0xff] }
 0x621   :  { %v9852_v19 = vadd.f32 %v9851_v54, %v9808_v36 }
 0x622   :  { %10221 = vmatpush2.bf16.msra.mxu0 %v13181_v17  ;;  %v3969_v17 = vld [vmem:[#allocation11 + $0x1ae8] sm:$0xff] }
 0x623   :  { %10180 = vmatpush2.bf16.msra.mxu1 %v12909_v10  ;;  %10222 = vmatprep.subr.bf16.mxu0 %v13166_v63  ;;  %v12592_v10 = vcombine.high %v3226_v58, %v3234_v52  ;;  %v3218_v63 = vld [vmem:[#allocation11 + $0x370] sm:$0xff]  ;;  %v13326_v31 = vcombine.high %v3961_v61, %v3969_v17  ;;  %v13325_v24 = vcombine.low %v3961_v61, %v3969_v17 }
 0x624   :  { %10181 = vmatprep.subr.bf16.mxu1 %v12894_v12  ;;  %v3210_v12 = vld [vmem:[#allocation11 + $0x330] sm:$0xff] }
 0x625   :  { %v12575_v25 = vcombine.low %v3210_v12, %v3218_v63  ;;  %v3170_v61 = vld [vmem:[#allocation11 + $0x1f0] sm:$0xff] }
 0x626   :  { %10223 = vmatpush2.bf16.msra.mxu0 %v13165_v8  ;;  %v9894_v8 = vpop.f32.mrf.mxu0 }
 0x627   :  { %10182 = vmatpush2.bf16.msra.mxu1 %v12893_v18  ;;  %10224 = vmatprep.subr.bf16.mxu0 %v13150_v15  ;;  %v3945_v15 = vld [vmem:[#allocation11 + $0x1a28] sm:$0xff] }
 0x628   :  { %10183 = vmatprep.subr.bf16.mxu1 %v12878_v14  ;;  %v12576_v14 = vcombine.high %v3210_v12, %v3218_v63  ;;  %v3897_v12 = vld [vmem:[#allocation11 + $0x18a8] sm:$0xff] }
 0x629   :  { %v3905_v63 = vld [vmem:[#allocation11 + $0x18e8] sm:$0xff] }
 0x62a   :  { %10225 = vmatpush2.bf16.msra.mxu0 %v13149_v16  ;;  %v3194_v16 = vld [vmem:[#allocation11 + $0x2b0] sm:$0xff] }
 0x62b   :  { %10184 = vmatpush2.bf16.msra.mxu1 %v12877_v22  ;;  %10226 = vmatprep.subr.bf16.mxu0 %v13134_v29  ;;  %v3953_v22 = vld [vmem:[#allocation11 + $0x1a68] sm:$0xff]  ;;  %v12560_v33 = vcombine.high %v3194_v16, %v3202_v7  ;;  %v12559_v52 = vcombine.low %v3194_v16, %v3202_v7  ;;  %v3114_v16 = vld [vmem:[#allocation11 + $0x30] sm:$0xff] }
 0x62c   :  { %10185 = vmatprep.subr.bf16.mxu1 %v12862_v42  ;;  %v9895_v42 = vadd.f32 %v9894_v8, %v9852_v19  ;;  %v13310_v30 = vcombine.high %v3945_v15, %v3953_v22  ;;  %v13309_v58 = vcombine.low %v3945_v15, %v3953_v22  ;;  %v3881_v8 = vld [vmem:[#allocation11 + $0x1828] sm:$0xff]  ;;  %v13261_v15 = vcombine.low %v3897_v12, %v3905_v63  ;;  %v3122_v7 = vld [vmem:[#allocation11 + $0x70] sm:$0xff] }
 0x62d   :  { %v4129_v22 = vld [vmem:[#allocation11 + $0x1fe8] sm:$0xff] }
 0x62e   :  { %10227 = vmatpush2.bf16.msra.mxu0 %v13133_v43 }
 0x62f   :  { %10186 = vmatpush2.bf16.msra.mxu1 %v12861_v37  ;;  %10228 = vmatprep.subr.bf16.mxu0 %v13118_v38  ;;  %v3929_v37 = vld [vmem:[#allocation11 + $0x19a8] sm:$0xff]  ;;  %v3178_v38 = vld [vmem:[#allocation11 + $0x230] sm:$0xff] }
 0x630   :  { %10241 = vmatprep.subr.bf16.mxu1 %v13358_v46  ;;  %v3186_v46 = vld [vmem:[#allocation11 + $0x270] sm:$0xff]  ;;  %v13294_v39 = vcombine.high %v3929_v37, %v3937_v45  ;;  %v13293_v11 = vcombine.low %v3929_v37, %v3937_v45  ;;  %v12479_v37 = vcombine.low %v3114_v16, %v3122_v7  ;;  %v4089_v45 = vld [vmem:[#allocation11 + $0x1ea8] sm:$0xff] }
 0x632   :  { %v9931_v2 = vpop.f32.mrf.mxu1  ;;  %10188 = vmatmul.mubr.bf16.vlgmr.msra.gmra.mxu1 %v14461_v0  ;;  %10229 = vmatpush2.bf16.msra.mxu0 %v13117_v6  ;;  %v12544_v6 = vcombine.high %v3178_v38, %v3186_v46 }
 0x633   :  { %v9932_v18 = vadd.f32 %v9931_v2, %v9889_v13  ;;  %10242 = vmatpush1.bf16.msra.mxu1 %v13357_v57  ;;  %10273 = vmatprep.mubr.bf16.mxu1 %v14477_v51  ;;  %v3913_v57 = vld [vmem:[#allocation11 + $0x1928] sm:$0xff]  ;;  %v12543_v13 = vcombine.low %v3178_v38, %v3186_v46  ;;  %v3146_v2 = vld [vmem:[#allocation11 + $0x130] sm:$0xff] }
 0x634   :  { %v9933_v5 = vpop.f32.mrf.mxu1  ;;  %10243 = vmatprep.subr.bf16.mxu1 %v13342_v3  ;;  %10284 = vmatprep.subr.bf16.mxu0 %v12592_v10  ;;  %v3162_v3 = vld [vmem:[#allocation11 + $0x1b0] sm:$0xff]  ;;  %v13278_v10 = vcombine.high %v3913_v57, %v3921_v60  ;;  %v4097_v38 = vld [vmem:[#allocation11 + $0x1ee8] sm:$0xff] }
 0x635   :  { %v10634_v35 = vmax.f32 %v9932_v18, 0.0  ;;  %v9934_v21 = vadd.f32 %v9933_v5, %v9891_v28  ;;  %10231 = vmatmul.mubr.bf16.vlgmr.msra.gmra.mxu0 %v14470_v40  ;;  %v12528_v17 = vcombine.high %v3162_v3, %v3170_v61  ;;  %v12527_v48 = vcombine.low %v3162_v3, %v3170_v61  ;;  %v3889_v5 = vld [vmem:[#allocation11 + $0x1868] sm:$0xff]  ;;  %v3338_v46 = vld [vmem:[#allocation11 + $0x730] sm:$0xff] }
 0x636   :  { %v9935_v9 = vpop.f32.mrf.mxu1  ;;  %10285 = vmatpush1.bf16.msra.mxu0 %v12591_v50  ;;  %10316 = vmatprep.mubr.bf16.mxu0 %v14454_v44  ;;  %v13277_v50 = vcombine.low %v3913_v57, %v3921_v60  ;;  %v13262_v28 = vcombine.high %v3897_v12, %v3905_v63  ;;  %v4073_v57 = vld [vmem:[#allocation11 + $0x1e28] sm:$0xff]  ;;  %v3322_v3 = vld [vmem:[#allocation11 + $0x6b0] sm:$0xff] }
 0x637   :  { %10666 = vst [vmem:[#allocation14 + $0x30] sm:$0xff] %v10634_v35  ;;  %v10635_v29 = vmax.f32 %v9934_v21, 0.0  ;;  %v9936_v32 = vadd.f32 %v9935_v9, %v9893_v56  ;;  %10244 = vmatpush1.bf16.msra.mxu1 %v13341_v53  ;;  %10286 = vmatprep.subr.bf16.mxu0 %v12576_v14  ;;  %v3154_v53 = vld [vmem:[#allocation11 + $0x170] sm:$0xff]  ;;  %v13246_v56 = vcombine.high %v3881_v8, %v3889_v5  ;;  %v4121_v21 = vld [vmem:[#allocation11 + $0x1fa8] sm:$0xff] }
 0x638   :  { %v9937_v36 = vpop.f32.mrf.mxu1  ;;  %10245 = vmatprep.subr.bf16.mxu1 %v13326_v31  ;;  %v12512_v18 = vcombine.high %v3146_v2, %v3154_v53  ;;  %v3130_v31 = vld [vmem:[#allocation11 + $0xb0] sm:$0xff]  ;;  %v12511_v19 = vcombine.low %v3146_v2, %v3154_v53  ;;  %v13245_v9 = vcombine.low %v3881_v8, %v3889_v5  ;;  %v4081_v60 = vld [vmem:[#allocation11 + $0x1e68] sm:$0xff] }
 0x639   :  { %10667 = vst [vmem:[#allocation14 + $0x38] sm:$0xff] %v10635_v29  ;;  %v10650_v43 = vmax.f32 %v9936_v32, 0.0  ;;  %v9938_v23 = vadd.f32 %v9937_v36, %v9895_v42  ;;  %v3138_v14 = vld [vmem:[#allocation11 + $0xf0] sm:$0xff]  ;;  %v13486_v42 = vcombine.high %v4121_v21, %v4129_v22  ;;  %v4105_v32 = vld [vmem:[#allocation11 + $0x1f28] sm:$0xff] }
 0x63a   :  { %10287 = vmatpush1.bf16.msra.mxu0 %v12575_v25  ;;  %v4113_v25 = vld [vmem:[#allocation11 + $0x1f68] sm:$0xff]  ;;  %v3354_v36 = vld [vmem:[#allocation11 + $0x7b0] sm:$0xff] }
 0x63b   :  { %10682 = vst [vmem:[#allocation14 + $0xb0] sm:$0xff] %v10650_v43  ;;  %v14570_v41 = vpack.c.bf16 %v10650_v43, %v10634_v35  ;;  %v10651_v47 = vmax.f32 %v9938_v23, 0.0  ;;  %10246 = vmatpush1.bf16.msra.mxu1 %v13325_v24  ;;  %10288 = vmatprep.subr.bf16.mxu0 %v12560_v33  ;;  %v12496_v35 = vcombine.high %v3130_v31, %v3138_v14  ;;  %v3330_v61 = vld [vmem:[#allocation11 + $0x6f0] sm:$0xff]  ;;  %v4057_v12 = vld [vmem:[#allocation11 + $0x1da8] sm:$0xff] }
 0x63c   :  { %10247 = vmatprep.subr.bf16.mxu1 %v13310_v30  ;;  %v12495_v24 = vcombine.low %v3130_v31, %v3138_v14  ;;  %v3362_v30 = vld [vmem:[#allocation11 + $0x7f0] sm:$0xff]  ;;  %v13485_v33 = vcombine.low %v4121_v21, %v4129_v22  ;;  %v13470_v43 = vcombine.high %v4105_v32, %v4113_v25  ;;  %v4065_v63 = vld [vmem:[#allocation11 + $0x1de8] sm:$0xff] }
 0x63d   :  { %10683 = vst [vmem:[#allocation14 + $0xb8] sm:$0xff] %v10651_v47  ;;  %v14572_v54 = vpack.c.bf16 %v10651_v47, %v10635_v29  ;;  %v12480_v29 = vcombine.high %v3114_v16, %v3122_v7  ;;  %v12720_v23 = vcombine.high %v3354_v36, %v3362_v30  ;;  %v3346_v47 = vld [vmem:[#allocation11 + $0x770] sm:$0xff]  ;;  %v4041_v8 = vld [vmem:[#allocation11 + $0x1d28] sm:$0xff] }
 0x63e   :  { %10289 = vmatpush1.bf16.msra.mxu0 %v12559_v52  ;;  %v12719_v52 = vcombine.low %v3354_v36, %v3362_v30  ;;  %v3306_v2 = vld [vmem:[#allocation11 + $0x630] sm:$0xff]  ;;  %v4049_v5 = vld [vmem:[#allocation11 + $0x1d68] sm:$0xff] }
 0x63f   :  { %10248 = vmatpush1.bf16.msra.mxu1 %v13309_v58  ;;  %10290 = vmatprep.subr.bf16.mxu0 %v12544_v6  ;;  %v13469_v58 = vcombine.low %v4105_v32, %v4113_v25  ;;  %v12704_v6 = vcombine.high %v3338_v46, %v3346_v47  ;;  %v3314_v53 = vld [vmem:[#allocation11 + $0x670] sm:$0xff]  ;;  %v4025_v21 = vld [vmem:[#allocation11 + $0x1ca8] sm:$0xff] }
 0x640   :  { %10249 = vmatprep.subr.bf16.mxu1 %v13294_v39  ;;  %v13454_v39 = vcombine.high %v4089_v45, %v4097_v38  ;;  %v3290_v31 = vld [vmem:[#allocation11 + $0x5b0] sm:$0xff]  ;;  %v4033_v22 = vld [vmem:[#allocation11 + $0x1ce8] sm:$0xff] }
 0x641   :  { %v3298_v14 = vld [vmem:[#allocation11 + $0x5f0] sm:$0xff]  ;;  %v4009_v32 = vld [vmem:[#allocation11 + $0x1c28] sm:$0xff] }
 0x642   :  { %10291 = vmatpush1.bf16.msra.mxu0 %v12543_v13  ;;  %v12703_v13 = vcombine.low %v3338_v46, %v3346_v47  ;;  %v3274_v16 = vld [vmem:[#allocation11 + $0x530] sm:$0xff]  ;;  %v4017_v25 = vld [vmem:[#allocation11 + $0x1c68] sm:$0xff] }
 0x643   :  { %10250 = vmatpush1.bf16.msra.mxu1 %v13293_v11  ;;  %10292 = vmatprep.subr.bf16.mxu0 %v12528_v17  ;;  %v13453_v11 = vcombine.low %v4089_v45, %v4097_v38  ;;  %v12688_v17 = vcombine.high %v3322_v3, %v3330_v61  ;;  %v3282_v7 = vld [vmem:[#allocation11 + $0x570] sm:$0xff] }
 0x644   :  { %10251 = vmatprep.subr.bf16.mxu1 %v13278_v10  ;;  %v13438_v10 = vcombine.high %v4073_v57, %v4081_v60  ;;  %v3258_v36 = vld [vmem:[#allocation11 + $0x4b0] sm:$0xff] }
 0x645   :  { %v3266_v30 = vld [vmem:[#allocation11 + $0x4f0] sm:$0xff] }
 0x646   :  { %10293 = vmatpush1.bf16.msra.mxu0 %v12527_v48  ;;  %v12687_v48 = vcombine.low %v3322_v3, %v3330_v61  ;;  %v3242_v45 = vld [vmem:[#allocation11 + $0x430] sm:$0xff] }
 0x647   :  { %10252 = vmatpush1.bf16.msra.mxu1 %v13277_v50  ;;  %10294 = vmatprep.subr.bf16.mxu0 %v12512_v18  ;;  %v13437_v50 = vcombine.low %v4073_v57, %v4081_v60  ;;  %v12672_v18 = vcombine.high %v3306_v2, %v3314_v53  ;;  %v3250_v38 = vld [vmem:[#allocation11 + $0x470] sm:$0xff] }
 0x648   :  { %10253 = vmatprep.subr.bf16.mxu1 %v13262_v28  ;;  %v13422_v28 = vcombine.high %v4057_v12, %v4065_v63  ;;  %v3482_v46 = vld [vmem:[#allocation11 + $0xbb0] sm:$0xff] }
 0x649   :  { %v3490_v47 = vld [vmem:[#allocation11 + $0xbf0] sm:$0xff] }
 0x64a   :  { %10295 = vmatpush1.bf16.msra.mxu0 %v12511_v19  ;;  %v12671_v19 = vcombine.low %v3306_v2, %v3314_v53  ;;  %v3466_v57 = vld [vmem:[#allocation11 + $0xb30] sm:$0xff] }
 0x64b   :  { %10254 = vmatpush1.bf16.msra.mxu1 %v13261_v15  ;;  %10296 = vmatprep.subr.bf16.mxu0 %v12496_v35  ;;  %v13421_v15 = vcombine.low %v4057_v12, %v4065_v63  ;;  %v12656_v35 = vcombine.high %v3290_v31, %v3298_v14  ;;  %v3474_v60 = vld [vmem:[#allocation11 + $0xb70] sm:$0xff] }
 0x64c   :  { %10255 = vmatprep.subr.bf16.mxu1 %v13246_v56  ;;  %v13406_v56 = vcombine.high %v4041_v8, %v4049_v5  ;;  %v3738_v3 = vld [vmem:[#allocation11 + $0x13b0] sm:$0xff] }
 0x64d   :  { %v3746_v61 = vld [vmem:[#allocation11 + $0x13f0] sm:$0xff] }
 0x64e   :  { %10297 = vmatpush1.bf16.msra.mxu0 %v12495_v24  ;;  %v12655_v24 = vcombine.low %v3290_v31, %v3298_v14  ;;  %v3450_v12 = vld [vmem:[#allocation11 + $0xab0] sm:$0xff] }
 0x64f   :  { %10256 = vmatpush1.bf16.msra.mxu1 %v13245_v9  ;;  %10298 = vmatprep.subr.bf16.mxu0 %v12480_v29  ;;  %v13405_v9 = vcombine.low %v4041_v8, %v4049_v5  ;;  %v12640_v29 = vcombine.high %v3274_v16, %v3282_v7  ;;  %v3458_v63 = vld [vmem:[#allocation11 + $0xaf0] sm:$0xff] }
 0x650   :  { %10257 = vmatprep.subr.bf16.mxu1 %v13486_v42  ;;  %v13390_v42 = vcombine.high %v4025_v21, %v4033_v22  ;;  %v3722_v2 = vld [vmem:[#allocation11 + $0x1330] sm:$0xff] }
 0x651   :  { %v3730_v53 = vld [vmem:[#allocation11 + $0x1370] sm:$0xff] }
 0x652   :  { %10299 = vmatpush1.bf16.msra.mxu0 %v12479_v37  ;;  %v12639_v37 = vcombine.low %v3274_v16, %v3282_v7  ;;  %v13088_v8 = vcombine.high %v3722_v2, %v3730_v53  ;;  %v3442_v5 = vld [vmem:[#allocation11 + $0xa70] sm:$0xff] }
 0x653   :  { %10258 = vmatpush2.bf16.msra.mxu1 %v13485_v33  ;;  %10300 = vmatprep.subr.bf16.mxu0 %v12720_v23  ;;  %v13389_v33 = vcombine.low %v4025_v21, %v4033_v22  ;;  %v12624_v23 = vcombine.high %v3258_v36, %v3266_v30  ;;  %v3706_v31 = vld [vmem:[#allocation11 + $0x12b0] sm:$0xff] }
 0x654   :  { %10259 = vmatprep.subr.bf16.mxu1 %v13470_v43  ;;  %v13374_v43 = vcombine.high %v4009_v32, %v4017_v25  ;;  %v3714_v14 = vld [vmem:[#allocation11 + $0x12f0] sm:$0xff] }
 0x655   :  { %v3418_v21 = vld [vmem:[#allocation11 + $0x9b0] sm:$0xff] }
 0x656   :  { %10301 = vmatpush2.bf16.msra.mxu0 %v12719_v52  ;;  %v12623_v52 = vcombine.low %v3258_v36, %v3266_v30  ;;  %v3426_v22 = vld [vmem:[#allocation11 + $0x9f0] sm:$0xff] }
 0x657   :  { %10260 = vmatpush2.bf16.msra.mxu1 %v13469_v58  ;;  %10302 = vmatprep.subr.bf16.mxu0 %v12704_v6  ;;  %v13373_v58 = vcombine.low %v4009_v32, %v4017_v25  ;;  %v12848_v6 = vcombine.high %v3482_v46, %v3490_v47  ;;  %v3690_v16 = vld [vmem:[#allocation11 + $0x1230] sm:$0xff] }
 0x658   :  { %10261 = vmatprep.subr.bf16.mxu1 %v13454_v39  ;;  %v12608_v39 = vcombine.high %v3242_v45, %v3250_v38  ;;  %v3698_v7 = vld [vmem:[#allocation11 + $0x1270] sm:$0xff] }
 0x659   :  { %v3402_v32 = vld [vmem:[#allocation11 + $0x930] sm:$0xff] }
 0x65a   :  { %10303 = vmatpush2.bf16.msra.mxu0 %v12703_v13  ;;  %v12847_v13 = vcombine.low %v3482_v46, %v3490_v47  ;;  %v3410_v25 = vld [vmem:[#allocation11 + $0x970] sm:$0xff] }
 0x65b   :  { %10262 = vmatpush2.bf16.msra.mxu1 %v13453_v11  ;;  %10304 = vmatprep.subr.bf16.mxu0 %v12688_v17  ;;  %v12607_v11 = vcombine.low %v3242_v45, %v3250_v38  ;;  %v13104_v17 = vcombine.high %v3738_v3, %v3746_v61  ;;  %v3674_v36 = vld [vmem:[#allocation11 + $0x11b0] sm:$0xff] }
 0x65c   :  { %10263 = vmatprep.subr.bf16.mxu1 %v13438_v10  ;;  %v12832_v10 = vcombine.high %v3466_v57, %v3474_v60  ;;  %v3682_v30 = vld [vmem:[#allocation11 + $0x11f0] sm:$0xff] }
 0x65d   :  { %v3386_v45 = vld [vmem:[#allocation11 + $0x8b0] sm:$0xff] }
 0x65e   :  { %10305 = vmatpush2.bf16.msra.mxu0 %v12687_v48  ;;  %v13103_v48 = vcombine.low %v3738_v3, %v3746_v61  ;;  %v3394_v38 = vld [vmem:[#allocation11 + $0x8f0] sm:$0xff] }
 0x65f   :  { %10264 = vmatpush2.bf16.msra.mxu1 %v13437_v50  ;;  %10306 = vmatprep.subr.bf16.mxu0 %v12672_v18  ;;  %v12831_v50 = vcombine.low %v3466_v57, %v3474_v60  ;;  %v3434_v18 = vld [vmem:[#allocation11 + $0xa30] sm:$0xff] }
 0x660   :  { %10265 = vmatprep.subr.bf16.mxu1 %v13422_v28  ;;  %v12816_v28 = vcombine.high %v3450_v12, %v3458_v63  ;;  %v3658_v46 = vld [vmem:[#allocation11 + $0x1130] sm:$0xff] }
 0x661   :  { %v3666_v47 = vld [vmem:[#allocation11 + $0x1170] sm:$0xff] }
 0x662   :  { %10307 = vmatpush2.bf16.msra.mxu0 %v12671_v19  ;;  %v13087_v19 = vcombine.low %v3722_v2, %v3730_v53  ;;  %v3370_v57 = vld [vmem:[#allocation11 + $0x830] sm:$0xff] }
 0x663   :  { %10266 = vmatpush2.bf16.msra.mxu1 %v13421_v15  ;;  %10308 = vmatprep.subr.bf16.mxu0 %v12656_v35  ;;  %v12815_v15 = vcombine.low %v3450_v12, %v3458_v63  ;;  %v13072_v35 = vcombine.high %v3706_v31, %v3714_v14  ;;  %v3378_v60 = vld [vmem:[#allocation11 + $0x870] sm:$0xff] }
 0x664   :  { %10267 = vmatprep.subr.bf16.mxu1 %v13406_v56  ;;  %v12800_v56 = vcombine.high %v3434_v18, %v3442_v5  ;;  %v3642_v3 = vld [vmem:[#allocation11 + $0x10b0] sm:$0xff] }
 0x665   :  { %v3650_v61 = vld [vmem:[#allocation11 + $0x10f0] sm:$0xff] }
 0x666   :  { %10309 = vmatpush2.bf16.msra.mxu0 %v12655_v24  ;;  %v13071_v24 = vcombine.low %v3706_v31, %v3714_v14  ;;  %v3610_v12 = vld [vmem:[#allocation11 + $0xfb0] sm:$0xff] }
 0x667   :  { %10268 = vmatpush2.bf16.msra.mxu1 %v13405_v9  ;;  %10310 = vmatprep.subr.bf16.mxu0 %v12640_v29  ;;  %v12799_v9 = vcombine.low %v3434_v18, %v3442_v5  ;;  %v13056_v29 = vcombine.high %v3690_v16, %v3698_v7  ;;  %v3618_v63 = vld [vmem:[#allocation11 + $0xff0] sm:$0xff] }
 0x668   :  { %10269 = vmatprep.subr.bf16.mxu1 %v13390_v42  ;;  %v12784_v42 = vcombine.high %v3418_v21, %v3426_v22  ;;  %v3626_v2 = vld [vmem:[#allocation11 + $0x1030] sm:$0xff] }
 0x669   :  { %v3634_v53 = vld [vmem:[#allocation11 + $0x1070] sm:$0xff] }
 0x66a   :  { %10311 = vmatpush2.bf16.msra.mxu0 %v12639_v37  ;;  %v13055_v37 = vcombine.low %v3690_v16, %v3698_v7  ;;  %v12992_v18 = vcombine.high %v3626_v2, %v3634_v53  ;;  %v3602_v5 = vld [vmem:[#allocation11 + $0xf70] sm:$0xff] }
 0x66b   :  { %10270 = vmatpush2.bf16.msra.mxu1 %v13389_v33  ;;  %10312 = vmatprep.subr.bf16.mxu0 %v12624_v23  ;;  %v12783_v33 = vcombine.low %v3418_v21, %v3426_v22  ;;  %v13040_v23 = vcombine.high %v3674_v36, %v3682_v30  ;;  %v3866_v31 = vld [vmem:[#allocation11 + $0x17b0] sm:$0xff] }
 0x66c   :  { %10271 = vmatprep.subr.bf16.mxu1 %v13374_v43  ;;  %v12768_v43 = vcombine.high %v3402_v32, %v3410_v25  ;;  %v3874_v14 = vld [vmem:[#allocation11 + $0x17f0] sm:$0xff] }
 0x66d   :  { %v3578_v21 = vld [vmem:[#allocation11 + $0xeb0] sm:$0xff] }
 0x66e   :  { %10313 = vmatpush2.bf16.msra.mxu0 %v12623_v52  ;;  %v13039_v52 = vcombine.low %v3674_v36, %v3682_v30  ;;  %v3586_v22 = vld [vmem:[#allocation11 + $0xef0] sm:$0xff] }
 0x66f   :  { %10272 = vmatpush2.bf16.msra.mxu1 %v13373_v58  ;;  %10314 = vmatprep.subr.bf16.mxu0 %v12608_v39  ;;  %v12767_v58 = vcombine.low %v3402_v32, %v3410_v25  ;;  %v12752_v39 = vcombine.high %v3386_v45, %v3394_v38  ;;  %v3850_v16 = vld [vmem:[#allocation11 + $0x1730] sm:$0xff] }
 0x670   :  { %10327 = vmatprep.subr.bf16.mxu1 %v12848_v6  ;;  %v13024_v6 = vcombine.high %v3658_v46, %v3666_v47  ;;  %v3858_v7 = vld [vmem:[#allocation11 + $0x1770] sm:$0xff] }
 0x671   :  { %v3562_v32 = vld [vmem:[#allocation11 + $0xe30] sm:$0xff] }
 0x672   :  { %10274 = vmatmul.mubr.bf16.vlgmr.msra.gmra.mxu1 %v14479_v26  ;;  %10315 = vmatpush2.bf16.msra.mxu0 %v12607_v11  ;;  %v12751_v11 = vcombine.low %v3386_v45, %v3394_v38  ;;  %v3570_v25 = vld [vmem:[#allocation11 + $0xe70] sm:$0xff] }
 0x673   :  { %10328 = vmatpush1.bf16.msra.mxu1 %v12847_v13  ;;  %10359 = vmatprep.mubr.bf16.mxu1 %v14463_v55  ;;  %v13023_v13 = vcombine.low %v3658_v46, %v3666_v47  ;;  %v3834_v36 = vld [vmem:[#allocation11 + $0x16b0] sm:$0xff] }
 0x674   :  { %10329 = vmatprep.subr.bf16.mxu1 %v12832_v10  ;;  %10370 = vmatprep.subr.bf16.mxu0 %v13104_v17  ;;  %v12736_v10 = vcombine.high %v3370_v57, %v3378_v60  ;;  %v13008_v17 = vcombine.high %v3642_v3, %v3650_v61  ;;  %v3842_v30 = vld [vmem:[#allocation11 + $0x16f0] sm:$0xff] }
 0x675   :  { %10317 = vmatmul.mubr.bf16.vlgmr.msra.gmra.mxu0 %v14452_v59  ;;  %v3546_v45 = vld [vmem:[#allocation11 + $0xdb0] sm:$0xff] }
 0x676   :  { %10371 = vmatpush1.bf16.msra.mxu0 %v13103_v48  ;;  %10402 = vmatprep.mubr.bf16.mxu0 %v14472_v4  ;;  %v13007_v48 = vcombine.low %v3642_v3, %v3650_v61  ;;  %v3554_v38 = vld [vmem:[#allocation11 + $0xdf0] sm:$0xff] }
 0x677   :  { %10330 = vmatpush1.bf16.msra.mxu1 %v12831_v50  ;;  %10372 = vmatprep.subr.bf16.mxu0 %v13088_v8  ;;  %v12735_v50 = vcombine.low %v3370_v57, %v3378_v60  ;;  %v3594_v8 = vld [vmem:[#allocation11 + $0xf30] sm:$0xff] }
 0x678   :  { %10331 = vmatprep.subr.bf16.mxu1 %v12816_v28  ;;  %v12976_v28 = vcombine.high %v3610_v12, %v3618_v63  ;;  %v3818_v46 = vld [vmem:[#allocation11 + $0x1630] sm:$0xff] }
 0x679   :  { %v3826_v47 = vld [vmem:[#allocation11 + $0x1670] sm:$0xff] }
 0x67a   :  { %10373 = vmatpush1.bf16.msra.mxu0 %v13087_v19  ;;  %v12991_v19 = vcombine.low %v3626_v2, %v3634_v53  ;;  %v13184_v57 = vcombine.high %v3818_v46, %v3826_v47  ;;  %v3530_v60 = vld [vmem:[#allocation11 + $0xd30] sm:$0xff] }
 0x67b   :  { %10332 = vmatpush1.bf16.msra.mxu1 %v12815_v15  ;;  %10374 = vmatprep.subr.bf16.mxu0 %v13072_v35  ;;  %v12975_v15 = vcombine.low %v3610_v12, %v3618_v63  ;;  %v13232_v35 = vcombine.high %v3866_v31, %v3874_v14  ;;  %v3538_v3 = vld [vmem:[#allocation11 + $0xd70] sm:$0xff] }
 0x67c   :  { %10333 = vmatprep.subr.bf16.mxu1 %v12800_v56  ;;  %v12960_v56 = vcombine.high %v3594_v8, %v3602_v5  ;;  %v3802_v61 = vld [vmem:[#allocation11 + $0x15b0] sm:$0xff]  ;;  %v12896_v12 = vcombine.high %v3530_v60, %v3538_v3 }
 0x67d   :  { %v3514_v2 = vld [vmem:[#allocation11 + $0xcb0] sm:$0xff] }
 0x67e   :  { %10375 = vmatpush1.bf16.msra.mxu0 %v13071_v24  ;;  %v13231_v24 = vcombine.low %v3866_v31, %v3874_v14  ;;  %v3522_v53 = vld [vmem:[#allocation11 + $0xcf0] sm:$0xff] }
 0x67f   :  { %10334 = vmatpush1.bf16.msra.mxu1 %v12799_v9  ;;  %10376 = vmatprep.subr.bf16.mxu0 %v13056_v29  ;;  %v12959_v9 = vcombine.low %v3594_v8, %v3602_v5  ;;  %v13216_v29 = vcombine.high %v3850_v16, %v3858_v7  ;;  %v10017_v5 = vpop.f32.mrf.mxu1  ;;  %v12880_v31 = vcombine.high %v3514_v2, %v3522_v53 }
 0x680   :  { %10335 = vmatprep.subr.bf16.mxu1 %v12784_v42  ;;  %v12944_v42 = vcombine.high %v3578_v21, %v3586_v22 }
 0x682   :  { %10377 = vmatpush1.bf16.msra.mxu0 %v13055_v37  ;;  %v13215_v37 = vcombine.low %v3850_v16, %v3858_v7  ;;  %v10019_v7 = vpop.f32.mrf.mxu1 }
 0x683   :  { %10336 = vmatpush1.bf16.msra.mxu1 %v12783_v33  ;;  %10378 = vmatprep.subr.bf16.mxu0 %v13040_v23  ;;  %v12943_v33 = vcombine.low %v3578_v21, %v3586_v22  ;;  %v13200_v23 = vcombine.high %v3834_v36, %v3842_v30  ;;  %v12879_v22 = vcombine.low %v3514_v2, %v3522_v53  ;;  %v3211_v2 = vld [vmem:[#allocation11 + $0x338] sm:$0xff] }
 0x684   :  { %10337 = vmatprep.subr.bf16.mxu1 %v12768_v43  ;;  %v12928_v43 = vcombine.high %v3562_v32, %v3570_v25  ;;  %v3219_v53 = vld [vmem:[#allocation11 + $0x378] sm:$0xff] }
 0x686   :  { %10379 = vmatpush1.bf16.msra.mxu0 %v13039_v52  ;;  %v12927_v52 = vcombine.low %v3562_v32, %v3570_v25  ;;  %v3762_v32 = vld [vmem:[#allocation11 + $0x1470] sm:$0xff] }
 0x687   :  { %10338 = vmatpush1.bf16.msra.mxu1 %v12767_v58  ;;  %10380 = vmatprep.subr.bf16.mxu0 %v13024_v6  ;;  %v14578_v58 = vpop.f32.mrf.mxu0  ;;  %v12912_v6 = vcombine.high %v3546_v45, %v3554_v38  ;;  %v3994_v25 = vld [vmem:[#allocation11 + $0x1bb0] sm:$0xff] }
 0x688   :  { %10339 = vmatprep.subr.bf16.mxu1 %v12752_v39  ;;  %v13199_v39 = vcombine.low %v3834_v36, %v3842_v30  ;;  %v4002_v36 = vld [vmem:[#allocation11 + $0x1bf0] sm:$0xff] }
 0x68a   :  { %10381 = vmatpush1.bf16.msra.mxu0 %v13023_v13  ;;  %v14580_v13 = vpop.f32.mrf.mxu0 }
 0x68b   :  { %10340 = vmatpush1.bf16.msra.mxu1 %v12751_v11  ;;  %10382 = vmatprep.subr.bf16.mxu0 %v13008_v17  ;;  %v3810_v11 = vld [vmem:[#allocation11 + $0x15f0] sm:$0xff]  ;;  %v13183_v17 = vcombine.low %v3818_v46, %v3826_v47  ;;  %v3227_v47 = vld [vmem:[#allocation11 + $0x3b8] sm:$0xff] }
 0x68c   :  { %10341 = vmatprep.subr.bf16.mxu1 %v12736_v10  ;;  %v12911_v10 = vcombine.low %v3546_v45, %v3554_v38  ;;  %v13168_v63 = vcombine.high %v3802_v61, %v3810_v11  ;;  %v13167_v8 = vcombine.low %v3802_v61, %v3810_v11  ;;  %v13360_v45 = vcombine.high %v3994_v25, %v4002_v36  ;;  %v3978_v38 = vld [vmem:[#allocation11 + $0x1b30] sm:$0xff] }
 0x68d   :  { %v3986_v46 = vld [vmem:[#allocation11 + $0x1b70] sm:$0xff] }
 0x68e   :  { %10383 = vmatpush1.bf16.msra.mxu0 %v13007_v48  ;;  %v3794_v48 = vld [vmem:[#allocation11 + $0x1570] sm:$0xff]  ;;  %v13344_v61 = vcombine.high %v3978_v38, %v3986_v46 }
 0x68f   :  { %10342 = vmatpush1.bf16.msra.mxu1 %v12735_v50  ;;  %10384 = vmatprep.subr.bf16.mxu0 %v12992_v18  ;;  %v3786_v50 = vld [vmem:[#allocation11 + $0x1530] sm:$0xff]  ;;  %v12895_v18 = vcombine.low %v3530_v60, %v3538_v3 }
 0x690   :  { %10343 = vmatprep.subr.bf16.mxu1 %v12976_v28  ;;  %v14582_v28 = vpop.f32.mrf.mxu0  ;;  %v13152_v14 = vcombine.high %v3786_v50, %v3794_v48  ;;  %v13151_v16 = vcombine.low %v3786_v50, %v3794_v48  ;;  %v3962_v11 = vld [vmem:[#allocation11 + $0x1ab0] sm:$0xff] }
 0x692   :  { %10385 = vmatpush1.bf16.msra.mxu0 %v12991_v19  ;;  %v3506_v19 = vld [vmem:[#allocation11 + $0xc70] sm:$0xff]  ;;  %v9980_v21 = vpop.f32.mrf.mxu0 }
 0x693   :  { %10344 = vmatpush2.bf16.msra.mxu1 %v12975_v15  ;;  %10386 = vmatprep.subr.bf16.mxu0 %v13232_v35  ;;  %v3498_v15 = vld [vmem:[#allocation11 + $0xc30] sm:$0xff] }
 0x694   :  { %10345 = vmatprep.subr.bf16.mxu1 %v12960_v56  ;;  %v3770_v56 = vld [vmem:[#allocation11 + $0x14b0] sm:$0xff]  ;;  %v12863_v30 = vcombine.low %v3498_v15, %v3506_v19 }
 0x695   :  { %v3778_v35 = vld [vmem:[#allocation11 + $0x14f0] sm:$0xff] }
 0x696   :  { %10387 = vmatpush2.bf16.msra.mxu0 %v13231_v24  ;;  %v12864_v24 = vcombine.high %v3498_v15, %v3506_v19  ;;  %v12578_v15 = vcombine.high %v3211_v2, %v3219_v53  ;;  %v3946_v19 = vld [vmem:[#allocation11 + $0x1a30] sm:$0xff] }
 0x697   :  { %10346 = vmatpush2.bf16.msra.mxu1 %v12959_v9  ;;  %10388 = vmatprep.subr.bf16.mxu0 %v13216_v29  ;;  %v10060_v9 = vpop.f32.mrf.mxu0  ;;  %v3754_v29 = vld [vmem:[#allocation11 + $0x1430] sm:$0xff] }
 0x698   :  { %10347 = vmatprep.subr.bf16.mxu1 %v12944_v42  ;;  %v13136_v42 = vcombine.high %v3770_v56, %v3778_v35 }
 0x69a   :  { %10389 = vmatpush2.bf16.msra.mxu0 %v13215_v37  ;;  %v10021_v37 = vpop.f32.mrf.mxu1 }
 0x69b   :  { %10348 = vmatpush2.bf16.msra.mxu1 %v12943_v33  ;;  %10390 = vmatprep.subr.bf16.mxu0 %v13200_v23  ;;  %v13135_v33 = vcombine.low %v3770_v56, %v3778_v35  ;;  %v13120_v23 = vcombine.high %v3754_v29, %v3762_v32 }
 0x69c   :  { %10349 = vmatprep.subr.bf16.mxu1 %v12928_v43  ;;  %v10062_v43 = vpop.f32.mrf.mxu0  ;;  %v10023_v60 = vpop.f32.mrf.mxu1 }
 0x69d   :  { %v10024_v56 = vadd.f32 %v10023_v60, %v9980_v21  ;;  %v3914_v60 = vld [vmem:[#allocation11 + $0x1930] sm:$0xff] }
 0x69e   :  { %10391 = vmatpush2.bf16.msra.mxu0 %v13199_v39  ;;  %v10018_v39 = vadd.f32 %v10017_v5, %v14578_v58  ;;  %v10064_v3 = vpop.f32.mrf.mxu0  ;;  %v13343_v58 = vcombine.low %v3978_v38, %v3986_v46  ;;  %v3179_v38 = vld [vmem:[#allocation11 + $0x238] sm:$0xff] }
 0x69f   :  { %10350 = vmatpush2.bf16.msra.mxu1 %v12927_v52  ;;  %10392 = vmatprep.subr.bf16.mxu0 %v13184_v57  ;;  %v3235_v52 = vld [vmem:[#allocation11 + $0x3f8] sm:$0xff]  ;;  %v13359_v57 = vcombine.low %v3994_v25, %v4002_v36  ;;  %v12577_v36 = vcombine.low %v3211_v2, %v3219_v53  ;;  %v3898_v53 = vld [vmem:[#allocation11 + $0x18b0] sm:$0xff] }
 0x6a0   :  { %10351 = vmatprep.subr.bf16.mxu1 %v12912_v6  ;;  %v13119_v6 = vcombine.low %v3754_v29, %v3762_v32  ;;  %v12593_v48 = vcombine.low %v3227_v47, %v3235_v52  ;;  %v3187_v46 = vld [vmem:[#allocation11 + $0x278] sm:$0xff] }
 0x6a2   :  { %10393 = vmatpush2.bf16.msra.mxu0 %v13183_v17  ;;  %v10061_v17 = vadd.f32 %v10060_v9, %v10018_v39  ;;  %v3195_v9 = vld [vmem:[#allocation11 + $0x2b8] sm:$0xff] }
 0x6a3   :  { %10352 = vmatpush2.bf16.msra.mxu1 %v12911_v10  ;;  %10394 = vmatprep.subr.bf16.mxu0 %v13168_v63  ;;  %v10020_v10 = vadd.f32 %v10019_v7, %v14580_v13  ;;  %v3970_v63 = vld [vmem:[#allocation11 + $0x1af0] sm:$0xff] }
 0x6a4   :  { %10353 = vmatprep.subr.bf16.mxu1 %v12896_v12  ;;  %v12594_v12 = vcombine.high %v3227_v47, %v3235_v52  ;;  %v3954_v7 = vld [vmem:[#allocation11 + $0x1a70] sm:$0xff] }
 0x6a5   :  { %v13311_v39 = vcombine.low %v3946_v19, %v3954_v7 }
 0x6a6   :  { %10395 = vmatpush2.bf16.msra.mxu0 %v13167_v8  ;;  %v10063_v8 = vadd.f32 %v10062_v43, %v10020_v10  ;;  %v3171_v10 = vld [vmem:[#allocation11 + $0x1f8] sm:$0xff] }
 0x6a7   :  { %10354 = vmatpush2.bf16.msra.mxu1 %v12895_v18  ;;  %10396 = vmatprep.subr.bf16.mxu0 %v13152_v14  ;;  %v10022_v18 = vadd.f32 %v10021_v37, %v14582_v28  ;;  %v13328_v14 = vcombine.high %v3962_v11, %v3970_v63  ;;  %v3203_v28 = vld [vmem:[#allocation11 + $0x2f8] sm:$0xff]  ;;  %v3930_v37 = vld [vmem:[#allocation11 + $0x19b0] sm:$0xff] }
 0x6a8   :  { %10355 = vmatprep.subr.bf16.mxu1 %v12880_v31  ;;  %v10066_v31 = vpop.f32.mrf.mxu0 }
 0x6a9   :  { %v10065_v35 = vadd.f32 %v10064_v3, %v10022_v18  ;;  %v10067_v29 = vadd.f32 %v10066_v31, %v10024_v56 }
 0x6aa   :  { %10397 = vmatpush2.bf16.msra.mxu0 %v13151_v16 }
 0x6ab   :  { %10356 = vmatpush2.bf16.msra.mxu1 %v12879_v22  ;;  %10398 = vmatprep.subr.bf16.mxu0 %v13136_v42  ;;  %v13327_v42 = vcombine.low %v3962_v11, %v3970_v63  ;;  %v3163_v11 = vld [vmem:[#allocation11 + $0x1b8] sm:$0xff] }
 0x6ac   :  { %10357 = vmatprep.subr.bf16.mxu1 %v12864_v24  ;;  %v12530_v2 = vcombine.high %v3163_v11, %v3171_v10 }
 0x6ae   :  { %10399 = vmatpush2.bf16.msra.mxu0 %v13135_v33  ;;  %v12562_v33 = vcombine.high %v3195_v9, %v3203_v28 }
 0x6af   :  { %10358 = vmatpush2.bf16.msra.mxu1 %v12863_v30  ;;  %10400 = vmatprep.subr.bf16.mxu0 %v13120_v23  ;;  %v13312_v30 = vcombine.high %v3946_v19, %v3954_v7  ;;  %v3139_v19 = vld [vmem:[#allocation11 + $0xf8] sm:$0xff]  ;;  %v4122_v7 = vld [vmem:[#allocation11 + $0x1fb0] sm:$0xff] }
 0x6b0   :  { %10413 = vmatprep.subr.bf16.mxu1 %v13360_v45  ;;  %v3938_v45 = vld [vmem:[#allocation11 + $0x19f0] sm:$0xff] }
 0x6b2   :  { %v10103_v50 = vpop.f32.mrf.mxu1  ;;  %10360 = vmatmul.mubr.bf16.vlgmr.msra.gmra.mxu1 %v14461_v0  ;;  %10401 = vmatpush2.bf16.msra.mxu0 %v13119_v6  ;;  %v13296_v6 = vcombine.high %v3930_v37, %v3938_v45 }
 0x6b3   :  { %v10104_v5 = vadd.f32 %v10103_v50, %v10061_v17  ;;  %10414 = vmatpush1.bf16.msra.mxu1 %v13359_v57  ;;  %10445 = vmatprep.mubr.bf16.mxu1 %v14477_v51  ;;  %v12546_v57 = vcombine.high %v3179_v38, %v3187_v46  ;;  %v13295_v17 = vcombine.low %v3930_v37, %v3938_v45  ;;  %v3906_v50 = vld [vmem:[#allocation11 + $0x18f0] sm:$0xff] }
 0x6b4   :  { %v10105_v13 = vpop.f32.mrf.mxu1  ;;  %10415 = vmatprep.subr.bf16.mxu1 %v13344_v61  ;;  %10456 = vmatprep.subr.bf16.mxu0 %v12594_v12  ;;  %v3922_v61 = vld [vmem:[#allocation11 + $0x1970] sm:$0xff]  ;;  %v12545_v12 = vcombine.low %v3179_v38, %v3187_v46  ;;  %v13263_v56 = vcombine.low %v3898_v53, %v3906_v50 }
 0x6b5   :  { %v10636_v22 = vmax.f32 %v10104_v5, 0.0  ;;  %v10106_v16 = vadd.f32 %v10105_v13, %v10063_v8  ;;  %10403 = vmatmul.mubr.bf16.vlgmr.msra.gmra.mxu0 %v14470_v40  ;;  %v13280_v63 = vcombine.high %v3914_v60, %v3922_v61  ;;  %v13279_v18 = vcombine.low %v3914_v60, %v3922_v61  ;;  %v3882_v13 = vld [vmem:[#allocation11 + $0x1830] sm:$0xff] }
 0x6b6   :  { %v10107_v24 = vpop.f32.mrf.mxu1  ;;  %10457 = vmatpush1.bf16.msra.mxu0 %v12593_v48  ;;  %10488 = vmatprep.mubr.bf16.mxu0 %v14454_v44  ;;  %v12561_v44 = vcombine.low %v3195_v9, %v3203_v28  ;;  %v3155_v48 = vld [vmem:[#allocation11 + $0x178] sm:$0xff]  ;;  %v12529_v8 = vcombine.low %v3163_v11, %v3171_v10  ;;  %v13264_v5 = vcombine.high %v3898_v53, %v3906_v50  ;;  %v4130_v9 = vld [vmem:[#allocation11 + $0x1ff0] sm:$0xff] }
 0x6b7   :  { %10668 = vst [vmem:[#allocation14 + $0x40] sm:$0xff] %v10636_v22  ;;  %v10637_v32 = vmax.f32 %v10106_v16, 0.0  ;;  %v10108_v25 = vadd.f32 %v10107_v24, %v10065_v35  ;;  %10416 = vmatpush1.bf16.msra.mxu1 %v13343_v58  ;;  %10458 = vmatprep.subr.bf16.mxu0 %v12578_v15  ;;  %v3147_v58 = vld [vmem:[#allocation11 + $0x138] sm:$0xff]  ;;  %v13487_v37 = vcombine.low %v4122_v7, %v4130_v9  ;;  %v4090_v38 = vld [vmem:[#allocation11 + $0x1eb0] sm:$0xff] }
 0x6b8   :  { %v10109_v21 = vpop.f32.mrf.mxu1  ;;  %10417 = vmatprep.subr.bf16.mxu1 %v13328_v14  ;;  %v12514_v31 = vcombine.high %v3147_v58, %v3155_v48  ;;  %v3890_v14 = vld [vmem:[#allocation11 + $0x1870] sm:$0xff]  ;;  %v3131_v15 = vld [vmem:[#allocation11 + $0xb8] sm:$0xff]  ;;  %v12513_v35 = vcombine.low %v3147_v58, %v3155_v48 }
 0x6b9   :  { %10669 = vst [vmem:[#allocation14 + $0x48] sm:$0xff] %v10637_v32  ;;  %v10652_v43 = vmax.f32 %v10108_v25, 0.0  ;;  %v10110_v23 = vadd.f32 %v10109_v21, %v10067_v29  ;;  %v12498_v16 = vcombine.high %v3131_v15, %v3139_v19  ;;  %v3115_v28 = vld [vmem:[#allocation11 + $0x38] sm:$0xff]  ;;  %v12497_v29 = vcombine.low %v3131_v15, %v3139_v19  ;;  %v4114_v21 = vld [vmem:[#allocation11 + $0x1f70] sm:$0xff] }
 0x6ba   :  { %10459 = vmatpush1.bf16.msra.mxu0 %v12577_v36  ;;  %v3123_v24 = vld [vmem:[#allocation11 + $0x78] sm:$0xff]  ;;  %v4106_v36 = vld [vmem:[#allocation11 + $0x1f30] sm:$0xff] }
 0x6bb   :  { %10684 = vst [vmem:[#allocation14 + $0xc0] sm:$0xff] %v10652_v43  ;;  %v14591_v47 = vpack.c.bf16 %v10652_v43, %v10636_v22  ;;  %v10653_v52 = vmax.f32 %v10110_v23, 0.0  ;;  %10418 = vmatpush1.bf16.msra.mxu1 %v13327_v42  ;;  %10460 = vmatprep.subr.bf16.mxu0 %v12562_v33  ;;  %v13248_v22 = vcombine.high %v3882_v13, %v3890_v14  ;;  %v3363_v33 = vld [vmem:[#allocation11 + $0x7f8] sm:$0xff]  ;;  %v4098_v46 = vld [vmem:[#allocation11 + $0x1ef0] sm:$0xff] }
 0x6bc   :  { %10419 = vmatprep.subr.bf16.mxu1 %v13312_v30  ;;  %v13247_v42 = vcombine.low %v3882_v13, %v3890_v14  ;;  %v12482_v25 = vcombine.high %v3115_v28, %v3123_v24  ;;  %v3355_v30 = vld [vmem:[#allocation11 + $0x7b8] sm:$0xff]  ;;  %v12481_v43 = vcombine.low %v3115_v28, %v3123_v24  ;;  %v13472_v23 = vcombine.high %v4106_v36, %v4114_v21  ;;  %v4074_v61 = vld [vmem:[#allocation11 + $0x1e30] sm:$0xff] }
 0x6bd   :  { %10685 = vst [vmem:[#allocation14 + $0xc8] sm:$0xff] %v10653_v52  ;;  %v14593_v3 = vpack.c.bf16 %v10653_v52, %v10637_v32  ;;  %v13488_v32 = vcombine.high %v4122_v7, %v4130_v9  ;;  %v12722_v45 = vcombine.high %v3355_v30, %v3363_v33  ;;  %v3339_v52 = vld [vmem:[#allocation11 + $0x738] sm:$0xff]  ;;  %v4082_v11 = vld [vmem:[#allocation11 + $0x1e70] sm:$0xff] }
 0x6be   :  { %10461 = vmatpush1.bf16.msra.mxu0 %v12561_v44  ;;  %v13471_v44 = vcombine.low %v4106_v36, %v4114_v21  ;;  %v3323_v10 = vld [vmem:[#allocation11 + $0x6b8] sm:$0xff]  ;;  %v4058_v50 = vld [vmem:[#allocation11 + $0x1db0] sm:$0xff] }
 0x6bf   :  { %10420 = vmatpush1.bf16.msra.mxu1 %v13311_v39  ;;  %10462 = vmatprep.subr.bf16.mxu0 %v12546_v57  ;;  %v3347_v39 = vld [vmem:[#allocation11 + $0x778] sm:$0xff]  ;;  %v13456_v57 = vcombine.high %v4090_v38, %v4098_v46  ;;  %v4066_v58 = vld [vmem:[#allocation11 + $0x1df0] sm:$0xff] }
 0x6c0   :  { %10421 = vmatprep.subr.bf16.mxu1 %v13296_v6  ;;  %v12721_v6 = vcombine.low %v3355_v30, %v3363_v33  ;;  %v12706_v60 = vcombine.high %v3339_v52, %v3347_v39  ;;  %v3307_v48 = vld [vmem:[#allocation11 + $0x638] sm:$0xff]  ;;  %v4042_v14 = vld [vmem:[#allocation11 + $0x1d30] sm:$0xff] }
 0x6c1   :  { %v4050_v15 = vld [vmem:[#allocation11 + $0x1d70] sm:$0xff]  ;;  %v3291_v19 = vld [vmem:[#allocation11 + $0x5b8] sm:$0xff] }
 0x6c2   :  { %10463 = vmatpush1.bf16.msra.mxu0 %v12545_v12  ;;  %v13455_v12 = vcombine.low %v4090_v38, %v4098_v46  ;;  %v4026_v9 = vld [vmem:[#allocation11 + $0x1cb0] sm:$0xff]  ;;  %v3275_v24 = vld [vmem:[#allocation11 + $0x538] sm:$0xff] }
 0x6c3   :  { %10422 = vmatpush1.bf16.msra.mxu1 %v13295_v17  ;;  %10464 = vmatprep.subr.bf16.mxu0 %v12530_v2  ;;  %v3331_v17 = vld [vmem:[#allocation11 + $0x6f8] sm:$0xff]  ;;  %v13440_v2 = vcombine.high %v4074_v61, %v4082_v11  ;;  %v4034_v28 = vld [vmem:[#allocation11 + $0x1cf0] sm:$0xff] }
 0x6c4   :  { %10423 = vmatprep.subr.bf16.mxu1 %v13280_v63  ;;  %v12705_v63 = vcombine.low %v3339_v52, %v3347_v39  ;;  %v12690_v53 = vcombine.high %v3323_v10, %v3331_v17  ;;  %v4010_v21 = vld [vmem:[#allocation11 + $0x1c30] sm:$0xff]  ;;  %v3259_v33 = vld [vmem:[#allocation11 + $0x4b8] sm:$0xff] }
 0x6c5   :  { %v4018_v30 = vld [vmem:[#allocation11 + $0x1c70] sm:$0xff]  ;;  %v3243_v46 = vld [vmem:[#allocation11 + $0x438] sm:$0xff] }
 0x6c6   :  { %10465 = vmatpush1.bf16.msra.mxu0 %v12529_v8  ;;  %v13439_v8 = vcombine.low %v4074_v61, %v4082_v11  ;;  %v3251_v52 = vld [vmem:[#allocation11 + $0x478] sm:$0xff] }
 0x6c7   :  { %10424 = vmatpush1.bf16.msra.mxu1 %v13279_v18  ;;  %10466 = vmatprep.subr.bf16.mxu0 %v12514_v31  ;;  %v3315_v18 = vld [vmem:[#allocation11 + $0x678] sm:$0xff]  ;;  %v13424_v31 = vcombine.high %v4058_v50, %v4066_v58 }
 0x6c8   :  { %10425 = vmatprep.subr.bf16.mxu1 %v13264_v5  ;;  %v12689_v5 = vcombine.low %v3323_v10, %v3331_v17  ;;  %v12674_v13 = vcombine.high %v3307_v48, %v3315_v18  ;;  %v3483_v39 = vld [vmem:[#allocation11 + $0xbb8] sm:$0xff] }
 0x6c9   :  { %v3467_v11 = vld [vmem:[#allocation11 + $0xb38] sm:$0xff] }
 0x6ca   :  { %10467 = vmatpush1.bf16.msra.mxu0 %v12513_v35  ;;  %v13423_v35 = vcombine.low %v4058_v50, %v4066_v58  ;;  %v3475_v10 = vld [vmem:[#allocation11 + $0xb78] sm:$0xff] }
 0x6cb   :  { %10426 = vmatpush1.bf16.msra.mxu1 %v13263_v56  ;;  %10468 = vmatprep.subr.bf16.mxu0 %v12498_v16  ;;  %v3299_v56 = vld [vmem:[#allocation11 + $0x5f8] sm:$0xff]  ;;  %v13408_v16 = vcombine.high %v4042_v14, %v4050_v15 }
 0x6cc   :  { %10427 = vmatprep.subr.bf16.mxu1 %v13248_v22  ;;  %v12673_v22 = vcombine.low %v3307_v48, %v3315_v18  ;;  %v12658_v7 = vcombine.high %v3291_v19, %v3299_v56  ;;  %v3739_v17 = vld [vmem:[#allocation11 + $0x13b8] sm:$0xff] }
 0x6cd   :  { %v3451_v58 = vld [vmem:[#allocation11 + $0xab8] sm:$0xff] }
 0x6ce   :  { %10469 = vmatpush1.bf16.msra.mxu0 %v12497_v29  ;;  %v13407_v29 = vcombine.low %v4042_v14, %v4050_v15  ;;  %v3459_v48 = vld [vmem:[#allocation11 + $0xaf8] sm:$0xff] }
 0x6cf   :  { %10428 = vmatpush1.bf16.msra.mxu1 %v13247_v42  ;;  %10470 = vmatprep.subr.bf16.mxu0 %v12482_v25  ;;  %v3283_v42 = vld [vmem:[#allocation11 + $0x578] sm:$0xff]  ;;  %v13392_v25 = vcombine.high %v4026_v9, %v4034_v28 }
 0x6d0   :  { %10429 = vmatprep.subr.bf16.mxu1 %v13488_v32  ;;  %v12657_v32 = vcombine.low %v3291_v19, %v3299_v56  ;;  %v12642_v36 = vcombine.high %v3275_v24, %v3283_v42  ;;  %v3723_v18 = vld [vmem:[#allocation11 + $0x1338] sm:$0xff] }
 0x6d1   :  { %v3435_v14 = vld [vmem:[#allocation11 + $0xa38] sm:$0xff] }
 0x6d2   :  { %10471 = vmatpush1.bf16.msra.mxu0 %v12481_v43  ;;  %v13391_v43 = vcombine.low %v4026_v9, %v4034_v28  ;;  %v3443_v19 = vld [vmem:[#allocation11 + $0xa78] sm:$0xff] }
 0x6d3   :  { %10430 = vmatpush2.bf16.msra.mxu1 %v13487_v37  ;;  %10472 = vmatprep.subr.bf16.mxu0 %v12722_v45  ;;  %v3267_v37 = vld [vmem:[#allocation11 + $0x4f8] sm:$0xff]  ;;  %v13376_v45 = vcombine.high %v4010_v21, %v4018_v30 }
 0x6d4   :  { %10431 = vmatprep.subr.bf16.mxu1 %v13472_v23  ;;  %v12641_v23 = vcombine.low %v3275_v24, %v3283_v42  ;;  %v12626_v38 = vcombine.high %v3259_v33, %v3267_v37  ;;  %v3707_v56 = vld [vmem:[#allocation11 + $0x12b8] sm:$0xff] }
 0x6d5   :  { %v3427_v28 = vld [vmem:[#allocation11 + $0x9f8] sm:$0xff] }
 0x6d6   :  { %10473 = vmatpush2.bf16.msra.mxu0 %v12721_v6  ;;  %v13375_v6 = vcombine.low %v4010_v21, %v4018_v30  ;;  %v3691_v24 = vld [vmem:[#allocation11 + $0x1238] sm:$0xff] }
 0x6d7   :  { %10432 = vmatpush2.bf16.msra.mxu1 %v13471_v44  ;;  %10474 = vmatprep.subr.bf16.mxu0 %v12706_v60  ;;  %v3491_v44 = vld [vmem:[#allocation11 + $0xbf8] sm:$0xff]  ;;  %v12610_v60 = vcombine.high %v3243_v46, %v3251_v52 }
 0x6d8   :  { %10433 = vmatprep.subr.bf16.mxu1 %v13456_v57  ;;  %v12625_v57 = vcombine.low %v3259_v33, %v3267_v37  ;;  %v12850_v61 = vcombine.high %v3483_v39, %v3491_v44  ;;  %v3699_v42 = vld [vmem:[#allocation11 + $0x1278] sm:$0xff] }
 0x6d9   :  { %v3411_v21 = vld [vmem:[#allocation11 + $0x978] sm:$0xff]  ;;  %v13057_v37 = vcombine.low %v3691_v24, %v3699_v42 }
 0x6da   :  { %10475 = vmatpush2.bf16.msra.mxu0 %v12705_v63  ;;  %v12609_v63 = vcombine.low %v3243_v46, %v3251_v52  ;;  %v3675_v30 = vld [vmem:[#allocation11 + $0x11b8] sm:$0xff] }
 0x6db   :  { %10434 = vmatpush2.bf16.msra.mxu1 %v13455_v12  ;;  %10476 = vmatprep.subr.bf16.mxu0 %v12690_v53  ;;  %v3747_v12 = vld [vmem:[#allocation11 + $0x13f8] sm:$0xff]  ;;  %v12834_v53 = vcombine.high %v3467_v11, %v3475_v10 }
 0x6dc   :  { %10435 = vmatprep.subr.bf16.mxu1 %v13440_v2  ;;  %v12849_v2 = vcombine.low %v3483_v39, %v3491_v44  ;;  %v13106_v50 = vcombine.high %v3739_v17, %v3747_v12  ;;  %v3659_v46 = vld [vmem:[#allocation11 + $0x1138] sm:$0xff] }
 0x6dd   :  { %v3667_v52 = vld [vmem:[#allocation11 + $0x1178] sm:$0xff] }
 0x6de   :  { %10477 = vmatpush2.bf16.msra.mxu0 %v12689_v5  ;;  %v12833_v5 = vcombine.low %v3467_v11, %v3475_v10  ;;  %v3643_v11 = vld [vmem:[#allocation11 + $0x10b8] sm:$0xff] }
 0x6df   :  { %10436 = vmatpush2.bf16.msra.mxu1 %v13439_v8  ;;  %10478 = vmatprep.subr.bf16.mxu0 %v12674_v13  ;;  %v3731_v8 = vld [vmem:[#allocation11 + $0x1378] sm:$0xff]  ;;  %v12818_v13 = vcombine.high %v3451_v58, %v3459_v48 }
 0x6e0   :  { %10437 = vmatprep.subr.bf16.mxu1 %v13424_v31  ;;  %v13105_v31 = vcombine.low %v3739_v17, %v3747_v12  ;;  %v13090_v15 = vcombine.high %v3723_v18, %v3731_v8  ;;  %v3651_v10 = vld [vmem:[#allocation11 + $0x10f8] sm:$0xff]  ;;  %v13025_v12 = vcombine.low %v3659_v46, %v3667_v52 }
 0x6e2   :  { %10479 = vmatpush2.bf16.msra.mxu0 %v12673_v22  ;;  %v12817_v22 = vcombine.low %v3451_v58, %v3459_v48  ;;  %v3627_v58 = vld [vmem:[#allocation11 + $0x1038] sm:$0xff] }
 0x6e3   :  { %10438 = vmatpush2.bf16.msra.mxu1 %v13423_v35  ;;  %10480 = vmatprep.subr.bf16.mxu0 %v12658_v7  ;;  %v3715_v35 = vld [vmem:[#allocation11 + $0x12f8] sm:$0xff]  ;;  %v12802_v7 = vcombine.high %v3435_v14, %v3443_v19 }
 0x6e4   :  { %10439 = vmatprep.subr.bf16.mxu1 %v13408_v16  ;;  %v13089_v16 = vcombine.low %v3723_v18, %v3731_v8  ;;  %v13074_v9 = vcombine.high %v3707_v56, %v3715_v35  ;;  %v3635_v48 = vld [vmem:[#allocation11 + $0x1078] sm:$0xff]  ;;  %v13009_v8 = vcombine.low %v3643_v11, %v3651_v10 }
 0x6e6   :  { %10481 = vmatpush2.bf16.msra.mxu0 %v12657_v32  ;;  %v13073_v32 = vcombine.low %v3707_v56, %v3715_v35  ;;  %v12993_v35 = vcombine.low %v3627_v58, %v3635_v48 }
 0x6e7   :  { %10440 = vmatpush2.bf16.msra.mxu1 %v13407_v29  ;;  %10482 = vmatprep.subr.bf16.mxu0 %v12642_v36  ;;  %v12801_v29 = vcombine.low %v3435_v14, %v3443_v19  ;;  %v3403_v36 = vld [vmem:[#allocation11 + $0x938] sm:$0xff] }
 0x6e8   :  { %10441 = vmatprep.subr.bf16.mxu1 %v13392_v25  ;;  %v13058_v25 = vcombine.high %v3691_v24, %v3699_v42  ;;  %v12769_v39 = vcombine.low %v3403_v36, %v3411_v21  ;;  %v3603_v14 = vld [vmem:[#allocation11 + $0xf78] sm:$0xff] }
 0x6e9   :  { %v3875_v19 = vld [vmem:[#allocation11 + $0x17f8] sm:$0xff] }
 0x6ea   :  { %10483 = vmatpush2.bf16.msra.mxu0 %v12641_v23 }
 0x6eb   :  { %10442 = vmatpush2.bf16.msra.mxu1 %v13391_v43  ;;  %10484 = vmatprep.subr.bf16.mxu0 %v12626_v38  ;;  %v12770_v43 = vcombine.high %v3403_v36, %v3411_v21  ;;  %v3395_v38 = vld [vmem:[#allocation11 + $0x8f8] sm:$0xff] }
 0x6ec   :  { %10443 = vmatprep.subr.bf16.mxu1 %v13376_v45  ;;  %v3387_v45 = vld [vmem:[#allocation11 + $0x8b8] sm:$0xff] }
 0x6ed   :  { %v12753_v17 = vcombine.low %v3387_v45, %v3395_v38  ;;  %v3835_v36 = vld [vmem:[#allocation11 + $0x16b8] sm:$0xff] }
 0x6ee   :  { %10485 = vmatpush2.bf16.msra.mxu0 %v12625_v57  ;;  %v13026_v57 = vcombine.high %v3659_v46, %v3667_v52  ;;  %v3843_v21 = vld [vmem:[#allocation11 + $0x16f8] sm:$0xff]  ;;  %v14599_v46 = vpop.f32.mrf.mxu0 }
 0x6ef   :  { %10444 = vmatpush2.bf16.msra.mxu1 %v13375_v6  ;;  %10486 = vmatprep.subr.bf16.mxu0 %v12610_v60  ;;  %v12754_v6 = vcombine.high %v3387_v45, %v3395_v38  ;;  %v3371_v60 = vld [vmem:[#allocation11 + $0x838] sm:$0xff] }
 0x6f0   :  { %10499 = vmatprep.subr.bf16.mxu1 %v12850_v61  ;;  %v3379_v61 = vld [vmem:[#allocation11 + $0x878] sm:$0xff] }
 0x6f1   :  { %v12737_v18 = vcombine.low %v3371_v60, %v3379_v61  ;;  %v3819_v45 = vld [vmem:[#allocation11 + $0x1638] sm:$0xff] }
 0x6f2   :  { %10446 = vmatmul.mubr.bf16.vlgmr.msra.gmra.mxu1 %v14479_v26  ;;  %10487 = vmatpush2.bf16.msra.mxu0 %v12609_v63  ;;  %v12738_v63 = vcombine.high %v3371_v60, %v3379_v61  ;;  %v3827_v38 = vld [vmem:[#allocation11 + $0x1678] sm:$0xff] }
 0x6f3   :  { %10500 = vmatpush1.bf16.msra.mxu1 %v12849_v2  ;;  %10531 = vmatprep.mubr.bf16.mxu1 %v14463_v55  ;;  %v3419_v55 = vld [vmem:[#allocation11 + $0x9b8] sm:$0xff]  ;;  %v13010_v2 = vcombine.high %v3643_v11, %v3651_v10  ;;  %v14601_v10 = vpop.f32.mrf.mxu0 }
 0x6f4   :  { %10501 = vmatprep.subr.bf16.mxu1 %v12834_v53  ;;  %10542 = vmatprep.subr.bf16.mxu0 %v13106_v50  ;;  %v12785_v33 = vcombine.low %v3419_v55, %v3427_v28  ;;  %v3611_v53 = vld [vmem:[#allocation11 + $0xfb8] sm:$0xff] }
 0x6f5   :  { %10489 = vmatmul.mubr.bf16.vlgmr.msra.gmra.mxu0 %v14452_v59  ;;  %v12786_v59 = vcombine.high %v3419_v55, %v3427_v28  ;;  %v3619_v50 = vld [vmem:[#allocation11 + $0xff8] sm:$0xff] }
 0x6f6   :  { %10543 = vmatpush1.bf16.msra.mxu0 %v13105_v31  ;;  %10574 = vmatprep.mubr.bf16.mxu0 %v14472_v4  ;;  %v3683_v4 = vld [vmem:[#allocation11 + $0x11f8] sm:$0xff]  ;;  %v12994_v31 = vcombine.high %v3627_v58, %v3635_v48  ;;  %v12977_v56 = vcombine.low %v3611_v53, %v3619_v50 }
 0x6f7   :  { %10502 = vmatpush1.bf16.msra.mxu1 %v12833_v5  ;;  %10544 = vmatprep.subr.bf16.mxu0 %v13090_v15  ;;  %v13042_v23 = vcombine.high %v3675_v30, %v3683_v4  ;;  %v13041_v44 = vcombine.low %v3675_v30, %v3683_v4  ;;  %v12978_v5 = vcombine.high %v3611_v53, %v3619_v50  ;;  %v3867_v15 = vld [vmem:[#allocation11 + $0x17b8] sm:$0xff] }
 0x6f8   :  { %10503 = vmatprep.subr.bf16.mxu1 %v12818_v13  ;;  %v3595_v13 = vld [vmem:[#allocation11 + $0xf38] sm:$0xff]  ;;  %v13233_v42 = vcombine.low %v3867_v15, %v3875_v19 }
 0x6f9   :  { %v3851_v55 = vld [vmem:[#allocation11 + $0x1738] sm:$0xff]  ;;  %v12961_v24 = vcombine.low %v3595_v13, %v3603_v14 }
 0x6fa   :  { %10545 = vmatpush1.bf16.msra.mxu0 %v13089_v16  ;;  %v13234_v16 = vcombine.high %v3867_v15, %v3875_v19  ;;  %v3859_v28 = vld [vmem:[#allocation11 + $0x1778] sm:$0xff] }
 0x6fb   :  { %10504 = vmatpush1.bf16.msra.mxu1 %v12817_v22  ;;  %10546 = vmatprep.subr.bf16.mxu0 %v13074_v9  ;;  %v12962_v22 = vcombine.high %v3595_v13, %v3603_v14  ;;  %v3587_v9 = vld [vmem:[#allocation11 + $0xef8] sm:$0xff]  ;;  %v13217_v4 = vcombine.low %v3851_v55, %v3859_v28 }
 0x6fc   :  { %10505 = vmatprep.subr.bf16.mxu1 %v12802_v7  ;;  %v3579_v7 = vld [vmem:[#allocation11 + $0xeb8] sm:$0xff] }
 0x6fd   :  { %v12945_v30 = vcombine.low %v3579_v7, %v3587_v9  ;;  %v3539_v60 = vld [vmem:[#allocation11 + $0xd78] sm:$0xff] }
 0x6fe   :  { %10547 = vmatpush1.bf16.msra.mxu0 %v13073_v32  ;;  %v13218_v32 = vcombine.high %v3851_v55, %v3859_v28  ;;  %v3803_v61 = vld [vmem:[#allocation11 + $0x15b8] sm:$0xff] }
 0x6ff   :  { %10506 = vmatpush1.bf16.msra.mxu1 %v12801_v29  ;;  %10548 = vmatprep.subr.bf16.mxu0 %v13058_v25  ;;  %v12946_v29 = vcombine.high %v3579_v7, %v3587_v9  ;;  %v3571_v25 = vld [vmem:[#allocation11 + $0xe78] sm:$0xff] }
 0x700   :  { %10507 = vmatprep.subr.bf16.mxu1 %v12786_v59  ;;  %v3563_v59 = vld [vmem:[#allocation11 + $0xe38] sm:$0xff] }
 0x701   :  { %v12929_v52 = vcombine.low %v3563_v59, %v3571_v25  ;;  %v3811_v11 = vld [vmem:[#allocation11 + $0x15f8] sm:$0xff] }
 0x702   :  { %10549 = vmatpush1.bf16.msra.mxu0 %v13057_v37  ;;  %v13202_v37 = vcombine.high %v3835_v36, %v3843_v21  ;;  %v3515_v53 = vld [vmem:[#allocation11 + $0xcb8] sm:$0xff] }
 0x703   :  { %10508 = vmatpush1.bf16.msra.mxu1 %v12785_v33  ;;  %10550 = vmatprep.subr.bf16.mxu0 %v13042_v23  ;;  %v12930_v33 = vcombine.high %v3563_v59, %v3571_v25  ;;  %v3555_v23 = vld [vmem:[#allocation11 + $0xdf8] sm:$0xff] }
 0x704   :  { %10509 = vmatprep.subr.bf16.mxu1 %v12770_v43  ;;  %v3547_v43 = vld [vmem:[#allocation11 + $0xdb8] sm:$0xff] }
 0x705   :  { %v3523_v50 = vld [vmem:[#allocation11 + $0xcf8] sm:$0xff] }
 0x706   :  { %10551 = vmatpush1.bf16.msra.mxu0 %v13041_v44  ;;  %v12914_v44 = vcombine.high %v3547_v43, %v3555_v23  ;;  %v3787_v58 = vld [vmem:[#allocation11 + $0x1538] sm:$0xff]  ;;  %v12882_v13 = vcombine.high %v3515_v53, %v3523_v50 }
 0x707   :  { %10510 = vmatpush1.bf16.msra.mxu1 %v12769_v39  ;;  %10552 = vmatprep.subr.bf16.mxu0 %v13026_v57  ;;  %v13201_v39 = vcombine.low %v3835_v36, %v3843_v21  ;;  %v3531_v57 = vld [vmem:[#allocation11 + $0xd38] sm:$0xff] }
 0x708   :  { %10511 = vmatprep.subr.bf16.mxu1 %v12754_v6  ;;  %v13186_v6 = vcombine.high %v3819_v45, %v3827_v38  ;;  %v3795_v48 = vld [vmem:[#allocation11 + $0x1578] sm:$0xff] }
 0x709   :  { %v13154_v14 = vcombine.high %v3787_v58, %v3795_v48  ;;  %v3499_v15 = vld [vmem:[#allocation11 + $0xc38] sm:$0xff]  ;;  %v13153_v7 = vcombine.low %v3787_v58, %v3795_v48 }
 0x70a   :  { %10553 = vmatpush1.bf16.msra.mxu0 %v13025_v12  ;;  %v13185_v12 = vcombine.low %v3819_v45, %v3827_v38  ;;  %v3507_v19 = vld [vmem:[#allocation11 + $0xc78] sm:$0xff] }
 0x70b   :  { %10512 = vmatpush1.bf16.msra.mxu1 %v12753_v17  ;;  %10554 = vmatprep.subr.bf16.mxu0 %v13010_v2  ;;  %v12913_v17 = vcombine.low %v3547_v43, %v3555_v23  ;;  %v13170_v2 = vcombine.high %v3803_v61, %v3811_v11  ;;  %v12866_v28 = vcombine.high %v3499_v15, %v3507_v19  ;;  %v4003_v59 = vld [vmem:[#allocation11 + $0x1bf8] sm:$0xff] }
 0x70c   :  { %10513 = vmatprep.subr.bf16.mxu1 %v12738_v63  ;;  %v12898_v63 = vcombine.high %v3531_v57, %v3539_v60  ;;  %v12865_v25 = vcombine.low %v3499_v15, %v3507_v19  ;;  %v3987_v43 = vld [vmem:[#allocation11 + $0x1b78] sm:$0xff] }
 0x70e   :  { %10555 = vmatpush1.bf16.msra.mxu0 %v13009_v8  ;;  %v12897_v8 = vcombine.low %v3531_v57, %v3539_v60  ;;  %v13843_v60 = vld [vmem:[%s15030_s6 + $0x78] sm:$0xff]  }
 0x70f   :  { %10514 = vmatpush1.bf16.msra.mxu1 %v12737_v18  ;;  %10556 = vmatprep.subr.bf16.mxu0 %v12994_v31  ;;  %v10150_v18 = vpop.f32.mrf.mxu0  ;;  %v10189_v31 = vpop.f32.mrf.mxu1 }
 0x710   :  { %10515 = vmatprep.subr.bf16.mxu1 %v12978_v5  ;;  %v13169_v5 = vcombine.low %v3803_v61, %v3811_v11  ;;  %v10190_v23 = vadd.f32 %v10189_v31, %v14599_v46  ;;  %v3963_v61 = vld [vmem:[#allocation11 + $0x1ab8] sm:$0xff] }
 0x711   :  { %v10191_v9 = vpop.f32.mrf.mxu1  ;;  %v3971_v11 = vld [vmem:[#allocation11 + $0x1af8] sm:$0xff] }
 0x712   :  { %10557 = vmatpush1.bf16.msra.mxu0 %v12993_v35  ;;  %v3779_v35 = vld [vmem:[#allocation11 + $0x14f8] sm:$0xff]  ;;  %v13330_v58 = vcombine.high %v3963_v61, %v3971_v11 }
 0x713   :  { %10516 = vmatpush2.bf16.msra.mxu1 %v12977_v56  ;;  %10558 = vmatprep.subr.bf16.mxu0 %v13234_v16  ;;  %v3771_v56 = vld [vmem:[#allocation11 + $0x14b8] sm:$0xff]  ;;  %v12881_v16 = vcombine.low %v3515_v53, %v3523_v50  ;;  %v10193_v21 = vpop.f32.mrf.mxu1 }
 0x714   :  { %10517 = vmatprep.subr.bf16.mxu1 %v12962_v22  ;;  %v10152_v22 = vpop.f32.mrf.mxu0  ;;  %v13137_v36 = vcombine.low %v3771_v56, %v3779_v35  ;;  %v3947_v31 = vld [vmem:[#allocation11 + $0x1a38] sm:$0xff] }
 0x716   :  { %10559 = vmatpush2.bf16.msra.mxu0 %v13233_v42  ;;  %v10232_v55 = vpop.f32.mrf.mxu0  ;;  %v3755_v42 = vld [vmem:[#allocation11 + $0x1438] sm:$0xff] }
 0x717   :  { %10518 = vmatpush2.bf16.msra.mxu1 %v12961_v24  ;;  %10560 = vmatprep.subr.bf16.mxu0 %v13218_v32  ;;  %v13138_v24 = vcombine.high %v3771_v56, %v3779_v35  ;;  %v3995_v32 = vld [vmem:[#allocation11 + $0x1bb8] sm:$0xff]  ;;  %v10233_v57 = vadd.f32 %v10232_v55, %v10190_v23  ;;  %v13329_v56 = vcombine.low %v3963_v61, %v3971_v11  ;;  %v13855_v11 = vld [vmem:[%s15030_s6 + $0x48] sm:$0xff]  }
 0x718   :  { %10519 = vmatprep.subr.bf16.mxu1 %v12946_v29  ;;  %v3763_v29 = vld [vmem:[#allocation11 + $0x1478] sm:$0xff]  ;;  %v13361_v38 = vcombine.low %v3995_v32, %v4003_v59 }
 0x719   :  { %v13121_v45 = vcombine.low %v3755_v42, %v3763_v29  ;;  %v13846_v35 = vld [vmem:[%s15030_s6 + $0x30] sm:$0xff]  }
 0x71a   :  { %10561 = vmatpush2.bf16.msra.mxu0 %v13217_v4  ;;  %v13122_v4 = vcombine.high %v3755_v42, %v3763_v29  ;;  %v3931_v55 = vld [vmem:[#allocation11 + $0x19b8] sm:$0xff]  ;;  %v13848_v29 = vld [vmem:[%s15030_s6 + $0x28] sm:$0xff]  }
 0x71b   :  { %10520 = vmatpush2.bf16.msra.mxu1 %v12945_v30  ;;  %10562 = vmatprep.subr.bf16.mxu0 %v13202_v37  ;;  %v10234_v30 = vpop.f32.mrf.mxu0  ;;  %v3979_v37 = vld [vmem:[#allocation11 + $0x1b38] sm:$0xff] }
 0x71c   :  { %10521 = vmatprep.subr.bf16.mxu1 %v12930_v33  ;;  %v13362_v33 = vcombine.high %v3995_v32, %v4003_v59  ;;  %v13345_v46 = vcombine.low %v3979_v37, %v3987_v43  ;;  %v13849_v59 = vld [vmem:[%s15030_s6 + $0x60] sm:$0xff]   ;;  %v3907_v23 = vld [vmem:[#allocation11 + $0x18f8] sm:$0xff] }
 0x71e   :  { %10563 = vmatpush2.bf16.msra.mxu0 %v13201_v39  ;;  %v10236_v39 = vpop.f32.mrf.mxu0 }
 0x71f   :  { %10522 = vmatpush2.bf16.msra.mxu1 %v12929_v52  ;;  %10564 = vmatprep.subr.bf16.mxu0 %v13186_v6  ;;  %v10195_v52 = vpop.f32.mrf.mxu1  ;;  %v10192_v6 = vadd.f32 %v10191_v9, %v14601_v10  ;;  %v13844_v10 = vld [vmem:[%s15030_s6 + $0x38] sm:$0xff]  }
 0x720   :  { %10523 = vmatprep.subr.bf16.mxu1 %v12914_v44  ;;  %v13346_v44 = vcombine.high %v3979_v37, %v3987_v43  ;;  %v10238_v53 = vpop.f32.mrf.mxu0  ;;  %v10196_v48 = vadd.f32 %v10195_v52, %v10152_v22  ;;  %v13851_v37 = vld [vmem:[%s15030_s6 + $0x58] sm:$0xff]   ;;  %v3899_v43 = vld [vmem:[#allocation11 + $0x18b8] sm:$0xff] }
 0x721   :  { %v13266_v52 = vcombine.high %v3899_v43, %v3907_v23 }
 0x722   :  { %10565 = vmatpush2.bf16.msra.mxu0 %v13185_v12  ;;  %v10194_v12 = vadd.f32 %v10193_v21, %v10150_v18  ;;  %v13845_v18 = vld [vmem:[%s15030_s6 + $0x70] sm:$0xff]   ;;  %v10239_v15 = vadd.f32 %v10238_v53, %v10196_v48  ;;  %v13858_v48 = vld [vmem:[%s15030_s6] sm:$0xff]  }
 0x723   :  { %10524 = vmatpush2.bf16.msra.mxu1 %v12913_v17  ;;  %10566 = vmatprep.subr.bf16.mxu0 %v13170_v2  ;;  %v3923_v21 = vld [vmem:[#allocation11 + $0x1978] sm:$0xff] }
 0x724   :  { %10525 = vmatprep.subr.bf16.mxu1 %v12898_v63  ;;  %v10235_v63 = vadd.f32 %v10234_v30, %v10192_v6  ;;  %v3891_v6 = vld [vmem:[#allocation11 + $0x1878] sm:$0xff] }
 0x725   :  { %v4107_v53 = vld [vmem:[#allocation11 + $0x1f38] sm:$0xff] }
 0x726   :  { %10567 = vmatpush2.bf16.msra.mxu0 %v13169_v5 }
 0x727   :  { %10526 = vmatpush2.bf16.msra.mxu1 %v12897_v8  ;;  %10568 = vmatprep.subr.bf16.mxu0 %v13154_v14  ;;  %v10237_v8 = vadd.f32 %v10236_v39, %v10194_v12  ;;  %v13853_v39 = vld [vmem:[%s15030_s6 + $0x50] sm:$0xff]  }
 0x728   :  { %10527 = vmatprep.subr.bf16.mxu1 %v12882_v13  ;;  %v3955_v13 = vld [vmem:[#allocation11 + $0x1a78] sm:$0xff] }
 0x72a   :  { %10569 = vmatpush2.bf16.msra.mxu0 %v13153_v7 }
 0x72b   :  { %10528 = vmatpush2.bf16.msra.mxu1 %v12881_v16  ;;  %10570 = vmatprep.subr.bf16.mxu0 %v13138_v24  ;;  %v13314_v16 = vcombine.high %v3947_v31, %v3955_v13 }
 0x72c   :  { %10529 = vmatprep.subr.bf16.mxu1 %v12866_v28  ;;  %v3939_v28 = vld [vmem:[#allocation11 + $0x19f8] sm:$0xff] }
 0x72d   :  { %v13298_v32 = vcombine.high %v3931_v55, %v3939_v28  ;;  %v13297_v30 = vcombine.low %v3931_v55, %v3939_v28  ;;  %v4043_v28 = vld [vmem:[#allocation11 + $0x1d38] sm:$0xff] }
 0x72e   :  { %10571 = vmatpush2.bf16.msra.mxu0 %v13137_v36  ;;  %v3915_v36 = vld [vmem:[#allocation11 + $0x1938] sm:$0xff] }
 0x72f   :  { %10530 = vmatpush2.bf16.msra.mxu1 %v12865_v25  ;;  %10572 = vmatprep.subr.bf16.mxu0 %v13122_v4  ;;  %v13850_v4 = vld [vmem:[%s15030_s6 + $0x20] sm:$0xff]  }
 0x730   :  { %10585 = vmatprep.subr.bf16.mxu1 %v13362_v33  ;;  %v13282_v33 = vcombine.high %v3915_v36, %v3923_v21 }
 0x732   :  { %v10275_v17 = vpop.f32.mrf.mxu1  ;;  %10532 = vmatmul.mubr.bf16.vlgmr.msra.gmra.mxu1 %v14461_v0  ;;  %10573 = vmatpush2.bf16.msra.mxu0 %v13121_v45  ;;  %v13281_v45 = vcombine.low %v3915_v36, %v3923_v21  ;;  %v4027_v36 = vld [vmem:[#allocation11 + $0x1cb8] sm:$0xff] }
 0x733   :  { %v10276_v2 = vadd.f32 %v10275_v17, %v10233_v57  ;;  %10586 = vmatpush1.bf16.msra.mxu1 %v13361_v38  ;;  %10617 = vmatprep.mubr.bf16.mxu1 %v14477_v51  ;;  %v13852_v38 = vld [vmem:[%s15030_s6 + $0x18] sm:$0xff]   ;;  %v13265_v57 = vcombine.low %v3899_v43, %v3907_v23  ;;  %v4123_v17 = vld [vmem:[#allocation11 + $0x1fb8] sm:$0xff] }
 0x734   :  { %v10277_v50 = vpop.f32.mrf.mxu1  ;;  %10587 = vmatprep.subr.bf16.mxu1 %v13346_v44  ;;  %13624 = vmatprep.subr.bf16.mxu0 %v13843_v60  ;;  %v3883_v44 = vld [vmem:[#allocation11 + $0x1838] sm:$0xff] }
 0x735   :  { %v10638_v5 = vmax.f32 %v10276_v2, 0.0  ;;  %v10278_v0 = vadd.f32 %v10277_v50, %v10235_v63  ;;  %10575 = vmatmul.mubr.bf16.vlgmr.msra.gmra.mxu0 %v14470_v40  ;;  %v13847_v40 = vld [vmem:[%s15030_s6 + $0x68] sm:$0xff]   ;;  %v13854_v60 = vld [vmem:[%s15030_s6 + $0x10] sm:$0xff]   ;;  %v13250_v61 = vcombine.high %v3883_v44, %v3891_v6  ;;  %v13249_v12 = vcombine.low %v3883_v44, %v3891_v6 }
 0x736   :  { %v10279_v14 = vpop.f32.mrf.mxu1  ;;  %13625 = vmatpush3.bf16.msra.mxu0 %v13844_v10  ;;  %11771 = vmatprep.mubr.bf16.mxu0 %v14509_v49  ;;  %v13313_v49 = vcombine.low %v3947_v31, %v3955_v13  ;;  %v13856_v63 = vld [vmem:[%s15030_s6 + $0x8] sm:$0xff]   ;;  %v13857_v10 = vld [vmem:[%s15030_s6 + $0x40] sm:$0xff]   ;;  %v4115_v50 = vld [vmem:[#allocation11 + $0x1f78] sm:$0xff] }
 0x737   :  { %10670 = vst [vmem:[#allocation14 + $0x50] sm:$0xff] %v10638_v5  ;;  %v10639_v51 = vmax.f32 %v10278_v0, 0.0  ;;  %v10280_v19 = vadd.f32 %v10279_v14, %v10237_v8  ;;  %10588 = vmatpush1.bf16.msra.mxu1 %v13345_v46  ;;  %13626 = vmatprep.subr.bf16.mxu0 %v13845_v18  ;;  %v4131_v46 = vld [vmem:[#allocation11 + $0x1ff8] sm:$0xff]  ;;  %v13474_v8 = vcombine.high %v4107_v53, %v4115_v50  ;;  %v13860_v13 = vld [vmem:[%s15030_s6 + $0x138] sm:$0xff]   ;;  %v13872_v6 = vld [vmem:[%s15030_s6 + $0x108] sm:$0xff]  }
 0x738   :  { %v10281_v22 = vpop.f32.mrf.mxu1  ;;  %10589 = vmatprep.subr.bf16.mxu1 %v13330_v58  ;;  %v13490_v2 = vcombine.high %v4123_v17, %v4131_v46  ;;  %v13489_v58 = vcombine.low %v4123_v17, %v4131_v46  ;;  %v4091_v0 = vld [vmem:[#allocation11 + $0x1eb8] sm:$0xff]  ;;  %v13473_v31 = vcombine.low %v4107_v53, %v4115_v50  ;;  %v13878_v46 = vld [vmem:[%s15030_s6 + $0x278] sm:$0xff]   ;;  %v13885_v53 = vld [vmem:[%s15030_s6 + $0xe0] sm:$0xff]  }
 0x739   :  { %10671 = vst [vmem:[#allocation14 + $0x58] sm:$0xff] %v10639_v51  ;;  %v10654_v7 = vmax.f32 %v10280_v19, 0.0  ;;  %v10282_v9 = vadd.f32 %v10281_v22, %v10239_v15  ;;  %v4099_v18 = vld [vmem:[#allocation11 + $0x1ef8] sm:$0xff]  ;;  %v13887_v50 = vld [vmem:[%s15030_s6 + $0xa0] sm:$0xff]  }
 0x73a   :  { %13627 = vmatpush3.bf16.msra.mxu0 %v13846_v35  ;;  %v13458_v14 = vcombine.high %v4091_v0, %v4099_v18  ;;  %v13861_v15 = vld [vmem:[%s15030_s6 + $0x170] sm:$0xff]  }
 0x73b   :  { %10686 = vst [vmem:[#allocation14 + $0xd0] sm:$0xff] %v10654_v7  ;;  %v14624_v24 = vpack.c.bf16 %v10654_v7, %v10638_v5  ;;  %v10655_v42 = vmax.f32 %v10282_v9, 0.0  ;;  %10590 = vmatpush1.bf16.msra.mxu1 %v13329_v56  ;;  %13628 = vmatprep.subr.bf16.mxu0 %v13847_v40  ;;  %v13859_v5 = vld [vmem:[%s15030_s6 + $0x178] sm:$0xff]   ;;  %v4083_v19 = vld [vmem:[#allocation11 + $0x1e78] sm:$0xff]  ;;  %v13457_v56 = vcombine.low %v4091_v0, %v4099_v18  ;;  %v13864_v9 = vld [vmem:[%s15030_s6 + $0x128] sm:$0xff]  }
 0x73c   :  { %10591 = vmatprep.subr.bf16.mxu1 %v13314_v16  ;;  %v13862_v35 = vld [vmem:[%s15030_s6 + $0x130] sm:$0xff]   ;;  %v13863_v16 = vld [vmem:[%s15030_s6 + $0x168] sm:$0xff]   ;;  %v13894_v18 = vld [vmem:[%s15030_s6 + $0x258] sm:$0xff]  }
 0x73d   :  { %10687 = vst [vmem:[#allocation14 + $0xd8] sm:$0xff] %v10655_v42  ;;  %v14632_v25 = vpack.c.bf16 %v10655_v42, %v10639_v51  ;;  %v4075_v51 = vld [vmem:[#allocation11 + $0x1e38] sm:$0xff] }
 0x73e   :  { %13629 = vmatpush3.bf16.msra.mxu0 %v13848_v29  ;;  %v13442_v22 = vcombine.high %v4075_v51, %v4083_v19  ;;  %v4059_v40 = vld [vmem:[#allocation11 + $0x1db8] sm:$0xff]  ;;  %v13866_v29 = vld [vmem:[%s15030_s6 + $0x120] sm:$0xff]  }
 0x73f   :  { %10592 = vmatpush1.bf16.msra.mxu1 %v13313_v49  ;;  %13630 = vmatprep.subr.bf16.mxu0 %v13849_v59  ;;  %v4067_v7 = vld [vmem:[#allocation11 + $0x1df8] sm:$0xff]  ;;  %v13867_v59 = vld [vmem:[%s15030_s6 + $0x158] sm:$0xff]  }
 0x740   :  { %10593 = vmatprep.subr.bf16.mxu1 %v13298_v32  ;;  %v13426_v55 = vcombine.high %v4059_v40, %v4067_v7  ;;  %v4051_v42 = vld [vmem:[#allocation11 + $0x1d78] sm:$0xff]  ;;  %v13425_v49 = vcombine.low %v4059_v40, %v4067_v7  ;;  %v13905_v40 = vld [vmem:[%s15030_s6 + $0x1f8] sm:$0xff]   ;;  %v13906_v7 = vld [vmem:[%s15030_s6 + $0x240] sm:$0xff]  }
 0x741   :  { %v13410_v32 = vcombine.high %v4043_v28, %v4051_v42  ;;  %v4035_v21 = vld [vmem:[#allocation11 + $0x1cf8] sm:$0xff] }
 0x742   :  { %13631 = vmatpush3.bf16.msra.mxu0 %v13850_v4  ;;  %v13868_v4 = vld [vmem:[%s15030_s6 + $0x118] sm:$0xff]   ;;  %v4011_v43 = vld [vmem:[#allocation11 + $0x1c38] sm:$0xff] }
 0x743   :  { %10594 = vmatpush1.bf16.msra.mxu1 %v13297_v30  ;;  %13632 = vmatprep.subr.bf16.mxu0 %v13851_v37  ;;  %v13409_v30 = vcombine.low %v4043_v28, %v4051_v42  ;;  %v13869_v37 = vld [vmem:[%s15030_s6 + $0x150] sm:$0xff]   ;;  %v13911_v42 = vld [vmem:[%s15030_s6 + $0x1e8] sm:$0xff]  }
 0x744   :  { %10595 = vmatprep.subr.bf16.mxu1 %v13282_v33  ;;  %v13394_v33 = vcombine.high %v4027_v36, %v4035_v21  ;;  %v4019_v23 = vld [vmem:[#allocation11 + $0x1c78] sm:$0xff] }
 0x745   :  { %v13377_v44 = vcombine.low %v4011_v43, %v4019_v23  ;;  %v13877_v17 = vld [vmem:[%s15030_s6 + $0xf0] sm:$0xff]  }
 0x746   :  { %13633 = vmatpush3.bf16.msra.mxu0 %v13852_v38  ;;  %v13870_v38 = vld [vmem:[%s15030_s6 + $0x110] sm:$0xff]  }
 0x747   :  { %10596 = vmatpush1.bf16.msra.mxu1 %v13281_v45  ;;  %13634 = vmatprep.subr.bf16.mxu0 %v13853_v39  ;;  %v13393_v45 = vcombine.low %v4027_v36, %v4035_v21  ;;  %v13871_v39 = vld [vmem:[%s15030_s6 + $0x148] sm:$0xff]   ;;  %v13893_v0 = vld [vmem:[%s15030_s6 + $0xd0] sm:$0xff]   ;;  %v13914_v36 = vld [vmem:[%s15030_s6 + $0x1a0] sm:$0xff]  }
 0x748   :  { %10597 = vmatprep.subr.bf16.mxu1 %v13266_v52  ;;  %v13378_v52 = vcombine.high %v4011_v43, %v4019_v23  ;;  %v13910_v28 = vld [vmem:[%s15030_s6 + $0x1b0] sm:$0xff]   ;;  %v13917_v21 = vld [vmem:[%s15030_s6 + $0x1d8] sm:$0xff]   ;;  %v13928_v23 = vld [vmem:[%s15030_s6 + $0x320] sm:$0xff]  }
 0x749   :  { %v13921_v43 = vld [vmem:[%s15030_s6 + $0x1d0] sm:$0xff]  }
 0x74a   :  { %13635 = vmatpush3.bf16.msra.mxu0 %v13854_v60  ;;  %v13874_v60 = vld [vmem:[%s15030_s6 + $0x140] sm:$0xff]  }
 0x74b   :  { %10598 = vmatpush1.bf16.msra.mxu1 %v13265_v57  ;;  %13636 = vmatprep.subr.bf16.mxu0 %v13855_v11  ;;  %v13873_v57 = vld [vmem:[%s15030_s6 + $0xf8] sm:$0xff]   ;;  %v13876_v11 = vld [vmem:[%s15030_s6 + $0x100] sm:$0xff]  }
 0x74c   :  { %10599 = vmatprep.subr.bf16.mxu1 %v13250_v61  ;;  %v13875_v61 = vld [vmem:[%s15030_s6 + $0xb8] sm:$0xff]  }
 0x74e   :  { %13637 = vmatpush3.bf16.msra.mxu0 %v13856_v63  ;;  %v13880_v63 = vld [vmem:[%s15030_s6 + $0x238] sm:$0xff]  }
 0x74f   :  { %10600 = vmatpush1.bf16.msra.mxu1 %v13249_v12  ;;  %13638 = vmatprep.subr.bf16.mxu0 %v13857_v10  ;;  %v13879_v12 = vld [vmem:[%s15030_s6 + $0xb0] sm:$0xff]  }
 0x750   :  { %10601 = vmatprep.subr.bf16.mxu1 %v13490_v2  ;;  %v13881_v2 = vld [vmem:[%s15030_s6 + $0xe8] sm:$0xff]   ;;  %v13884_v10 = vld [vmem:[%s15030_s6 + $0x230] sm:$0xff]  }
 0x752   :  { %13639 = vmatpush3.bf16.msra.mxu0 %v13858_v48  ;;  %v13890_v48 = vld [vmem:[%s15030_s6 + $0x260] sm:$0xff]  }
 0x753   :  { %10602 = vmatpush2.bf16.msra.mxu1 %v13489_v58  ;;  %13668 = vmatprep.subr.bf16.mxu0 %v13859_v5  ;;  %v13889_v58 = vld [vmem:[%s15030_s6 + $0xd8] sm:$0xff]   ;;  %v13892_v5 = vld [vmem:[%s15030_s6 + $0x220] sm:$0xff]  }
 0x754   :  { %10603 = vmatprep.subr.bf16.mxu1 %v13474_v8  ;;  %v13891_v8 = vld [vmem:[%s15030_s6 + $0x98] sm:$0xff]  }
 0x755   :  { %11772 = vmatmul.mubr.bf16.vlgmr.msra.gmra.mxu0 %v14507_v1  ;;  %v13441_v1 = vcombine.low %v4075_v51, %v4083_v19  ;;  %v13899_v51 = vld [vmem:[%s15030_s6 + $0x88] sm:$0xff]   ;;  %v13900_v19 = vld [vmem:[%s15030_s6 + $0x210] sm:$0xff]  }
 0x756   :  { %13669 = vmatpush3.bf16.msra.mxu0 %v13860_v13  ;;  %11853 = vmatprep.mubr.bf16.mxu0 %v14551_v20  ;;  %v13865_v20 = vld [vmem:[%s15030_s6 + $0x160] sm:$0xff]   ;;  %v13896_v13 = vld [vmem:[%s15030_s6 + $0x218] sm:$0xff]  }
 0x757   :  { %10604 = vmatpush2.bf16.msra.mxu1 %v13473_v31  ;;  %13670 = vmatprep.subr.bf16.mxu0 %v13861_v15  ;;  %v13895_v31 = vld [vmem:[%s15030_s6 + $0x90] sm:$0xff]  }
 0x758   :  { %10605 = vmatprep.subr.bf16.mxu1 %v13458_v14  ;;  %v13897_v14 = vld [vmem:[%s15030_s6 + $0xc8] sm:$0xff]   ;;  %v13898_v15 = vld [vmem:[%s15030_s6 + $0x250] sm:$0xff]  }
 0x75a   :  { %13671 = vmatpush3.bf16.msra.mxu0 %v13862_v35  ;;  %v13902_v35 = vld [vmem:[%s15030_s6 + $0x248] sm:$0xff]  }
 0x75b   :  { %10606 = vmatpush2.bf16.msra.mxu1 %v13457_v56  ;;  %13672 = vmatprep.subr.bf16.mxu0 %v13863_v16  ;;  %v13901_v56 = vld [vmem:[%s15030_s6 + $0xc0] sm:$0xff]   ;;  %v13904_v16 = vld [vmem:[%s15030_s6 + $0x208] sm:$0xff]  }
 0x75c   :  { %10607 = vmatprep.subr.bf16.mxu1 %v13442_v22  ;;  %v13903_v22 = vld [vmem:[%s15030_s6 + $0x80] sm:$0xff]  }
 0x75e   :  { %13673 = vmatpush3.bf16.msra.mxu0 %v13864_v9  ;;  %v13908_v9 = vld [vmem:[%s15030_s6 + $0x200] sm:$0xff]  }
 0x75f   :  { %10608 = vmatpush2.bf16.msra.mxu1 %v13441_v1  ;;  %13674 = vmatprep.subr.bf16.mxu0 %v13865_v20  ;;  %v13907_v1 = vld [vmem:[%s15030_s6 + $0x1b8] sm:$0xff]  }
 0x760   :  { %10609 = vmatprep.subr.bf16.mxu1 %v13426_v55  ;;  %v13909_v55 = vld [vmem:[%s15030_s6 + $0x1f0] sm:$0xff]   ;;  %v13915_v20 = vld [vmem:[%s15030_s6 + $0x378] sm:$0xff]  }
 0x762   :  { %13675 = vmatpush3.bf16.msra.mxu0 %v13866_v29  ;;  %v13913_v29 = vld [vmem:[%s15030_s6 + $0x1e0] sm:$0xff]  }
 0x763   :  { %10610 = vmatpush2.bf16.msra.mxu1 %v13425_v49  ;;  %13676 = vmatprep.subr.bf16.mxu0 %v13867_v59  ;;  %v13916_v49 = vld [vmem:[%s15030_s6 + $0x338] sm:$0xff]   ;;  %v10318_v59 = vpop.f32.mrf.mxu0 }
 0x764   :  { %10611 = vmatprep.subr.bf16.mxu1 %v13410_v32  ;;  %v13920_v32 = vld [vmem:[%s15030_s6 + $0x330] sm:$0xff]  }
 0x766   :  { %13677 = vmatpush3.bf16.msra.mxu0 %v13868_v4  ;;  %v13927_v4 = vld [vmem:[%s15030_s6 + $0x360] sm:$0xff]  }
 0x767   :  { %10612 = vmatpush2.bf16.msra.mxu1 %v13409_v30  ;;  %13678 = vmatprep.subr.bf16.mxu0 %v13869_v37  ;;  %v13924_v30 = vld [vmem:[%s15030_s6 + $0x328] sm:$0xff]   ;;  %v13918_v37 = vld [vmem:[%s15030_s6 + $0x198] sm:$0xff]  }
 0x768   :  { %10613 = vmatprep.subr.bf16.mxu1 %v13394_v33  ;;  %v10320_v33 = vpop.f32.mrf.mxu0 }
 0x76a   :  { %13679 = vmatpush3.bf16.msra.mxu0 %v13870_v38  ;;  %v10322_v38 = vpop.f32.mrf.mxu0 }
 0x76b   :  { %10614 = vmatpush2.bf16.msra.mxu1 %v13393_v45  ;;  %13680 = vmatprep.subr.bf16.mxu0 %v13871_v39  ;;  %v13931_v45 = vld [vmem:[%s15030_s6 + $0x358] sm:$0xff]  }
 0x76c   :  { %10615 = vmatprep.subr.bf16.mxu1 %v13378_v52  ;;  %v13922_v52 = vld [vmem:[%s15030_s6 + $0x190] sm:$0xff]  }
 0x76e   :  { %13681 = vmatpush3.bf16.msra.mxu0 %v13872_v6  ;;  %v13932_v6 = vld [vmem:[%s15030_s6 + $0x318] sm:$0xff]  }
 0x76f   :  { %10616 = vmatpush2.bf16.msra.mxu1 %v13377_v44  ;;  %13682 = vmatprep.subr.bf16.mxu0 %v13874_v60  ;;  %v13925_v44 = vld [vmem:[%s15030_s6 + $0x1c8] sm:$0xff]   ;;  %v10324_v60 = vpop.f32.mrf.mxu0 }
 0x770   :  { %13646 = vmatprep.subr.bf16.mxu1 %v13873_v57  ;;  %v13935_v57 = vld [vmem:[%s15030_s6 + $0x350] sm:$0xff]  }
 0x772   :  { %10618 = vmatmul.mubr.bf16.vlgmr.msra.gmra.mxu1 %v14479_v26  ;;  %13683 = vmatpush3.bf16.msra.mxu0 %v13876_v11  ;;  %v13882_v26 = vld [vmem:[%s15030_s6 + $0x270] sm:$0xff]   ;;  %v10361_v39 = vpop.f32.mrf.mxu1 }
 0x773   :  { %13647 = vmatpush3.bf16.msra.mxu1 %v13875_v61  ;;  %11812 = vmatprep.mubr.bf16.mxu1 %v14530_v27  ;;  %v13883_v27 = vld [vmem:[%s15030_s6 + $0xa8] sm:$0xff]  }
 0x774   :  { %13648 = vmatprep.subr.bf16.mxu1 %v13877_v17  ;;  %13712 = vmatprep.subr.bf16.mxu0 %v13878_v46  ;;  %v13926_v61 = vld [vmem:[%s15030_s6 + $0x188] sm:$0xff]   ;;  %v10363_v11 = vpop.f32.mrf.mxu1  ;;  %v13929_v46 = vld [vmem:[%s15030_s6 + $0x1c0] sm:$0xff]  }
 0x775   :  { %11854 = vmatmul.mubr.bf16.vlgmr.msra.gmra.mxu0 %v14549_v62  ;;  %v13886_v62 = vld [vmem:[%s15030_s6 + $0x268] sm:$0xff]   ;;  %v10404_v17 = vpop.f32.mrf.mxu0 }
 0x776   :  { %13713 = vmatpush3.bf16.msra.mxu0 %v13880_v63  ;;  %11935 = vmatprep.mubr.bf16.mxu0 %v14593_v3  ;;  %v13888_v3 = vld [vmem:[%s15030_s6 + $0x228] sm:$0xff]  }
 0x777   :  { %13649 = vmatpush3.bf16.msra.mxu1 %v13879_v12  ;;  %13714 = vmatprep.subr.bf16.mxu0 %v13882_v26  ;;  %v13936_v12 = vld [vmem:[%s15030_s6 + $0x310] sm:$0xff]   ;;  %v13939_v63 = vld [vmem:[%s15030_s6 + $0x348] sm:$0xff]   ;;  %v10365_v26 = vpop.f32.mrf.mxu1 }
 0x778   :  { %13650 = vmatprep.subr.bf16.mxu1 %v13881_v2  ;;  %v13930_v2 = vld [vmem:[%s15030_s6 + $0x180] sm:$0xff]  }
 0x77a   :  { %13715 = vmatpush3.bf16.msra.mxu0 %v13884_v10  ;;  %v13933_v10 = vld [vmem:[%s15030_s6 + $0x2f8] sm:$0xff]  }
 0x77b   :  { %13651 = vmatpush3.bf16.msra.mxu1 %v13883_v27  ;;  %13716 = vmatprep.subr.bf16.mxu0 %v13886_v62  ;;  %v10406_v27 = vpop.f32.mrf.mxu0  ;;  %v13943_v62 = vld [vmem:[%s15030_s6 + $0x340] sm:$0xff]  }
 0x77c   :  { %13652 = vmatprep.subr.bf16.mxu1 %v13885_v53  ;;  %v13940_v53 = vld [vmem:[%s15030_s6 + $0x308] sm:$0xff]  }
 0x77e   :  { %13717 = vmatpush3.bf16.msra.mxu0 %v13888_v3  ;;  %v13934_v3 = vld [vmem:[%s15030_s6 + $0x2b8] sm:$0xff]  }
 0x77f   :  { %13653 = vmatpush3.bf16.msra.mxu1 %v13887_v50  ;;  %13718 = vmatprep.subr.bf16.mxu0 %v13890_v48  ;;  %v10362_v50 = vadd.f32 %v10361_v39, %v10318_v59  ;;  %v10408_v48 = vpop.f32.mrf.mxu0  ;;  %v13948_v59 = vld [vmem:[%s15030_s6 + $0x298] sm:$0xff]   ;;  %v13960_v39 = vld [vmem:[%s15030_s6 + $0x3a8] sm:$0xff]  }
 0x780   :  { %13654 = vmatprep.subr.bf16.mxu1 %v13889_v58  ;;  %v10367_v58 = vpop.f32.mrf.mxu1 }
 0x782   :  { %13719 = vmatpush3.bf16.msra.mxu0 %v13892_v5  ;;  %v13944_v5 = vld [vmem:[%s15030_s6 + $0x300] sm:$0xff]  }
 0x783   :  { %13655 = vmatpush3.bf16.msra.mxu1 %v13891_v8  ;;  %13720 = vmatprep.subr.bf16.mxu0 %v13894_v18  ;;  %v13937_v8 = vld [vmem:[%s15030_s6 + $0x2f0] sm:$0xff]   ;;  %v10405_v18 = vadd.f32 %v10404_v17, %v10362_v50  ;;  %v13968_v17 = vld [vmem:[%s15030_s6 + $0x388] sm:$0xff]  }
 0x784   :  { %13656 = vmatprep.subr.bf16.mxu1 %v13893_v0  ;;  %v10364_v0 = vadd.f32 %v10363_v11, %v10320_v33  ;;  %v13953_v33 = vld [vmem:[%s15030_s6 + $0x2c0] sm:$0xff]   ;;  %v13967_v11 = vld [vmem:[%s15030_s6 + $0x3c8] sm:$0xff]  }
 0x786   :  { %13721 = vmatpush3.bf16.msra.mxu0 %v13896_v13  ;;  %v10366_v13 = vadd.f32 %v10365_v26, %v10322_v38  ;;  %v13958_v38 = vld [vmem:[%s15030_s6 + $0x3b0] sm:$0xff]  }
 0x787   :  { %13657 = vmatpush3.bf16.msra.mxu1 %v13895_v31  ;;  %13722 = vmatprep.subr.bf16.mxu0 %v13898_v15 }
 0x788   :  { %13658 = vmatprep.subr.bf16.mxu1 %v13897_v14  ;;  %v10407_v14 = vadd.f32 %v10406_v27, %v10364_v0 }
 0x78a   :  { %13723 = vmatpush3.bf16.msra.mxu0 %v13900_v19  ;;  %v10410_v19 = vpop.f32.mrf.mxu0 }
 0x78b   :  { %13659 = vmatpush3.bf16.msra.mxu1 %v13899_v51  ;;  %13724 = vmatprep.subr.bf16.mxu0 %v13902_v35  ;;  %v13938_v51 = vld [vmem:[%s15030_s6 + $0x2b0] sm:$0xff]   ;;  %v13941_v35 = vld [vmem:[%s15030_s6 + $0x2e8] sm:$0xff]  }
 0x78c   :  { %13660 = vmatprep.subr.bf16.mxu1 %v13901_v56 }
 0x78e   :  { %13725 = vmatpush3.bf16.msra.mxu0 %v13904_v16 }
 0x78f   :  { %13661 = vmatpush3.bf16.msra.mxu1 %v13903_v22  ;;  %13726 = vmatprep.subr.bf16.mxu0 %v13906_v7  ;;  %v10368_v22 = vadd.f32 %v10367_v58, %v10324_v60  ;;  %v13965_v60 = vld [vmem:[%s15030_s6 + $0x3d0] sm:$0xff]  }
 0x790   :  { %13690 = vmatprep.subr.bf16.mxu1 %v13905_v40 }
 0x792   :  { %11813 = vmatmul.mubr.bf16.vlgmr.msra.gmra.mxu1 %v14528_v34  ;;  %13727 = vmatpush3.bf16.msra.mxu0 %v13908_v9  ;;  %v13919_v34 = vld [vmem:[%s15030_s6 + $0x370] sm:$0xff]  }
 0x793   :  { %13691 = vmatpush3.bf16.msra.mxu1 %v13907_v1  ;;  %11894 = vmatprep.mubr.bf16.mxu1 %v14572_v54  ;;  %v13912_v54 = vld [vmem:[%s15030_s6 + $0x1a8] sm:$0xff]   ;;  %v10411_v1 = vadd.f32 %v10410_v19, %v10368_v22 }
 0x794   :  { %13692 = vmatprep.subr.bf16.mxu1 %v13909_v55  ;;  %13756 = vmatprep.subr.bf16.mxu0 %v13915_v20  ;;  %v13942_v55 = vld [vmem:[%s15030_s6 + $0x2a8] sm:$0xff]  }
 0x795   :  { %11936 = vmatmul.mubr.bf16.vlgmr.msra.gmra.mxu0 %v14591_v47  ;;  %v13923_v47 = vld [vmem:[%s15030_s6 + $0x368] sm:$0xff]  }
 0x796   :  { %13757 = vmatpush3.bf16.msra.mxu0 %v13916_v49 }
 0x797   :  { %13693 = vmatpush3.bf16.msra.mxu1 %v13910_v28  ;;  %13758 = vmatprep.subr.bf16.mxu0 %v13919_v34  ;;  %v13945_v28 = vld [vmem:[%s15030_s6 + $0x2e0] sm:$0xff]  }
 0x798   :  { %13694 = vmatprep.subr.bf16.mxu1 %v13911_v42 }
 0x79a   :  { %13759 = vmatpush3.bf16.msra.mxu0 %v13920_v32 }
 0x79b   :  { %13695 = vmatpush3.bf16.msra.mxu1 %v13912_v54  ;;  %13760 = vmatprep.subr.bf16.mxu0 %v13923_v47  ;;  %v13946_v54 = vld [vmem:[%s15030_s6 + $0x2a0] sm:$0xff]  }
 0x79c   :  { %13696 = vmatprep.subr.bf16.mxu1 %v13913_v29  ;;  %v13947_v29 = vld [vmem:[%s15030_s6 + $0x2d8] sm:$0xff]  }
 0x79e   :  { %13761 = vmatpush3.bf16.msra.mxu0 %v13924_v30  ;;  %v13951_v30 = vld [vmem:[%s15030_s6 + $0x2c8] sm:$0xff]  }
 0x79f   :  { %13697 = vmatpush3.bf16.msra.mxu1 %v13914_v36  ;;  %13762 = vmatprep.subr.bf16.mxu0 %v13927_v4  ;;  %v13949_v36 = vld [vmem:[%s15030_s6 + $0x2d0] sm:$0xff]   ;;  %v13952_v4 = vld [vmem:[%s15030_s6 + $0x288] sm:$0xff]  }
 0x7a0   :  { %13698 = vmatprep.subr.bf16.mxu1 %v13917_v21  ;;  %v13950_v21 = vld [vmem:[%s15030_s6 + $0x290] sm:$0xff]  }
 0x7a2   :  { %13763 = vmatpush3.bf16.msra.mxu0 %v13928_v23  ;;  %v13956_v23 = vld [vmem:[%s15030_s6 + $0x3b8] sm:$0xff]  }
 0x7a3   :  { %13699 = vmatpush3.bf16.msra.mxu1 %v13918_v37  ;;  %13764 = vmatprep.subr.bf16.mxu0 %v13931_v45  ;;  %v13954_v37 = vld [vmem:[%s15030_s6 + $0x280] sm:$0xff]   ;;  %v13957_v45 = vld [vmem:[%s15030_s6 + $0x3f0] sm:$0xff]  }
 0x7a4   :  { %13700 = vmatprep.subr.bf16.mxu1 %v13921_v43  ;;  %v13955_v43 = vld [vmem:[%s15030_s6 + $0x3f8] sm:$0xff]  }
 0x7a6   :  { %13765 = vmatpush3.bf16.msra.mxu0 %v13932_v6  ;;  %v13963_v6 = vld [vmem:[%s15030_s6 + $0x3d8] sm:$0xff]  }
 0x7a7   :  { %13701 = vmatpush3.bf16.msra.mxu1 %v13922_v52  ;;  %13766 = vmatprep.subr.bf16.mxu0 %v13935_v57  ;;  %v13959_v52 = vld [vmem:[%s15030_s6 + $0x3e8] sm:$0xff]   ;;  %v13964_v57 = vld [vmem:[%s15030_s6 + $0x398] sm:$0xff]  }
 0x7a8   :  { %13702 = vmatprep.subr.bf16.mxu1 %v13925_v44  ;;  %v13962_v44 = vld [vmem:[%s15030_s6 + $0x3a0] sm:$0xff]  }
 0x7aa   :  { %13767 = vmatpush3.bf16.msra.mxu0 %v13936_v12  ;;  %v13970_v12 = vld [vmem:[%s15030_s6 + $0x380] sm:$0xff]  }
 0x7ab   :  { %13703 = vmatpush3.bf16.msra.mxu1 %v13926_v61  ;;  %13768 = vmatprep.subr.bf16.mxu0 %v13939_v63  ;;  %v13966_v61 = vld [vmem:[%s15030_s6 + $0x390] sm:$0xff]  }
 0x7ac   :  { %13704 = vmatprep.subr.bf16.mxu1 %v13929_v46  ;;  %v13969_v46 = vld [vmem:[%s15030_s6 + $0x3c0] sm:$0xff]  }
 0x7ae   :  { %13769 = vmatpush3.bf16.msra.mxu0 %v13940_v53 }
 0x7af   :  { %13705 = vmatpush3.bf16.msra.mxu1 %v13930_v2  ;;  %13770 = vmatprep.subr.bf16.mxu0 %v13943_v62 }
 0x7b0   :  { %13734 = vmatprep.subr.bf16.mxu1 %v13933_v10 }
 0x7b2   :  { %v10447_v31 = vpop.f32.mrf.mxu1  ;;  %11895 = vmatmul.mubr.bf16.vlgmr.msra.gmra.mxu1 %v14570_v41  ;;  %13771 = vmatpush3.bf16.msra.mxu0 %v13944_v5  ;;  %v10409_v41 = vadd.f32 %v10408_v48, %v10366_v13 }
 0x7b3   :  { %v10448_v15 = vadd.f32 %v10447_v31, %v10405_v18  ;;  %13735 = vmatpush3.bf16.msra.mxu1 %v13934_v3  ;;  %11976 = vmatprep.mubr.bf16.mxu1 %v14632_v25 }
 0x7b4   :  { %v10449_v56 = vpop.f32.mrf.mxu1  ;;  %13736 = vmatprep.subr.bf16.mxu1 %v13937_v8 }
 0x7b5   :  { %v10640_v16 = vmax.f32 %v10448_v15, 0.0  ;;  %v10450_v40 = vadd.f32 %v10449_v56, %v10407_v14  ;;  %v10490_v63 = vpop.f32.mrf.mxu0 }
 0x7b6   :  { %v10451_v7 = vpop.f32.mrf.mxu1 }
 0x7b7   :  { %10672 = vst [vmem:[#allocation14 + $0x60] sm:$0xff] %v10640_v16  ;;  %v10641_v25 = vmax.f32 %v10450_v40, 0.0  ;;  %v10452_v9 = vadd.f32 %v10451_v7, %v10409_v41  ;;  %13737 = vmatpush3.bf16.msra.mxu1 %v13938_v51  ;;  %v10492_v2 = vpop.f32.mrf.mxu0 }
 0x7b8   :  { %v10453_v20 = vpop.f32.mrf.mxu1  ;;  %13738 = vmatprep.subr.bf16.mxu1 %v13941_v35 }
 0x7b9   :  { %10673 = vst [vmem:[#allocation14 + $0x68] sm:$0xff] %v10641_v25  ;;  %v10656_v42 = vmax.f32 %v10452_v9, 0.0  ;;  %v10454_v49 = vadd.f32 %v10453_v20, %v10411_v1  ;;  %v10494_v26 = vpop.f32.mrf.mxu0 }
 0x7bb   :  { %10688 = vst [vmem:[#allocation14 + $0xe0] sm:$0xff] %v10656_v42  ;;  %v10657_v34 = vmax.f32 %v10454_v49, 0.0  ;;  %13739 = vmatpush3.bf16.msra.mxu1 %v13942_v55  ;;  %v10704_v47 = vpack.c.bf16 %v10656_v42, %v10640_v16  ;;  %v10496_v10 = vpop.f32.mrf.mxu0 }
 0x7bc   :  { %13740 = vmatprep.subr.bf16.mxu1 %v13945_v28 }
 0x7bd   :  { %10689 = vst [vmem:[#allocation14 + $0xe8] sm:$0xff] %v10657_v34  ;;  %v10705_v32 = vpack.c.bf16 %v10657_v34, %v10641_v25 }
 0x7bf   :  { %13741 = vmatpush3.bf16.msra.mxu1 %v13946_v54  ;;  %12017 = vmatprep.mubr.bf16.mxu0 %v10705_v32 }
 0x7c0   :  { %12018 = vmatmul.mubr.bf16.vlgmr.msra.gmra.mxu0 %v10704_v47  ;;  %13742 = vmatprep.subr.bf16.mxu1 %v13947_v29 }
 0x7c3   :  { %13743 = vmatpush3.bf16.msra.mxu1 %v13948_v59 }
 0x7c4   :  { %13744 = vmatprep.subr.bf16.mxu1 %v13949_v36 }
 0x7c7   :  { %13745 = vmatpush3.bf16.msra.mxu1 %v13950_v21 }
 0x7c8   :  { %13746 = vmatprep.subr.bf16.mxu1 %v13951_v30 }
 0x7cb   :  { %13747 = vmatpush3.bf16.msra.mxu1 %v13952_v4 }
 0x7cc   :  { %13748 = vmatprep.subr.bf16.mxu1 %v13953_v33 }
 0x7cf   :  { %13749 = vmatpush3.bf16.msra.mxu1 %v13954_v37 }
 0x7d0   :  { %13778 = vmatprep.subr.bf16.mxu1 %v13955_v43 }
 0x7d2   :  { %11977 = vmatmul.mubr.bf16.vlgmr.msra.gmra.mxu1 %v14624_v24  ;;  %v13961_v24 = vld [vmem:[%s15030_s6 + $0x3e0] sm:$0xff]   ;;  %s14189_s6 = smov [#allocation14]  }
 0x7d3   :  { %13779 = vmatpush3.bf16.msra.mxu1 %v13956_v23  ;;  %s12101_s27 = sshll.u32 %s14189_s6, 4  ;;  %s12102_s27 = int_to_ptr.vmem [resolvable:$true] %s12101_s27 }
 0x7d4   :  { %13780 = vmatprep.subr.bf16.mxu1 %v13957_v45  ;;  %s14120_s28 = scalar_lea.vmem %s12102_s27, 4096  ;;  %p14125_p8 = scmp.lt.s32.totalorder %s12102_s27, %s12102_s27 }
 0x7d5   :  { %p14121_p7 = scmp.ne.s32.totalorder %s12102_s27, %s14120_s28  ;;  %p14126_p9 = scmp.lt.s32.totalorder %s14120_s28, %s14120_s28 }
 0x7d7   :  { %13781 = vmatpush3.bf16.msra.mxu1 %v13958_v38  ;;  %p14127_p10 = por %p14126_p9, %p14125_p8 }
 0x7d8   :  { %13782 = vmatprep.subr.bf16.mxu1 %v13959_v52  ;;  %v13491_v52 = vld [vmem:[#allocation13] ss:$0 sm:$0xff] }
 0x7d9   :  { %p14128_p11 = pnand %p14127_p10, %p14121_p7 }
 0x7db   :  { %13783 = vmatpush3.bf16.msra.mxu1 %v13960_v39 }
 0x7dc   :  { %13784 = vmatprep.subr.bf16.mxu1 %v13961_v24 }
 0x7df   :  { %13785 = vmatpush3.bf16.msra.mxu1 %v13962_v44 }
 0x7e0   :  { %13786 = vmatprep.subr.bf16.mxu1 %v13963_v6 }
 0x7e3   :  { %13787 = vmatpush3.bf16.msra.mxu1 %v13964_v57 }
 0x7e4   :  { %13788 = vmatprep.subr.bf16.mxu1 %v13965_v60 }
 0x7e7   :  { %13789 = vmatpush3.bf16.msra.mxu1 %v13966_v61 }
 0x7e8   :  { %13790 = vmatprep.subr.bf16.mxu1 %v13967_v11 }
 0x7eb   :  { %13791 = vmatpush3.bf16.msra.mxu1 %v13968_v17 }
 0x7ec   :  { %13792 = vmatprep.subr.bf16.mxu1 %v13969_v46 }
 0x7ef   :  { %13793 = vmatpush3.bf16.msra.mxu1 %v13970_v12 }
 0x7f2   :  { %v10533_v27 = vpop.f32.mrf.mxu1 }
 0x7f3   :  { %v10534_v58 = vadd.f32 %v10533_v27, %v10490_v63 }
 0x7f4   :  { %v10535_v53 = vpop.f32.mrf.mxu1 }
 0x7f5   :  { %v10576_v62 = vpop.f32.mrf.mxu0  ;;  %v10536_v5 = vadd.f32 %v10535_v53, %v10492_v2 }
 0x7f6   :  { %v10537_v50 = vpop.f32.mrf.mxu1  ;;  %v10577_v0 = vadd.f32 %v10576_v62, %v10534_v58 }
 0x7f7   :  { %v10578_v3 = vpop.f32.mrf.mxu0  ;;  %v10538_v31 = vadd.f32 %v10537_v50, %v10494_v26 }
 0x7f8   :  { %v10539_v48 = vpop.f32.mrf.mxu1  ;;  %v10579_v13 = vadd.f32 %v10578_v3, %v10536_v5 }
 0x7f9   :  { %v10580_v8 = vpop.f32.mrf.mxu0  ;;  %v10540_v19 = vadd.f32 %v10539_v48, %v10496_v10 }
 0x7fa   :  { %v10581_v56 = vadd.f32 %v10580_v8, %v10538_v31 }
 0x7fb   :  { %v10582_v15 = vpop.f32.mrf.mxu0 }
 0x7fc   :  { %v10583_v16 = vadd.f32 %v10582_v15, %v10540_v19 }
 0x815   :  { %v13640_v42 = vpop.f32.mrf.mxu0 }
 0x817   :  { %v13641_v49 = vpop.f32.mrf.mxu0 }
 0x818   :  { %v13642_v38 = vadd.f32 %v13641_v49, %v13640_v42 }
 0x819   :  { %v13643_v34 = vpop.f32.mrf.mxu0 }
 0x81a   :  { %v11774_v57 = vadd.f32 %v13642_v38, %v13491_v52 }
 0x81b   :  { %v13644_v29 = vpop.f32.mrf.mxu0 }
 0x81c   :  { %v13645_v60 = vadd.f32 %v13644_v29, %v13643_v34 }
 0x81e   :  { %v11777_v12 = vadd.f32 %v13645_v60, %v13491_v52 }
 0x832   :  { %v10619_v18 = vpop.f32.mrf.mxu1 }
 0x833   :  { %v10620_v14 = vadd.f32 %v10619_v18, %v10577_v0 }
 0x834   :  { %v10621_v51 = vpop.f32.mrf.mxu1 }
 0x835   :  { %v10642_v35 = vmax.f32 %v10620_v14, 0.0  ;;  %v10622_v22 = vadd.f32 %v10621_v51, %v10579_v13  ;;  %v13684_v47 = vpop.f32.mrf.mxu0 }
 0x836   :  { %v10623_v41 = vpop.f32.mrf.mxu1 }
 0x837   :  { %10674 = vst [vmem:[#allocation14 + $0x70] sm:$0xff] %v10642_v35  ;;  %v10643_v40 = vmax.f32 %v10622_v22, 0.0  ;;  %v10624_v7 = vadd.f32 %v10623_v41, %v10581_v56  ;;  %v13685_v36 = vpop.f32.mrf.mxu0 }
 0x838   :  { %v10625_v1 = vpop.f32.mrf.mxu1  ;;  %v13686_v63 = vadd.f32 %v13685_v36, %v13684_v47 }
 0x839   :  { %10675 = vst [vmem:[#allocation14 + $0x78] sm:$0xff] %v10643_v40  ;;  %v10658_v25 = vmax.f32 %v10624_v7, 0.0  ;;  %v10626_v9 = vadd.f32 %v10625_v1, %v10583_v16  ;;  %v13687_v30 = vpop.f32.mrf.mxu0 }
 0x83b   :  { %10690 = vst [vmem:[#allocation14 + $0xf0] sm:$0xff] %v10658_v25  ;;  %v10659_v55 = vmax.f32 %v10626_v9, 0.0  ;;  %v10706_v28 = vpack.c.bf16 %v10658_v25, %v10642_v35  ;;  %v13688_v33 = vpop.f32.mrf.mxu0 }
 0x83c   :  { %v13689_v62 = vadd.f32 %v13688_v33, %v13687_v30 }
 0x83d   :  { %10691 = vst [vmem:[#allocation14 + $0xf8] sm:$0xff] %v10659_v55  ;;  %v10707_v20 = vpack.c.bf16 %v10659_v55, %v10643_v40 }
 0x83f   :  { %12058 = vmatprep.mubr.bf16.mxu1 %v10707_v20 }
 0x840   :  { %12059 = vmatmul.mubr.bf16.vlgmr.msra.gmra.mxu1 %v10706_v28 }
 0x852   :  { %v13662_v54 = vpop.f32.mrf.mxu1 }
 0x854   :  { %v13663_v32 = vpop.f32.mrf.mxu1 }
 0x855   :  { %v13728_v43 = vpop.f32.mrf.mxu0  ;;  %v13664_v24 = vadd.f32 %v13663_v32, %v13662_v54 }
 0x856   :  { %v13665_v59 = vpop.f32.mrf.mxu1 }
 0x857   :  { %v13729_v45 = vpop.f32.mrf.mxu0  ;;  %v11815_v61 = vadd.f32 %v13664_v24, %v11774_v57 }
 0x858   :  { %v13666_v21 = vpop.f32.mrf.mxu1  ;;  %v13730_v48 = vadd.f32 %v13729_v45, %v13728_v43 }
 0x859   :  { %v13731_v44 = vpop.f32.mrf.mxu0  ;;  %v13667_v11 = vadd.f32 %v13666_v21, %v13665_v59  ;;  %v11856_v10 = vadd.f32 %v13686_v63, %v11815_v61 }
 0x85b   :  { %v13732_v17 = vpop.f32.mrf.mxu0  ;;  %v11818_v27 = vadd.f32 %v13667_v11, %v11777_v12 }
 0x85c   :  { %v13733_v14 = vadd.f32 %v13732_v17, %v13731_v44 }
 0x85d   :  { %v11859_v8 = vadd.f32 %v13689_v62, %v11818_v27 }
 0x872   :  { %v13706_v4 = vpop.f32.mrf.mxu1 }
 0x874   :  { %v13707_v37 = vpop.f32.mrf.mxu1 }
 0x875   :  { %v13708_v2 = vadd.f32 %v13707_v37, %v13706_v4 }
 0x876   :  { %v13709_v23 = vpop.f32.mrf.mxu1 }
 0x877   :  { %v11897_v50 = vadd.f32 %v13708_v2, %v11856_v10 }
 0x878   :  { %v13710_v39 = vpop.f32.mrf.mxu1 }
 0x879   :  { %v13711_v3 = vadd.f32 %v13710_v39, %v13709_v23  ;;  %v11938_v31 = vadd.f32 %v13730_v48, %v11897_v50 }
 0x87b   :  { %v11900_v18 = vadd.f32 %v13711_v3, %v11859_v8 }
 0x87d   :  { %v11941_v35 = vadd.f32 %v13733_v14, %v11900_v18 }
 0x880   :  { %v13772_v26 = vpop.f32.mrf.mxu0 }
 0x882   :  { %v13773_v58 = vpop.f32.mrf.mxu0 }
 0x883   :  { %v13774_v56 = vadd.f32 %v13773_v58, %v13772_v26 }
 0x884   :  { %v13775_v13 = vpop.f32.mrf.mxu0 }
 0x886   :  { %v13776_v22 = vpop.f32.mrf.mxu0 }
 0x887   :  { %v13777_v25 = vadd.f32 %v13776_v22, %v13775_v13 }
 0x892   :  { %v13750_v6 = vpop.f32.mrf.mxu1 }
 0x894   :  { %v13751_v46 = vpop.f32.mrf.mxu1 }
 0x895   :  { %v13752_v5 = vadd.f32 %v13751_v46, %v13750_v6 }
 0x896   :  { %v13753_v53 = vpop.f32.mrf.mxu1 }
 0x897   :  { %v11979_v15 = vadd.f32 %v13752_v5, %v11938_v31 }
 0x898   :  { %v13754_v0 = vpop.f32.mrf.mxu1 }
 0x899   :  { %v13755_v51 = vadd.f32 %v13754_v0, %v13753_v53  ;;  %v12020_v40 = vadd.f32 %v13774_v56, %v11979_v15 }
 0x89b   :  { %v11982_v16 = vadd.f32 %v13755_v51, %v11941_v35 }
 0x89d   :  { %v12023_v20 = vadd.f32 %v13777_v25, %v11982_v16 }
 0x900   :  { %v13794_v19 = vpop.f32.mrf.mxu1 }
 0x902   :  { %v13795_v41 = vpop.f32.mrf.mxu1 }
 0x903   :  { %v13796_v7 = vadd.f32 %v13795_v41, %v13794_v19 }
 0x904   :  { %v13797_v1 = vpop.f32.mrf.mxu1 }
 0x905   :  { %v12061_v9 = vadd.f32 %v13796_v7, %v12020_v40 }
 0x906   :  { %v13798_v55 = vpop.f32.mrf.mxu1 }
 0x907   :  { %v13799_v28 = vadd.f32 %v13798_v55, %v13797_v1  ;;  %v12068_v42 = vsel %vm12067_vm4, %v12061_v9, -inf }
 0x908   :  { %12069 = vmax.xlane.f32.xlu0 %v12068_v42 }
 0x909   :  { %v12064_v49 = vadd.f32 %v13799_v28, %v12023_v20 }
 0x90b   :  { %v12071_v34 = vsel %vm12067_vm4, %v12064_v49, -inf }
 0x90c   :  { %12072 = vmax.xlane.f32.xlu0 %v12071_v34 }
 0x991   :  { %v12070_v54 = vpop.xlane.xlu0 %12069 }
 0x992   :  { %v12074_v29 = vsub.f32 %v12061_v9, %v12070_v54 }
 0x994   :  { %v12076_v32 = vmul.f32 1.442695, %v12074_v29 }
 0x995   :  { %v12073_v47 = vpop.xlane.xlu0 %12072 }
 0x996   :  { %13971 = vpow2.f32 %v12076_v32  ;;  %v12075_v59 = vsub.f32 %v12064_v49, %v12073_v47 }
 0x998   :  { %v12078_v36 = vmul.f32 1.442695, %v12075_v59 }
 0x99a   :  { %13973 = vpow2.f32 %v12078_v36 }
 0x9a3   :  { %v13972_v21 = vpop.eup %13971 }
 0x9a4   :  { %v12080_v30 = vsel %vm12067_vm4, %v13972_v21, 0.0 }
 0x9a5   :  { %12081 = vadd.xlane.f32.xlu1 %v12080_v30 }
 0x9a7   :  { %v13974_v4 = vpop.eup %13973 }
 0x9a8   :  { %v12083_v33 = vsel %vm12067_vm4, %v13974_v4, 0.0 }
 0x9a9   :  { %12084 = vadd.xlane.f32.xlu1 %v12083_v33 }
 0x9aa   :  { %14131 = shalt.err (!%p14128_p11)
}
 0x9ab   :  { %s14190_s29 = smov 2048   ;;  %s14191_s30 = smov 128  }
 0x9ac   :  { %12107 = dma.vmem_to_hbm [thread:$0]  %s12102_s27, 4096, %s15032_s8, [#allocation4], %s14190_s29, %s14190_s29, %s14191_s30  }
 0x9ad   :  { %s14192_s11 = smov [#allocation15]  }
 0x9ae   :  { %s12113_s14 = sshll.u32 %s14192_s11, 4  ;;  %s12114_s14 = int_to_ptr.vmem [resolvable:$true] %s12113_s14 }
 0x9af   :  { %s14140_s8 = scalar_lea.vmem %s12114_s14, 256  ;;  %p14145_p13 = scmp.lt.s32.totalorder %s12114_s14, %s12114_s14 }
 0x9b0   :  { %p14141_p12 = scmp.ne.s32.totalorder %s12114_s14, %s14140_s8  ;;  %p14146_p0 = scmp.lt.s32.totalorder %s14140_s8, %s14140_s8 }
 0x9b2   :  { %p14147_p1 = por %p14146_p0, %p14145_p13 }
 0x9b4   :  { %p14148_p2 = pnand %p14147_p1, %p14141_p12 }
 0xa2e   :  { %v12082_v37 = vpop.xlane.xlu1 %12081 }
 0xa2f   :  { %13975 = vlog2.f32 %v12082_v37 }
 0xa32   :  { %v12085_v43 = vpop.xlane.xlu1 %12084 }
 0xa33   :  { %13977 = vlog2.f32 %v12085_v43 }
 0xa3c   :  { %v13976_v23 = vpop.eup %13975 }
 0xa3d   :  { %v12087_v45 = vmul.f32 0.6931472, %v13976_v23 }
 0xa3f   :  { %v12090_v38 = vadd.f32 %v12087_v45, %v12070_v54 }
 0xa40   :  { %v13978_v52 = vpop.eup %13977 }
 0xa41   :  { %v12092_v39 = vsub.f32 %v12061_v9, %v12090_v38  ;;  %v12089_v24 = vmul.f32 0.6931472, %v13978_v52 }
 0xa43   :  { %12094 = vst.msk [vmem:[#allocation15] sm:$0xff] %vm12067_vm4, %v12092_v39  ;;  %v12091_v44 = vadd.f32 %v12089_v24, %v12073_v47 }
 0xa45   :  { %v12093_v6 = vsub.f32 %v12064_v49, %v12091_v44 }
 0xa47   :  { %12095 = vst.msk [vmem:[#allocation15 + $0x8] sm:$0xff] %vm12067_vm4, %v12093_v6 }
 0xa48   :  { %14151 = shalt.err (!%p14148_p2)
}
 0xa49   :  { %s14193_s15 = smov 8  }
 0xa4a   :  { %12119 = dma.vmem_to_hbm [thread:$0]  %s12114_s14, 256, %s15033_s9, [#allocation16], %s14191_s30, %s14191_s30, %s14193_s15  }
 0xa4b   :  { %14168 = dma.done.wait [#allocation4], 4096  }
 0xa4c   :  { %14169 = vsyncadd [#allocation4], 4294963200 }
 0xa4d   :  { %14170 = dma.done.wait [#allocation16], 256  }
 0xa4e   :  { %14171 = vsyncadd [#allocation16], 4294967040 }
 0xa4f   :  { %12126 = vsyncpa [#allocation3], 1 }
 0xa50   :  { %12127 = vsyncpa [#allocation6], 1 }
 0xa51   :  { %12128 = vsyncpa [#allocation9], 1 }
 0xa52   :  { %12129 = vsyncpa [#allocation12], 1 }
 0xa53   :  { %12130 = vsyncpa [#allocation4], 1 }
 0xa54   :  { %12131 = vsyncpa [#allocation16], 1 }

</bundles_post_ra>
